<compile_context>
chip_gen: v7x
topology: tpu7x:2x2x1
jax: 0.10.0
libtpu: 0.0.40
codegen_flags: <defaults>
</compile_context>

<pallas_src>
import functools

import jax
import jax.numpy as jnp
from jax import lax
from jax.experimental import pallas as pl
from jax.experimental.pallas import tpu as pltpu

_EPS = 1e-5


def _pick_matmul_precision():
    """Prefer HIGH (bf16x3) per the perf review; fall back to HIGHEST if the Mosaic dot
    lowering does not accept it (only DEFAULT/HIGHEST are guaranteed)."""
    def probe_kernel(a_ref, b_ref, o_ref):
        o_ref[...] = jnp.dot(a_ref[...], b_ref[...],
                             preferred_element_type=jnp.float32,
                             precision=lax.Precision.HIGH)
    try:
        a = jnp.zeros((8, 128), jnp.float32)
        b = jnp.zeros((128, 128), jnp.float32)
        f = pl.pallas_call(probe_kernel,
                           out_shape=jax.ShapeDtypeStruct((8, 128), jnp.float32))
        jax.block_until_ready(f(a, b))
        return lax.Precision.HIGH
    except Exception:
        return lax.Precision.HIGHEST


_PREC = _pick_matmul_precision()
_HI = lax.Precision.HIGHEST      # reference baseline precision


def _fold_bn(gamma, beta, mean, var):
    scale = gamma / jnp.sqrt(var + _EPS)
    bias = beta - mean * scale
    return scale, bias


def residual131_kernel(x_ref, w1_ref, w2_ref, w3_ref, b_ref, o_ref, *, H):
    """One lane-dense (Bblk*H, W*C) row slab per grid step; BN scales pre-folded into
    the weights, so the VPU only does bias-add / ReLU / residual."""
    M, WCin = x_ref.shape            # M = Bblk * H
    WCmid = w1_ref.shape[1]          # W * Cmid
    WCout = w3_ref.shape[1]          # W * Cout (== W * Cin for the residual add)

    x = x_ref[...]                   # (M, W*Cin) full-width load
    b1 = b_ref[0:1, :WCmid]
    b2 = b_ref[1:2, :WCmid]
    b3 = b_ref[2:3, :WCout]

    # --- stage 1: 1x1 conv (block-diag weight, BN1 scale folded in) + bias + ReLU ---
    y1 = jnp.dot(x, w1_ref[...], preferred_element_type=jnp.float32, precision=_PREC)
    y1 = jnp.maximum(y1 + b1, 0.0)                       # (M, W*Cmid)

    # --- stage 2: 3x3 conv (padding=1), single fused banded matmul ---
    # dx taps sit on the +/-1 block diagonals of the banded weight (zero edge blocks give
    # width padding); dy is handled by shifting rows one up/down and masking rows at
    # per-image boundaries (row_id % H) so images in the same slab never mix.
    row = lax.broadcasted_iota(jnp.int32, (M, 1), 0) % H
    zrow = jnp.zeros((1, WCmid), jnp.float32)
    y1_prev = jnp.where(row == 0, 0.0,
                        jnp.concatenate([zrow, y1[:-1, :]], axis=0))   # y1[m-1]
    y1_next = jnp.where(row == H - 1, 0.0,
                        jnp.concatenate([y1[1:, :], zrow], axis=0))    # y1[m+1]
    lhs2 = jnp.concatenate([y1_prev, y1, y1_next], axis=1)             # (M, 3*W*Cmid)
    y2 = jnp.dot(lhs2, w2_ref[...], preferred_element_type=jnp.float32, precision=_PREC)
    y2 = jnp.maximum(y2 + b2, 0.0)                       # (M, W*Cmid)

    # --- stage 3: 1x1 conv (BN3 scale + conv bias folded), residual add, ReLU ---
    y3 = jnp.dot(y2, w3_ref[...], preferred_element_type=jnp.float32, precision=_PREC)
    o_ref[...] = jnp.maximum(y3 + b3 + x, 0.0)           # (M, W*Cout) full-width store


def _pick_bblk(B, H, bblk):
    if bblk is None:
        target = max(1, pl.cdiv(128, H))   # aim for >= 128 MXU rows per grid step
        bblk = min(B, target)
        while B % bblk:                    # largest divisor of B not above the target
            bblk -= 1
    assert B % bblk == 0
    return bblk


def residual131(x_nhwc, kparams, bblk=None):
    w1big, w2stack, w3big, biases = kparams
    B, H, W, Cin = x_nhwc.shape
    WCin = W * Cin
    WCout = w3big.shape[1]
    Cout = WCout // W
    assert WCout == WCin, "residual add requires Cout == Cin"

    bblk = _pick_bblk(B, H, bblk)          # images per grid step
    rows = bblk * H                        # MXU M per grid step
    x_rows = x_nhwc.reshape(B * H, WCin)   # lane-dense rows (free reshape)

    def rep(a):
        n = a.ndim
        return pl.BlockSpec(a.shape, lambda b, _n=n: (0,) * _n)

    out = pl.pallas_call(
        functools.partial(residual131_kernel, H=H),
        out_shape=jax.ShapeDtypeStruct((B * H, WCout), jnp.float32),
        grid_spec=pltpu.PrefetchScalarGridSpec(
            num_scalar_prefetch=0,
            grid=(B // bblk,),
            in_specs=[
                pl.BlockSpec((rows, WCin), lambda b: (b, 0)),
                rep(w1big), rep(w2stack), rep(w3big), rep(biases),
            ],
            out_specs=pl.BlockSpec((rows, WCout), lambda b: (b, 0)),
        ),
        compiler_params=pltpu.CompilerParams(dimension_semantics=("parallel",)),
    )(x_rows, w1big, w2stack, w3big, biases)
    return out.reshape(B, H, W, Cout)


def make_torch_style_params(key, cin, cmid, cout):
    """Deterministic params matching nn.Conv2d/nn.BatchNorm2d shapes (OIHW weights)."""
    ks = jax.random.split(key, 12)
    p = {}
    p['w1'] = 0.2 * jax.random.normal(ks[0], (cmid, cin, 1, 1), jnp.float32)
    p['bn1'] = (0.5 + jax.random.uniform(ks[1], (cmid,)),            # gamma
                0.1 * jax.random.normal(ks[2], (cmid,)),             # beta
                0.1 * jax.random.normal(ks[3], (cmid,)),             # running_mean
                0.5 + jax.random.uniform(ks[4], (cmid,)))            # running_var
    p['w2'] = 0.1 * jax.random.normal(ks[5], (cmid, cmid, 3, 3), jnp.float32)
    p['bn2'] = (0.5 + jax.random.uniform(ks[6], (cmid,)),
                0.1 * jax.random.normal(ks[7], (cmid,)),
                0.1 * jax.random.normal(ks[8], (cmid,)),
                0.5 + jax.random.uniform(ks[9], (cmid,)))
    p['w3'] = 0.2 * jax.random.normal(ks[10], (cout, cmid, 1, 1), jnp.float32)
    p['b3'] = 0.1 * jax.random.normal(ks[11], (cout,))
    p['bn3'] = (jnp.ones((cout,)), jnp.zeros((cout,)),
                0.05 * jnp.ones((cout,)), 0.8 * jnp.ones((cout,)))
    return p


def to_kernel_params(p, W):
    """Fold BN scales into the weights (and conv bias through BN3), keep only the biases,
    and rebuild everything for the lane-dense (rows, W*C) layout."""
    s1, b1 = _fold_bn(*p['bn1'])
    s2, b2 = _fold_bn(*p['bn2'])
    s3, b3 = _fold_bn(*p['bn3'])
    b3 = b3 + p['b3'] * s3                                    # fold conv1_out bias into BN3 bias

    # BN scales folded into the conv weights' output-channel axis.
    w1 = p['w1'][:, :, 0, 0].T.astype(jnp.float32) * s1[None, :]            # (Cin, Cmid)
    w2 = (jnp.transpose(p['w2'], (2, 3, 1, 0)).astype(jnp.float32)
          * s2[None, None, None, :])                                        # (kh,kw,Ci,Co)
    w3 = p['w3'][:, :, 0, 0].T.astype(jnp.float32) * s3[None, :]            # (Cmid, Cout)
    Cmid, Cout = w1.shape[1], w3.shape[1]

    eyeW = jnp.eye(W, dtype=jnp.float32)
    # 1x1 convs -> block-diagonal dense-row weights.
    w1big = jnp.kron(eyeW, w1)                                # (W*Cin,  W*Cmid)
    w3big = jnp.kron(eyeW, w3)                                # (W*Cmid, W*Cout)

    # 3x3 conv -> one banded (W*Cmid, W*Cmid) weight per kernel row ky (dx taps on the
    # +/-1 block diagonals; missing edge blocks implement padding=1 along W), stacked into
    # a single (3*W*Cmid, W*Cmid) matrix so stage 2 is a single matmul in the kernel.
    def band(ky):
        b = jnp.zeros((W * Cmid, W * Cmid), jnp.float32)
        for ox in (-1, 0, 1):
            b = b + jnp.kron(jnp.eye(W, k=-ox, dtype=jnp.float32), w2[ky, ox + 1])
        return b
    w2stack = jnp.concatenate([band(0), band(1), band(2)], axis=0)   # (3*W*Cmid, W*Cmid)

    # Only the three folded biases remain for the VPU; tile to dense-row form, pack into
    # one (3, W*Cmax) array -> single tiny DMA.
    Cmax = max(Cmid, Cout)
    def row(v):
        t = jnp.tile(v.astype(jnp.float32), W)
        return jnp.pad(t, (0, W * Cmax - t.shape[0]))
    biases = jnp.stack([row(b1), row(b2), row(b3)], axis=0)
    return (w1big, w2stack, w3big, biases)


def reference_nchw(x, p):
    def conv(x, w, pad):
        return lax.conv_general_dilated(x, w, (1, 1), pad,
                                        dimension_numbers=('NCHW', 'OIHW', 'NCHW'),
                                        precision=_HI)

    def bn(x, g, b, m, v):
        g, b, m, v = (t[None, :, None, None] for t in (g, b, m, v))
        return (x - m) / jnp.sqrt(v + _EPS) * g + b

    res = x
    x1 = jax.nn.relu(bn(conv(x, p['w1'], ((0, 0), (0, 0))), *p['bn1']))
    x2 = jax.nn.relu(bn(conv(x1, p['w2'], ((1, 1), (1, 1))), *p['bn2']))
    x3 = conv(x2, p['w3'], ((0, 0), (0, 0))) + p['b3'][None, :, None, None]
    x3 = bn(x3, *p['bn3'])
    return jax.nn.relu(x3 + res)


if __name__ == "__main__":
    key = jax.random.PRNGKey(0)
    kx, kp = jax.random.split(key)

    B, Cin, H, W = 2, 8, 16, 16
    Cmid, Cout = 16, 8                      # residual add requires Cout == Cin

    x_nchw = jax.random.normal(kx, (B, Cin, H, W), jnp.float32)
    params = make_torch_style_params(kp, Cin, Cmid, Cout)
    kparams = to_kernel_params(params, W)

    x_nhwc = jnp.transpose(x_nchw, (0, 2, 3, 1))
    out_nhwc = residual131(x_nhwc, kparams)
    out_nhwc = jax.block_until_ready(out_nhwc)

    ref = reference_nchw(x_nchw, params)
    ref_nhwc = jnp.transpose(ref, (0, 2, 3, 1))
    assert out_nhwc.shape == (B, H, W, Cout)
    assert jnp.allclose(out_nhwc, ref_nhwc, atol=1e-4, rtol=1e-4), \
        float(jnp.max(jnp.abs(out_nhwc - ref_nhwc)))

    print("KERNEL_OK")
</pallas_src>

<mosaic_0001>
module attributes {stable_mosaic.version = 11 : i64} {
  func.func @residual131_kernel(%arg0: i32, %arg1: memref<32x128xf32, #tpu.memory_space<vmem>>, %arg2: memref<128x256xf32, #tpu.memory_space<vmem>>, %arg3: memref<768x256xf32, #tpu.memory_space<vmem>>, %arg4: memref<256x128xf32, #tpu.memory_space<vmem>>, %arg5: memref<3x256xf32, #tpu.memory_space<vmem>>, %arg6: memref<32x128xf32, #tpu.memory_space<vmem>>) attributes {dimension_semantics = [#tpu.dimension_semantics<parallel>], iteration_bounds = array<i64: 1>, scalar_prefetch = 0 : i64, scratch_operands = 0 : i64, tpu.core_type = #tpu.core_type<tc>, window_params = [{transform_indices = @transform_0, window_bounds = array<i64: 32, 128>}, {pipeline_mode = #tpu.pipeline_mode<synchronous>, transform_indices = @transform_1, window_bounds = array<i64: 128, 256>}, {pipeline_mode = #tpu.pipeline_mode<synchronous>, transform_indices = @transform_2, window_bounds = array<i64: 768, 256>}, {pipeline_mode = #tpu.pipeline_mode<synchronous>, transform_indices = @transform_3, window_bounds = array<i64: 256, 128>}, {pipeline_mode = #tpu.pipeline_mode<synchronous>, transform_indices = @transform_4, window_bounds = array<i64: 3, 256>}, {transform_indices = @transform_5, window_bounds = array<i64: 32, 128>}]} {
    %c0 = arith.constant 0 : index
    %c0_0 = arith.constant 0 : index
    %0 = vector.load %arg1[%c0, %c0_0] : memref<32x128xf32, #tpu.memory_space<vmem>>, vector<32x128xf32>
    %c0_1 = arith.constant 0 : index
    %c0_2 = arith.constant 0 : index
    %1 = vector.load %arg5[%c0_1, %c0_2] : memref<3x256xf32, #tpu.memory_space<vmem>>, vector<1x256xf32>
    %c1 = arith.constant 1 : index
    %c0_3 = arith.constant 0 : index
    %2 = vector.load %arg5[%c1, %c0_3] : memref<3x256xf32, #tpu.memory_space<vmem>>, vector<1x256xf32>
    %c2 = arith.constant 2 : index
    %c0_4 = arith.constant 0 : index
    %3 = vector.load %arg5[%c2, %c0_4] : memref<3x256xf32, #tpu.memory_space<vmem>>, vector<1x128xf32>
    %c0_5 = arith.constant 0 : index
    %c0_6 = arith.constant 0 : index
    %4 = vector.load %arg2[%c0_5, %c0_6] : memref<128x256xf32, #tpu.memory_space<vmem>>, vector<128x256xf32>
    %cst = arith.constant dense<0.000000e+00> : vector<32x256xf32>
    %5 = tpu.matmul %0, %4, %cst {dimension_numbers = #tpu.dot_dimension_numbers<[1], [0], [0], [1], [0, 0, 1, 1], [], []>, precision = #tpu.contract_precision<fp32>} : vector<32x128xf32>, vector<128x256xf32>, vector<32x256xf32> -> vector<32x256xf32>
    %6 = vector.broadcast %1 : vector<1x256xf32> to vector<32x256xf32>
    %7 = arith.addf %5, %6 : vector<32x256xf32>
    %cst_7 = arith.constant 0.000000e+00 : f32
    %8 = vector.broadcast %cst_7 : f32 to vector<32x256xf32>
    %9 = arith.maximumf %7, %8 : vector<32x256xf32>
    %10 = tpu.iota {dimensions = array<i32: 0>} : vector<32x1xi32>
    %c16_i32 = arith.constant 16 : i32
    %c0_i32 = arith.constant 0 : i32
    %11 = arith.cmpi eq, %c16_i32, %c0_i32 : i32
    %c1_i32 = arith.constant 1 : i32
    %12 = arith.select %11, %c1_i32, %c16_i32 : i32
    %13 = vector.broadcast %12 : i32 to vector<32x1xi32>
    %14 = arith.remsi %10, %13 : vector<32x1xi32>
    %c0_i32_8 = arith.constant 0 : i32
    %15 = vector.broadcast %c0_i32_8 : i32 to vector<32x1xi32>
    %16 = arith.cmpi ne, %14, %15 : vector<32x1xi32>
    %c0_i32_9 = arith.constant 0 : i32
    %17 = vector.broadcast %c0_i32_9 : i32 to vector<32x1xi32>
    %18 = arith.cmpi slt, %14, %17 : vector<32x1xi32>
    %c0_i32_10 = arith.constant 0 : i32
    %19 = arith.cmpi slt, %12, %c0_i32_10 : i32
    %20 = vector.broadcast %19 : i1 to vector<32x1xi1>
    %21 = vector.broadcast %20 : vector<32x1xi1> to vector<32x1xi1>
    %22 = arith.xori %18, %21 : vector<32x1xi1>
    %23 = arith.andi %22, %16 : vector<32x1xi1>
    %24 = vector.broadcast %12 : i32 to vector<32x1xi32>
    %25 = arith.addi %14, %24 : vector<32x1xi32>
    %26 = arith.select %23, %25, %14 : vector<32x1xi1>, vector<32x1xi32>
    %cst_11 = arith.constant 0.000000e+00 : f32
    %27 = vector.broadcast %cst_11 : f32 to vector<1x256xf32>
    %c0_i32_12 = arith.constant 0 : i32
    %28 = vector.broadcast %c0_i32_12 : i32 to vector<32x1xi32>
    %29 = arith.cmpi eq, %26, %28 : vector<32x1xi32>
    %30 = vector.extract_strided_slice %9 {offsets = [0, 0], sizes = [31, 256], strides = [1, 1]} : vector<32x256xf32> to vector<31x256xf32>
    %31 = tpu.concatenate %27, %30 in 0 : vector<1x256xf32>, vector<31x256xf32> -> vector<32x256xf32>
    %cst_13 = arith.constant 0.000000e+00 : f32
    %32 = vector.shape_cast %29 : vector<32x1xi1> to vector<32x1xi1>
    %33 = vector.broadcast %32 : vector<32x1xi1> to vector<32x256xi1>
    %34 = vector.broadcast %cst_13 : f32 to vector<32x256xf32>
    %35 = arith.select %33, %34, %31 : vector<32x256xi1>, vector<32x256xf32>
    %c15_i32 = arith.constant 15 : i32
    %36 = vector.broadcast %c15_i32 : i32 to vector<32x1xi32>
    %37 = arith.cmpi eq, %26, %36 : vector<32x1xi32>
    %38 = vector.extract_strided_slice %9 {offsets = [1, 0], sizes = [31, 256], strides = [1, 1]} : vector<32x256xf32> to vector<31x256xf32>
    %39 = tpu.concatenate %38, %27 in 0 : vector<31x256xf32>, vector<1x256xf32> -> vector<32x256xf32>
    %cst_14 = arith.constant 0.000000e+00 : f32
    %40 = vector.shape_cast %37 : vector<32x1xi1> to vector<32x1xi1>
    %41 = vector.broadcast %40 : vector<32x1xi1> to vector<32x256xi1>
    %42 = vector.broadcast %cst_14 : f32 to vector<32x256xf32>
    %43 = arith.select %41, %42, %39 : vector<32x256xi1>, vector<32x256xf32>
    %44 = tpu.concatenate %35, %9, %43 in 1 : vector<32x256xf32>, vector<32x256xf32>, vector<32x256xf32> -> vector<32x768xf32>
    %c0_15 = arith.constant 0 : index
    %c0_16 = arith.constant 0 : index
    %45 = vector.load %arg3[%c0_15, %c0_16] : memref<768x256xf32, #tpu.memory_space<vmem>>, vector<768x256xf32>
    %cst_17 = arith.constant dense<0.000000e+00> : vector<32x256xf32>
    %46 = tpu.matmul %44, %45, %cst_17 {dimension_numbers = #tpu.dot_dimension_numbers<[1], [0], [0], [1], [0, 0, 1, 1], [], []>, precision = #tpu.contract_precision<fp32>} : vector<32x768xf32>, vector<768x256xf32>, vector<32x256xf32> -> vector<32x256xf32>
    %47 = vector.broadcast %2 : vector<1x256xf32> to vector<32x256xf32>
    %48 = arith.addf %46, %47 : vector<32x256xf32>
    %cst_18 = arith.constant 0.000000e+00 : f32
    %49 = vector.broadcast %cst_18 : f32 to vector<32x256xf32>
    %50 = arith.maximumf %48, %49 : vector<32x256xf32>
    %c0_19 = arith.constant 0 : index
    %c0_20 = arith.constant 0 : index
    %51 = vector.load %arg4[%c0_19, %c0_20] : memref<256x128xf32, #tpu.memory_space<vmem>>, vector<256x128xf32>
    %cst_21 = arith.constant dense<0.000000e+00> : vector<32x128xf32>
    %52 = tpu.matmul %50, %51, %cst_21 {dimension_numbers = #tpu.dot_dimension_numbers<[1], [0], [0], [1], [0, 0, 1, 1], [], []>, precision = #tpu.contract_precision<fp32>} : vector<32x256xf32>, vector<256x128xf32>, vector<32x128xf32> -> vector<32x128xf32>
    %53 = vector.broadcast %3 : vector<1x128xf32> to vector<32x128xf32>
    %54 = arith.addf %52, %53 : vector<32x128xf32>
    %55 = arith.addf %54, %0 : vector<32x128xf32>
    %cst_22 = arith.constant 0.000000e+00 : f32
    %56 = vector.broadcast %cst_22 : f32 to vector<32x128xf32>
    %57 = arith.maximumf %55, %56 : vector<32x128xf32>
    %c0_23 = arith.constant 0 : index
    %c0_24 = arith.constant 0 : index
    %58 = vector.load %arg6[%c0_23, %c0_24] : memref<32x128xf32, #tpu.memory_space<vmem>>, vector<32x128xf32>
    tpu.vector_store %arg6[%c0_23, %c0_24], %57 {strides = array<i32>} : memref<32x128xf32, #tpu.memory_space<vmem>>, vector<32x128xf32>,
    return
  }
  func.func @transform_0(%arg0: i32) -> (i32, i32) {
    %c0_i32 = arith.constant 0 : i32
    %c0_i32_0 = arith.constant 0 : i32
    return %arg0, %c0_i32 : i32, i32
  }
  func.func @transform_1(%arg0: i32) -> (i32, i32) {
    %c0_i32 = arith.constant 0 : i32
    %c0_i32_0 = arith.constant 0 : i32
    %c0_i32_1 = arith.constant 0 : i32
    return %c0_i32, %c0_i32_0 : i32, i32
  }
  func.func @transform_2(%arg0: i32) -> (i32, i32) {
    %c0_i32 = arith.constant 0 : i32
    %c0_i32_0 = arith.constant 0 : i32
    %c0_i32_1 = arith.constant 0 : i32
    return %c0_i32, %c0_i32_0 : i32, i32
  }
  func.func @transform_3(%arg0: i32) -> (i32, i32) {
    %c0_i32 = arith.constant 0 : i32
    %c0_i32_0 = arith.constant 0 : i32
    %c0_i32_1 = arith.constant 0 : i32
    return %c0_i32, %c0_i32_0 : i32, i32
  }
  func.func @transform_4(%arg0: i32) -> (i32, i32) {
    %c0_i32 = arith.constant 0 : i32
    %c0_i32_0 = arith.constant 0 : i32
    %c0_i32_1 = arith.constant 0 : i32
    return %c0_i32, %c0_i32_0 : i32, i32
  }
  func.func @transform_5(%arg0: i32) -> (i32, i32) {
    %c0_i32 = arith.constant 0 : i32
    %c0_i32_0 = arith.constant 0 : i32
    return %arg0, %c0_i32 : i32, i32
  }
}

</mosaic_0001>

<bundles_post_ra>
// kernel: tpu_custom_call.1
= control target key start
LH: loop header
LB: loop body
LE: loop exit
PB: predicated region body
PF: predicated region fallthrough
CT: control target
= control target key end

     0   :  { %10 = vsyncpa [#allocation3], 0  ;;  %s13989_s0 = inlined_call_operand.hbm [shape: f32[32,128], index: 0, kind: input, shape index: {}]   ;;  %s13990_s1 = inlined_call_operand.hbm [shape: f32[128,256], index: 1, kind: input, shape index: {}]   ;;  %s13991_s2 = inlined_call_operand.hbm [shape: f32[768,256], index: 2, kind: input, shape index: {}]   ;;  %s13992_s3 = inlined_call_operand.hbm [shape: f32[256,128], index: 3, kind: input, shape index: {}]   ;;  %s13993_s4 = inlined_call_operand.vmem [shape: f32[3,256], index: 4, kind: input, shape index: {}]   ;;  %s13994_s5 = inlined_call_operand.hbm [shape: f32[32,128], index: 5, kind: output, shape index: {}]  }
   0x1   :  { %11 = vsyncpa [#allocation6], 0 }
   0x2   :  { %12 = vsyncpa [#allocation9], 0 }
   0x3   :  { %13 = vsyncpa [#allocation4], 0  ;;  %s9132_s18 = smov [#allocation5]   ;;  %s9014_s22 = scalar_lea.hbm %s13990_s1, 4096 }
   0x4   :  { %s31_s19 = sshll.u32 %s9132_s18, 4  ;;  %p9015_p0 = scmp.ne.s32.totalorder %s13990_s1, %s9014_s22  ;;  %s32_s19 = int_to_ptr.vmem [resolvable:$true] %s31_s19 }
   0x5   :  { %p9018_p1 = scmp.lt.u32.totalorder %s9014_s22, %s13990_s1 }
   0x7   :  { %p9020_p2 = pnand %p9018_p1, %p9015_p0 }
   0x9   :  { %9023 = shalt.err (!%p9020_p2)
}
   0xa   :  { %s9024_s27 = scalar_lea.vmem %s32_s19, 4096  ;;  %p9029_p4 = scmp.lt.s32.totalorder %s32_s19, %s32_s19 }
   0xb   :  { %p9025_p3 = scmp.ne.s32.totalorder %s32_s19, %s9024_s27  ;;  %p9030_p5 = scmp.lt.s32.totalorder %s9024_s27, %s9024_s27 }
   0xd   :  { %p9031_p6 = por %p9030_p5, %p9029_p4 }
   0xf   :  { %p9032_p7 = pnand %p9031_p6, %p9025_p3 }
  0x11   :  { %9035 = shalt.err (!%p9032_p7)
}
  0x12   :  { %s9133_s28 = smov 256   ;;  %s9134_s29 = smov 16  }
  0x13   :  { %37 = dma.hbm_to_vmem [thread:$0]  %s13990_s1, 4096, %s32_s19, [#allocation6], %s9133_s28, %s9133_s28, %s9134_s29  }
  0x14   :  { %s9135_s7 = smov [#allocation2]   ;;  %s9036_s11 = scalar_lea.hbm %s13989_s0, 512 }
  0x15   :  { %s19_s8 = sshll.u32 %s9135_s7, 4  ;;  %p9037_p8 = scmp.ne.s32.totalorder %s13989_s0, %s9036_s11  ;;  %s20_s8 = int_to_ptr.vmem [resolvable:$true] %s19_s8 }
  0x16   :  { %p9040_p9 = scmp.lt.u32.totalorder %s9036_s11, %s13989_s0 }
  0x18   :  { %p9042_p10 = pnand %p9040_p9, %p9037_p8 }
  0x1a   :  { %9045 = shalt.err (!%p9042_p10)
}
  0x1b   :  { %s9046_s16 = scalar_lea.vmem %s20_s8, 512  ;;  %p9051_p12 = scmp.lt.s32.totalorder %s20_s8, %s20_s8 }
  0x1c   :  { %p9047_p11 = scmp.ne.s32.totalorder %s20_s8, %s9046_s16  ;;  %p9052_p13 = scmp.lt.s32.totalorder %s9046_s16, %s9046_s16 }
  0x1e   :  { %p9053_p0 = por %p9052_p13, %p9051_p12 }
  0x20   :  { %p9054_p1 = pnand %p9053_p0, %p9047_p11 }
  0x22   :  { %9057 = shalt.err (!%p9054_p1)
}
  0x23   :  { %s9136_s1 = smov 128   ;;  %s9137_s17 = smov 8  }
  0x24   :  { %25 = dma.hbm_to_vmem [thread:$0]  %s13989_s0, 512, %s20_s8, [#allocation3], %s9136_s1, %s9136_s1, %s9137_s17  }
  0x25   :  { %s9138_s20 = smov [#allocation7]   ;;  %s9139_s22 = smov [#allocation8]  }
  0x26   :  { %s43_s21 = sshll.u32 %s9138_s20, 4  ;;  %s55_s23 = sshll.u32 %s9139_s22, 4  ;;  %s44_s21 = int_to_ptr.vmem [resolvable:$true] %s43_s21  ;;  %s9202_s23 = int_to_ptr.vmem [resolvable:$true] %s55_s23 }
  0x27   :  { %s9058_s26 = scalar_lea.hbm %s13991_s2, 24576 }
  0x28   :  { %p9059_p2 = scmp.ne.s32.totalorder %s13991_s2, %s9058_s26  ;;  %p9062_p3 = scmp.lt.u32.totalorder %s9058_s26, %s13991_s2 }
  0x2a   :  { %p9064_p4 = pnand %p9062_p3, %p9059_p2 }
  0x2c   :  { %9067 = shalt.err (!%p9064_p4)
}
  0x2d   :  { %s9068_s0 = scalar_lea.vmem %s44_s21, 24576  ;;  %p9073_p6 = scmp.lt.s32.totalorder %s44_s21, %s44_s21 }
  0x2e   :  { %p9069_p5 = scmp.ne.s32.totalorder %s44_s21, %s9068_s0  ;;  %p9074_p7 = scmp.lt.s32.totalorder %s9068_s0, %s9068_s0 }
  0x30   :  { %p9075_p8 = por %p9074_p7, %p9073_p6 }
  0x32   :  { %p9076_p9 = pnand %p9075_p8, %p9069_p5 }
  0x34   :  { %9079 = shalt.err (!%p9076_p9)
}
  0x35   :  { %49 = dma.hbm_to_vmem [thread:$0]  %s13991_s2, 24576, %s44_s21, [#allocation6], %s9133_s28, %s9133_s28, %s9134_s29  }
  0x36   :  { %s9080_s12 = scalar_lea.hbm %s13992_s3, 4096 }
  0x37   :  { %p9081_p10 = scmp.ne.s32.totalorder %s13992_s3, %s9080_s12  ;;  %p9084_p11 = scmp.lt.u32.totalorder %s9080_s12, %s13992_s3 }
  0x39   :  { %p9086_p12 = pnand %p9084_p11, %p9081_p10 }
  0x3b   :  { %9089 = shalt.err (!%p9086_p12)
}
  0x3c   :  { %s9090_s18 = scalar_lea.vmem %s9202_s23, 4096  ;;  %p9095_p0 = scmp.lt.s32.totalorder %s9202_s23, %s9202_s23 }
  0x3d   :  { %p9091_p13 = scmp.ne.s32.totalorder %s9202_s23, %s9090_s18  ;;  %p9096_p1 = scmp.lt.s32.totalorder %s9090_s18, %s9090_s18 }
  0x3f   :  { %p9097_p2 = por %p9096_p1, %p9095_p0 }
  0x41   :  { %p9098_p3 = pnand %p9097_p2, %p9091_p13 }
  0x43   :  { %9101 = shalt.err (!%p9098_p3)
}
  0x44   :  { %61 = dma.hbm_to_vmem [thread:$0]  %s13992_s3, 4096, %s9202_s23, [#allocation9], %s9136_s1, %s9136_s1, %s9137_s17  }
  0x45   :  { %9124 = dma.done.wait [#allocation3], 512  }
  0x46   :  { %9125 = vsyncadd [#allocation3], 4294966784 }
  0x47   :  { %9126 = dma.done.wait [#allocation6], 28672  }
  0x48   :  { %9127 = vsyncadd [#allocation6], 4294938624 }
  0x49   :  { %9128 = dma.done.wait [#allocation9], 4096  }
  0x4a   :  { %9129 = vsyncadd [#allocation9], 4294963200  ;;  %v13995_v0 = vmov 0.0   ;;  %v85_v1 = vld [vmem:[#allocation5 + $0x8] sm:$0xff]  ;;  %v87_v2 = vld [vmem:[#allocation5 + $0x18] sm:$0xff]  ;;  %vm1202_vm0 = vcmask 1040384  }
  0x4b   :  { %223 = vmatprep.mubr.f32.mxu0 %v13995_v0  ;;  %v84_v3 = vld [vmem:[#allocation5] sm:$0xff]  ;;  %v127_v4 = vand.u32 4294901760, %v85_v1  ;;  %v131_v5 = vand.u32 4294901760, %v87_v2  ;;  %v86_v6 = vld [vmem:[#allocation5 + $0x10] sm:$0xff]  ;;  %v89_v8 = vld [vmem:[#allocation5 + $0x28] sm:$0xff]  ;;  %vm1247_vm2 = vcmask 1046528  }
  0x4c   :  { %v129_v7 = vand.u32 4294901760, %v84_v3  ;;  %v91_v9 = vld [vmem:[#allocation5 + $0x38] sm:$0xff]  ;;  %v133_v10 = vand.u32 4294901760, %v86_v6  ;;  %v135_v11 = vand.u32 4294901760, %v89_v8  ;;  %v88_v13 = vld [vmem:[#allocation5 + $0x20] sm:$0xff]  ;;  %v90_v14 = vld [vmem:[#allocation5 + $0x30] sm:$0xff] }
  0x4d   :  { %v139_v12 = vand.u32 4294901760, %v91_v9  ;;  %v93_v15 = vld [vmem:[#allocation5 + $0x48] sm:$0xff]  ;;  %v9240_v16 = vpack.c.bf16 %v131_v5, %v127_v4  ;;  %v95_v17 = vld [vmem:[#allocation5 + $0x58] sm:$0xff]  ;;  %v92_v18 = vld [vmem:[#allocation5 + $0x40] sm:$0xff]  ;;  %v137_v23 = vand.u32 4294901760, %v88_v13  ;;  %v141_v24 = vand.u32 4294901760, %v90_v14 }
  0x4e   :  { %v94_v19 = vld [vmem:[#allocation5 + $0x50] sm:$0xff]  ;;  %v9242_v20 = vpack.c.bf16 %v133_v10, %v129_v7  ;;  %v97_v22 = vld [vmem:[#allocation5 + $0x68] sm:$0xff]  ;;  %v143_v25 = vand.u32 4294901760, %v93_v15  ;;  %v147_v26 = vand.u32 4294901760, %v95_v17  ;;  %v145_v27 = vand.u32 4294901760, %v92_v18  ;;  %v99_v29 = vld [vmem:[#allocation5 + $0x78] sm:$0xff] }
  0x4f   :  { %14951 = vst [vmem:[#allocation15_spill] sm:$0xff] %v9240_v16  ;;  %v9244_v21 = vpack.c.bf16 %v139_v12, %v135_v11  ;;  %7273 = vmatprep.subr.bf16.mxu0 %v9240_v16  ;;  %v149_v28 = vand.u32 4294901760, %v94_v19  ;;  %v96_v30 = vld [vmem:[#allocation5 + $0x60] sm:$0xff]  ;;  %v9248_v31 = vsub.f32 %v85_v1, %v127_v4  ;;  %v9250_v32 = vsub.f32 %v87_v2, %v131_v5  ;;  %v98_v35 = vld [vmem:[#allocation5 + $0x70] sm:$0xff]  ;;  %v101_v40 = vld [vmem:[#allocation5 + $0x88] sm:$0xff] }
  0x50   :  { %14952 = vst [vmem:[#allocation16_spill] sm:$0xff] %v9242_v20  ;;  %7275 = vmatpush1.bf16.msra.mxu0 %v9242_v20  ;;  %v9253_v33 = vpack.c.bf16 %v141_v24, %v137_v23  ;;  %v151_v34 = vand.u32 4294901760, %v97_v22  ;;  %v9255_v36 = vsub.f32 %v84_v3, %v129_v7  ;;  %v9257_v37 = vsub.f32 %v86_v6, %v133_v10  ;;  %v103_v41 = vld [vmem:[#allocation5 + $0x98] sm:$0xff]  ;;  %v100_v46 = vld [vmem:[#allocation5 + $0x80] sm:$0xff]  ;;  %v102_v47 = vld [vmem:[#allocation5 + $0x90] sm:$0xff] }
  0x51   :  { %14953 = vst [vmem:[#allocation17_spill] sm:$0xff] %v9244_v21  ;;  %7277 = vmatprep.subr.bf16.mxu0 %v9244_v21  ;;  %v9259_v38 = vsub.f32 %v89_v8, %v135_v11  ;;  %v9261_v39 = vpack.c.bf16 %v147_v26, %v143_v25  ;;  %v9263_v42 = vsub.f32 %v91_v9, %v139_v12  ;;  %v155_v44 = vand.u32 4294901760, %v99_v29  ;;  %v105_v52 = vld [vmem:[#allocation5 + $0xa8] sm:$0xff]  ;;  %v107_v57 = vld [vmem:[#allocation5 + $0xb8] sm:$0xff]  ;;  %v104_v58 = vld [vmem:[#allocation5 + $0xa0] sm:$0xff] }
  0x52   :  { %14954 = vst [vmem:[#allocation18_spill] sm:$0xff] %v9253_v33  ;;  %v9265_v43 = vsub.f32 %v88_v13, %v137_v23  ;;  %v153_v45 = vand.u32 4294901760, %v96_v30  ;;  %v9268_v48 = vsub.f32 %v90_v14, %v141_v24  ;;  %v9270_v49 = vsub.f32 %v93_v15, %v143_v25  ;;  %v106_v59 = vld [vmem:[#allocation5 + $0xb0] sm:$0xff]  ;;  %v109_v1 = vld [vmem:[#allocation5 + $0xc8] sm:$0xff]  ;;  %v111_v2 = vld [vmem:[#allocation5 + $0xd8] sm:$0xff] }
  0x53   :  { %14955 = vst [vmem:[#allocation19_spill] sm:$0xff] %v9261_v39  ;;  %v9272_v50 = vpack.c.bf16 %v149_v28, %v145_v27  ;;  %v157_v51 = vand.u32 4294901760, %v98_v35  ;;  %v9275_v53 = vsub.f32 %v95_v17, %v147_v26  ;;  %v9277_v54 = vpack.c.bf16 %v155_v44, %v151_v34  ;;  %v108_v11 = vld [vmem:[#allocation5 + $0xc0] sm:$0xff]  ;;  %v110_v12 = vld [vmem:[#allocation5 + $0xd0] sm:$0xff] }
  0x54   :  { %7279 = vmatpush1.bf16.msra.mxu0 %v9253_v33  ;;  %v159_v55 = vand.u32 4294901760, %v101_v40  ;;  %v163_v56 = vand.u32 4294901760, %v103_v41  ;;  %v9279_v60 = vsub.f32 %v92_v18, %v145_v27  ;;  %v9281_v61 = vsub.f32 %v94_v19, %v149_v28  ;;  %v76_v28 = vld [vmem:[#allocation2] sm:$0xff] }
  0x55   :  { %14956 = vst [vmem:[#allocation20_spill] sm:$0xff] %v9272_v50  ;;  %7281 = vmatprep.subr.bf16.mxu0 %v9261_v39  ;;  %14957 = vst [vmem:[#allocation21_spill] sm:$0xff] %v9277_v54  ;;  %v161_v62 = vand.u32 4294901760, %v100_v46  ;;  %v165_v63 = vand.u32 4294901760, %v102_v47  ;;  %v9283_v3 = vsub.f32 %v97_v22, %v151_v34  ;;  %v9285_v4 = vsub.f32 %v99_v29, %v155_v44 }
  0x56   :  { %v9287_v5 = vpack.c.bf16 %v157_v51, %v153_v45  ;;  %v9289_v6 = vsub.f32 %v96_v30, %v153_v45  ;;  %v167_v7 = vand.u32 4294901760, %v105_v52  ;;  %v171_v8 = vand.u32 4294901760, %v107_v57 }
  0x57   :  { %v169_v9 = vand.u32 4294901760, %v104_v58  ;;  %v173_v10 = vand.u32 4294901760, %v106_v59  ;;  %v9293_v13 = vsub.f32 %v98_v35, %v157_v51  ;;  %v9295_v14 = vpack.c.bf16 %v163_v56, %v159_v55  ;;  %v112_v51 = vld [vmem:[#allocation5 + $0xe0] sm:$0xff] }
  0x58   :  { %14958 = vst [vmem:[#allocation22_spill] sm:$0xff] %v9287_v5  ;;  %7283 = vmatpush1.bf16.msra.mxu0 %v9272_v50  ;;  %v175_v15 = vand.u32 4294901760, %v109_v1  ;;  %v179_v17 = vand.u32 4294901760, %v111_v2  ;;  %v9297_v18 = vsub.f32 %v101_v40, %v159_v55  ;;  %v9299_v19 = vsub.f32 %v103_v41, %v163_v56  ;;  %v113_v40 = vld [vmem:[#allocation5 + $0xe8] sm:$0xff]  ;;  %v115_v41 = vld [vmem:[#allocation5 + $0xf8] sm:$0xff] }
  0x59   :  { %7285 = vmatprep.subr.bf16.mxu0 %v9277_v54  ;;  %14959 = vst [vmem:[#allocation23_spill] sm:$0xff] %v9295_v14  ;;  %v9301_v22 = vpack.c.bf16 %v165_v63, %v161_v62  ;;  %v9303_v23 = vsub.f32 %v100_v46, %v161_v62  ;;  %v9305_v24 = vsub.f32 %v102_v47, %v165_v63  ;;  %v177_v26 = vand.u32 4294901760, %v108_v11 }
  0x5a   :  { %v9307_v25 = vpack.c.bf16 %v171_v8, %v167_v7  ;;  %v181_v27 = vand.u32 4294901760, %v110_v12  ;;  %v9310_v29 = vsub.f32 %v105_v52, %v167_v7  ;;  %v9312_v30 = vsub.f32 %v107_v57, %v171_v8  ;;  %v9327_v52 = vld [vmem:[#allocation5 + $0xf0] sm:$0xff] }
  0x5b   :  { %14960 = vst [vmem:[#allocation24_spill] sm:$0xff] %v9301_v22  ;;  %v9314_v34 = vpack.c.bf16 %v173_v10, %v169_v9  ;;  %v9316_v35 = vsub.f32 %v104_v58, %v169_v9  ;;  %v9319_v44 = vsub.f32 %v106_v59, %v173_v10  ;;  %v9321_v45 = vpack.c.bf16 %v179_v17, %v175_v15 }
  0x5c   :  { %14961 = vst [vmem:[#allocation25_spill] sm:$0xff] %v9307_v25  ;;  %7287 = vmatpush1.bf16.msra.mxu0 %v9287_v5  ;;  %v9323_v46 = vsub.f32 %v109_v1, %v175_v15  ;;  %v9325_v47 = vsub.f32 %v111_v2, %v179_v17  ;;  %v13997_v55 = vand.u32 4294901760, %v9248_v31  ;;  %v13998_v56 = vand.u32 4294901760, %v9250_v32 }
  0x5d   :  { %14962 = vst [vmem:[#allocation26_spill] sm:$0xff] %v9314_v34  ;;  %7289 = vmatprep.subr.bf16.mxu0 %v9295_v14  ;;  %14963 = vst [vmem:[#allocation27_spill] sm:$0xff] %v9321_v45  ;;  %v9331_v57 = vand.u32 4294901760, %v76_v28  ;;  %v14001_v58 = vand.u32 4294901760, %v9255_v36  ;;  %v9334_v62 = vpack.c.bf16 %v181_v27, %v177_v26  ;;  %v9336_v59 = vsub.f32 %v108_v11, %v177_v26 }
  0x5e   :  { %v183_v63 = vand.u32 4294901760, %v113_v40  ;;  %v187_v1 = vand.u32 4294901760, %v115_v41  ;;  %v185_v2 = vand.u32 4294901760, %v112_v51  ;;  %v271_v8 = vsub.f32 %v9248_v31, %v13997_v55 }
  0x5f   :  { %14964 = vst [vmem:[#allocation28_spill] sm:$0xff] %v9334_v62  ;;  %v283_v9 = vsub.f32 %v9250_v32, %v13998_v56  ;;  %v9348_v10 = vsub.f32 %v76_v28, %v9331_v57  ;;  %v277_v11 = vsub.f32 %v9255_v36, %v14001_v58  ;;  %v14002_v15 = vand.u32 4294901760, %v9257_v37 }
  0x60   :  { %7291 = vmatpush1.bf16.msra.mxu0 %v9301_v22  ;;  %v14003_v17 = vand.u32 4294901760, %v9259_v38  ;;  %v272_v26 = vand.u32 4294901760, %v271_v8  ;;  %v14010_v55 = vand.u32 4294901760, %v9263_v42  ;;  %v14013_v7 = vand.u32 4294901760, %v9265_v43 }
  0x61   :  { %7293 = vmatprep.subr.bf16.mxu0 %v9307_v25  ;;  %14965 = vst [vmem:[#allocation29_spill] sm:$0xff] %v9348_v10  ;;  %v284_v0 = vand.u32 4294901760, %v283_v9  ;;  %v9357_v56 = vsub.f32 %v110_v12, %v181_v27  ;;  %v289_v28 = vsub.f32 %v9257_v37, %v14002_v15  ;;  %v9367_v8 = vpack.c.bf16 %v187_v1, %v183_v63 }
  0x62   :  { %v295_v58 = vsub.f32 %v9259_v38, %v14003_v17  ;;  %v307_v9 = vsub.f32 %v9263_v42, %v14010_v55  ;;  %v301_v12 = vsub.f32 %v9265_v43, %v14013_v7  ;;  %v14018_v27 = vand.u32 4294901760, %v9268_v48 }
  0x63   :  { %14966 = vst [vmem:[#allocation30_spill] sm:$0xff] %v9367_v8  ;;  %v9377_v15 = vsub.f32 %v113_v40, %v183_v63  ;;  %v14967_v17 = vand.u32 4294901760, %v9327_v52  ;;  %v7304_v14 = vpack.c.bf16 %v284_v0, %v272_v26  ;;  %v14969_v55 = vand.u32 4294901760, %v9348_v10 }
  0x64   :  { %7295 = vmatpush1.bf16.msra.mxu0 %v9314_v34  ;;  %v278_v34 = vand.u32 4294901760, %v277_v11  ;;  %v313_v7 = vsub.f32 %v9268_v48, %v14018_v27  ;;  %v290_v40 = vand.u32 4294901760, %v289_v28  ;;  %v296_v63 = vand.u32 4294901760, %v295_v58 }
  0x65   :  { %7297 = vmatprep.subr.bf16.mxu0 %v9321_v45  ;;  %v9381_v25 = vpack.c.bf16 %v14967_v17, %v185_v2  ;;  %v227_v5 = vsub.f32 %v9348_v10, %v14969_v55  ;;  %v14023_v45 = vand.u32 4294901760, %v9275_v53  ;;  %v308_v54 = vand.u32 4294901760, %v307_v9 }
  0x66   :  { %v14024_v17 = vand.u32 4294901760, %v9279_v60  ;;  %v302_v11 = vand.u32 4294901760, %v301_v12  ;;  %v314_v22 = vand.u32 4294901760, %v313_v7  ;;  %v14970_v0 = vand.u32 4294901760, %v9270_v49 }
  0x67   :  { %14968 = vst [vmem:[#allocation31_spill] sm:$0xff] %v9381_v25  ;;  %v14027_v55 = vand.u32 4294901760, %v9281_v61  ;;  %v331_v28 = vsub.f32 %v9275_v53, %v14023_v45  ;;  %v14028_v9 = vand.u32 4294901760, %v9283_v3  ;;  %v14031_v7 = vand.u32 4294901760, %v9285_v4 }
  0x68   :  { %7299 = vmatpush1.bf16.msra.mxu0 %v9334_v62  ;;  %v319_v26 = vsub.f32 %v9270_v49, %v14970_v0  ;;  %v325_v58 = vsub.f32 %v9279_v60, %v14024_v17  ;;  %v9406_v12 = vsub.f32 %v115_v41, %v187_v1  ;;  %v9408_v27 = vsub.f32 %v112_v51, %v185_v2 }
  0x69   :  { %7301 = vmatprep.subr.bf16.mxu0 %v9367_v8  ;;  %v337_v0 = vsub.f32 %v9281_v61, %v14027_v55  ;;  %v228_v62 = vand.u32 4294901760, %v227_v5  ;;  %v7306_v45 = vpack.c.bf16 %v290_v40, %v278_v34  ;;  %v343_v17 = vsub.f32 %v9283_v3, %v14028_v9 }
  0x6a   :  { %v7308_v41 = vpack.c.bf16 %v308_v54, %v296_v63  ;;  %v320_v1 = vand.u32 4294901760, %v319_v26  ;;  %v355_v51 = vsub.f32 %v9285_v4, %v14031_v7  ;;  %v14034_v2 = vand.u32 4294901760, %v9297_v18  ;;  %v77_v63 = vld [vmem:[#allocation2 + $0x8] sm:$0xff] }
  0x6b   :  { %v7310_v55 = vpack.c.bf16 %v314_v22, %v302_v11  ;;  %v332_v5 = vand.u32 4294901760, %v331_v28  ;;  %v326_v34 = vand.u32 4294901760, %v325_v58  ;;  %v14032_v40 = vand.u32 4294901760, %v9299_v19 }
  0x6c   :  { %7303 = vmatpush1.bf16.msra.mxu0 %v9381_v25  ;;  %v338_v8 = vand.u32 4294901760, %v337_v0  ;;  %v344_v9 = vand.u32 4294901760, %v343_v17  ;;  %v14971_v50 = vand.u32 4294901760, %v9289_v6  ;;  %v14033_v54 = vand.u32 4294901760, %v9303_v23 }
  0x6d   :  { %7305 = vmatprep.subr.bf16.mxu0 %v7304_v14  ;;  %v14972_v26 = vand.u32 4294901760, %v9293_v13  ;;  %v367_v14 = vsub.f32 %v9297_v18, %v14034_v2  ;;  %v379_v22 = vsub.f32 %v9299_v19, %v14032_v40  ;;  %v14037_v17 = vand.u32 4294901760, %v9305_v24 }
  0x6e   :  { %v349_v25 = vsub.f32 %v9289_v6, %v14971_v50  ;;  %v356_v50 = vand.u32 4294901760, %v355_v51  ;;  %v14973_v11 = vmov 0.0   ;;  %v14044_v28 = vand.u32 4294901760, %v9310_v29 }
  0x6f   :  { %229 = vmatmul.mubr.f32.vlgmr.msra.gmra.mrb[0].mxu0 %v228_v62  ;;  %v361_v7 = vsub.f32 %v9293_v13, %v14972_v26  ;;  %v373_v62 = vsub.f32 %v9303_v23, %v14033_v54  ;;  %v14047_v58 = vand.u32 4294901760, %v9312_v30  ;;  %v14974_v0 = vand.u32 4294901760, %v9327_v52 }
  0x70   :  { %7307 = vmatpush1.bf16.msra.mxu0 %v7306_v45  ;;  %234 = vmatprep.mubr.f32.mxu0 %v14973_v11  ;;  %v7312_v40 = vpack.c.bf16 %v332_v5, %v320_v1  ;;  %v385_v45 = vsub.f32 %v9305_v24, %v14037_v17  ;;  %v9452_v51 = vand.u32 4294901760, %v77_v63  ;;  %v350_v54 = vand.u32 4294901760, %v349_v25  ;;  %v78_v17 = vld [vmem:[#allocation2 + $0x10] sm:$0xff] }
  0x71   :  { %v9447_v26 = vsub.f32 %v9327_v52, %v14974_v0  ;;  %7309 = vmatprep.subr.bf16.mxu0 %v7308_v41  ;;  %v391_v2 = vsub.f32 %v9310_v29, %v14044_v28  ;;  %v403_v39 = vsub.f32 %v9312_v30, %v14047_v58  ;;  %v14054_v52 = vand.u32 4294901760, %v9316_v35 }
  0x72   :  { %v362_v0 = vand.u32 4294901760, %v361_v7  ;;  %v368_v41 = vand.u32 4294901760, %v367_v14  ;;  %v380_v1 = vand.u32 4294901760, %v379_v22  ;;  %v9462_v5 = vsub.f32 %v77_v63, %v9452_v51 }
  0x73   :  { %v7314_v33 = vpack.c.bf16 %v338_v8, %v326_v34  ;;  %v7316_v25 = vpack.c.bf16 %v356_v50, %v344_v9  ;;  %v374_v21 = vand.u32 4294901760, %v373_v62  ;;  %v14049_v20 = vand.u32 4294901760, %v9319_v44 }
  0x74   :  { %14975 = vst [vmem:[#allocation32_spill] sm:$0xff] %v9462_v5  ;;  %7311 = vmatpush1.bf16.msra.mxu0 %v7310_v55  ;;  %v386_v28 = vand.u32 4294901760, %v385_v45  ;;  %v14048_v10 = vand.u32 4294901760, %v9462_v5  ;;  %v14053_v58 = vand.u32 4294901760, %v9323_v46  ;;  %v14052_v7 = vand.u32 4294901760, %v9325_v47 }
  0x75   :  { %7313 = vmatprep.subr.bf16.mxu0 %v7312_v40  ;;  %v392_v14 = vand.u32 4294901760, %v391_v2  ;;  %v404_v22 = vand.u32 4294901760, %v403_v39  ;;  %v397_v63 = vsub.f32 %v9316_v35, %v14054_v52  ;;  %v9471_v55 = vand.u32 4294901760, %v78_v17 }
  0x76   :  { %v7318_v8 = vpack.c.bf16 %v362_v0, %v350_v54  ;;  %v7320_v9 = vpack.c.bf16 %v380_v1, %v368_v41  ;;  %v238_v34 = vsub.f32 %v9462_v5, %v14048_v10  ;;  %v14051_v40 = vand.u32 4294901760, %v9336_v59  ;;  %v79_v54 = vld [vmem:[#allocation2 + $0x18] sm:$0xff] }
  0x77   :  { %v409_v2 = vsub.f32 %v9319_v44, %v14049_v20  ;;  %v9481_v39 = vsub.f32 %v78_v17, %v9471_v55  ;;  %v14050_v50 = vand.u32 4294901760, %v9357_v56  ;;  %v14060_v62 = vand.u32 4294901760, %v9377_v15 }
  0x78   :  { %7315 = vmatpush1.bf16.msra.mxu0 %v7314_v33  ;;  %v7322_v45 = vpack.c.bf16 %v386_v28, %v374_v21  ;;  %v239_v0 = vand.u32 4294901760, %v238_v34  ;;  %v415_v41 = vsub.f32 %v9323_v46, %v14053_v58  ;;  %v427_v33 = vsub.f32 %v9325_v47, %v14052_v7 }
  0x79   :  { %14976 = vst [vmem:[#allocation33_spill] sm:$0xff] %v9481_v39  ;;  %7317 = vmatprep.subr.bf16.mxu0 %v7316_v25  ;;  %v7324_v1 = vpack.c.bf16 %v404_v22, %v392_v14  ;;  %v398_v10 = vand.u32 4294901760, %v397_v63  ;;  %v14057_v17 = vand.u32 4294901760, %v9481_v39  ;;  %v450_v20 = vand.u32 4294901760, %v9406_v12 }
  0x7a   :  { %240 = vmatmul.mubr.f32.gmra.mrb[2].mxu0 %v239_v0  ;;  %v421_v21 = vsub.f32 %v9336_v59, %v14051_v40  ;;  %v433_v28 = vsub.f32 %v9357_v56, %v14050_v50  ;;  %v9499_v25 = vand.u32 4294901760, %v79_v54  ;;  %v444_v34 = vand.u32 4294901760, %v9408_v27 }
  0x7b   :  { %v410_v14 = vand.u32 4294901760, %v409_v2  ;;  %245 = vmatprep.mubr.f32.mxu0 %v14973_v11  ;;  %v249_v22 = vsub.f32 %v9481_v39, %v14057_v17  ;;  %v439_v63 = vsub.f32 %v9377_v15, %v14060_v62  ;;  %v451_v0 = vsub.f32 %v9406_v12, %v450_v20 }
  0x7c   :  { %7319 = vmatpush1.bf16.msra.mxu0 %v7318_v8  ;;  %v416_v50 = vand.u32 4294901760, %v415_v41  ;;  %v428_v40 = vand.u32 4294901760, %v427_v33  ;;  %v9511_v7 = vsub.f32 %v79_v54, %v9499_v25  ;;  %v456_v8 = vand.u32 4294901760, %v9447_v26 }
  0x7d   :  { %7321 = vmatprep.subr.bf16.mxu0 %v7320_v9  ;;  %v250_v2 = vand.u32 4294901760, %v249_v22  ;;  %v422_v58 = vand.u32 4294901760, %v421_v21  ;;  %v434_v52 = vand.u32 4294901760, %v433_v28  ;;  %v445_v17 = vsub.f32 %v9408_v27, %v444_v34 }
  0x7e   :  { %v14063_v5 = vand.u32 4294901760, %v9511_v7  ;;  %v7326_v39 = vpack.c.bf16 %v410_v14, %v398_v10  ;;  %v440_v62 = vand.u32 4294901760, %v439_v63  ;;  %v452_v16 = vand.u32 4294901760, %v451_v0 }
  0x7f   :  { %v457_v9 = vsub.f32 %v9447_v26, %v456_v8  ;;  %v7328_v41 = vpack.c.bf16 %v428_v40, %v416_v50  ;;  %251 = vmatmul.mubr.f32.gmra.mrb[4].mxu0 %v250_v2  ;;  %v7330_v33 = vpack.c.bf16 %v434_v52, %v422_v58  ;;  %v446_v28 = vand.u32 4294901760, %v445_v17 }
  0x80   :  { %7323 = vmatpush1.bf16.msra.mxu0 %v7322_v45  ;;  %v260_v54 = vsub.f32 %v9511_v7, %v14063_v5  ;;  %256 = vmatprep.mubr.f32.mxu0 %v14973_v11  ;;  %v7332_v22 = vpack.c.bf16 %v452_v16, %v440_v62  ;;  %v14977_v10 = vand.u32 4294901760, %v9248_v31  ;;  %v14978_v14 = vand.u32 4294901760, %v9250_v32 }
  0x81   :  { %7325 = vmatprep.subr.bf16.mxu0 %v7324_v1  ;;  %v458_v45 = vand.u32 4294901760, %v457_v9  ;;  %v14979_v40 = vand.u32 4294901760, %v9255_v36  ;;  %v14980_v50 = vand.u32 4294901760, %v9257_v37  ;;  %v14981_v58 = vand.u32 4294901760, %v9259_v38 }
  0x82   :  { %v261_v21 = vand.u32 4294901760, %v260_v54  ;;  %v9525_v63 = vpack.c.bf16 %v14978_v14, %v14977_v10  ;;  %v14982_v52 = vand.u32 4294901760, %v9263_v42  ;;  %v14984_v62 = vand.u32 4294901760, %v9268_v48 }
  0x83   :  { %v9531_v1 = vpack.c.bf16 %v14980_v50, %v14979_v40  ;;  %v14985_v0 = vand.u32 4294901760, %v9270_v49  ;;  %v14986_v2 = vand.u32 4294901760, %v9275_v53  ;;  %v14988_v54 = vand.u32 4294901760, %v9281_v61 }
  0x84   :  { %7327 = vmatpush1.bf16.msra.mxu0 %v7326_v39  ;;  %v9537_v16 = vpack.c.bf16 %v14982_v52, %v14981_v58  ;;  %v14983_v39 = vand.u32 4294901760, %v9265_v43  ;;  %v14989_v10 = vand.u32 4294901760, %v9283_v3  ;;  %v14990_v14 = vand.u32 4294901760, %v9285_v4 }
  0x85   :  { %7329 = vmatprep.subr.bf16.mxu0 %v7328_v41  ;;  %262 = vmatmul.mubr.f32.gmra.mrb[6].mxu0 %v261_v21  ;;  %v9549_v9 = vpack.c.bf16 %v14986_v2, %v14985_v0  ;;  %v14987_v41 = vand.u32 4294901760, %v9279_v60  ;;  %v14991_v50 = vand.u32 4294901760, %v9289_v6  ;;  %v14992_v58 = vand.u32 4294901760, %v9293_v13 }
  0x86   :  { %v9543_v17 = vpack.c.bf16 %v14984_v62, %v14983_v39  ;;  %492 = vmatprep.mubr.f32.mxu0 %v14973_v11  ;;  %v9562_v40 = vpack.c.bf16 %v14990_v14, %v14989_v10  ;;  %v14994_v39 = vand.u32 4294901760, %v9297_v18  ;;  %v14995_v62 = vand.u32 4294901760, %v9299_v19 }
  0x87   :  { %v9556_v21 = vpack.c.bf16 %v14988_v54, %v14987_v41  ;;  %v9568_v52 = vpack.c.bf16 %v14992_v58, %v14991_v50  ;;  %v14997_v2 = vand.u32 4294901760, %v9303_v23  ;;  %v14998_v41 = vand.u32 4294901760, %v9305_v24 }
  0x88   :  { %v9574_v0 = vpack.c.bf16 %v14995_v62, %v14994_v39  ;;  %v15000_v10 = vand.u32 4294901760, %v9310_v29  ;;  %v15001_v14 = vand.u32 4294901760, %v9312_v30  ;;  %v15003_v50 = vand.u32 4294901760, %v9316_v35  ;;  %7331 = vmatpush1.bf16.msra.mxu0 %v7330_v33 }
  0x89   :  { %14993 = vst [vmem:[#allocation34_spill] sm:$0xff] %v9568_v52  ;;  %v9580_v54 = vpack.c.bf16 %v14998_v41, %v14997_v2  ;;  %v15004_v58 = vand.u32 4294901760, %v9319_v44  ;;  %v15005_v39 = vand.u32 4294901760, %v9323_v46  ;;  %v15006_v62 = vand.u32 4294901760, %v9325_v47  ;;  %7333 = vmatprep.subr.bf16.mxu0 %v7332_v22 }
  0x8a   :  { %14996 = vst [vmem:[#allocation35_spill] sm:$0xff] %v9574_v0  ;;  %v9586_v5 = vpack.c.bf16 %v15001_v14, %v15000_v10  ;;  %v7334_v2 = vpack.c.bf16 %v458_v45, %v446_v28  ;;  %v15007_v41 = vand.u32 4294901760, %v9336_v59  ;;  %v15009_v14 = vand.u32 4294901760, %v9377_v15 }
  0x8b   :  { %14999 = vst [vmem:[#allocation36_spill] sm:$0xff] %v9580_v54  ;;  %v9592_v52 = vpack.c.bf16 %v15004_v58, %v15003_v50  ;;  %v9598_v0 = vpack.c.bf16 %v15006_v62, %v15005_v39  ;;  %v15008_v54 = vand.u32 4294901760, %v9357_v56  ;;  %v9610_v50 = vpack.c.bf16 %v456_v8, %v444_v34  ;;  %v9650_v34 = vld [vmem:[#allocation7] sm:$0xff]  ;;  %v9660_v39 = vld [vmem:[#allocation7 + $0x10] sm:$0xff] }
  0x8c   :  { %15002 = vst [vmem:[#allocation37_spill] sm:$0xff] %v9586_v5  ;;  %v9608_v5 = vpack.c.bf16 %v450_v20, %v15009_v14  ;;  %v7336_v58 = vpack.c.bf16 %v9250_v32, %v9248_v31  ;;  %7335 = vmatpush1.bf16.msra.mxu0 %v7334_v2  ;;  %v7338_v33 = vpack.c.bf16 %v9257_v37, %v9255_v36 }
  0x8d   :  { %v9604_v10 = vpack.c.bf16 %v15008_v54, %v15007_v41  ;;  %v7340_v28 = vpack.c.bf16 %v9263_v42, %v9259_v38  ;;  %v7342_v20 = vpack.c.bf16 %v9268_v48, %v9265_v43  ;;  %v7344_v31 = vpack.c.bf16 %v9275_v53, %v9270_v49  ;;  %v1353_v43 = vld [vmem:[#allocation7 + $0x208] sm:$0xff]  ;;  %v1355_v48 = vld [vmem:[#allocation7 + $0x218] sm:$0xff]  ;;  %v1352_v49 = vld [vmem:[#allocation7 + $0x200] sm:$0xff] }
  0x8e   :  { %7337 = vmatprep.subr.bf16.mxu0 %v7336_v58  ;;  %v7346_v32 = vpack.c.bf16 %v9281_v61, %v9279_v60  ;;  %v7348_v36 = vpack.c.bf16 %v9285_v4, %v9283_v3  ;;  %v7350_v37 = vpack.c.bf16 %v9293_v13, %v9289_v6  ;;  %v7352_v38 = vpack.c.bf16 %v9299_v19, %v9297_v18  ;;  %v1354_v3 = vld [vmem:[#allocation7 + $0x210] sm:$0xff]  ;;  %v9642_v6 = vld [vmem:[#allocation7 + $0x8] sm:$0xff]  ;;  %v9644_v13 = vld [vmem:[#allocation7 + $0x18] sm:$0xff] }
  0x8f   :  { %494 = vmatmul.mubr.f32.vlgmr.msra.gmra.mrb[0].mxu0 %v9331_v57  ;;  %v7354_v42 = vpack.c.bf16 %v9305_v24, %v9303_v23  ;;  %v7356_v53 = vpack.c.bf16 %v9312_v30, %v9310_v29  ;;  %v2961_v60 = vand.u32 4294901760, %v1353_v43  ;;  %v2965_v61 = vand.u32 4294901760, %v1355_v48  ;;  %v1357_v29 = vld [vmem:[#allocation7 + $0x228] sm:$0xff]  ;;  %v1359_v30 = vld [vmem:[#allocation7 + $0x238] sm:$0xff] }
  0x90   :  { %7339 = vmatpush1.bf16.msra.mxu0 %v7338_v33  ;;  %499 = vmatprep.mubr.f32.mxu0 %v14973_v11  ;;  %v2963_v4 = vand.u32 4294901760, %v1352_v49  ;;  %v7358_v18 = vpack.c.bf16 %v9319_v44, %v9316_v35  ;;  %v2967_v19 = vand.u32 4294901760, %v1354_v3  ;;  %v14068_v23 = vand.u32 4294901760, %v9642_v6  ;;  %v1356_v35 = vld [vmem:[#allocation7 + $0x220] sm:$0xff]  ;;  %v1358_v44 = vld [vmem:[#allocation7 + $0x230] sm:$0xff]  ;;  %v9673_v58 = vld [vmem:[#allocation7 + $0x28] sm:$0xff] }
  0x91   :  { %7341 = vmatprep.subr.bf16.mxu0 %v7340_v28  ;;  %v14067_v24 = vand.u32 4294901760, %v9644_v13  ;;  %v9652_v8 = vpack.c.bf16 %v2965_v61, %v2961_v60  ;;  %v9654_v22 = vsub.f32 %v1353_v43, %v2961_v60  ;;  %v9656_v45 = vsub.f32 %v1355_v48, %v2965_v61  ;;  %v9698_v60 = vld [vmem:[#allocation7 + $0x20] sm:$0xff] }
  0x92   :  { %v9658_v54 = vsub.f32 %v1352_v49, %v2963_v4  ;;  %v7360_v62 = vpack.c.bf16 %v9325_v47, %v9323_v46  ;;  %v9664_v2 = vpack.c.bf16 %v2967_v19, %v2963_v4  ;;  %v9666_v41 = vsub.f32 %v1354_v3, %v2967_v19  ;;  %15023 = vst [vmem:[#allocation51_spill] sm:$0xff] %v9698_v60  ;;  %v1360_v61 = vld [vmem:[#allocation7 + $0x240] sm:$0xff] }
  0x93   :  { %501 = vmatmul.mubr.f32.gmra.mrb[2].mxu0 %v9452_v51  ;;  %15010 = vst [vmem:[#allocation38_spill] sm:$0xff] %v9652_v8  ;;  %15011 = vst [vmem:[#allocation39_spill] sm:$0xff] %v9654_v22  ;;  %v9671_v14 = vsub.f32 %v9642_v6, %v14068_v23  ;;  %7849 = vmatprep.subr.bf16.mxu1 %v9652_v8  ;;  %v9679_v33 = vsub.f32 %v9644_v13, %v14067_v24  ;;  %v2969_v46 = vand.u32 4294901760, %v1357_v29  ;;  %v9736_v23 = vld [vmem:[#allocation7 + $0x58] sm:$0xff]  ;;  %v1366_v8 = vld [vmem:[#allocation7 + $0x270] sm:$0xff] }
  0x94   :  { %7343 = vmatpush1.bf16.msra.mxu0 %v7342_v20  ;;  %506 = vmatprep.mubr.f32.mxu0 %v14973_v11  ;;  %15012 = vst [vmem:[#allocation40_spill] sm:$0xff] %v9656_v45  ;;  %15013 = vst [vmem:[#allocation41_spill] sm:$0xff] %v9658_v54  ;;  %v2973_v47 = vand.u32 4294901760, %v1359_v30  ;;  %v14064_v28 = vand.u32 4294901760, %v9650_v34  ;;  %v14065_v20 = vand.u32 4294901760, %v9660_v39  ;;  %v7362_v3 = vpack.c.bf16 %v9357_v56, %v9336_v59  ;;  %v1377_v45 = vld [vmem:[#allocation7 + $0x2c8] sm:$0xff] }
  0x95   :  { %7345 = vmatprep.subr.bf16.mxu0 %v7344_v31  ;;  %15014 = vst [vmem:[#allocation42_spill] sm:$0xff] %v9664_v2  ;;  %15015 = vst [vmem:[#allocation43_spill] sm:$0xff] %v9666_v41  ;;  %7851 = vmatpush1.bf16.msra.mxu1 %v9664_v2  ;;  %v2971_v31 = vand.u32 4294901760, %v1356_v35  ;;  %v9689_v43 = vsub.f32 %v1357_v29, %v2969_v46  ;;  %v15036_v2 = vand.u32 4294901760, %v9698_v60 }
  0x96   :  { %15016 = vst [vmem:[#allocation44_spill] sm:$0xff] %v9671_v14  ;;  %15017 = vst [vmem:[#allocation45_spill] sm:$0xff] %v9679_v33  ;;  %v9691_v48 = vsub.f32 %v1359_v30, %v2973_v47  ;;  %v9696_v49 = vsub.f32 %v9650_v34, %v14064_v28  ;;  %v9705_v4 = vsub.f32 %v9660_v39, %v14065_v20  ;;  %v9711_v30 = vld [vmem:[#allocation7 + $0x30] sm:$0xff]  ;;  %v2979_v20 = vand.u32 4294901760, %v1360_v61  ;;  %v9883_v14 = vld [vmem:[#allocation7 + $0xb8] sm:$0xff] }
  0x97   :  { %508 = vmatmul.mubr.f32.gmra.mrb[4].mxu0 %v9471_v55  ;;  %15020 = vst [vmem:[#allocation48_spill] sm:$0xff] %v9689_v43  ;;  %v9709_v29 = vsub.f32 %v1356_v35, %v2971_v31  ;;  %15027 = vst [vmem:[#allocation55_spill] sm:$0xff] %v9711_v30  ;;  %v7364_v35 = vpack.c.bf16 %v9406_v12, %v9377_v15  ;;  %v1365_v15 = vld [vmem:[#allocation7 + $0x268] sm:$0xff]  ;;  %v1367_v12 = vld [vmem:[#allocation7 + $0x278] sm:$0xff] }
  0x98   :  { %7347 = vmatpush1.bf16.msra.mxu0 %v7346_v32  ;;  %513 = vmatprep.mubr.f32.mxu0 %v14973_v11  ;;  %v2975_v32 = vand.u32 4294901760, %v1358_v44  ;;  %15021 = vst [vmem:[#allocation49_spill] sm:$0xff] %v9691_v48  ;;  %15022 = vst [vmem:[#allocation50_spill] sm:$0xff] %v9696_v49  ;;  %v1374_v43 = vld [vmem:[#allocation7 + $0x2b0] sm:$0xff] }
  0x99   :  { %7349 = vmatprep.subr.bf16.mxu0 %v7348_v36  ;;  %v9684_v36 = vld [vmem:[#allocation7 + $0x38] sm:$0xff]  ;;  %15024 = vst [vmem:[#allocation52_spill] sm:$0xff] %v9705_v4  ;;  %15026 = vst [vmem:[#allocation54_spill] sm:$0xff] %v9709_v29  ;;  %v15068_v29 = vld [vmem:[#allocation17_spill] sm:$0xff] }
  0x9a   :  { %15018 = vst [vmem:[#allocation46_spill] sm:$0xff] %v9684_v36  ;;  %v9707_v19 = vpack.c.bf16 %v2975_v32, %v2971_v31  ;;  %v14075_v28 = vand.u32 4294901760, %v9684_v36  ;;  %15033 = vst [vmem:[#allocation61_spill] sm:$0xff] %v9736_v23 }
  0x9b   :  { %515 = vmatmul.mubr.f32.gmra.mrb[6].mxu0 %v9499_v25  ;;  %15085 = vst [vmem:[#allocation95_spill] sm:$0xff] %v9883_v14 }
  0x9c   :  { %7351 = vmatpush1.bf16.msra.mxu0 %v7350_v37  ;;  %649 = vmatprep.mubr.f32.mxu0 %v14973_v11  ;;  %v14066_v37 = vand.u32 4294901760, %v9673_v58  ;;  %15025 = vst [vmem:[#allocation53_spill] sm:$0xff] %v9707_v19 }
  0x9d   :  { %7353 = vmatprep.subr.bf16.mxu0 %v7352_v38  ;;  %v1361_v38 = vld [vmem:[#allocation7 + $0x248] sm:$0xff] }
  0x9e   :  { %v9720_v56 = vsub.f32 %v9673_v58, %v14066_v37  ;;  %v2977_v59 = vand.u32 4294901760, %v1361_v38 }
  0xa0   :  { %7355 = vmatpush1.bf16.msra.mxu0 %v7354_v42  ;;  %v9687_v42 = vpack.c.bf16 %v2973_v47, %v2969_v46  ;;  %v1362_v46 = vld [vmem:[#allocation7 + $0x250] sm:$0xff]  ;;  %v9714_v47 = vsub.f32 %v1358_v44, %v2975_v32  ;;  %15029 = vst [vmem:[#allocation57_spill] sm:$0xff] %v9720_v56  ;;  %v9726_v44 = vld [vmem:[#allocation7 + $0x48] sm:$0xff]  ;;  %v9731_v32 = vsub.f32 %v9684_v36, %v14075_v28  ;;  %v15055_v56 = vld [vmem:[#allocation15_spill] sm:$0xff] }
  0xa1   :  { %7357 = vmatprep.subr.bf16.mxu0 %v7356_v53  ;;  %v1363_v53 = vld [vmem:[#allocation7 + $0x258] sm:$0xff]  ;;  %15030 = vst [vmem:[#allocation58_spill] sm:$0xff] %v9726_v44  ;;  %v9733_v37 = vsub.f32 %v1361_v38, %v2977_v59  ;;  %v2983_v24 = vand.u32 4294901760, %v1362_v46  ;;  %v9747_v28 = vsub.f32 %v9698_v60, %v15036_v2  ;;  %v9749_v38 = vld [vmem:[#allocation7 + $0x40] sm:$0xff]  ;;  %v14089_v2 = vand.u32 4294901760, %v9726_v44 }
  0xa2   :  { %15019 = vst [vmem:[#allocation47_spill] sm:$0xff] %v9687_v42  ;;  %7853 = vmatprep.subr.bf16.mxu1 %v9687_v42  ;;  %15028 = vst [vmem:[#allocation56_spill] sm:$0xff] %v9714_v47  ;;  %v2981_v31 = vand.u32 4294901760, %v1363_v53  ;;  %v15061_v47 = vld [vmem:[#allocation29_spill] sm:$0xff] }
  0xa3   :  { %7855 = vmatpush1.bf16.msra.mxu1 %v9707_v19  ;;  %15031 = vst [vmem:[#allocation59_spill] sm:$0xff] %v9731_v32  ;;  %15032 = vst [vmem:[#allocation60_spill] sm:$0xff] %v9733_v37  ;;  %v15039_v37 = vand.u32 4294901760, %v9711_v30 }
  0xa4   :  { %7359 = vmatpush1.bf16.msra.mxu0 %v7358_v18  ;;  %v7366_v18 = vpack.c.bf16 %v9447_v26, %v9408_v27  ;;  %v9740_v19 = vpack.c.bf16 %v2981_v31, %v2977_v59  ;;  %v9742_v42 = vsub.f32 %v1363_v53, %v2981_v31  ;;  %15037 = vst [vmem:[#allocation64_spill] sm:$0xff] %v9747_v28  ;;  %15038 = vst [vmem:[#allocation65_spill] sm:$0xff] %v9749_v38  ;;  %v9762_v59 = vld [vmem:[#allocation7 + $0x50] sm:$0xff] }
  0xa5   :  { %7361 = vmatprep.subr.bf16.mxu0 %v7360_v62  ;;  %v1364_v62 = vld [vmem:[#allocation7 + $0x260] sm:$0xff]  ;;  %v9754_v32 = vsub.f32 %v9711_v30, %v15039_v37  ;;  %v9756_v27 = vpack.c.bf16 %v2983_v24, %v2979_v20  ;;  %v9758_v26 = vsub.f32 %v1360_v61, %v2979_v20  ;;  %v9760_v53 = vsub.f32 %v1362_v46, %v2983_v24  ;;  %v9769_v61 = vld [vmem:[#allocation7 + $0x68] sm:$0xff]  ;;  %v15158_v30 = vld [vmem:[#allocation30_spill] sm:$0xff] }
  0xa6   :  { %15034 = vst [vmem:[#allocation62_spill] sm:$0xff] %v9740_v19  ;;  %15035 = vst [vmem:[#allocation63_spill] sm:$0xff] %v9742_v42  ;;  %7857 = vmatprep.subr.bf16.mxu1 %v9740_v19  ;;  %v2985_v31 = vand.u32 4294901760, %v1365_v15  ;;  %v2989_v28 = vand.u32 4294901760, %v1367_v12  ;;  %v2991_v20 = vand.u32 4294901760, %v1366_v8  ;;  %v9774_v24 = vsub.f32 %v9726_v44, %v14089_v2  ;;  %v9784_v19 = vld [vmem:[#allocation7 + $0x78] sm:$0xff] }
  0xa7   :  { %15040 = vst [vmem:[#allocation66_spill] sm:$0xff] %v9754_v32  ;;  %15041 = vst [vmem:[#allocation67_spill] sm:$0xff] %v9756_v27  ;;  %7859 = vmatpush1.bf16.msra.mxu1 %v9756_v27  ;;  %v2987_v32 = vand.u32 4294901760, %v1364_v62  ;;  %v14100_v27 = vand.u32 4294901760, %v9762_v59  ;;  %v1369_v37 = vld [vmem:[#allocation7 + $0x288] sm:$0xff]  ;;  %v15052_v2 = vand.u32 4294901760, %v9749_v38 }
  0xa8   :  { %7363 = vmatpush1.bf16.msra.mxu0 %v7362_v3  ;;  %15042 = vst [vmem:[#allocation68_spill] sm:$0xff] %v9758_v26  ;;  %15043 = vst [vmem:[#allocation69_spill] sm:$0xff] %v9760_v53  ;;  %v14091_v3 = vand.u32 4294901760, %v9736_v23  ;;  %v1371_v53 = vld [vmem:[#allocation7 + $0x298] sm:$0xff]  ;;  %v9786_v26 = vsub.f32 %v1365_v15, %v2985_v31  ;;  %v9788_v42 = vsub.f32 %v1367_v12, %v2989_v28  ;;  %v14105_v12 = vand.u32 4294901760, %v9769_v61  ;;  %v15154_v44 = vld [vmem:[#allocation28_spill] sm:$0xff] }
  0xa9   :  { %15044 = vst [vmem:[#allocation70_spill] sm:$0xff] %v9762_v59  ;;  %7365 = vmatprep.subr.bf16.mxu0 %v7364_v35  ;;  %15045 = vst [vmem:[#allocation71_spill] sm:$0xff] %v9769_v61  ;;  %v9781_v35 = vpack.c.bf16 %v2989_v28, %v2985_v31  ;;  %v9804_v15 = vpack.c.bf16 %v2991_v20, %v2987_v32  ;;  %v9806_v28 = vsub.f32 %v1364_v62, %v2987_v32  ;;  %v1370_v31 = vld [vmem:[#allocation7 + $0x290] sm:$0xff]  ;;  %v1373_v62 = vld [vmem:[#allocation7 + $0x2a8] sm:$0xff] }
  0xaa   :  { %15046 = vst [vmem:[#allocation72_spill] sm:$0xff] %v9774_v24  ;;  %v9779_v46 = vsub.f32 %v9736_v23, %v14091_v3  ;;  %15049 = vst [vmem:[#allocation75_spill] sm:$0xff] %v9784_v19  ;;  %v9793_v24 = vsub.f32 %v9749_v38, %v15052_v2  ;;  %v9795_v3 = vld [vmem:[#allocation7 + $0x60] sm:$0xff]  ;;  %v9809_v2 = vld [vmem:[#allocation7 + $0x70] sm:$0xff]  ;;  %v9819_v32 = vsub.f32 %v9769_v61, %v14105_v12  ;;  %v2999_v12 = vand.u32 4294901760, %v1370_v31 }
  0xab   :  { %15048 = vst [vmem:[#allocation74_spill] sm:$0xff] %v9781_v35  ;;  %15050 = vst [vmem:[#allocation76_spill] sm:$0xff] %v9786_v26  ;;  %7861 = vmatprep.subr.bf16.mxu1 %v9781_v35  ;;  %v2993_v26 = vand.u32 4294901760, %v1369_v37  ;;  %v2997_v35 = vand.u32 4294901760, %v1371_v53  ;;  %v15071_v48 = vand.u32 4294901760, %v9795_v3  ;;  %v15139_v38 = vld [vmem:[#allocation26_spill] sm:$0xff] }
  0xac   :  { %15047 = vst [vmem:[#allocation73_spill] sm:$0xff] %v9779_v46  ;;  %7367 = vmatpush1.bf16.msra.mxu0 %v7366_v18  ;;  %15051 = vst [vmem:[#allocation77_spill] sm:$0xff] %v9788_v42  ;;  %v1368_v46 = vld [vmem:[#allocation7 + $0x280] sm:$0xff]  ;;  %v9802_v18 = vsub.f32 %v9762_v59, %v14100_v27  ;;  %v14112_v42 = vand.u32 4294901760, %v9784_v19  ;;  %7863 = vmatpush1.bf16.msra.mxu1 %v9804_v15 }
  0xad   :  { %15053 = vst [vmem:[#allocation78_spill] sm:$0xff] %v9793_v24  ;;  %15054 = vst [vmem:[#allocation79_spill] sm:$0xff] %v9795_v3  ;;  %7369 = vmatprep.subr.bf16.mxu0 %v15055_v56  ;;  %v9811_v24 = vsub.f32 %v1366_v8, %v2991_v20  ;;  %v2995_v27 = vand.u32 4294901760, %v1368_v46  ;;  %v15064_v8 = vld [vmem:[#allocation16_spill] sm:$0xff]  ;;  %v9837_v4 = vsub.f32 %v1369_v37, %v2993_v26  ;;  %v9858_v37 = vld [vmem:[#allocation7 + $0x80] sm:$0xff] }
  0xae   :  { %15056 = vst [vmem:[#allocation15_spill] sm:$0xff] %v9802_v18  ;;  %15057 = vst [vmem:[#allocation80_spill] sm:$0xff] %v9804_v15  ;;  %v9829_v20 = vsub.f32 %v9784_v19, %v14112_v42  ;;  %v9831_v15 = vpack.c.bf16 %v2997_v35, %v2993_v26  ;;  %v1375_v18 = vld [vmem:[#allocation7 + $0x2b8] sm:$0xff]  ;;  %v9839_v49 = vsub.f32 %v1371_v53, %v2997_v35  ;;  %v9860_v35 = vld [vmem:[#allocation7 + $0x90] sm:$0xff] }
  0xaf   :  { %15058 = vst [vmem:[#allocation81_spill] sm:$0xff] %v9806_v28  ;;  %15059 = vst [vmem:[#allocation82_spill] sm:$0xff] %v9809_v2  ;;  %652 = vmatmul.mubr.f32.vlgmr.msra.gmra.mrb[0].mxu0 %v15061_v47  ;;  %v9822_v28 = vld [vmem:[#allocation7 + $0x88] sm:$0xff]  ;;  %v9844_v42 = vsub.f32 %v9795_v3, %v15071_v48  ;;  %v9852_v54 = vpack.c.bf16 %v2999_v12, %v2995_v27  ;;  %v9854_v26 = vsub.f32 %v1368_v46, %v2995_v27 }
  0xb0   :  { %15060 = vst [vmem:[#allocation83_spill] sm:$0xff] %v9811_v24  ;;  %15062 = vst [vmem:[#allocation29_spill] sm:$0xff] %v9819_v32  ;;  %7371 = vmatpush1.bf16.msra.mxu0 %v15064_v8  ;;  %657 = vmatprep.mubr.f32.mxu0 %v14973_v11  ;;  %v14122_v24 = vand.u32 4294901760, %v9809_v2  ;;  %v9834_v32 = vld [vmem:[#allocation7 + $0x98] sm:$0xff]  ;;  %v9856_v53 = vsub.f32 %v1370_v31, %v2999_v12  ;;  %v15079_v48 = vld [vmem:[#allocation32_spill] sm:$0xff]  ;;  %v3007_v46 = vand.u32 4294901760, %v1374_v43 }
  0xb1   :  { %15063 = vst [vmem:[#allocation84_spill] sm:$0xff] %v9822_v28  ;;  %15065 = vst [vmem:[#allocation16_spill] sm:$0xff] %v9829_v20  ;;  %7373 = vmatprep.subr.bf16.mxu0 %v15068_v29  ;;  %v1372_v20 = vld [vmem:[#allocation7 + $0x2a0] sm:$0xff]  ;;  %7865 = vmatprep.subr.bf16.mxu1 %v9831_v15 }
  0xb2   :  { %15066 = vst [vmem:[#allocation85_spill] sm:$0xff] %v9831_v15  ;;  %15067 = vst [vmem:[#allocation86_spill] sm:$0xff] %v9834_v32  ;;  %v9850_v41 = vsub.f32 %v9809_v2, %v14122_v24  ;;  %v14136_v15 = vand.u32 4294901760, %v9834_v32  ;;  %v9865_v24 = vld [vmem:[#allocation7 + $0xa8] sm:$0xff]  ;;  %v3003_v27 = vand.u32 4294901760, %v1372_v20  ;;  %v15082_v12 = vld [vmem:[#allocation19_spill] sm:$0xff]  ;;  %7867 = vmatpush1.bf16.msra.mxu1 %v9852_v54 }
  0xb3   :  { %15069 = vst [vmem:[#allocation17_spill] sm:$0xff] %v9837_v4  ;;  %15070 = vst [vmem:[#allocation87_spill] sm:$0xff] %v9839_v49  ;;  %660 = vmatmul.mubr.f32.gmra.mrb[2].mxu0 %v15079_v48  ;;  %v3001_v49 = vand.u32 4294901760, %v1373_v62  ;;  %v3005_v4 = vand.u32 4294901760, %v1375_v18 }
  0xb4   :  { %15072 = vst [vmem:[#allocation88_spill] sm:$0xff] %v9844_v42  ;;  %15073 = vst [vmem:[#allocation89_spill] sm:$0xff] %v9850_v41  ;;  %v14133_v42 = vand.u32 4294901760, %v9822_v28  ;;  %v15081_v41 = vld [vmem:[#allocation18_spill] sm:$0xff]  ;;  %665 = vmatprep.mubr.f32.mxu0 %v14973_v11 }
  0xb5   :  { %15074 = vst [vmem:[#allocation90_spill] sm:$0xff] %v9852_v54  ;;  %15075 = vst [vmem:[#allocation91_spill] sm:$0xff] %v9854_v26  ;;  %7375 = vmatpush1.bf16.msra.mxu0 %v15081_v41  ;;  %v14141_v26 = vand.u32 4294901760, %v9858_v37  ;;  %v9885_v22 = vpack.c.bf16 %v3005_v4, %v3001_v49  ;;  %v9887_v54 = vsub.f32 %v1373_v62, %v3001_v49  ;;  %v9909_v62 = vld [vmem:[#allocation7 + $0xb0] sm:$0xff] }
  0xb6   :  { %15076 = vst [vmem:[#allocation92_spill] sm:$0xff] %v9856_v53  ;;  %15077 = vst [vmem:[#allocation93_spill] sm:$0xff] %v9858_v37  ;;  %7377 = vmatprep.subr.bf16.mxu0 %v15082_v12  ;;  %v9874_v31 = vsub.f32 %v9822_v28, %v14133_v42  ;;  %v9879_v53 = vsub.f32 %v9834_v32, %v14136_v15  ;;  %v9889_v2 = vsub.f32 %v1375_v18, %v3005_v4  ;;  %v9892_v28 = vld [vmem:[#allocation7 + $0xa0] sm:$0xff]  ;;  %v1378_v42 = vld [vmem:[#allocation7 + $0x2d0] sm:$0xff] }
  0xb7   :  { %15078 = vst [vmem:[#allocation94_spill] sm:$0xff] %v9860_v35  ;;  %15080 = vst [vmem:[#allocation32_spill] sm:$0xff] %v9865_v24  ;;  %v1376_v15 = vld [vmem:[#allocation7 + $0x2c0] sm:$0xff]  ;;  %v9898_v33 = vsub.f32 %v9858_v37, %v14141_v26  ;;  %v15092_v32 = vand.u32 4294901760, %v9860_v35  ;;  %v9905_v4 = vpack.c.bf16 %v3007_v46, %v3003_v27  ;;  %v9907_v18 = vsub.f32 %v1372_v20, %v3003_v27  ;;  %v9924_v37 = vld [vmem:[#allocation7 + $0xc8] sm:$0xff] }
  0xb8   :  { %15083 = vst [vmem:[#allocation18_spill] sm:$0xff] %v9874_v31  ;;  %15084 = vst [vmem:[#allocation19_spill] sm:$0xff] %v9879_v53  ;;  %v1379_v31 = vld [vmem:[#allocation7 + $0x2d8] sm:$0xff]  ;;  %v15090_v53 = vld [vmem:[#allocation33_spill] sm:$0xff]  ;;  %v14155_v26 = vand.u32 4294901760, %v9883_v14  ;;  %7869 = vmatprep.subr.bf16.mxu1 %v9885_v22 }
  0xb9   :  { %15086 = vst [vmem:[#allocation96_spill] sm:$0xff] %v9885_v22  ;;  %15087 = vst [vmem:[#allocation97_spill] sm:$0xff] %v9887_v54  ;;  %668 = vmatmul.mubr.f32.gmra.mrb[4].mxu0 %v15090_v53  ;;  %v9903_v49 = vsub.f32 %v9860_v35, %v15092_v32  ;;  %v9913_v54 = vsub.f32 %v1374_v43, %v3007_v46  ;;  %v15101_v35 = vld [vmem:[#allocation21_spill] sm:$0xff]  ;;  %v3013_v20 = vand.u32 4294901760, %v1379_v31  ;;  %7871 = vmatpush1.bf16.msra.mxu1 %v9905_v4  ;;  %v1381_v22 = vld [vmem:[#allocation7 + $0x2e8] sm:$0xff] }
  0xba   :  { %15088 = vst [vmem:[#allocation98_spill] sm:$0xff] %v9889_v2  ;;  %15089 = vst [vmem:[#allocation99_spill] sm:$0xff] %v9892_v28  ;;  %v15097_v2 = vld [vmem:[#allocation20_spill] sm:$0xff]  ;;  %673 = vmatprep.mubr.f32.mxu0 %v14973_v11  ;;  %v9930_v43 = vsub.f32 %v9883_v14, %v14155_v26  ;;  %v15112_v46 = vld [vmem:[#allocation22_spill] sm:$0xff]  ;;  %v3017_v19 = vand.u32 4294901760, %v1381_v22 }
  0xbb   :  { %15091 = vst [vmem:[#allocation33_spill] sm:$0xff] %v9898_v33  ;;  %15093 = vst [vmem:[#allocation100_spill] sm:$0xff] %v9903_v49  ;;  %7379 = vmatpush1.bf16.msra.mxu0 %v15097_v2  ;;  %v15099_v33 = vand.u32 4294901760, %v9865_v24  ;;  %v3009_v49 = vand.u32 4294901760, %v1377_v45  ;;  %v9940_v3 = vsub.f32 %v1379_v31, %v3013_v20 }
  0xbc   :  { %15094 = vst [vmem:[#allocation101_spill] sm:$0xff] %v9905_v4  ;;  %15095 = vst [vmem:[#allocation102_spill] sm:$0xff] %v9907_v18  ;;  %7381 = vmatprep.subr.bf16.mxu0 %v15101_v35  ;;  %v3011_v18 = vand.u32 4294901760, %v1376_v15  ;;  %v15108_v4 = vand.u32 4294901760, %v9892_v28 }
  0xbd   :  { %15096 = vst [vmem:[#allocation103_spill] sm:$0xff] %v9909_v62  ;;  %15098 = vst [vmem:[#allocation20_spill] sm:$0xff] %v9913_v54  ;;  %v9919_v32 = vsub.f32 %v9865_v24, %v15099_v33  ;;  %v9932_v33 = vsub.f32 %v1377_v45, %v3009_v49  ;;  %v9935_v54 = vld [vmem:[#allocation7 + $0xd8] sm:$0xff]  ;;  %676 = vmatmul.mubr.f32.gmra.mrb[6].mxu0 %v9511_v7  ;;  %v9938_v27 = vpack.c.bf16 %v3013_v20, %v3009_v49  ;;  %v9947_v45 = vld [vmem:[#allocation7 + $0xc0] sm:$0xff] }
  0xbe   :  { %15102 = vst [vmem:[#allocation21_spill] sm:$0xff] %v9924_v37  ;;  %15103 = vst [vmem:[#allocation105_spill] sm:$0xff] %v9930_v43  ;;  %v1383_v24 = vld [vmem:[#allocation7 + $0x2f8] sm:$0xff]  ;;  %v9945_v26 = vsub.f32 %v9892_v28, %v15108_v4  ;;  %778 = vmatprep.mubr.f32.mxu0 %v14973_v11  ;;  %v15113_v43 = vand.u32 4294901760, %v9909_v62  ;;  %v9960_v20 = vsub.f32 %v1376_v15, %v3011_v18  ;;  %v14170_v4 = vand.u32 4294901760, %v9924_v37 }
  0xbf   :  { %15100 = vst [vmem:[#allocation104_spill] sm:$0xff] %v9919_v32  ;;  %15104 = vst [vmem:[#allocation106_spill] sm:$0xff] %v9932_v33  ;;  %v3015_v32 = vand.u32 4294901760, %v1378_v42  ;;  %v9949_v33 = vld [vmem:[#allocation7 + $0xd0] sm:$0xff]  ;;  %7383 = vmatpush1.bf16.msra.mxu0 %v15112_v46  ;;  %7873 = vmatprep.subr.bf16.mxu1 %v9938_v27  ;;  %v14176_v14 = vand.u32 4294901760, %v9935_v54  ;;  %v3021_v61 = vand.u32 4294901760, %v1383_v24 }
  0xc0   :  { %15105 = vst [vmem:[#allocation107_spill] sm:$0xff] %v9935_v54  ;;  %15106 = vst [vmem:[#allocation108_spill] sm:$0xff] %v9938_v27  ;;  %v9956_v49 = vsub.f32 %v9909_v62, %v15113_v43  ;;  %v9972_v15 = vsub.f32 %v9924_v37, %v14170_v4  ;;  %v9987_v27 = vsub.f32 %v1381_v22, %v3017_v19  ;;  %v15126_v43 = vld [vmem:[#allocation24_spill] sm:$0xff]  ;;  %v15128_v62 = vand.u32 4294901760, %v9947_v45  ;;  %v10004_v22 = vld [vmem:[#allocation7 + $0xf0] sm:$0xff] }
  0xc1   :  { %15107 = vst [vmem:[#allocation109_spill] sm:$0xff] %v9940_v3  ;;  %15109 = vst [vmem:[#allocation110_spill] sm:$0xff] %v9945_v26  ;;  %v9958_v31 = vpack.c.bf16 %v3015_v32, %v3011_v18  ;;  %v1380_v26 = vld [vmem:[#allocation7 + $0x2e0] sm:$0xff]  ;;  %v9965_v28 = vsub.f32 %v1378_v42, %v3015_v32  ;;  %v9978_v42 = vld [vmem:[#allocation7 + $0xf8] sm:$0xff]  ;;  %v9983_v32 = vsub.f32 %v9935_v54, %v14176_v14  ;;  %v15130_v14 = vand.u32 4294901760, %v9949_v33 }
  0xc2   :  { %15110 = vst [vmem:[#allocation111_spill] sm:$0xff] %v9947_v45  ;;  %15111 = vst [vmem:[#allocation112_spill] sm:$0xff] %v9949_v33  ;;  %v15117_v3 = vld [vmem:[#allocation23_spill] sm:$0xff]  ;;  %v3019_v4 = vand.u32 4294901760, %v1380_v26  ;;  %v9992_v37 = vsub.f32 %v1383_v24, %v3021_v61  ;;  %v9997_v59 = vsub.f32 %v9947_v45, %v15128_v62  ;;  %v1389_v24 = vld [vmem:[#allocation7 + $0x328] sm:$0xff] }
  0xc3   :  { %15114 = vst [vmem:[#allocation22_spill] sm:$0xff] %v9956_v49  ;;  %15115 = vst [vmem:[#allocation113_spill] sm:$0xff] %v9958_v31  ;;  %7385 = vmatprep.subr.bf16.mxu0 %v15117_v3  ;;  %7875 = vmatpush1.bf16.msra.mxu1 %v9958_v31  ;;  %v9976_v49 = vld [vmem:[#allocation7 + $0xe8] sm:$0xff]  ;;  %v9985_v31 = vpack.c.bf16 %v3021_v61, %v3017_v19  ;;  %v9989_v18 = vld [vmem:[#allocation7 + $0xe0] sm:$0xff] }
  0xc4   :  { %15116 = vst [vmem:[#allocation114_spill] sm:$0xff] %v9960_v20  ;;  %15118 = vst [vmem:[#allocation23_spill] sm:$0xff] %v9965_v28  ;;  %v1382_v20 = vld [vmem:[#allocation7 + $0x2f0] sm:$0xff]  ;;  %v1387_v28 = vld [vmem:[#allocation7 + $0x318] sm:$0xff]  ;;  %7387 = vmatpush1.bf16.msra.mxu0 %v15126_v43  ;;  %v10008_v54 = vsub.f32 %v1380_v26, %v3019_v4  ;;  %v14190_v61 = vand.u32 4294901760, %v9976_v49  ;;  %v15148_v23 = vand.u32 4294901760, %v9989_v18 }
  0xc5   :  { %15119 = vst [vmem:[#allocation115_spill] sm:$0xff] %v9972_v15  ;;  %15120 = vst [vmem:[#allocation116_spill] sm:$0xff] %v9976_v49  ;;  %v1385_v15 = vld [vmem:[#allocation7 + $0x308] sm:$0xff]  ;;  %v15133_v19 = vld [vmem:[#allocation25_spill] sm:$0xff]  ;;  %7877 = vmatprep.subr.bf16.mxu1 %v9985_v31 }
  0xc6   :  { %15121 = vst [vmem:[#allocation117_spill] sm:$0xff] %v9978_v42  ;;  %15122 = vst [vmem:[#allocation118_spill] sm:$0xff] %v9983_v32  ;;  %v10002_v32 = vsub.f32 %v9949_v33, %v15130_v14  ;;  %7389 = vmatprep.subr.bf16.mxu0 %v15133_v19  ;;  %v3025_v62 = vand.u32 4294901760, %v1385_v15  ;;  %v1384_v45 = vld [vmem:[#allocation7 + $0x300] sm:$0xff]  ;;  %v10023_v33 = vld [vmem:[#allocation7 + $0x108] sm:$0xff] }
  0xc7   :  { %15123 = vst [vmem:[#allocation119_spill] sm:$0xff] %v9985_v31  ;;  %15124 = vst [vmem:[#allocation120_spill] sm:$0xff] %v9987_v27  ;;  %v3023_v27 = vand.u32 4294901760, %v1382_v20  ;;  %v10020_v31 = vsub.f32 %v9976_v49, %v14190_v61  ;;  %v10037_v61 = vld [vmem:[#allocation7 + $0x118] sm:$0xff]  ;;  %v15147_v49 = vld [vmem:[#allocation27_spill] sm:$0xff] }
  0xc8   :  { %15125 = vst [vmem:[#allocation121_spill] sm:$0xff] %v9989_v18  ;;  %15127 = vst [vmem:[#allocation24_spill] sm:$0xff] %v9992_v37  ;;  %7391 = vmatpush1.bf16.msra.mxu0 %v15139_v38  ;;  %v15140_v37 = vand.u32 4294901760, %v9978_v42  ;;  %v1391_v26 = vld [vmem:[#allocation7 + $0x338] sm:$0xff] }
  0xc9   :  { %15129 = vst [vmem:[#allocation122_spill] sm:$0xff] %v9997_v59  ;;  %15131 = vst [vmem:[#allocation123_spill] sm:$0xff] %v10002_v32  ;;  %v3029_v59 = vand.u32 4294901760, %v1387_v28  ;;  %v10013_v14 = vpack.c.bf16 %v3023_v27, %v3019_v4  ;;  %v10015_v32 = vsub.f32 %v1382_v20, %v3023_v27  ;;  %v10033_v20 = vsub.f32 %v1385_v15, %v3025_v62 }
  0xca   :  { %15132 = vst [vmem:[#allocation124_spill] sm:$0xff] %v10004_v22  ;;  %15134 = vst [vmem:[#allocation25_spill] sm:$0xff] %v10008_v54  ;;  %v1386_v54 = vld [vmem:[#allocation7 + $0x310] sm:$0xff]  ;;  %v10029_v4 = vsub.f32 %v9978_v42, %v15140_v37  ;;  %7393 = vmatprep.subr.bf16.mxu0 %v15147_v49  ;;  %v10046_v37 = vsub.f32 %v9989_v18, %v15148_v23  ;;  %v3037_v23 = vand.u32 4294901760, %v1391_v26  ;;  %v1388_v18 = vld [vmem:[#allocation7 + $0x320] sm:$0xff] }
  0xcb   :  { %15135 = vst [vmem:[#allocation125_spill] sm:$0xff] %v10013_v14  ;;  %15136 = vst [vmem:[#allocation126_spill] sm:$0xff] %v10015_v32  ;;  %v10031_v27 = vpack.c.bf16 %v3029_v59, %v3025_v62  ;;  %v10035_v32 = vsub.f32 %v1387_v28, %v3029_v59  ;;  %7879 = vmatpush1.bf16.msra.mxu1 %v10013_v14  ;;  %v3027_v59 = vand.u32 4294901760, %v1384_v45  ;;  %v10053_v28 = vld [vmem:[#allocation7 + $0x110] sm:$0xff]  ;;  %v3031_v62 = vand.u32 4294901760, %v1386_v54  ;;  %v1393_v42 = vld [vmem:[#allocation7 + $0x348] sm:$0xff] }
  0xcc   :  { %15137 = vst [vmem:[#allocation127_spill] sm:$0xff] %v10020_v31  ;;  %15138 = vst [vmem:[#allocation128_spill] sm:$0xff] %v10023_v33  ;;  %v10039_v31 = vld [vmem:[#allocation7 + $0x100] sm:$0xff]  ;;  %7395 = vmatpush1.bf16.msra.mxu0 %v15154_v44 }
  0xcd   :  { %15141 = vst [vmem:[#allocation26_spill] sm:$0xff] %v10029_v4  ;;  %15142 = vst [vmem:[#allocation129_spill] sm:$0xff] %v10031_v27  ;;  %v15150_v4 = vand.u32 4294901760, %v10004_v22  ;;  %7881 = vmatprep.subr.bf16.mxu1 %v10031_v27  ;;  %v10057_v14 = vsub.f32 %v1384_v45, %v3027_v59  ;;  %7397 = vmatprep.subr.bf16.mxu0 %v15158_v30  ;;  %v1395_v45 = vld [vmem:[#allocation7 + $0x358] sm:$0xff] }
  0xce   :  { %15143 = vst [vmem:[#allocation130_spill] sm:$0xff] %v10033_v20  ;;  %15144 = vst [vmem:[#allocation131_spill] sm:$0xff] %v10035_v32  ;;  %v14210_v32 = vand.u32 4294901760, %v10023_v33  ;;  %v3033_v20 = vand.u32 4294901760, %v1389_v24 }
  0xcf   :  { %15145 = vst [vmem:[#allocation132_spill] sm:$0xff] %v10037_v61  ;;  %15146 = vst [vmem:[#allocation133_spill] sm:$0xff] %v10039_v31  ;;  %v10051_v15 = vsub.f32 %v10004_v22, %v15150_v4  ;;  %v10062_v4 = vpack.c.bf16 %v3031_v62, %v3027_v59  ;;  %v10072_v22 = vld [vmem:[#allocation7 + $0x128] sm:$0xff] }
  0xd0   :  { %15149 = vst [vmem:[#allocation27_spill] sm:$0xff] %v10046_v37  ;;  %15152 = vst [vmem:[#allocation135_spill] sm:$0xff] %v10053_v28  ;;  %v10069_v27 = vsub.f32 %v10023_v33, %v14210_v32  ;;  %v15159_v37 = vand.u32 4294901760, %v10037_v61  ;;  %v10086_v32 = vld [vmem:[#allocation7 + $0x138] sm:$0xff]  ;;  %v15164_v33 = vand.u32 4294901760, %v10039_v31 }
  0xd1   :  { %15151 = vst [vmem:[#allocation134_spill] sm:$0xff] %v10051_v15  ;;  %15153 = vst [vmem:[#allocation136_spill] sm:$0xff] %v10057_v14  ;;  %v10064_v15 = vsub.f32 %v1386_v54, %v3031_v62  ;;  %v1390_v14 = vld [vmem:[#allocation7 + $0x330] sm:$0xff]  ;;  %v10080_v54 = vpack.c.bf16 %v3037_v23, %v3033_v20  ;;  %v10082_v62 = vsub.f32 %v1389_v24, %v3033_v20  ;;  %7883 = vmatpush1.bf16.msra.mxu1 %v10062_v4 }
  0xd2   :  { %15155 = vst [vmem:[#allocation28_spill] sm:$0xff] %v10062_v4  ;;  %15157 = vst [vmem:[#allocation138_spill] sm:$0xff] %v10069_v27  ;;  %v10078_v59 = vsub.f32 %v10037_v61, %v15159_v37  ;;  %v10088_v27 = vld [vmem:[#allocation7 + $0x120] sm:$0xff]  ;;  %v10094_v60 = vsub.f32 %v10039_v31, %v15164_v33  ;;  %v15166_v37 = vand.u32 4294901760, %v10053_v28  ;;  %v3035_v24 = vand.u32 4294901760, %v1388_v18  ;;  %v10121_v61 = vld [vmem:[#allocation7 + $0x148] sm:$0xff] }
  0xd3   :  { %15156 = vst [vmem:[#allocation137_spill] sm:$0xff] %v10064_v15  ;;  %15161 = vst [vmem:[#allocation139_spill] sm:$0xff] %v10080_v54  ;;  %v10084_v15 = vsub.f32 %v1391_v26, %v3037_v23  ;;  %v10101_v26 = vld [vmem:[#allocation7 + $0x130] sm:$0xff]  ;;  %7885 = vmatprep.subr.bf16.mxu1 %v10080_v54  ;;  %v3039_v20 = vand.u32 4294901760, %v1390_v14  ;;  %v14228_v23 = vand.u32 4294901760, %v10072_v22  ;;  %v15168_v4 = vld [vmem:[#allocation31_spill] sm:$0xff] }
  0xd4   :  { %15160 = vst [vmem:[#allocation30_spill] sm:$0xff] %v10078_v59  ;;  %15162 = vst [vmem:[#allocation140_spill] sm:$0xff] %v10082_v62  ;;  %v10099_v59 = vsub.f32 %v10053_v28, %v15166_v37  ;;  %7399 = vmatpush1.bf16.msra.mxu0 %v15168_v4  ;;  %v10106_v62 = vsub.f32 %v1388_v18, %v3035_v24  ;;  %v1392_v37 = vld [vmem:[#allocation7 + $0x340] sm:$0xff]  ;;  %v1397_v33 = vld [vmem:[#allocation7 + $0x368] sm:$0xff]  ;;  %v15173_v31 = vand.u32 4294901760, %v10086_v32  ;;  %v15178_v18 = vand.u32 4294901760, %v15061_v47 }
  0xd5   :  { %15163 = vst [vmem:[#allocation141_spill] sm:$0xff] %v10084_v15  ;;  %15165 = vst [vmem:[#allocation142_spill] sm:$0xff] %v10094_v60  ;;  %v3041_v15 = vand.u32 4294901760, %v1393_v42  ;;  %v3045_v60 = vand.u32 4294901760, %v1395_v45  ;;  %7401 = vmatprep.subr.bf16.mxu0 %v9525_v63  ;;  %v10113_v28 = vsub.f32 %v1390_v14, %v3039_v20  ;;  %v10118_v54 = vsub.f32 %v10072_v22, %v14228_v23  ;;  %v1399_v23 = vld [vmem:[#allocation7 + $0x378] sm:$0xff] }
  0xd6   :  { %15167 = vst [vmem:[#allocation143_spill] sm:$0xff] %v10099_v59  ;;  %15169 = vst [vmem:[#allocation31_spill] sm:$0xff] %v10106_v62  ;;  %v10111_v59 = vpack.c.bf16 %v3039_v20, %v3035_v24  ;;  %v1394_v62 = vld [vmem:[#allocation7 + $0x350] sm:$0xff]  ;;  %v10126_v36 = vsub.f32 %v10086_v32, %v15173_v31  ;;  %v10134_v20 = vld [vmem:[#allocation7 + $0x158] sm:$0xff] }
  0xd7   :  { %15171 = vst [vmem:[#allocation145_spill] sm:$0xff] %v10113_v28  ;;  %15172 = vst [vmem:[#allocation146_spill] sm:$0xff] %v10118_v54  ;;  %v10128_v63 = vpack.c.bf16 %v3045_v60, %v3041_v15  ;;  %v10130_v14 = vsub.f32 %v1393_v42, %v3041_v15  ;;  %v10132_v24 = vsub.f32 %v1395_v45, %v3045_v60  ;;  %v10136_v54 = vld [vmem:[#allocation7 + $0x140] sm:$0xff]  ;;  %782 = vmatmul.mubr.f32.vlgmr.msra.gmra.mrb[0].mxu0 %v15178_v18  ;;  %v10151_v45 = vld [vmem:[#allocation7 + $0x150] sm:$0xff] }
  0xd8   :  { %15170 = vst [vmem:[#allocation144_spill] sm:$0xff] %v10111_v59  ;;  %15174 = vst [vmem:[#allocation147_spill] sm:$0xff] %v10126_v36  ;;  %7887 = vmatpush1.bf16.msra.mxu1 %v10111_v59  ;;  %v15179_v28 = vand.u32 4294901760, %v10088_v27  ;;  %v15181_v42 = vand.u32 4294901760, %v10101_v26  ;;  %v3043_v15 = vand.u32 4294901760, %v1392_v37  ;;  %7403 = vmatpush1.bf16.msra.mxu0 %v9531_v1  ;;  %v3047_v47 = vand.u32 4294901760, %v1394_v62 }
  0xd9   :  { %15175 = vst [vmem:[#allocation148_spill] sm:$0xff] %v10128_v63  ;;  %15176 = vst [vmem:[#allocation149_spill] sm:$0xff] %v10130_v14  ;;  %787 = vmatprep.mubr.f32.mxu0 %v14973_v11  ;;  %v14240_v18 = vand.u32 4294901760, %v10121_v61  ;;  %v3049_v59 = vand.u32 4294901760, %v1397_v33  ;;  %7405 = vmatprep.subr.bf16.mxu0 %v9537_v16  ;;  %v1577_v16 = vand.u32 4294901760, %v10151_v45 }
  0xda   :  { %15177 = vst [vmem:[#allocation150_spill] sm:$0xff] %v10132_v24  ;;  %v10144_v31 = vsub.f32 %v10088_v27, %v15179_v28  ;;  %v10149_v60 = vsub.f32 %v10101_v26, %v15181_v42  ;;  %7889 = vmatprep.subr.bf16.mxu1 %v10128_v63  ;;  %v10158_v28 = vsub.f32 %v1392_v37, %v3043_v15  ;;  %v14241_v42 = vand.u32 4294901760, %v10134_v20  ;;  %v1396_v24 = vld [vmem:[#allocation7 + $0x360] sm:$0xff]  ;;  %v1398_v63 = vld [vmem:[#allocation7 + $0x370] sm:$0xff] }
  0xdb   :  { %v10162_v14 = vpack.c.bf16 %v3047_v47, %v3043_v15  ;;  %v10164_v1 = vsub.f32 %v1394_v62, %v3047_v47  ;;  %v10169_v36 = vsub.f32 %v10121_v61, %v14240_v18  ;;  %v15187_v37 = vand.u32 4294901760, %v15079_v48 }
  0xdc   :  { %15180 = vst [vmem:[#allocation151_spill] sm:$0xff] %v10144_v31  ;;  %15182 = vst [vmem:[#allocation152_spill] sm:$0xff] %v10149_v60  ;;  %v3053_v60 = vand.u32 4294901760, %v1399_v23  ;;  %v10177_v31 = vsub.f32 %v10134_v20, %v14241_v42  ;;  %v10181_v62 = vsub.f32 %v1397_v33, %v3049_v59  ;;  %7407 = vmatpush1.bf16.msra.mxu0 %v9543_v17  ;;  %v15192_v18 = vand.u32 4294901760, %v10136_v54 }
  0xdd   :  { %15183 = vst [vmem:[#allocation153_spill] sm:$0xff] %v10158_v28  ;;  %15184 = vst [vmem:[#allocation154_spill] sm:$0xff] %v10162_v14  ;;  %791 = vmatmul.mubr.f32.gmra.mrb[2].mxu0 %v15187_v37  ;;  %v10195_v37 = vsub.f32 %v10151_v45, %v1577_v16  ;;  %v3051_v42 = vand.u32 4294901760, %v1396_v24  ;;  %7409 = vmatprep.subr.bf16.mxu0 %v9549_v9  ;;  %v15199_v9 = vand.u32 4294901760, %v9511_v7  ;;  %v15205_v7 = vand.u32 4294901760, %v9644_v13  ;;  %v10420_v45 = vld [vmem:[#allocation7 + $0x160] sm:$0xff] }
  0xde   :  { %15185 = vst [vmem:[#allocation155_spill] sm:$0xff] %v10164_v1  ;;  %15186 = vst [vmem:[#allocation156_spill] sm:$0xff] %v10169_v36  ;;  %v10179_v15 = vpack.c.bf16 %v3053_v60, %v3049_v59  ;;  %v10183_v47 = vsub.f32 %v1399_v23, %v3053_v60  ;;  %796 = vmatprep.mubr.f32.mxu0 %v14973_v11  ;;  %v10190_v48 = vsub.f32 %v10136_v54, %v15192_v18  ;;  %v15202_v18 = vld [vmem:[#allocation36_spill] sm:$0xff] }
  0xdf   :  { %15188 = vst [vmem:[#allocation157_spill] sm:$0xff] %v10177_v31  ;;  %15190 = vst [vmem:[#allocation159_spill] sm:$0xff] %v10181_v62  ;;  %7891 = vmatpush1.bf16.msra.mxu1 %v10162_v14  ;;  %v3055_v59 = vand.u32 4294901760, %v1398_v63  ;;  %v10200_v17 = vsub.f32 %v1396_v24, %v3051_v42  ;;  %v15196_v23 = vand.u32 4294901760, %v15090_v53  ;;  %v15200_v24 = vld [vmem:[#allocation34_spill] sm:$0xff]  ;;  %v15201_v53 = vld [vmem:[#allocation35_spill] sm:$0xff] }
  0xe0   :  { %15189 = vst [vmem:[#allocation158_spill] sm:$0xff] %v10179_v15  ;;  %15191 = vst [vmem:[#allocation160_spill] sm:$0xff] %v10183_v47  ;;  %7893 = vmatprep.subr.bf16.mxu1 %v10179_v15  ;;  %7411 = vmatpush1.bf16.msra.mxu0 %v9556_v21 }
  0xe1   :  { %15193 = vst [vmem:[#allocation161_spill] sm:$0xff] %v10190_v48  ;;  %15194 = vst [vmem:[#allocation162_spill] sm:$0xff] %v10195_v37  ;;  %800 = vmatmul.mubr.f32.gmra.mrb[4].mxu0 %v15196_v23  ;;  %v10204_v33 = vpack.c.bf16 %v3055_v59, %v3051_v42  ;;  %v10206_v60 = vsub.f32 %v1398_v63, %v3055_v59  ;;  %7413 = vmatprep.subr.bf16.mxu0 %v9562_v40  ;;  %v15203_v63 = vld [vmem:[#allocation37_spill] sm:$0xff]  ;;  %v15207_v40 = vand.u32 4294901760, %v9650_v34  ;;  %v15216_v34 = vld [vmem:[#allocation55_spill] sm:$0xff] }
  0xe2   :  { %15195 = vst [vmem:[#allocation163_spill] sm:$0xff] %v10200_v17  ;;  %805 = vmatprep.mubr.f32.mxu0 %v14973_v11  ;;  %v15236_v59 = vld [vmem:[#allocation82_spill] sm:$0xff]  ;;  %v15438_v37 = vld [vmem:[#allocation88_spill] sm:$0xff]  ;;  %v15439_v48 = vld [vmem:[#allocation89_spill] sm:$0xff] }
  0xe3   :  { %15197 = vst [vmem:[#allocation164_spill] sm:$0xff] %v10204_v33  ;;  %15198 = vst [vmem:[#allocation165_spill] sm:$0xff] %v10206_v60  ;;  %7895 = vmatpush1.bf16.msra.mxu1 %v10204_v33  ;;  %v15237_v23 = vand.u32 4294901760, %v15236_v59  ;;  %v15271_v59 = vld [vmem:[#allocation117_spill] sm:$0xff] }
  0xe4   :  { %7415 = vmatpush1.bf16.msra.mxu0 %v15200_v24  ;;  %v15239_v24 = vld [vmem:[#allocation84_spill] sm:$0xff] }
  0xe5   :  { %809 = vmatmul.mubr.f32.gmra.mrb[6].mxu0 %v15199_v9  ;;  %7417 = vmatprep.subr.bf16.mxu0 %v15201_v53  ;;  %v15240_v53 = vand.u32 4294901760, %v15239_v24 }
  0xe6   :  { %975 = vmatprep.mubr.f32.mxu0 %v14973_v11 }
  0xe8   :  { %7419 = vmatpush1.bf16.msra.mxu0 %v15202_v18  ;;  %v15241_v18 = vld [vmem:[#allocation86_spill] sm:$0xff] }
  0xe9   :  { %7421 = vmatprep.subr.bf16.mxu0 %v15203_v63  ;;  %v15242_v63 = vand.u32 4294901760, %v15241_v18 }
  0xec   :  { %7423 = vmatpush1.bf16.msra.mxu0 %v9592_v52  ;;  %v15208_v52 = vand.u32 4294901760, %v9660_v39  ;;  %v15217_v39 = vand.u32 4294901760, %v15216_v34  ;;  %v15254_v34 = vld [vmem:[#allocation99_spill] sm:$0xff] }
  0xed   :  { %7425 = vmatprep.subr.bf16.mxu0 %v9598_v0 }
  0xee   :  { %v10258_v0 = vpack.c.bf16 %v15208_v52, %v15207_v40 }
  0xf0   :  { %7427 = vmatpush1.bf16.msra.mxu0 %v9604_v10  ;;  %15209 = vst [vmem:[#allocation35_spill] sm:$0xff] %v10258_v0  ;;  %v15210_v10 = vand.u32 4294901760, %v9673_v58 }
  0xf1   :  { %7429 = vmatprep.subr.bf16.mxu0 %v9608_v5  ;;  %v15204_v5 = vand.u32 4294901760, %v9642_v6  ;;  %v15214_v6 = vld [vmem:[#allocation51_spill] sm:$0xff] }
  0xf2   :  { %v15215_v13 = vand.u32 4294901760, %v15214_v6 }
  0xf3   :  { %v10251_v21 = vpack.c.bf16 %v15205_v7, %v15204_v5  ;;  %v10313_v5 = vpack.c.bf16 %v15242_v63, %v15240_v53  ;;  %v15246_v7 = vld [vmem:[#allocation94_spill] sm:$0xff]  ;;  %v15274_v53 = vld [vmem:[#allocation121_spill] sm:$0xff]  ;;  %v15276_v63 = vld [vmem:[#allocation124_spill] sm:$0xff] }
  0xf4   :  { %7431 = vmatpush1.bf16.msra.mxu0 %v9610_v50  ;;  %v15211_v50 = vld [vmem:[#allocation46_spill] sm:$0xff]  ;;  %v15247_v40 = vand.u32 4294901760, %v15246_v7  ;;  %v15275_v18 = vand.u32 4294901760, %v15274_v53  ;;  %v15279_v7 = vld [vmem:[#allocation128_spill] sm:$0xff]  ;;  %v1581_v53 = vand.u32 4294901760, %v10420_v45 }
  0xf5   :  { %7433 = vmatprep.subr.bf16.mxu0 %v15055_v56  ;;  %15206 = vst [vmem:[#allocation34_spill] sm:$0xff] %v10251_v21  ;;  %v15219_v56 = vld [vmem:[#allocation58_spill] sm:$0xff] }
  0xf6   :  { %v15220_v58 = vand.u32 4294901760, %v15219_v56 }
  0xf7   :  { %977 = vmatmul.mubr.f32.vlgmr.msra.gmra.mrb[0].mxu0 %v9331_v57 }
  0xf8   :  { %7435 = vmatpush1.bf16.msra.mxu0 %v15064_v8  ;;  %982 = vmatprep.mubr.f32.mxu0 %v14973_v11  ;;  %v15226_v8 = vld [vmem:[#allocation70_spill] sm:$0xff] }
  0xf9   :  { %7437 = vmatprep.subr.bf16.mxu0 %v15068_v29 }
  0xfb   :  { %984 = vmatmul.mubr.f32.gmra.mrb[2].mxu0 %v9452_v51 }
  0xfc   :  { %7439 = vmatpush1.bf16.msra.mxu0 %v15081_v41  ;;  %989 = vmatprep.mubr.f32.mxu0 %v14973_v11  ;;  %v15212_v41 = vand.u32 4294901760, %v15211_v50 }
  0xfd   :  { %7441 = vmatprep.subr.bf16.mxu0 %v15082_v12 }
  0xfe   :  { %v10265_v29 = vpack.c.bf16 %v15212_v41, %v15210_v10  ;;  %v15249_v10 = vld [vmem:[#allocation32_spill] sm:$0xff]  ;;  %v15251_v41 = vld [vmem:[#allocation95_spill] sm:$0xff] }
  0xff   :  { %991 = vmatmul.mubr.f32.gmra.mrb[4].mxu0 %v9471_v55  ;;  %v15250_v50 = vand.u32 4294901760, %v15249_v10  ;;  %v15252_v6 = vand.u32 4294901760, %v15251_v41  ;;  %v15281_v10 = vld [vmem:[#allocation132_spill] sm:$0xff] }
 0x100   :  { %7443 = vmatpush1.bf16.msra.mxu0 %v15097_v2  ;;  %996 = vmatprep.mubr.f32.mxu0 %v14973_v11  ;;  %15213 = vst [vmem:[#allocation36_spill] sm:$0xff] %v10265_v29 }
 0x101   :  { %7445 = vmatprep.subr.bf16.mxu0 %v15101_v35  ;;  %v15227_v35 = vand.u32 4294901760, %v15226_v8 }
 0x103   :  { %998 = vmatmul.mubr.f32.gmra.mrb[6].mxu0 %v9499_v25 }
 0x104   :  { %7447 = vmatpush1.bf16.msra.mxu0 %v15112_v46  ;;  %1100 = vmatprep.mubr.f32.mxu0 %v14973_v11  ;;  %v15229_v46 = vld [vmem:[#allocation71_spill] sm:$0xff] }
 0x105   :  { %7449 = vmatprep.subr.bf16.mxu0 %v15117_v3 }
 0x108   :  { %7451 = vmatpush1.bf16.msra.mxu0 %v15126_v43  ;;  %v15231_v43 = vld [vmem:[#allocation75_spill] sm:$0xff] }
 0x109   :  { %7453 = vmatprep.subr.bf16.mxu0 %v15133_v19  ;;  %v15232_v19 = vand.u32 4294901760, %v15231_v43 }
 0x10c   :  { %7455 = vmatpush1.bf16.msra.mxu0 %v15139_v38 }
 0x10d   :  { %7457 = vmatprep.subr.bf16.mxu0 %v15147_v49  ;;  %v15230_v49 = vand.u32 4294901760, %v15229_v46 }
 0x110   :  { %7459 = vmatpush1.bf16.msra.mxu0 %v15154_v44  ;;  %v15221_v44 = vld [vmem:[#allocation61_spill] sm:$0xff] }
 0x111   :  { %7461 = vmatprep.subr.bf16.mxu0 %v15158_v30  ;;  %v10274_v30 = vpack.c.bf16 %v15217_v39, %v15215_v13  ;;  %v15222_v38 = vand.u32 4294901760, %v15221_v44  ;;  %15243 = vst [vmem:[#allocation61_spill] sm:$0xff] %v10313_v5  ;;  %v10328_v13 = vpack.c.bf16 %v15252_v6, %v15250_v50  ;;  %v15256_v39 = vld [vmem:[#allocation103_spill] sm:$0xff]  ;;  %v15259_v44 = vld [vmem:[#allocation21_spill] sm:$0xff]  ;;  %v15282_v50 = vand.u32 4294901760, %v15281_v10 }
 0x112   :  { %v15257_v56 = vand.u32 4294901760, %v15256_v39  ;;  %v15284_v6 = vld [vmem:[#allocation133_spill] sm:$0xff] }
 0x113   :  { %15218 = vst [vmem:[#allocation37_spill] sm:$0xff] %v10274_v30  ;;  %v10281_v3 = vpack.c.bf16 %v15222_v38, %v15220_v58  ;;  %15253 = vst [vmem:[#allocation70_spill] sm:$0xff] %v10328_v13  ;;  %v15260_v38 = vand.u32 4294901760, %v15259_v44  ;;  %v15289_v44 = vand.u32 4294901760, %v10072_v22 }
 0x114   :  { %7463 = vmatpush1.bf16.msra.mxu0 %v15168_v4  ;;  %v10297_v4 = vpack.c.bf16 %v15232_v19, %v15230_v49  ;;  %v15266_v49 = vld [vmem:[#allocation112_spill] sm:$0xff] }
 0x115   :  { %7465 = vmatprep.subr.bf16.mxu0 %v10251_v21  ;;  %15223 = vst [vmem:[#allocation46_spill] sm:$0xff] %v10281_v3  ;;  %v15267_v43 = vand.u32 4294901760, %v15266_v49  ;;  %v15295_v49 = vand.u32 4294901760, %v10121_v61  ;;  %v10413_v61 = vld [vmem:[#allocation7 + $0x388] sm:$0xff] }
 0x116   :  { %15233 = vst [vmem:[#allocation55_spill] sm:$0xff] %v10297_v4 }
 0x117   :  { %1102 = vmatmul.mubr.f32.vlgmr.msra.gmra.mrb[0].mxu0 %v9331_v57  ;;  %v15224_v57 = vld [vmem:[#allocation65_spill] sm:$0xff] }
 0x118   :  { %1107 = vmatprep.mubr.f32.mxu0 %v14973_v11  ;;  %7467 = vmatpush1.bf16.msra.mxu0 %v10258_v0  ;;  %v15225_v2 = vand.u32 4294901760, %v15224_v57  ;;  %v15261_v57 = vld [vmem:[#allocation107_spill] sm:$0xff] }
 0x119   :  { %7469 = vmatprep.subr.bf16.mxu0 %v10265_v29  ;;  %v15335_v29 = vld [vmem:[#allocation40_spill] sm:$0xff] }
 0x11a   :  { %v10290_v12 = vpack.c.bf16 %v15227_v35, %v15225_v2  ;;  %v15262_v2 = vand.u32 4294901760, %v15261_v57  ;;  %v15264_v35 = vld [vmem:[#allocation111_spill] sm:$0xff] }
 0x11b   :  { %1109 = vmatmul.mubr.f32.gmra.mrb[2].mxu0 %v9452_v51  ;;  %v15234_v51 = vld [vmem:[#allocation79_spill] sm:$0xff]  ;;  %v15265_v46 = vand.u32 4294901760, %v15264_v35  ;;  %v15293_v35 = vand.u32 4294901760, %v10101_v26  ;;  %v10411_v26 = vld [vmem:[#allocation7 + $0x178] sm:$0xff] }
 0x11c   :  { %1114 = vmatprep.mubr.f32.mxu0 %v14973_v11  ;;  %7471 = vmatpush1.bf16.msra.mxu0 %v10274_v30  ;;  %15228 = vst [vmem:[#allocation51_spill] sm:$0xff] %v10290_v12  ;;  %v15235_v42 = vand.u32 4294901760, %v15234_v51  ;;  %v10342_v8 = vpack.c.bf16 %v15262_v2, %v15260_v38  ;;  %v15269_v51 = vld [vmem:[#allocation116_spill] sm:$0xff]  ;;  %v15290_v38 = vand.u32 4294901760, %v10086_v32  ;;  %v15292_v2 = vand.u32 4294901760, %v10088_v27 }
 0x11d   :  { %7473 = vmatprep.subr.bf16.mxu0 %v10281_v3  ;;  %v10349_v19 = vpack.c.bf16 %v15267_v43, %v15265_v46  ;;  %v15296_v43 = vand.u32 4294901760, %v10134_v20  ;;  %v15298_v32 = vand.u32 4294901760, %v10136_v54  ;;  %v10409_v27 = vld [vmem:[#allocation7 + $0x168] sm:$0xff]  ;;  %v3057_v54 = vand.u32 4294901760, %v10413_v61  ;;  %v15334_v3 = vld [vmem:[#allocation39_spill] sm:$0xff] }
 0x11e   :  { %v10306_v9 = vpack.c.bf16 %v15237_v23, %v15235_v42  ;;  %15263 = vst [vmem:[#allocation75_spill] sm:$0xff] %v10342_v8  ;;  %v15270_v42 = vand.u32 4294901760, %v15269_v51  ;;  %v15272_v23 = vand.u32 4294901760, %v15271_v59  ;;  %v10384_v57 = vpack.c.bf16 %v15290_v38, %v15289_v44  ;;  %v10417_v59 = vld [vmem:[#allocation7 + $0x398] sm:$0xff] }
 0x11f   :  { %1116 = vmatmul.mubr.f32.gmra.mrb[4].mxu0 %v9471_v55  ;;  %15268 = vst [vmem:[#allocation79_spill] sm:$0xff] %v10349_v19  ;;  %v10391_v46 = vpack.c.bf16 %v15293_v35, %v15292_v2  ;;  %v10398_v51 = vpack.c.bf16 %v15296_v43, %v15295_v49  ;;  %v10405_v22 = vpack.c.bf16 %v1577_v16, %v15298_v32  ;;  %v1579_v20 = vand.u32 4294901760, %v10409_v27  ;;  %v10422_v16 = vld [vmem:[#allocation7 + $0x170] sm:$0xff]  ;;  %v10444_v35 = vld [vmem:[#allocation7 + $0x3b8] sm:$0xff]  ;;  %v10446_v49 = vld [vmem:[#allocation7 + $0x180] sm:$0xff] }
 0x120   :  { %1121 = vmatprep.mubr.f32.mxu0 %v14973_v11  ;;  %7475 = vmatpush1.bf16.msra.mxu0 %v10290_v12  ;;  %15238 = vst [vmem:[#allocation58_spill] sm:$0xff] %v10306_v9  ;;  %v15244_v11 = vld [vmem:[#allocation93_spill] sm:$0xff]  ;;  %v10356_v24 = vpack.c.bf16 %v15272_v23, %v15270_v42  ;;  %15291 = vst [vmem:[#allocation94_spill] sm:$0xff] %v10384_v57  ;;  %v1583_v42 = vand.u32 4294901760, %v10411_v26  ;;  %v3061_v23 = vand.u32 4294901760, %v10417_v59  ;;  %v15308_v38 = vand.u32 4294901760, %v10444_v35 }
 0x121   :  { %7477 = vmatprep.subr.bf16.mxu0 %v10297_v4  ;;  %v15245_v55 = vand.u32 4294901760, %v15244_v11  ;;  %v15277_v11 = vand.u32 4294901760, %v15276_v63  ;;  %15294 = vst [vmem:[#allocation32_spill] sm:$0xff] %v10391_v46  ;;  %15297 = vst [vmem:[#allocation95_spill] sm:$0xff] %v10398_v51  ;;  %v1400_v63 = vld [vmem:[#allocation7 + $0x380] sm:$0xff]  ;;  %v10448_v43 = vld [vmem:[#allocation7 + $0x190] sm:$0xff] }
 0x122   :  { %15273 = vst [vmem:[#allocation82_spill] sm:$0xff] %v10356_v24  ;;  %15299 = vst [vmem:[#allocation99_spill] sm:$0xff] %v10405_v22  ;;  %v10458_v2 = vld [vmem:[#allocation7 + $0x3b0] sm:$0xff]  ;;  %v15310_v14 = vand.u32 4294901760, %v10446_v49  ;;  %v1349_v4 = vld [vmem:[#allocation7 + $0x1e8] sm:$0xff] }
 0x123   :  { %1123 = vmatmul.mubr.f32.gmra.mrb[6].mxu0 %v9499_v25  ;;  %v10321_v52 = vpack.c.bf16 %v15247_v40, %v15245_v55  ;;  %v15255_v25 = vand.u32 4294901760, %v15254_v34  ;;  %v10363_v55 = vpack.c.bf16 %v15277_v11, %v15275_v18  ;;  %v15280_v40 = vand.u32 4294901760, %v15279_v7  ;;  %v1402_v11 = vld [vmem:[#allocation7 + $0x390] sm:$0xff]  ;;  %v1351_v12 = vld [vmem:[#allocation7 + $0x1f8] sm:$0xff] }
 0x124   :  { %7479 = vmatpush1.bf16.msra.mxu0 %v10306_v9  ;;  %v15285_v34 = vand.u32 4294901760, %v15284_v6  ;;  %v1585_v18 = vand.u32 4294901760, %v10422_v16  ;;  %v10427_v7 = vpack.c.bf16 %v1583_v42, %v1579_v20  ;;  %v3063_v10 = vand.u32 4294901760, %v1402_v11 }
 0x125   :  { %15248 = vst [vmem:[#allocation65_spill] sm:$0xff] %v10321_v52  ;;  %7481 = vmatprep.subr.bf16.mxu0 %v10313_v5  ;;  %v10335_v58 = vpack.c.bf16 %v15257_v56, %v15255_v25  ;;  %15278 = vst [vmem:[#allocation84_spill] sm:$0xff] %v10363_v55  ;;  %v10370_v41 = vpack.c.bf16 %v15282_v50, %v15280_v40  ;;  %v15286_v25 = vld [vmem:[#allocation135_spill] sm:$0xff]  ;;  %v3059_v40 = vand.u32 4294901760, %v1400_v63 }
 0x126   :  { %v15287_v39 = vand.u32 4294901760, %v15286_v25  ;;  %15300 = vst [vmem:[#allocation103_spill] sm:$0xff] %v10427_v7  ;;  %v10429_v50 = vpack.c.bf16 %v3061_v23, %v3057_v54  ;;  %v10431_v6 = vpack.c.bf16 %v1585_v18, %v1581_v53  ;;  %v10435_v25 = vld [vmem:[#allocation7 + $0x198] sm:$0xff] }
 0x127   :  { %15258 = vst [vmem:[#allocation71_spill] sm:$0xff] %v10335_v58  ;;  %15283 = vst [vmem:[#allocation86_spill] sm:$0xff] %v10370_v41  ;;  %v10440_v44 = vpack.c.bf16 %v3063_v10, %v3059_v40 }
 0x128   :  { %7483 = vmatpush1.bf16.msra.mxu0 %v10321_v52  ;;  %v10377_v56 = vpack.c.bf16 %v15287_v39, %v15285_v34  ;;  %15301 = vst [vmem:[#allocation21_spill] sm:$0xff] %v10429_v50  ;;  %15302 = vst [vmem:[#allocation107_spill] sm:$0xff] %v10431_v6  ;;  %v10433_v34 = vld [vmem:[#allocation7 + $0x188] sm:$0xff]  ;;  %7897 = vmatprep.subr.bf16.mxu1 %v10429_v50  ;;  %v15305_v50 = vand.u32 4294901760, %v10435_v25  ;;  %v1414_v52 = vld [vmem:[#allocation7 + $0x3f0] sm:$0xff] }
 0x129   :  { %7485 = vmatprep.subr.bf16.mxu0 %v10328_v13  ;;  %v10437_v39 = vld [vmem:[#allocation7 + $0x3a8] sm:$0xff]  ;;  %15303 = vst [vmem:[#allocation111_spill] sm:$0xff] %v10440_v44  ;;  %7899 = vmatpush1.bf16.msra.mxu1 %v10440_v44  ;;  %v15304_v15 = vand.u32 4294901760, %v10433_v34  ;;  %v15311_v44 = vand.u32 4294901760, %v10448_v43  ;;  %v10537_v13 = vsub.f32 %v10422_v16, %v1585_v18  ;;  %v1346_v18 = vld [vmem:[#allocation7 + $0x1d0] sm:$0xff]  ;;  %v3087_v9 = vand.u32 4294901760, %v1414_v52 }
 0x12a   :  { %15288 = vst [vmem:[#allocation93_spill] sm:$0xff] %v10377_v56  ;;  %v15307_v33 = vand.u32 4294901760, %v10437_v39  ;;  %v15342_v30 = vand.u32 4294901760, %v10437_v39 }
 0x12b   :  { %15322 = vst [vmem:[#allocation167_spill] sm:$0xff] %v10537_v13  ;;  %v15340_v13 = vand.u32 4294901760, %v10435_v25 }
 0x12c   :  { %7487 = vmatpush1.bf16.msra.mxu0 %v10335_v58  ;;  %v1347_v58 = vld [vmem:[#allocation7 + $0x1d8] sm:$0xff]  ;;  %v10584_v0 = vsub.f32 %v10437_v39, %v15342_v30 }
 0x12d   :  { %7489 = vmatprep.subr.bf16.mxu0 %v10342_v8  ;;  %v1345_v8 = vld [vmem:[#allocation7 + $0x1c8] sm:$0xff] }
 0x12e   :  { %15343 = vst [vmem:[#allocation179_spill] sm:$0xff] %v10584_v0 }
 0x130   :  { %7491 = vmatpush1.bf16.msra.mxu0 %v10349_v19 }
 0x131   :  { %7493 = vmatprep.subr.bf16.mxu0 %v10356_v24 }
 0x134   :  { %7495 = vmatpush1.bf16.msra.mxu0 %v10363_v55 }
 0x135   :  { %7497 = vmatprep.subr.bf16.mxu0 %v10370_v41  ;;  %v10500_v41 = vld [vmem:[#allocation7 + $0x1b0] sm:$0xff] }
 0x138   :  { %7499 = vmatpush1.bf16.msra.mxu0 %v10377_v56  ;;  %v10510_v56 = vld [vmem:[#allocation7 + $0x3d0] sm:$0xff] }
 0x139   :  { %7501 = vmatprep.subr.bf16.mxu0 %v10384_v57  ;;  %v10481_v57 = vld [vmem:[#allocation7 + $0x1a8] sm:$0xff]  ;;  %v3079_v55 = vand.u32 4294901760, %v10510_v56 }
 0x13a   :  { %v15314_v24 = vand.u32 4294901760, %v10481_v57 }
 0x13c   :  { %7503 = vmatpush1.bf16.msra.mxu0 %v10391_v46  ;;  %v10479_v46 = vpack.c.bf16 %v15311_v44, %v15310_v14  ;;  %v10496_v14 = vld [vmem:[#allocation7 + $0x3d8] sm:$0xff]  ;;  %v10498_v44 = vld [vmem:[#allocation7 + $0x1a0] sm:$0xff] }
 0x13d   :  { %7505 = vmatprep.subr.bf16.mxu0 %v10398_v51  ;;  %v10465_v51 = vpack.c.bf16 %v15305_v50, %v15304_v15  ;;  %v10483_v15 = vld [vmem:[#allocation7 + $0x1b8] sm:$0xff]  ;;  %v10485_v50 = vld [vmem:[#allocation7 + $0x3c8] sm:$0xff] }
 0x13e   :  { %15312 = vst [vmem:[#allocation117_spill] sm:$0xff] %v10479_v46 }
 0x13f   :  { %15306 = vst [vmem:[#allocation112_spill] sm:$0xff] %v10465_v51 }
 0x140   :  { %7507 = vmatpush1.bf16.msra.mxu0 %v10405_v22  ;;  %v10456_v22 = vld [vmem:[#allocation7 + $0x3a0] sm:$0xff] }
 0x141   :  { %7509 = vmatprep.subr.bf16.mxu0 %v10427_v7  ;;  %v14273_v32 = vand.u32 4294901760, %v10456_v22  ;;  %v14272_v7 = vand.u32 4294901760, %v10458_v2  ;;  %v15350_v30 = vand.u32 4294901760, %v10456_v22 }
 0x143   :  { %v10605_v39 = vsub.f32 %v10456_v22, %v15350_v30  ;;  %v15358_v22 = vand.u32 4294901760, %v10485_v50 }
 0x144   :  { %7511 = vmatpush1.bf16.msra.mxu0 %v10431_v6  ;;  %v10473_v6 = vpack.c.bf16 %v15308_v38, %v15307_v33  ;;  %v10492_v33 = vpack.c.bf16 %v14272_v7, %v14273_v32  ;;  %v10508_v38 = vld [vmem:[#allocation7 + $0x3c0] sm:$0xff]  ;;  %v10522_v7 = vsub.f32 %v10409_v27, %v1579_v20  ;;  %v10525_v32 = vsub.f32 %v10411_v26, %v1583_v42  ;;  %v1415_v26 = vld [vmem:[#allocation7 + $0x3f8] sm:$0xff] }
 0x145   :  { %7513 = vmatprep.subr.bf16.mxu0 %v10465_v51  ;;  %v3075_v51 = vand.u32 4294901760, %v10508_v38  ;;  %v10539_v27 = vsub.f32 %v1400_v63, %v3059_v40  ;;  %v10541_v20 = vsub.f32 %v1402_v11, %v3063_v10  ;;  %v15326_v42 = vand.u32 4294901760, %v10496_v14  ;;  %v1412_v63 = vld [vmem:[#allocation7 + $0x3e0] sm:$0xff]  ;;  %15351 = vst [vmem:[#allocation183_spill] sm:$0xff] %v10605_v39 }
 0x146   :  { %15309 = vst [vmem:[#allocation116_spill] sm:$0xff] %v10473_v6  ;;  %15313 = vst [vmem:[#allocation121_spill] sm:$0xff] %v10492_v33  ;;  %7901 = vmatprep.subr.bf16.mxu1 %v10473_v6  ;;  %v15315_v6 = vand.u32 4294901760, %v10483_v15  ;;  %v1603_v11 = vand.u32 4294901760, %v1345_v8  ;;  %v1607_v40 = vand.u32 4294901760, %v1347_v58  ;;  %v3083_v5 = vand.u32 4294901760, %v1412_v63 }
 0x147   :  { %7903 = vmatpush1.bf16.msra.mxu1 %v10492_v33  ;;  %15317 = vst [vmem:[#allocation128_spill] sm:$0xff] %v10522_v7  ;;  %15318 = vst [vmem:[#allocation132_spill] sm:$0xff] %v10525_v32  ;;  %v10531_v33 = vsub.f32 %v10417_v59, %v3061_v23  ;;  %v10556_v16 = vpack.c.bf16 %v3079_v55, %v3075_v51  ;;  %v10626_v30 = vsub.f32 %v10485_v50, %v15358_v22  ;;  %v15433_v32 = vld [vmem:[#allocation29_spill] sm:$0xff] }
 0x148   :  { %7515 = vmatpush1.bf16.msra.mxu0 %v10479_v46  ;;  %v10517_v19 = vpack.c.bf16 %v15315_v6, %v15314_v24  ;;  %v10528_v46 = vsub.f32 %v10413_v61, %v3057_v54  ;;  %v1413_v24 = vld [vmem:[#allocation7 + $0x3e8] sm:$0xff]  ;;  %v10534_v6 = vsub.f32 %v10420_v45, %v1581_v53  ;;  %15323 = vst [vmem:[#allocation168_spill] sm:$0xff] %v10539_v27  ;;  %15324 = vst [vmem:[#allocation169_spill] sm:$0xff] %v10541_v20  ;;  %v1344_v53 = vld [vmem:[#allocation7 + $0x1c0] sm:$0xff] }
 0x149   :  { %15320 = vst [vmem:[#allocation135_spill] sm:$0xff] %v10531_v33  ;;  %v15325_v61 = vand.u32 4294901760, %v10485_v50  ;;  %v15328_v54 = vand.u32 4294901760, %v10498_v44  ;;  %v15329_v45 = vand.u32 4294901760, %v10500_v41  ;;  %15331 = vst [vmem:[#allocation172_spill] sm:$0xff] %v10556_v16  ;;  %v3081_v10 = vand.u32 4294901760, %v1413_v24 }
 0x14a   :  { %15316 = vst [vmem:[#allocation124_spill] sm:$0xff] %v10517_v19  ;;  %15319 = vst [vmem:[#allocation133_spill] sm:$0xff] %v10528_v46  ;;  %7517 = vmatprep.subr.bf16.mxu0 %v10517_v19  ;;  %v3085_v19 = vand.u32 4294901760, %v1415_v26  ;;  %v1615_v20 = vand.u32 4294901760, %v1351_v12  ;;  %v15338_v27 = vand.u32 4294901760, %v10433_v34  ;;  %v15344_v33 = vand.u32 4294901760, %v10444_v35 }
 0x14b   :  { %15321 = vst [vmem:[#allocation166_spill] sm:$0xff] %v10534_v6  ;;  %v10548_v59 = vpack.c.bf16 %v15326_v42, %v15325_v61  ;;  %v10554_v23 = vpack.c.bf16 %v15329_v45, %v15328_v54  ;;  %v1605_v61 = vand.u32 4294901760, %v1344_v53  ;;  %v1609_v42 = vand.u32 4294901760, %v1346_v18  ;;  %15359 = vst [vmem:[#allocation187_spill] sm:$0xff] %v10626_v30 }
 0x14c   :  { %v10561_v54 = vpack.c.bf16 %v1607_v40, %v1603_v11  ;;  %v10563_v45 = vpack.c.bf16 %v3085_v19, %v3081_v10  ;;  %v10579_v6 = vsub.f32 %v10435_v25, %v15340_v13  ;;  %v10589_v46 = vsub.f32 %v10444_v35, %v15344_v33 }
 0x14d   :  { %15327 = vst [vmem:[#allocation170_spill] sm:$0xff] %v10548_v59  ;;  %15330 = vst [vmem:[#allocation171_spill] sm:$0xff] %v10554_v23  ;;  %7905 = vmatprep.subr.bf16.mxu1 %v10548_v59  ;;  %7519 = vmatpush1.bf16.msra.mxu0 %v10554_v23  ;;  %v10567_v21 = vpack.c.bf16 %v1609_v42, %v1605_v61  ;;  %v10569_v59 = vpack.c.bf16 %v3087_v9, %v3083_v5  ;;  %v1611_v23 = vand.u32 4294901760, %v1349_v4 }
 0x14e   :  { %7907 = vmatpush1.bf16.msra.mxu1 %v10556_v16  ;;  %15332 = vst [vmem:[#allocation173_spill] sm:$0xff] %v10561_v54  ;;  %15333 = vst [vmem:[#allocation174_spill] sm:$0xff] %v10563_v45  ;;  %v10574_v16 = vsub.f32 %v10433_v34, %v15338_v27  ;;  %7521 = vmatprep.subr.bf16.mxu0 %v10561_v54  ;;  %v15346_v34 = vand.u32 4294901760, %v10446_v49  ;;  %v15348_v13 = vand.u32 4294901760, %v10448_v43  ;;  %v15352_v35 = vand.u32 4294901760, %v10458_v2 }
 0x14f   :  { %15336 = vst [vmem:[#allocation175_spill] sm:$0xff] %v10567_v21  ;;  %15337 = vst [vmem:[#allocation176_spill] sm:$0xff] %v10569_v59  ;;  %7909 = vmatprep.subr.bf16.mxu1 %v10563_v45  ;;  %v10645_v50 = vsub.f32 %v10508_v38, %v3075_v51  ;;  %v10648_v22 = vsub.f32 %v10510_v56, %v3079_v55  ;;  %v1350_v45 = vld [vmem:[#allocation7 + $0x1f0] sm:$0xff]  ;;  %v10663_v51 = vsub.f32 %v1412_v63, %v3083_v5  ;;  %v15381_v5 = vld [vmem:[#allocation44_spill] sm:$0xff] }
 0x150   :  { %15339 = vst [vmem:[#allocation177_spill] sm:$0xff] %v10574_v16  ;;  %15341 = vst [vmem:[#allocation178_spill] sm:$0xff] %v10579_v6  ;;  %v10595_v27 = vsub.f32 %v10446_v49, %v15346_v34  ;;  %v10600_v25 = vsub.f32 %v10448_v43, %v15348_v13  ;;  %v10610_v33 = vsub.f32 %v10458_v2, %v15352_v35  ;;  %v15354_v49 = vand.u32 4294901760, %v10481_v57  ;;  %v15430_v16 = vld [vmem:[#allocation15_spill] sm:$0xff] }
 0x151   :  { %15345 = vst [vmem:[#allocation180_spill] sm:$0xff] %v10589_v46  ;;  %v15356_v43 = vand.u32 4294901760, %v10483_v15  ;;  %v15360_v2 = vand.u32 4294901760, %v10496_v14  ;;  %7523 = vmatpush1.bf16.msra.mxu0 %v10567_v21  ;;  %15366 = vst [vmem:[#allocation191_spill] sm:$0xff] %v10645_v50  ;;  %v10655_v21 = vsub.f32 %v1413_v24, %v3081_v10  ;;  %v10665_v55 = vsub.f32 %v1414_v52, %v3087_v9  ;;  %v15432_v46 = vld [vmem:[#allocation83_spill] sm:$0xff] }
 0x152   :  { %15347 = vst [vmem:[#allocation181_spill] sm:$0xff] %v10595_v27  ;;  %15349 = vst [vmem:[#allocation182_spill] sm:$0xff] %v10600_v25  ;;  %v10616_v34 = vsub.f32 %v10481_v57, %v15354_v49  ;;  %v15362_v57 = vand.u32 4294901760, %v10498_v44  ;;  %7911 = vmatpush1.bf16.msra.mxu1 %v10569_v59  ;;  %v10667_v56 = vpack.c.bf16 %v1615_v20, %v1611_v23  ;;  %v15379_v38 = vand.u32 4294901760, %v15334_v3  ;;  %v15392_v59 = vld [vmem:[#allocation54_spill] sm:$0xff] }
 0x153   :  { %15353 = vst [vmem:[#allocation184_spill] sm:$0xff] %v10610_v33  ;;  %v10621_v13 = vsub.f32 %v10483_v15, %v15356_v43  ;;  %v10631_v35 = vsub.f32 %v10496_v14, %v15360_v2  ;;  %v15364_v15 = vand.u32 4294901760, %v10500_v41  ;;  %15367 = vst [vmem:[#allocation192_spill] sm:$0xff] %v10648_v22  ;;  %v10651_v14 = vsub.f32 %v1345_v8, %v1603_v11 }
 0x154   :  { %15355 = vst [vmem:[#allocation185_spill] sm:$0xff] %v10616_v34  ;;  %v10637_v49 = vsub.f32 %v10498_v44, %v15362_v57  ;;  %v10653_v2 = vsub.f32 %v1347_v58, %v1607_v40  ;;  %15370 = vst [vmem:[#allocation195_spill] sm:$0xff] %v10655_v21  ;;  %v10657_v44 = vsub.f32 %v1415_v26, %v3085_v19  ;;  %v1348_v57 = vld [vmem:[#allocation7 + $0x1e0] sm:$0xff]  ;;  %v15380_v24 = vand.u32 4294901760, %v15335_v29  ;;  %v15385_v40 = vld [vmem:[#allocation45_spill] sm:$0xff] }
 0x155   :  { %15357 = vst [vmem:[#allocation186_spill] sm:$0xff] %v10621_v13  ;;  %15361 = vst [vmem:[#allocation188_spill] sm:$0xff] %v10631_v35  ;;  %v10642_v43 = vsub.f32 %v10500_v41, %v15364_v15  ;;  %v10659_v41 = vsub.f32 %v1344_v53, %v1605_v61  ;;  %v10661_v15 = vsub.f32 %v1346_v18, %v1609_v42  ;;  %v1613_v53 = vand.u32 4294901760, %v1348_v57  ;;  %v15409_v13 = vld [vmem:[#allocation64_spill] sm:$0xff] }
 0x156   :  { %15363 = vst [vmem:[#allocation189_spill] sm:$0xff] %v10637_v49  ;;  %15368 = vst [vmem:[#allocation193_spill] sm:$0xff] %v10651_v14  ;;  %v10669_v8 = vsub.f32 %v1349_v4, %v1611_v23  ;;  %v10671_v58 = vsub.f32 %v1351_v12, %v1615_v20  ;;  %v3157_v19 = vsub.f32 %v15334_v3, %v15379_v38  ;;  %v1617_v18 = vand.u32 4294901760, %v1350_v45 }
 0x157   :  { %15365 = vst [vmem:[#allocation190_spill] sm:$0xff] %v10642_v43  ;;  %15369 = vst [vmem:[#allocation194_spill] sm:$0xff] %v10653_v2  ;;  %v3169_v26 = vsub.f32 %v15335_v29, %v15380_v24  ;;  %7525 = vmatprep.subr.bf16.mxu0 %v10667_v56  ;;  %v14328_v52 = vand.u32 4294901760, %v15381_v5  ;;  %v10683_v12 = vsub.f32 %v1348_v57, %v1613_v53  ;;  %v14338_v10 = vand.u32 4294901760, %v15385_v40 }
 0x158   :  { %15371 = vst [vmem:[#allocation196_spill] sm:$0xff] %v10657_v44  ;;  %15372 = vst [vmem:[#allocation197_spill] sm:$0xff] %v10659_v41  ;;  %v3158_v9 = vand.u32 4294901760, %v3157_v19  ;;  %v10681_v4 = vpack.c.bf16 %v1617_v18, %v1613_v53  ;;  %v10685_v20 = vsub.f32 %v1350_v45, %v1617_v18  ;;  %v117_v45 = vlaneseq  ;;  %v15386_v19 = vld [vmem:[#allocation41_spill] sm:$0xff]  ;;  %v15388_v18 = vld [vmem:[#allocation48_spill] sm:$0xff] }
 0x159   :  { %15373 = vst [vmem:[#allocation198_spill] sm:$0xff] %v10661_v15  ;;  %15374 = vst [vmem:[#allocation199_spill] sm:$0xff] %v10663_v51  ;;  %v3170_v63 = vand.u32 4294901760, %v3169_v26  ;;  %v1687_v23 = vsub.f32 %v15381_v5, %v14328_v52  ;;  %v1699_v42 = vsub.f32 %v15385_v40, %v14338_v10  ;;  %v15387_v26 = vld [vmem:[#allocation43_spill] sm:$0xff]  ;;  %v15393_v5 = vld [vmem:[#allocation56_spill] sm:$0xff]  ;;  %v15397_v53 = vand.u32 4294901760, %v15386_v19 }
 0x15a   :  { %15375 = vst [vmem:[#allocation200_spill] sm:$0xff] %v10665_v55  ;;  %15376 = vst [vmem:[#allocation201_spill] sm:$0xff] %v10667_v56  ;;  %7527 = vmatpush1.bf16.msra.mxu0 %v10681_v4  ;;  %v15398_v52 = vand.u32 4294901760, %v15387_v26 }
 0x15b   :  { %15377 = vst [vmem:[#allocation202_spill] sm:$0xff] %v10669_v8  ;;  %15378 = vst [vmem:[#allocation203_spill] sm:$0xff] %v10671_v58  ;;  %v7912_v11 = vpack.c.bf16 %v3170_v63, %v3158_v9  ;;  %v1688_v61 = vand.u32 4294901760, %v1687_v23  ;;  %v1700_v38 = vand.u32 4294901760, %v1699_v42  ;;  %v15389_v63 = vld [vmem:[#allocation49_spill] sm:$0xff]  ;;  %v3163_v9 = vsub.f32 %v15386_v19, %v15397_v53 }
 0x15c   :  { %15382 = vst [vmem:[#allocation204_spill] sm:$0xff] %v10681_v4  ;;  %15383 = vst [vmem:[#allocation205_spill] sm:$0xff] %v10683_v12  ;;  %v15390_v4 = vld [vmem:[#allocation50_spill] sm:$0xff]  ;;  %v15394_v42 = vld [vmem:[#allocation57_spill] sm:$0xff]  ;;  %v3175_v56 = vsub.f32 %v15387_v26, %v15398_v52  ;;  %v15399_v23 = vand.u32 4294901760, %v15388_v18  ;;  %v15400_v10 = vand.u32 4294901760, %v15389_v63 }
 0x15d   :  { %15384 = vst [vmem:[#allocation206_spill] sm:$0xff] %v10685_v20  ;;  %7913 = vmatprep.subr.bf16.mxu1 %v7912_v11  ;;  %v7528_v57 = vpack.c.bf16 %v1700_v38, %v1688_v61  ;;  %v15391_v11 = vld [vmem:[#allocation52_spill] sm:$0xff]  ;;  %v10704_v38 = vshrl.u32 %v117_v45, 7  ;;  %v15401_v45 = vand.u32 4294901760, %v15390_v4  ;;  %v15403_v19 = vand.u32 4294901760, %v15392_v59 }
 0x15e   :  { %v3181_v54 = vsub.f32 %v15388_v18, %v15399_v23  ;;  %v3193_v61 = vsub.f32 %v15389_v63, %v15400_v10  ;;  %v15402_v40 = vand.u32 4294901760, %v15391_v11  ;;  %v15404_v26 = vand.u32 4294901760, %v15393_v5  ;;  %v15406_v63 = vld [vmem:[#allocation60_spill] sm:$0xff] }
 0x15f   :  { %7529 = vmatprep.subr.bf16.mxu0 %v7528_v57  ;;  %15395 = vst [vmem:[#allocation207_spill] sm:$0xff] %v10704_v38  ;;  %v15396_v57 = vld [vmem:[#allocation59_spill] sm:$0xff]  ;;  %v1693_v24 = vsub.f32 %v15390_v4, %v15401_v45  ;;  %v3187_v52 = vsub.f32 %v15392_v59, %v15403_v19  ;;  %v15405_v18 = vand.u32 4294901760, %v15394_v42  ;;  %v3164_v34 = vand.u32 4294901760, %v3163_v9 }
 0x160   :  { %v1705_v53 = vsub.f32 %v15391_v11, %v15402_v40  ;;  %v3199_v23 = vsub.f32 %v15393_v5, %v15404_v26  ;;  %v15407_v4 = vand.u32 4294901760, %v15396_v57  ;;  %v15408_v11 = vld [vmem:[#allocation63_spill] sm:$0xff]  ;;  %v3176_v26 = vand.u32 4294901760, %v3175_v56  ;;  %v15410_v5 = vld [vmem:[#allocation66_spill] sm:$0xff] }
 0x161   :  { %v1711_v10 = vsub.f32 %v15394_v42, %v15405_v18  ;;  %v14360_v25 = vand.u32 4294901760, %v15410_v5  ;;  %v3182_v27 = vand.u32 4294901760, %v3181_v54  ;;  %v3194_v18 = vand.u32 4294901760, %v3193_v61  ;;  %v80_v45 = vld [vmem:[%s13993_s4] ss:$4 sm:$0x3] }
 0x162   :  { %v1723_v40 = vsub.f32 %v15396_v57, %v15407_v4  ;;  %v1694_v42 = vand.u32 4294901760, %v1693_v24  ;;  %v1706_v29 = vand.u32 4294901760, %v1705_v53  ;;  %v3188_v33 = vand.u32 4294901760, %v3187_v52  ;;  %v15414_v53 = vld [vmem:[#allocation68_spill] sm:$0xff] }
 0x163   :  { %v3200_v4 = vand.u32 4294901760, %v3199_v23  ;;  %v1712_v57 = vand.u32 4294901760, %v1711_v10  ;;  %v15411_v3 = vand.u32 4294901760, %v15406_v63  ;;  %v15412_v56 = vand.u32 4294901760, %v15408_v11 }
 0x164   :  { %v1724_v9 = vand.u32 4294901760, %v1723_v40  ;;  %v15413_v24 = vand.u32 4294901760, %v15409_v13  ;;  %v10765_v23 = vsub.f32 %v15410_v5, %v14360_v25  ;;  %v10769_v40 = vadd.s32 16, %v10704_v38 }
 0x165   :  { %v10749_v19 = vsub.f32 %v15406_v63, %v15411_v3  ;;  %v10754_v54 = vsub.f32 %v15408_v11, %v15412_v56  ;;  %v15415_v3 = vld [vmem:[#allocation69_spill] sm:$0xff]  ;;  %v15416_v56 = vsub.s32 0, %v10704_v38  ;;  %v15417_v11 = vsub.s32 1, %v10704_v38 }
 0x166   :  { %v10759_v61 = vsub.f32 %v15409_v13, %v15413_v24  ;;  %v10779_v13 = vpack.c.bf16 %v3176_v26, %v3164_v34  ;;  %v10782_v63 = vpack.c.bf16 %v3194_v18, %v3182_v27  ;;  %v10784_v25 = vpack.c.bf16 %v1706_v29, %v1694_v42  ;;  %v15425_v42 = vld [vmem:[#allocation72_spill] sm:$0xff]  ;;  %v15436_v26 = vld [vmem:[#allocation87_spill] sm:$0xff] }
 0x167   :  { %v10773_v59 = vrot.slane %v80_v45, %v15416_v56  ;;  %v10777_v24 = vrot.slane %v80_v45, %v15417_v11  ;;  %v10786_v10 = vpack.c.bf16 %v3200_v4, %v3188_v33  ;;  %v3206_v5 = vand.u32 4294901760, %v10749_v19  ;;  %v15427_v18 = vld [vmem:[#allocation76_spill] sm:$0xff]  ;;  %v15435_v19 = vld [vmem:[#allocation17_spill] sm:$0xff] }
 0x168   :  { %15418 = vst [vmem:[#allocation208_spill] sm:$0xff] %v10779_v13  ;;  %15419 = vst [vmem:[#allocation209_spill] sm:$0xff] %v10782_v63  ;;  %v10789_v39 = vpack.c.bf16 %v1724_v9, %v1712_v57  ;;  %v3218_v56 = vand.u32 4294901760, %v10754_v54  ;;  %v1718_v6 = vand.u32 4294901760, %v10759_v61  ;;  %v15423_v11 = vand.u32 4294901760, %v15414_v53  ;;  %v15426_v57 = vld [vmem:[#allocation73_spill] sm:$0xff] }
 0x169   :  { %15420 = vst [vmem:[#allocation210_spill] sm:$0xff] %v10784_v25  ;;  %15421 = vst [vmem:[#allocation211_spill] sm:$0xff] %v10786_v10  ;;  %v1730_v45 = vand.u32 4294901760, %v10765_v23  ;;  %v15424_v27 = vand.u32 4294901760, %v15415_v3  ;;  %v15428_v9 = vld [vmem:[#allocation77_spill] sm:$0xff]  ;;  %v15429_v61 = vld [vmem:[#allocation78_spill] sm:$0xff] }
 0x16a   :  { %15422 = vst [vmem:[#allocation212_spill] sm:$0xff] %v10789_v39  ;;  %v3211_v34 = vsub.f32 %v15414_v53, %v15423_v11  ;;  %v15431_v53 = vld [vmem:[#allocation81_spill] sm:$0xff]  ;;  %v15434_v33 = vld [vmem:[#allocation16_spill] sm:$0xff]  ;;  %v15437_v54 = vand.u32 4294901760, %v15425_v42  ;;  %v15440_v0 = vand.u32 4294901760, %v15426_v57  ;;  %v15442_v60 = vand.u32 4294901760, %v15428_v9 }
 0x16b   :  { %v3223_v29 = vsub.f32 %v15415_v3, %v15424_v27  ;;  %v15443_v17 = vand.u32 4294901760, %v15429_v61  ;;  %v15444_v11 = vand.u32 4294901760, %v15430_v16 }
 0x16c   :  { %v3212_v3 = vand.u32 4294901760, %v3211_v34  ;;  %v1735_v52 = vsub.f32 %v15425_v42, %v15437_v54  ;;  %v1747_v27 = vsub.f32 %v15426_v57, %v15440_v0  ;;  %v15441_v34 = vand.u32 4294901760, %v15427_v18 }
 0x16d   :  { %v3224_v4 = vand.u32 4294901760, %v3223_v29  ;;  %v3241_v29 = vsub.f32 %v15428_v9, %v15442_v60  ;;  %v1741_v54 = vsub.f32 %v15429_v61, %v15443_v17  ;;  %v1753_v23 = vsub.f32 %v15430_v16, %v15444_v11 }
 0x16e   :  { %v3229_v7 = vsub.f32 %v15427_v18, %v15441_v34  ;;  %v15445_v42 = vand.u32 4294901760, %v15431_v53  ;;  %v15446_v57 = vand.u32 4294901760, %v15432_v46  ;;  %v15447_v18 = vand.u32 4294901760, %v15433_v32 }
 0x16f   :  { %v15448_v9 = vand.u32 4294901760, %v15434_v33  ;;  %v15449_v61 = vand.u32 4294901760, %v15435_v19  ;;  %v15450_v16 = vand.u32 4294901760, %v15436_v26  ;;  %v1736_v20 = vand.u32 4294901760, %v1735_v52 }
 0x170   :  { %v3235_v0 = vsub.f32 %v15431_v53, %v15445_v42  ;;  %v3247_v34 = vsub.f32 %v15432_v46, %v15446_v57  ;;  %v1759_v60 = vsub.f32 %v15433_v32, %v15447_v18  ;;  %v15451_v53 = vld [vmem:[#allocation91_spill] sm:$0xff]  ;;  %v15452_v57 = vand.u32 4294901760, %v15438_v37 }
 0x171   :  { %v1771_v17 = vsub.f32 %v15434_v33, %v15448_v9  ;;  %v3253_v11 = vsub.f32 %v15435_v19, %v15449_v61  ;;  %v3265_v42 = vsub.f32 %v15436_v26, %v15450_v16  ;;  %v15453_v18 = vand.u32 4294901760, %v15439_v48  ;;  %v15454_v9 = vld [vmem:[#allocation92_spill] sm:$0xff] }
 0x172   :  { %v1765_v46 = vsub.f32 %v15438_v37, %v15452_v57  ;;  %v14391_v33 = vand.u32 4294901760, %v15454_v9  ;;  %v1748_v12 = vand.u32 4294901760, %v1747_v27  ;;  %v3230_v39 = vand.u32 4294901760, %v3229_v7  ;;  %v15456_v27 = vld [vmem:[#allocation18_spill] sm:$0xff] }
 0x173   :  { %v1777_v32 = vsub.f32 %v15439_v48, %v15453_v18  ;;  %v3242_v61 = vand.u32 4294901760, %v3241_v29  ;;  %v1742_v19 = vand.u32 4294901760, %v1741_v54  ;;  %v1754_v25 = vand.u32 4294901760, %v1753_v23 }
 0x174   :  { %v3236_v10 = vand.u32 4294901760, %v3235_v0  ;;  %v3248_v16 = vand.u32 4294901760, %v3247_v34  ;;  %v1760_v26 = vand.u32 4294901760, %v1759_v60  ;;  %v1772_v47 = vand.u32 4294901760, %v1771_v17  ;;  %v15458_v0 = vld [vmem:[#allocation19_spill] sm:$0xff]  ;;  %v15459_v60 = vld [vmem:[#allocation97_spill] sm:$0xff] }
 0x175   :  { %v3254_v52 = vand.u32 4294901760, %v3253_v11  ;;  %v3266_v63 = vand.u32 4294901760, %v3265_v42  ;;  %v15455_v13 = vand.u32 4294901760, %v15451_v53  ;;  %v1766_v37 = vand.u32 4294901760, %v1765_v46 }
 0x176   :  { %v1778_v18 = vand.u32 4294901760, %v1777_v32  ;;  %v10867_v7 = vsub.f32 %v15454_v9, %v14391_v33  ;;  %v14392_v23 = vand.u32 4294901760, %v15456_v27  ;;  %v10870_v29 = vpack.c.bf16 %v3218_v56, %v3206_v5  ;;  %v15478_v9 = vld [vmem:[#allocation22_spill] sm:$0xff] }
 0x177   :  { %v10862_v57 = vsub.f32 %v15451_v53, %v15455_v13  ;;  %v10872_v54 = vpack.c.bf16 %v1730_v45, %v1718_v6  ;;  %v14393_v34 = vand.u32 4294901760, %v15458_v0  ;;  %v14397_v17 = vand.u32 4294901760, %v15459_v60 }
 0x178   :  { %v10876_v11 = vpack.c.bf16 %v3224_v4, %v3212_v3  ;;  %v10878_v13 = vpack.c.bf16 %v1748_v12, %v1736_v20  ;;  %v10880_v46 = vpack.c.bf16 %v3242_v61, %v3230_v39  ;;  %v10882_v32 = vpack.c.bf16 %v1754_v25, %v1742_v19  ;;  %v15468_v39 = vld [vmem:[#allocation98_spill] sm:$0xff]  ;;  %v15472_v4 = vld [vmem:[#allocation20_spill] sm:$0xff]  ;;  %v15476_v20 = vld [vmem:[#allocation109_spill] sm:$0xff] }
 0x179   :  { %15457 = vst [vmem:[#allocation213_spill] sm:$0xff] %v10872_v54  ;;  %v10884_v42 = vpack.c.bf16 %v3248_v16, %v3236_v10  ;;  %v10886_v33 = vpack.c.bf16 %v1772_v47, %v1760_v26  ;;  %v10888_v5 = vpack.c.bf16 %v3266_v63, %v3254_v52  ;;  %v3260_v6 = vand.u32 4294901760, %v10862_v57  ;;  %v15469_v63 = vld [vmem:[#allocation33_spill] sm:$0xff]  ;;  %v15471_v19 = vld [vmem:[#allocation102_spill] sm:$0xff]  ;;  %v15473_v16 = vld [vmem:[#allocation104_spill] sm:$0xff] }
 0x17a   :  { %15460 = vst [vmem:[#allocation214_spill] sm:$0xff] %v10876_v11  ;;  %15461 = vst [vmem:[#allocation215_spill] sm:$0xff] %v10878_v13  ;;  %v10891_v56 = vpack.c.bf16 %v1778_v18, %v1766_v37  ;;  %v3272_v45 = vand.u32 4294901760, %v10867_v7  ;;  %v1783_v12 = vsub.f32 %v15456_v27, %v14392_v23  ;;  %v1795_v25 = vsub.f32 %v15458_v0, %v14393_v34  ;;  %v15470_v37 = vld [vmem:[#allocation100_spill] sm:$0xff]  ;;  %v15474_v57 = vld [vmem:[#allocation105_spill] sm:$0xff] }
 0x17b   :  { %15462 = vst [vmem:[#allocation216_spill] sm:$0xff] %v10880_v46  ;;  %15463 = vst [vmem:[#allocation217_spill] sm:$0xff] %v10882_v32  ;;  %v3277_v47 = vsub.f32 %v15459_v60, %v14397_v17  ;;  %v15475_v7 = vld [vmem:[#allocation106_spill] sm:$0xff]  ;;  %v15479_v3 = vand.u32 4294901760, %v15468_v39  ;;  %v15481_v61 = vld [vmem:[#allocation23_spill] sm:$0xff]  ;;  %v15482_v18 = vand.u32 4294901760, %v15469_v63 }
 0x17c   :  { %15464 = vst [vmem:[#allocation218_spill] sm:$0xff] %v10884_v42  ;;  %15465 = vst [vmem:[#allocation219_spill] sm:$0xff] %v10886_v33  ;;  %v15477_v0 = vld [vmem:[#allocation110_spill] sm:$0xff]  ;;  %v1784_v60 = vand.u32 4294901760, %v1783_v12  ;;  %v1796_v52 = vand.u32 4294901760, %v1795_v25  ;;  %v15483_v34 = vand.u32 4294901760, %v15470_v37 }
 0x17d   :  { %15466 = vst [vmem:[#allocation220_spill] sm:$0xff] %v10888_v5  ;;  %15467 = vst [vmem:[#allocation221_spill] sm:$0xff] %v10891_v56  ;;  %v3289_v10 = vsub.f32 %v15468_v39, %v15479_v3  ;;  %v15480_v26 = vld [vmem:[#allocation114_spill] sm:$0xff]  ;;  %v3278_v56 = vand.u32 4294901760, %v3277_v47  ;;  %v1789_v23 = vsub.f32 %v15469_v63, %v15482_v18  ;;  %v15484_v12 = vand.u32 4294901760, %v15471_v19 }
 0x17e   :  { %v1801_v27 = vsub.f32 %v15470_v37, %v15483_v34  ;;  %v15485_v3 = vand.u32 4294901760, %v15472_v4  ;;  %v15486_v48 = vand.u32 4294901760, %v15473_v16  ;;  %v15487_v47 = vand.u32 4294901760, %v15474_v57  ;;  %v15495_v33 = vld [vmem:[#allocation118_spill] sm:$0xff] }
 0x17f   :  { %v3283_v17 = vsub.f32 %v15471_v19, %v15484_v12  ;;  %v15488_v63 = vand.u32 4294901760, %v15475_v7  ;;  %v15489_v37 = vand.u32 4294901760, %v15476_v20  ;;  %v15490_v19 = vand.u32 4294901760, %v15477_v0 }
 0x180   :  { %v3295_v53 = vsub.f32 %v15472_v4, %v15485_v3  ;;  %v1807_v25 = vsub.f32 %v15473_v16, %v15486_v48  ;;  %v1819_v18 = vsub.f32 %v15474_v57, %v15487_v47  ;;  %v15491_v4 = vand.u32 4294901760, %v15478_v9 }
 0x181   :  { %v3301_v34 = vsub.f32 %v15475_v7, %v15488_v63  ;;  %v3313_v12 = vsub.f32 %v15476_v20, %v15489_v37  ;;  %v1813_v3 = vsub.f32 %v15477_v0, %v15490_v19  ;;  %v3290_v16 = vand.u32 4294901760, %v3289_v10  ;;  %v15494_v7 = vld [vmem:[#allocation115_spill] sm:$0xff]  ;;  %v15496_v19 = vld [vmem:[#allocation120_spill] sm:$0xff] }
 0x182   :  { %v1825_v48 = vsub.f32 %v15478_v9, %v15491_v4  ;;  %v15492_v39 = vand.u32 4294901760, %v15480_v26  ;;  %v15493_v57 = vand.u32 4294901760, %v15481_v61  ;;  %v14415_v5 = vand.u32 4294901760, %v15494_v7 }
 0x183   :  { %v1790_v37 = vand.u32 4294901760, %v1789_v23  ;;  %v1802_v20 = vand.u32 4294901760, %v1801_v27  ;;  %v14414_v32 = vand.u32 4294901760, %v15495_v33  ;;  %v14416_v0 = vand.u32 4294901760, %v15496_v19  ;;  %v15497_v23 = vld [vmem:[#allocation24_spill] sm:$0xff] }
 0x184   :  { %v3307_v47 = vsub.f32 %v15480_v26, %v15492_v39  ;;  %v3319_v63 = vsub.f32 %v15481_v61, %v15493_v57  ;;  %v3284_v42 = vand.u32 4294901760, %v3283_v17  ;;  %v3296_v13 = vand.u32 4294901760, %v3295_v53 }
 0x185   :  { %v1808_v4 = vand.u32 4294901760, %v1807_v25  ;;  %v1820_v10 = vand.u32 4294901760, %v1819_v18  ;;  %v3302_v9 = vand.u32 4294901760, %v3301_v34  ;;  %v3314_v46 = vand.u32 4294901760, %v3313_v12  ;;  %v15498_v25 = vld [vmem:[#allocation122_spill] sm:$0xff] }
 0x186   :  { %v1814_v54 = vand.u32 4294901760, %v1813_v3  ;;  %v1826_v39 = vand.u32 4294901760, %v1825_v48  ;;  %v3308_v26 = vand.u32 4294901760, %v3307_v47  ;;  %v3320_v11 = vand.u32 4294901760, %v3319_v63  ;;  %v15502_v48 = vld [vmem:[#allocation123_spill] sm:$0xff] }
 0x187   :  { %v1831_v57 = vsub.f32 %v15494_v7, %v14415_v5  ;;  %v10962_v61 = vpack.c.bf16 %v3272_v45, %v3260_v6  ;;  %v1843_v53 = vsub.f32 %v15495_v33, %v14414_v32  ;;  %v10970_v17 = vsub.f32 %v15496_v19, %v14416_v0  ;;  %v15506_v32 = vld [vmem:[#allocation25_spill] sm:$0xff] }
 0x188   :  { %v14417_v18 = vand.u32 4294901760, %v15498_v25  ;;  %v10973_v34 = vpack.c.bf16 %v1796_v52, %v1784_v60  ;;  %v10975_v12 = vpack.c.bf16 %v3290_v16, %v3278_v56  ;;  %v10977_v3 = vpack.c.bf16 %v1802_v20, %v1790_v37 }
 0x189   :  { %v14421_v6 = vand.u32 4294901760, %v15502_v48  ;;  %v10980_v45 = vpack.c.bf16 %v3296_v13, %v3284_v42  ;;  %v10982_v47 = vpack.c.bf16 %v1820_v10, %v1808_v4  ;;  %v10984_v63 = vpack.c.bf16 %v3314_v46, %v3302_v9  ;;  %v15510_v9 = vld [vmem:[#allocation126_spill] sm:$0xff] }
 0x18a   :  { %15499 = vst [vmem:[#allocation222_spill] sm:$0xff] %v10973_v34  ;;  %15500 = vst [vmem:[#allocation223_spill] sm:$0xff] %v10975_v12  ;;  %v14425_v5 = vand.u32 4294901760, %v15506_v32  ;;  %v10987_v0 = vpack.c.bf16 %v1826_v39, %v1814_v54  ;;  %v10989_v27 = vpack.c.bf16 %v3320_v11, %v3308_v26  ;;  %v1832_v60 = vand.u32 4294901760, %v1831_v57  ;;  %v15511_v11 = vld [vmem:[#allocation127_spill] sm:$0xff]  ;;  %v15512_v26 = vld [vmem:[#allocation26_spill] sm:$0xff] }
 0x18b   :  { %15501 = vst [vmem:[#allocation224_spill] sm:$0xff] %v10977_v3  ;;  %15503 = vst [vmem:[#allocation225_spill] sm:$0xff] %v10980_v45  ;;  %v15509_v56 = vand.u32 4294901760, %v15497_v23  ;;  %v1844_v16 = vand.u32 4294901760, %v1843_v53  ;;  %v3326_v52 = vand.u32 4294901760, %v10970_v17  ;;  %v1837_v13 = vsub.f32 %v15498_v25, %v14417_v18  ;;  %v15513_v4 = vld [vmem:[#allocation130_spill] sm:$0xff] }
 0x18c   :  { %15504 = vst [vmem:[#allocation226_spill] sm:$0xff] %v10982_v47  ;;  %15505 = vst [vmem:[#allocation227_spill] sm:$0xff] %v10984_v63  ;;  %v1849_v54 = vsub.f32 %v15502_v48, %v14421_v6  ;;  %v3331_v39 = vsub.f32 %v15506_v32, %v14425_v5  ;;  %v15514_v57 = vld [vmem:[#allocation131_spill] sm:$0xff]  ;;  %v15516_v18 = vld [vmem:[#allocation134_spill] sm:$0xff]  ;;  %v15521_v7 = vand.u32 4294901760, %v15510_v9  ;;  %v15524_v19 = vand.u32 4294901760, %v15512_v26 }
 0x18d   :  { %15507 = vst [vmem:[#allocation228_spill] sm:$0xff] %v10987_v0  ;;  %15508 = vst [vmem:[#allocation229_spill] sm:$0xff] %v10989_v27  ;;  %v3337_v20 = vsub.f32 %v15497_v23, %v15509_v56  ;;  %v15515_v17 = vld [vmem:[#allocation27_spill] sm:$0xff]  ;;  %v14433_v46 = vand.u32 4294901760, %v15516_v18  ;;  %v15517_v23 = vld [vmem:[#allocation136_spill] sm:$0xff]  ;;  %v11014_v37 = vpack.c.bf16 %v1844_v16, %v1832_v60  ;;  %v1838_v10 = vand.u32 4294901760, %v1837_v13 }
 0x18e   :  { %v15518_v6 = vld [vmem:[#allocation137_spill] sm:$0xff]  ;;  %v15519_v42 = vld [vmem:[#allocation138_spill] sm:$0xff]  ;;  %v3343_v5 = vsub.f32 %v15510_v9, %v15521_v7  ;;  %v1850_v0 = vand.u32 4294901760, %v1849_v54  ;;  %v15523_v56 = vand.u32 4294901760, %v15511_v11  ;;  %v1867_v48 = vsub.f32 %v15512_v26, %v15524_v19  ;;  %v15535_v63 = vld [vmem:[#allocation143_spill] sm:$0xff] }
 0x18f   :  { %v3338_v25 = vand.u32 4294901760, %v3337_v20  ;;  %15520 = vst [vmem:[#allocation230_spill] sm:$0xff] %v11014_v37  ;;  %v15522_v32 = vld [vmem:[#allocation30_spill] sm:$0xff]  ;;  %v15525_v33 = vand.u32 4294901760, %v15513_v4  ;;  %v3332_v16 = vand.u32 4294901760, %v3331_v39  ;;  %v15526_v13 = vand.u32 4294901760, %v15514_v57 }
 0x190   :  { %v1855_v20 = vsub.f32 %v15511_v11, %v15523_v56  ;;  %v15527_v53 = vand.u32 4294901760, %v15515_v17  ;;  %v1873_v56 = vsub.f32 %v15516_v18, %v14433_v46  ;;  %v15528_v11 = vand.u32 4294901760, %v15517_v23  ;;  %v15533_v46 = vld [vmem:[#allocation141_spill] sm:$0xff]  ;;  %v15534_v37 = vld [vmem:[#allocation142_spill] sm:$0xff] }
 0x191   :  { %v3349_v60 = vsub.f32 %v15513_v4, %v15525_v33  ;;  %v3361_v7 = vsub.f32 %v15514_v57, %v15526_v13  ;;  %v15529_v26 = vand.u32 4294901760, %v15518_v6  ;;  %v15530_v39 = vand.u32 4294901760, %v15519_v42  ;;  %v15531_v57 = vld [vmem:[#allocation140_spill] sm:$0xff] }
 0x192   :  { %v1861_v54 = vsub.f32 %v15515_v17, %v15527_v53  ;;  %v3355_v19 = vsub.f32 %v15517_v23, %v15528_v11  ;;  %v3344_v9 = vand.u32 4294901760, %v3343_v5  ;;  %v15532_v53 = vand.u32 4294901760, %v15522_v32 }
 0x193   :  { %v3367_v33 = vsub.f32 %v15518_v6, %v15529_v26  ;;  %v1879_v13 = vsub.f32 %v15519_v42, %v15530_v39  ;;  %v14438_v27 = vand.u32 4294901760, %v15534_v37  ;;  %v1856_v11 = vand.u32 4294901760, %v1855_v20  ;;  %v15536_v39 = vld [vmem:[#allocation31_spill] sm:$0xff] }
 0x194   :  { %v1891_v17 = vsub.f32 %v15522_v32, %v15532_v53  ;;  %v1868_v23 = vand.u32 4294901760, %v1867_v48  ;;  %v3350_v47 = vand.u32 4294901760, %v3349_v60  ;;  %v14439_v26 = vand.u32 4294901760, %v15535_v63  ;;  %v15555_v32 = vld [vmem:[#allocation151_spill] sm:$0xff] }
 0x195   :  { %v3362_v6 = vand.u32 4294901760, %v3361_v7  ;;  %v1862_v3 = vand.u32 4294901760, %v1861_v54  ;;  %v1874_v45 = vand.u32 4294901760, %v1873_v56  ;;  %v14440_v42 = vand.u32 4294901760, %v15536_v39  ;;  %v15539_v7 = vld [vmem:[#allocation145_spill] sm:$0xff] }
 0x196   :  { %v3356_v4 = vand.u32 4294901760, %v3355_v19  ;;  %v3368_v5 = vand.u32 4294901760, %v3367_v33  ;;  %v1880_v12 = vand.u32 4294901760, %v1879_v13  ;;  %v15537_v34 = vand.u32 4294901760, %v15531_v57 }
 0x197   :  { %v1892_v18 = vand.u32 4294901760, %v1891_v17  ;;  %v15538_v20 = vand.u32 4294901760, %v15533_v46  ;;  %v11068_v60 = vsub.f32 %v15534_v37, %v14438_v27  ;;  %v11071_v56 = vpack.c.bf16 %v3338_v25, %v3326_v52  ;;  %v15540_v17 = vld [vmem:[#allocation146_spill] sm:$0xff]  ;;  %v15541_v25 = vld [vmem:[#allocation147_spill] sm:$0xff] }
 0x198   :  { %v11058_v53 = vsub.f32 %v15531_v57, %v15537_v34  ;;  %v11073_v19 = vpack.c.bf16 %v1850_v0, %v1838_v10  ;;  %v11078_v34 = vsub.f32 %v15535_v63, %v14439_v26  ;;  %v11081_v13 = vpack.c.bf16 %v3344_v9, %v3332_v16 }
 0x199   :  { %v11063_v48 = vsub.f32 %v15533_v46, %v15538_v20  ;;  %v11083_v20 = vpack.c.bf16 %v1868_v23, %v1856_v11  ;;  %v11088_v27 = vsub.f32 %v15536_v39, %v14440_v42  ;;  %v14441_v52 = vand.u32 4294901760, %v15541_v25 }
 0x19a   :  { %v11091_v0 = vpack.c.bf16 %v3362_v6, %v3350_v47  ;;  %v11093_v10 = vpack.c.bf16 %v1874_v45, %v1862_v3  ;;  %v11095_v54 = vpack.c.bf16 %v3368_v5, %v3356_v4  ;;  %v11098_v33 = vpack.c.bf16 %v1892_v18, %v1880_v12  ;;  %v15547_v5 = vld [vmem:[#allocation149_spill] sm:$0xff]  ;;  %v15548_v6 = vld [vmem:[#allocation150_spill] sm:$0xff] }
 0x19b   :  { %v15545_v16 = vand.u32 4294901760, %v15539_v7  ;;  %v15546_v3 = vand.u32 4294901760, %v15540_v17  ;;  %v14444_v47 = vand.u32 4294901760, %v10626_v30  ;;  %v14445_v18 = vand.u32 4294901760, %v10631_v35 }
 0x19c   :  { %15542 = vst [vmem:[#allocation231_spill] sm:$0xff] %v11093_v10  ;;  %15543 = vst [vmem:[#allocation232_spill] sm:$0xff] %v11095_v54  ;;  %v11119_v4 = vsub.f32 %v15541_v25, %v14441_v52  ;;  %v14447_v42 = vand.u32 4294901760, %v10637_v49  ;;  %v14450_v12 = vand.u32 4294901760, %v10642_v43  ;;  %v14456_v9 = vand.u32 4294901760, %v10648_v22 }
 0x19d   :  { %15544 = vst [vmem:[#allocation233_spill] sm:$0xff] %v11098_v33  ;;  %v11105_v11 = vsub.f32 %v15539_v7, %v15545_v16  ;;  %v11111_v45 = vsub.f32 %v15540_v17, %v15546_v3  ;;  %v3493_v3 = vsub.f32 %v10626_v30, %v14444_v47  ;;  %v3505_v23 = vsub.f32 %v10631_v35, %v14445_v18 }
 0x19e   :  { %v2005_v52 = vsub.f32 %v10637_v49, %v14447_v42  ;;  %v14451_v16 = vand.u32 4294901760, %v10645_v50  ;;  %v2017_v18 = vsub.f32 %v10642_v43, %v14450_v12  ;;  %v3511_v42 = vsub.f32 %v10648_v22, %v14456_v9 }
 0x19f   :  { %v3494_v17 = vand.u32 4294901760, %v3493_v3  ;;  %v3506_v47 = vand.u32 4294901760, %v3505_v23  ;;  %v14454_v39 = vand.u32 4294901760, %v10651_v14  ;;  %v14455_v23 = vand.u32 4294901760, %v10653_v2 }
 0x1a0   :  { %v2006_v7 = vand.u32 4294901760, %v2005_v52  ;;  %v3499_v26 = vsub.f32 %v10645_v50, %v14451_v16  ;;  %v2018_v25 = vand.u32 4294901760, %v2017_v18  ;;  %v14458_v3 = vand.u32 4294901760, %v10655_v21  ;;  %v15598_v50 = vld [vmem:[#allocation209_spill] sm:$0xff] }
 0x1a1   :  { %v11148_v63 = vpack.c.bf16 %v3506_v47, %v3494_v17  ;;  %v3512_v52 = vand.u32 4294901760, %v3511_v42  ;;  %v2023_v16 = vsub.f32 %v10651_v14, %v14454_v39  ;;  %v14462_v37 = vand.u32 4294901760, %v10657_v44 }
 0x1a2   :  { %v3500_v12 = vand.u32 4294901760, %v3499_v26  ;;  %v11156_v46 = vpack.c.bf16 %v2018_v25, %v2006_v7  ;;  %v2035_v17 = vsub.f32 %v10653_v2, %v14455_v23  ;;  %v3517_v47 = vsub.f32 %v10655_v21, %v14458_v3 }
 0x1a3   :  { %15549 = vst [vmem:[#allocation234_spill] sm:$0xff] %v11148_v63  ;;  %v14463_v18 = vand.u32 4294901760, %v10659_v41  ;;  %v15551_v42 = vand.u32 15, %v10704_v38  ;;  %v2024_v7 = vand.u32 4294901760, %v2023_v16  ;;  %v3529_v25 = vsub.f32 %v10657_v44, %v14462_v37 }
 0x1a4   :  { %15550 = vst [vmem:[#allocation235_spill] sm:$0xff] %v11156_v46  ;;  %v11171_v39 = vpack.c.bf16 %v3512_v52, %v3500_v12  ;;  %v14464_v23 = vand.u32 4294901760, %v10661_v15  ;;  %v2036_v9 = vand.u32 4294901760, %v2035_v17  ;;  %v3518_v57 = vand.u32 4294901760, %v3517_v47 }
 0x1a5   :  { %vm11167_vm1 = vcmp.eq.s32.totalorder %v15551_v42, 0  ;;  %v2029_v3 = vsub.f32 %v10659_v41, %v14463_v18  ;;  %v14465_v42 = vand.u32 4294901760, %v10663_v51  ;;  %v3530_v52 = vand.u32 4294901760, %v3529_v25 }
 0x1a6   :  { %15554 = vst [vmem:[#allocation236_spill] sm:$0xff] %v11171_v39  ;;  %v2041_v16 = vsub.f32 %v10661_v15, %v14464_v23  ;;  %v14466_v37 = vand.u32 4294901760, %v10665_v55  ;;  %v11187_v46 = vpack.c.bf16 %v2036_v9, %v2024_v7 }
 0x1a7   :  { %v2030_v39 = vand.u32 4294901760, %v2029_v3  ;;  %v3523_v18 = vsub.f32 %v10663_v51, %v14465_v42  ;;  %v11193_v12 = vpack.c.bf16 %v3530_v52, %v3518_v57  ;;  %v15559_v3 = vand.u32 4294901760, %v15548_v6 }
 0x1a8   :  { %15556 = vst [vmem:[#allocation151_spill] sm:$0xff] %v11187_v46  ;;  %v2042_v25 = vand.u32 4294901760, %v2041_v16  ;;  %v3535_v23 = vsub.f32 %v10665_v55, %v14466_v37  ;;  %v15560_v16 = vld [vmem:[#allocation152_spill] sm:$0xff] }
 0x1a9   :  { %15557 = vst [vmem:[#allocation237_spill] sm:$0xff] %v11193_v12  ;;  %v11208_v7 = vsub.f32 %v15548_v6, %v15559_v3 }
 0x1aa   :  { %v11213_v46 = vpack.c.bf16 %v2042_v25, %v2030_v39 }
 0x1ac   :  { %15561 = vst [vmem:[#allocation238_spill] sm:$0xff] %v11213_v46  ;;  %v15573_v46 = vand.u32 4294901760, %v10669_v8 }
 0x1ea   :  { %v1103_v38 = vpop.f32.mrb[0].mxu0 }
 0x1eb   :  { %v8808_v17 = vadd.f32 %v1103_v38, %v10773_v59  ;;  %v1105_v47 = vpop.f32.mrb[1].mxu0  ;;  %v15558_v38 = vand.u32 4294901760, %v15547_v5 }
 0x1ec   :  { %v8809_v63 = vadd.f32 %v1105_v47, %v10777_v24  ;;  %v3524_v47 = vand.u32 4294901760, %v3523_v18 }
 0x1ed   :  { %v11198_v33 = vmax.f32 %v8808_v17, 0.0  ;;  %v11203_v9 = vsub.f32 %v15547_v5, %v15558_v38  ;;  %v3536_v17 = vand.u32 4294901760, %v3535_v23 }
 0x1ee   :  { %v11210_v57 = vmax.f32 %v8809_v63, 0.0  ;;  %v1110_v52 = vpop.f32.mrb[2].mxu0 }
 0x1ef   :  { %v14469_v37 = vrot.slane %v11198_v33, 7  ;;  %v11217_v12 = vand.u32 4294901760, %v11198_v33  ;;  %v8810_v38 = vadd.f32 %v1110_v52, %v10773_v59  ;;  %v1112_v5 = vpop.f32.mrb[3].mxu0  ;;  %v11236_v3 = vpack.c.bf16 %v3536_v17, %v3524_v47 }
 0x1f0   :  { %v11223_v63 = vand.u32 4294901760, %v11210_v57  ;;  %v8811_v42 = vadd.f32 %v1112_v5, %v10777_v24  ;;  %v15568_v17 = vrot.slane %v11210_v57, 7 }
 0x1f1   :  { %15562 = vst [vmem:[#allocation239_spill] sm:$0xff] %v11217_v12  ;;  %v1225_v23 = vsel %vm1202_vm0, 0.0, %v14469_v37  ;;  %v11230_v25 = vmax.f32 %v8810_v38, 0.0  ;;  %v11234_v52 = vsub.f32 %v11198_v33, %v11217_v12  ;;  %15566 = vst [vmem:[#allocation243_spill] sm:$0xff] %v11236_v3  ;;  %v1248_v38 = vrot.slane %v11198_v33, 1 }
 0x1f2   :  { %15563 = vst [vmem:[#allocation240_spill] sm:$0xff] %v11223_v63  ;;  %v11238_v18 = vmax.f32 %v8811_v42, 0.0  ;;  %v1117_v6 = vpop.f32.mrb[4].mxu0  ;;  %v11242_v5 = vsub.f32 %v11210_v57, %v11223_v63  ;;  %v1235_v42 = vsel %vm11167_vm1, 0.0, %v1225_v23  ;;  %v1226_v3 = vsel %vm1202_vm0, 0.0, %v15568_v17 }
 0x1f3   :  { %15564 = vst [vmem:[#allocation241_spill] sm:$0xff] %v11230_v25  ;;  %15565 = vst [vmem:[#allocation242_spill] sm:$0xff] %v11234_v52  ;;  %v14476_v37 = vrot.slane %v11230_v25, 1  ;;  %v8812_v12 = vadd.f32 %v1117_v6, %v10773_v59  ;;  %v1119_v10 = vpop.f32.mrb[5].mxu0  ;;  %v11272_v51 = vand.u32 4294901760, %v1235_v42  ;;  %v1236_v23 = vsel %vm11167_vm1, 0.0, %v1226_v3 }
 0x1f4   :  { %15567 = vst [vmem:[#allocation244_spill] sm:$0xff] %v11242_v5  ;;  %v8813_v47 = vadd.f32 %v1119_v10, %v10777_v24  ;;  %v11267_v10 = vand.u32 4294901760, %v11230_v25  ;;  %v11270_v17 = vand.u32 4294901760, %v11238_v18  ;;  %v1205_v15 = vrot.slane %v11230_v25, 7 }
 0x1f5   :  { %v11260_v54 = vsel %vm1247_vm2, %v1248_v38, %v14476_v37  ;;  %v11262_v6 = vmax.f32 %v8812_v12, 0.0  ;;  %15572 = vst [vmem:[#allocation248_spill] sm:$0xff] %v11272_v51  ;;  %v11277_v38 = vsub.f32 %v10669_v8, %v15573_v46  ;;  %v1207_v41 = vrot.slane %v11238_v18, 7 }
 0x1f6   :  { %15569 = vst [vmem:[#allocation245_spill] sm:$0xff] %v11260_v54  ;;  %15570 = vst [vmem:[#allocation246_spill] sm:$0xff] %v11267_v10  ;;  %v1124_v39 = vpop.f32.mrb[6].mxu0  ;;  %v11279_v12 = vmax.f32 %v8813_v47, 0.0  ;;  %v15575_v46 = vand.u32 15, %v10769_v40  ;;  %v15579_v3 = vand.u32 4294901760, %v11242_v5  ;;  %v11309_v40 = vsub.f32 %v1235_v42, %v11272_v51 }
 0x1f7   :  { %15571 = vst [vmem:[#allocation247_spill] sm:$0xff] %v11270_v17  ;;  %v8814_v37 = vadd.f32 %v1124_v39, %v10773_v59  ;;  %v1126_v55 = vpop.f32.mrb[7].mxu0  ;;  %v11289_v21 = vand.u32 4294901760, %v11262_v6  ;;  %v15580_v54 = vand.u32 4294901760, %v11234_v52  ;;  %v11306_v8 = vand.u32 4294901760, %v1236_v23 }
 0x1f8   :  { %vm11293_vm3 = vcmp.eq.s32.totalorder %v15575_v46, 0  ;;  %v8815_v26 = vadd.f32 %v1126_v55, %v10777_v24  ;;  %v3092_v39 = vsub.f32 %v11242_v5, %v15579_v3  ;;  %15582 = vst [vmem:[#allocation252_spill] sm:$0xff] %v11309_v40  ;;  %v11313_v46 = vsub.f32 %v11238_v18, %v11270_v17 }
 0x1f9   :  { %15574 = vst [vmem:[#allocation249_spill] sm:$0xff] %v11289_v21  ;;  %v11297_v59 = vmax.f32 %v8814_v37, 0.0  ;;  %v3098_v44 = vsub.f32 %v11234_v52, %v15580_v54  ;;  %15581 = vst [vmem:[#allocation251_spill] sm:$0xff] %v11306_v8  ;;  %v11317_v55 = vsub.f32 %v11230_v25, %v11267_v10  ;;  %v11321_v37 = vand.u32 4294901760, %v11279_v12 }
 0x1fa   :  { %15583 = vst [vmem:[#allocation253_spill] sm:$0xff] %v11313_v46  ;;  %v11324_v3 = vmax.f32 %v8815_v26, 0.0  ;;  %v3093_v52 = vand.u32 4294901760, %v3092_v39  ;;  %v11330_v5 = vsub.f32 %v1236_v23, %v11306_v8  ;;  %v14503_v51 = vand.u32 4294901760, %v11313_v46  ;;  %v15594_v23 = vld [vmem:[#allocation208_spill] sm:$0xff] }
 0x1fb   :  { %15578 = vst [vmem:[#allocation250_spill] sm:$0xff] %v11297_v59  ;;  %15584 = vst [vmem:[#allocation254_spill] sm:$0xff] %v11317_v55  ;;  %v11327_v42 = vand.u32 4294901760, %v11297_v59  ;;  %v3099_v17 = vand.u32 4294901760, %v3098_v44  ;;  %v14508_v25 = vand.u32 4294901760, %v11309_v40  ;;  %v15590_v54 = vrot.slane %v11210_v57, 7 }
 0x1fc   :  { %15585 = vst [vmem:[#allocation255_spill] sm:$0xff] %v11321_v37  ;;  %15586 = vst [vmem:[#allocation256_spill] sm:$0xff] %v11324_v3  ;;  %v1215_v10 = vrot.slane %v11324_v3, 7  ;;  %v11335_v24 = vand.u32 4294901760, %v11324_v3  ;;  %3094 = vmatprep.mubr.f32.mxu1 %v3093_v52  ;;  %v3108_v39 = vsub.f32 %v11313_v46, %v14503_v51  ;;  %v11353_v52 = vsub.f32 %v11279_v12, %v11321_v37 }
 0x1fd   :  { %15587 = vst [vmem:[#allocation257_spill] sm:$0xff] %v11327_v42  ;;  %15588 = vst [vmem:[#allocation258_spill] sm:$0xff] %v11330_v5  ;;  %v1208_v2 = vsel %vm1202_vm0, %v15590_v54, %v1207_v41  ;;  %3100 = vmatmul.mubr.f32.vlgmr.msra.gmra.mrb[0].mxu1 %v3099_v17  ;;  %v1628_v44 = vsub.f32 %v11309_v40, %v14508_v25  ;;  %v15593_v26 = vrot.slane %v11198_v33, 7  ;;  %v15595_v46 = vand.u32 4294901760, %v11330_v5 }
 0x1fe   :  { %15589 = vst [vmem:[#allocation259_spill] sm:$0xff] %v11335_v24  ;;  %v11349_v14 = vand.u32 4294901760, %v1208_v2  ;;  %15592 = vst [vmem:[#allocation261_spill] sm:$0xff] %v11353_v52  ;;  %7915 = vmatpush1.bf16.msra.mxu1 %v15594_v23  ;;  %v3109_v54 = vand.u32 4294901760, %v3108_v39  ;;  %v15596_v22 = vand.u32 4294901760, %v11317_v55  ;;  %v11374_v23 = vsub.f32 %v11262_v6, %v11289_v21 }
 0x1ff   :  { %v1206_v51 = vsel %vm1202_vm0, %v15593_v26, %v1205_v15  ;;  %v1622_v17 = vsub.f32 %v11330_v5, %v15595_v46  ;;  %7917 = vmatprep.subr.bf16.mxu1 %v15598_v50  ;;  %v1629_v37 = vand.u32 4294901760, %v1628_v44  ;;  %v14519_v26 = vand.u32 4294901760, %v11353_v52 }
 0x200   :  { %15591 = vst [vmem:[#allocation260_spill] sm:$0xff] %v11349_v14  ;;  %v3114_v25 = vsub.f32 %v11317_v55, %v15596_v22  ;;  %v11365_v40 = vand.u32 4294901760, %v1206_v51  ;;  %v11369_v33 = vsub.f32 %v1208_v2, %v11349_v14  ;;  %15600 = vst [vmem:[#allocation262_spill] sm:$0xff] %v11374_v23  ;;  %3110 = vmatprep.mubr.f32.mxu1 %v3109_v54  ;;  %v15602_v22 = vrot.slane %v11279_v12, 7 }
 0x201   :  { %v1623_v46 = vand.u32 4294901760, %v1622_v17  ;;  %v3124_v2 = vsub.f32 %v11353_v52, %v14519_v26  ;;  %v14523_v55 = vand.u32 4294901760, %v11374_v23  ;;  %v15605_v54 = vrot.slane %v11262_v6, 7  ;;  %v15606_v26 = vld [vmem:[#allocation211_spill] sm:$0xff]  ;;  %v15607_v52 = vld [vmem:[#allocation210_spill] sm:$0xff] }
 0x202   :  { %15597 = vst [vmem:[#allocation208_spill] sm:$0xff] %v11365_v40  ;;  %15599 = vst [vmem:[#allocation209_spill] sm:$0xff] %v11369_v33  ;;  %v3115_v39 = vand.u32 4294901760, %v3114_v25  ;;  %v11377_v5 = vsub.f32 %v1206_v51, %v11365_v40  ;;  %v1212_v50 = vsel %vm1202_vm0, %v1207_v41, %v15602_v22  ;;  %v14522_v44 = vand.u32 4294901760, %v11369_v33  ;;  %7919 = vmatpush1.bf16.msra.mxu1 %v15606_v26 }
 0x203   :  { %v1240_v17 = vsel %vm11293_vm3, 0.0, %v1212_v50  ;;  %1624 = vmatprep.mubr.f32.mxu0 %v1623_v46  ;;  %v11394_v41 = vsub.f32 %v11324_v3, %v11335_v24  ;;  %v1210_v22 = vsel %vm1202_vm0, %v1205_v15, %v15605_v54  ;;  %v3130_v50 = vsub.f32 %v11374_v23, %v14523_v55  ;;  %7921 = vmatprep.subr.bf16.mxu1 %v10870_v29  ;;  %v15611_v55 = vld [vmem:[#allocation212_spill] sm:$0xff] }
 0x204   :  { %15601 = vst [vmem:[#allocation263_spill] sm:$0xff] %v11377_v5  ;;  %3116 = vmatmul.mubr.f32.gmra.mrb[2].mxu1 %v3115_v39  ;;  %v11390_v25 = vand.u32 4294901760, %v1240_v17  ;;  %1630 = vmatmul.mubr.f32.vlgmr.msra.gmra.mrb[8].mxu0 %v1629_v37  ;;  %v1638_v46 = vsub.f32 %v11369_v33, %v14522_v44  ;;  %v3125_v39 = vand.u32 4294901760, %v3124_v2  ;;  %v1239_v51 = vsel %vm11293_vm3, 0.0, %v1210_v22 }
 0x205   :  { %15604 = vst [vmem:[#allocation265_spill] sm:$0xff] %v11394_v41  ;;  %7531 = vmatpush1.bf16.msra.mxu0 %v15607_v52  ;;  %v15608_v15 = vand.u32 4294901760, %v11377_v5  ;;  %v14526_v2 = vand.u32 4294901760, %v11394_v41  ;;  %v11417_v54 = vand.u32 4294901760, %v1239_v51  ;;  %v3131_v47 = vand.u32 4294901760, %v3130_v50 }
 0x206   :  { %15603 = vst [vmem:[#allocation264_spill] sm:$0xff] %v11390_v25  ;;  %v11414_v26 = vsub.f32 %v1240_v17, %v11390_v25  ;;  %v1639_v44 = vand.u32 4294901760, %v1638_v46  ;;  %7533 = vmatprep.subr.bf16.mxu0 %v15611_v55  ;;  %3126 = vmatprep.mubr.f32.mxu1 %v3125_v39  ;;  %v11422_v52 = vsub.f32 %v11297_v59, %v11327_v42  ;;  %v15613_v29 = vrot.slane %v11279_v12, 7  ;;  %v15618_v17 = vld [vmem:[#allocation214_spill] sm:$0xff] }
 0x207   :  { %v1644_v37 = vsub.f32 %v11377_v5, %v15608_v15  ;;  %15610 = vst [vmem:[#allocation210_spill] sm:$0xff] %v11417_v54  ;;  %v3140_v23 = vsub.f32 %v11394_v41, %v14526_v2  ;;  %v11432_v46 = vsub.f32 %v1239_v51, %v11417_v54  ;;  %v15616_v50 = vrot.slane %v11297_v59, 7  ;;  %7923 = vmatpush1.bf16.msra.mxu1 %v15618_v17  ;;  %v15621_v41 = vld [vmem:[#allocation213_spill] sm:$0xff]  ;;  %v15622_v5 = vld [vmem:[#allocation216_spill] sm:$0xff] }
 0x208   :  { %15609 = vst [vmem:[#allocation211_spill] sm:$0xff] %v11414_v26  ;;  %15612 = vst [vmem:[#allocation212_spill] sm:$0xff] %v11422_v52  ;;  %v1216_v22 = vsel %vm1202_vm0, %v15613_v29, %v1215_v10  ;;  %1640 = vmatprep.mubr.f32.mxu0 %v1639_v44  ;;  %3132 = vmatmul.mubr.f32.gmra.mrb[4].mxu1 %v3131_v47  ;;  %v15617_v10 = vrot.slane %v11262_v6, 7  ;;  %v2048_v29 = vand.u32 4294901760, %v11277_v38  ;;  %v15619_v51 = vand.u32 4294901760, %v11414_v26 }
 0x209   :  { %v1645_v15 = vand.u32 4294901760, %v1644_v37  ;;  %15614 = vst [vmem:[#allocation266_spill] sm:$0xff] %v11432_v46  ;;  %v11435_v39 = vand.u32 4294901760, %v1216_v22  ;;  %v3141_v47 = vand.u32 4294901760, %v3140_v23  ;;  %7535 = vmatpush1.bf16.msra.mxu0 %v15621_v41  ;;  %7925 = vmatprep.subr.bf16.mxu1 %v15622_v5  ;;  %v15625_v17 = vand.u32 4294901760, %v10671_v58  ;;  %v15626_v23 = vld [vmem:[#allocation205_spill] sm:$0xff] }
 0x20a   :  { %v1214_v37 = vsel %vm1202_vm0, %v15617_v10, %v15616_v50  ;;  %v1654_v44 = vsub.f32 %v11414_v26, %v15619_v51  ;;  %v15623_v50 = vand.u32 4294901760, %v11422_v52  ;;  %v14543_v51 = vand.u32 4294901760, %v15626_v23  ;;  %v15627_v26 = vld [vmem:[#allocation215_spill] sm:$0xff] }
 0x20b   :  { %15615 = vst [vmem:[#allocation267_spill] sm:$0xff] %v11435_v39  ;;  %1646 = vmatmul.mubr.f32.gmra.mrb[10].mxu0 %v1645_v15  ;;  %v11448_v55 = vand.u32 4294901760, %v1214_v37  ;;  %v11456_v15 = vsub.f32 %v1216_v22, %v11435_v39  ;;  %v2059_v10 = vsub.f32 %v10671_v58, %v15625_v17  ;;  %7537 = vmatprep.subr.bf16.mxu0 %v15627_v26  ;;  %v15628_v41 = vand.u32 4294901760, %v11432_v46 }
 0x20c   :  { %v3146_v38 = vsub.f32 %v11422_v52, %v15623_v50  ;;  %v1655_v2 = vand.u32 4294901760, %v1654_v44  ;;  %3142 = vmatprep.mubr.f32.mxu1 %v3141_v47  ;;  %v15630_v50 = vld [vmem:[#allocation206_spill] sm:$0xff]  ;;  %v2053_v44 = vsub.f32 %v15626_v23, %v14543_v51  ;;  %v15634_v51 = vld [vmem:[#allocation161_spill] sm:$0xff] }
 0x20d   :  { %15620 = vst [vmem:[#allocation214_spill] sm:$0xff] %v11448_v55  ;;  %15624 = vst [vmem:[#allocation213_spill] sm:$0xff] %v11456_v15  ;;  %v1660_v5 = vsub.f32 %v11432_v46, %v15628_v41  ;;  %v11467_v33 = vsub.f32 %v1214_v37, %v11448_v55  ;;  %v14544_v22 = vand.u32 4294901760, %v15630_v50  ;;  %v14549_v39 = vand.u32 4294901760, %v11456_v15  ;;  %v15631_v47 = vld [vmem:[#allocation218_spill] sm:$0xff]  ;;  %v15632_v41 = vld [vmem:[#allocation160_spill] sm:$0xff] }
 0x20e   :  { %v3147_v52 = vand.u32 4294901760, %v3146_v38  ;;  %v2060_v54 = vand.u32 4294901760, %v2059_v10  ;;  %1656 = vmatprep.mubr.f32.mxu0 %v1655_v2  ;;  %7927 = vmatpush1.bf16.msra.mxu1 %v15631_v47  ;;  %v15633_v38 = vld [vmem:[#allocation217_spill] sm:$0xff]  ;;  %v2054_v47 = vand.u32 4294901760, %v2053_v44  ;;  %v15641_v2 = vand.u32 4294901760, %v10164_v1 }
 0x20f   :  { %15629 = vst [vmem:[#allocation216_spill] sm:$0xff] %v11467_v33  ;;  %v1661_v26 = vand.u32 4294901760, %v1660_v5  ;;  %v14552_v17 = vand.u32 4294901760, %v11467_v33  ;;  %v2065_v37 = vsub.f32 %v15630_v50, %v14544_v22  ;;  %7539 = vmatpush1.bf16.msra.mxu0 %v15633_v38  ;;  %v1670_v10 = vsub.f32 %v11456_v15, %v14549_v39  ;;  %v15636_v38 = vld [vmem:[#allocation162_spill] sm:$0xff]  ;;  %v15637_v15 = vld [vmem:[#allocation219_spill] sm:$0xff]  ;;  %v15644_v55 = vld [vmem:[#allocation221_spill] sm:$0xff] }
 0x210   :  { %3148 = vmatmul.mubr.f32.gmra.mrb[6].mxu1 %v3147_v52  ;;  %v11485_v5 = vpack.c.bf16 %v2060_v54, %v2048_v29  ;;  %v15635_v22 = vand.u32 4294901760, %v15555_v32  ;;  %7541 = vmatprep.subr.bf16.mxu0 %v15637_v15  ;;  %v15638_v54 = vld [vmem:[#allocation220_spill] sm:$0xff]  ;;  %v15639_v29 = vand.u32 4294901760, %v15560_v16 }
 0x211   :  { %1662 = vmatmul.mubr.f32.gmra.mrb[12].mxu0 %v1661_v26  ;;  %3539 = vmatprep.mubr.f32.mxu1 %v11223_v63  ;;  %v1676_v46 = vsub.f32 %v11467_v33, %v14552_v17  ;;  %v2066_v42 = vand.u32 4294901760, %v2065_v37  ;;  %v1671_v39 = vand.u32 4294901760, %v1670_v10  ;;  %v15640_v26 = vand.u32 4294901760, %v10158_v28 }
 0x212   :  { %v1909_v52 = vsub.f32 %v15555_v32, %v15635_v22  ;;  %7929 = vmatprep.subr.bf16.mxu1 %v15638_v54  ;;  %v1921_v44 = vsub.f32 %v15560_v16, %v15639_v29  ;;  %v3415_v22 = vsub.f32 %v10164_v1, %v15641_v2  ;;  %v15642_v37 = vand.u32 4294901760, %v10169_v36 }
 0x213   :  { %v3403_v17 = vsub.f32 %v10158_v28, %v15640_v26  ;;  %v1677_v63 = vand.u32 4294901760, %v1676_v46  ;;  %7931 = vmatpush1.bf16.msra.mxu1 %v10962_v61  ;;  %v15643_v10 = vand.u32 4294901760, %v10177_v31  ;;  %v11513_v29 = vpack.c.bf16 %v2066_v42, %v2054_v47  ;;  %1672 = vmatprep.mubr.f32.mxu0 %v1671_v39  ;;  %v15649_v42 = vld [vmem:[#allocation222_spill] sm:$0xff] }
 0x214   :  { %v1927_v15 = vsub.f32 %v10169_v36, %v15642_v37  ;;  %7543 = vmatpush1.bf16.msra.mxu0 %v15644_v55  ;;  %v15645_v26 = vand.u32 4294901760, %v10181_v62  ;;  %v15646_v46 = vand.u32 4294901760, %v15632_v41  ;;  %v15647_v33 = vand.u32 4294901760, %v15634_v51  ;;  %v15648_v36 = vld [vmem:[#allocation163_spill] sm:$0xff] }
 0x215   :  { %v1939_v54 = vsub.f32 %v10177_v31, %v15643_v10  ;;  %1678 = vmatmul.mubr.f32.gmra.mrb[14].mxu0 %v1677_v63  ;;  %7545 = vmatprep.subr.bf16.mxu0 %v15649_v42  ;;  %v1916_v39 = vand.u32 4294901760, %v11119_v4  ;;  %v15650_v55 = vand.u32 4294901760, %v15636_v38  ;;  %v15651_v10 = vld [vmem:[#allocation165_spill] sm:$0xff]  ;;  %v3410_v63 = vand.u32 4294901760, %v11208_v7  ;;  %v15658_v7 = vld [vmem:[#allocation226_spill] sm:$0xff] }
 0x216   :  { %v3421_v2 = vsub.f32 %v10181_v62, %v15645_v26  ;;  %v3433_v61 = vsub.f32 %v15632_v41, %v15646_v46  ;;  %v1933_v37 = vsub.f32 %v15634_v51, %v15647_v33  ;;  %v15652_v62 = vld [vmem:[#allocation128_spill] sm:$0xff]  ;;  %2069 = vmatprep.mubr.f32.mxu0 %v11306_v8  ;;  %v15653_v46 = vld [vmem:[#allocation223_spill] sm:$0xff]  ;;  %v3398_v33 = vand.u32 4294901760, %v11203_v9  ;;  %v15654_v51 = vld [vmem:[#allocation225_spill] sm:$0xff] }
 0x217   :  { %v1945_v47 = vsub.f32 %v15636_v38, %v15650_v55  ;;  %7933 = vmatprep.subr.bf16.mxu1 %v15653_v46  ;;  %v1910_v1 = vand.u32 4294901760, %v1909_v52  ;;  %v1922_v42 = vand.u32 4294901760, %v1921_v44  ;;  %v3404_v4 = vand.u32 4294901760, %v3403_v17  ;;  %v15655_v38 = vld [vmem:[#allocation224_spill] sm:$0xff]  ;;  %v15656_v26 = vld [vmem:[#allocation227_spill] sm:$0xff] }
 0x218   :  { %7935 = vmatpush1.bf16.msra.mxu1 %v15654_v51  ;;  %v3416_v41 = vand.u32 4294901760, %v3415_v22  ;;  %v1928_v28 = vand.u32 4294901760, %v1927_v15  ;;  %v1940_v55 = vand.u32 4294901760, %v1939_v54  ;;  %7547 = vmatpush1.bf16.msra.mxu0 %v15655_v38  ;;  %v3422_v31 = vand.u32 4294901760, %v3421_v2  ;;  %v15661_v22 = vld [vmem:[#allocation132_spill] sm:$0xff] }
 0x219   :  { %7937 = vmatprep.subr.bf16.mxu1 %v15656_v26  ;;  %v3434_v8 = vand.u32 4294901760, %v3433_v61  ;;  %v1934_v16 = vand.u32 4294901760, %v1933_v37  ;;  %v15657_v46 = vand.u32 4294901760, %v15648_v36  ;;  %7549 = vmatprep.subr.bf16.mxu0 %v15658_v7  ;;  %v1946_v52 = vand.u32 4294901760, %v1945_v47 }
 0x21a   :  { %v15659_v51 = vand.u32 4294901760, %v15651_v10  ;;  %v15660_v44 = vand.u32 4294901760, %v15652_v62  ;;  %v15662_v54 = vand.u32 4294901760, %v11058_v53  ;;  %v15663_v2 = vand.u32 4294901760, %v11063_v48 }
 0x21b   :  { %v11543_v9 = vsub.f32 %v15648_v36, %v15657_v46  ;;  %v15664_v37 = vand.u32 4294901760, %v11068_v60  ;;  %v15665_v47 = vand.u32 4294901760, %v11078_v34  ;;  %v15666_v46 = vld [vmem:[#allocation133_spill] sm:$0xff]  ;;  %v15670_v15 = vand.u32 4294901760, %v11105_v11  ;;  %v15672_v34 = vld [vmem:[#allocation228_spill] sm:$0xff]  ;;  %v15673_v11 = vld [vmem:[#allocation230_spill] sm:$0xff] }
 0x21c   :  { %v3439_v17 = vsub.f32 %v15651_v10, %v15659_v51  ;;  %v11552_v38 = vsub.f32 %v15652_v62, %v15660_v44  ;;  %v7948_v61 = vpack.c.bf16 %v15663_v2, %v15662_v54  ;;  %v14576_v7 = vand.u32 4294901760, %v15666_v46  ;;  %v15667_v51 = vld [vmem:[#allocation135_spill] sm:$0xff]  ;;  %v15668_v36 = vld [vmem:[#allocation229_spill] sm:$0xff]  ;;  %7551 = vmatpush1.bf16.msra.mxu0 %v15672_v34 }
 0x21d   :  { %v11563_v26 = vpack.c.bf16 %v15665_v47, %v15664_v37  ;;  %v14575_v10 = vand.u32 4294901760, %v15667_v51  ;;  %7939 = vmatpush1.bf16.msra.mxu1 %v15668_v36  ;;  %v15669_v44 = vand.u32 4294901760, %v11088_v27  ;;  %v15671_v48 = vand.u32 4294901760, %v11111_v45  ;;  %7553 = vmatprep.subr.bf16.mxu0 %v15673_v11 }
 0x21e   :  { %v7952_v60 = vpack.c.bf16 %v3410_v63, %v3398_v33  ;;  %v11576_v2 = vpack.c.bf16 %v1922_v42, %v1910_v1  ;;  %7941 = vmatprep.subr.bf16.mxu1 %v11071_v56  ;;  %v11580_v37 = vpack.c.bf16 %v3416_v41, %v3404_v4  ;;  %v11582_v47 = vpack.c.bf16 %v1940_v55, %v1928_v28  ;;  %v15676_v41 = vld [vmem:[#allocation167_spill] sm:$0xff]  ;;  %v15689_v56 = vld [vmem:[#allocation232_spill] sm:$0xff] }
 0x21f   :  { %v7950_v53 = vpack.c.bf16 %v15670_v15, %v15669_v44  ;;  %v11574_v54 = vpack.c.bf16 %v1916_v39, %v15671_v48  ;;  %v11584_v36 = vpack.c.bf16 %v3434_v8, %v3422_v31  ;;  %v3428_v27 = vand.u32 4294901760, %v11543_v9  ;;  %v15675_v8 = vld [vmem:[#allocation166_spill] sm:$0xff]  ;;  %v15677_v9 = vld [vmem:[#allocation168_spill] sm:$0xff]  ;;  %v15690_v44 = vld [vmem:[#allocation169_spill] sm:$0xff] }
 0x220   :  { %v11588_v45 = vpack.c.bf16 %v1946_v52, %v1934_v16  ;;  %v3440_v39 = vand.u32 4294901760, %v3439_v17  ;;  %v1952_v1 = vand.u32 4294901760, %v11552_v38  ;;  %v15674_v33 = vand.u32 4294901760, %v15661_v22  ;;  %7555 = vmatpush1.bf16.msra.mxu0 %v11073_v19  ;;  %v15681_v48 = vld [vmem:[#allocation194_spill] sm:$0xff]  ;;  %v15696_v52 = vld [vmem:[#allocation231_spill] sm:$0xff] }
 0x221   :  { %v3445_v28 = vsub.f32 %v15666_v46, %v14576_v7  ;;  %v3457_v31 = vsub.f32 %v15667_v51, %v14575_v10  ;;  %v1252_v42 = vrot.slane %v11238_v18, 1  ;;  %v1254_v4 = vrot.slane %v11262_v6, 1  ;;  %7943 = vmatpush1.bf16.msra.mxu1 %v11081_v13  ;;  %7557 = vmatprep.subr.bf16.mxu0 %v11083_v20  ;;  %v15678_v6 = vld [vmem:[#allocation191_spill] sm:$0xff]  ;;  %v15719_v16 = vld [vmem:[#allocation186_spill] sm:$0xff] }
 0x222   :  { %v1963_v63 = vsub.f32 %v15661_v22, %v15674_v33  ;;  %v1256_v55 = vrot.slane %v11279_v12, 1  ;;  %v1251_v17 = vrot.slane %v11210_v57, 1  ;;  %7945 = vmatprep.subr.bf16.mxu1 %v11091_v0  ;;  %v15679_v12 = vld [vmem:[#allocation192_spill] sm:$0xff]  ;;  %v15680_v57 = vld [vmem:[#allocation193_spill] sm:$0xff]  ;;  %v15697_v13 = vld [vmem:[#allocation179_spill] sm:$0xff]  ;;  %v15699_v15 = vrot.slane %v11324_v3, 1 }
 0x223   :  { %v15693_v0 = vld [vmem:[#allocation241_spill] sm:$0xff]  ;;  %v3458_v23 = vand.u32 4294901760, %v3457_v31  ;;  %v15705_v50 = vand.u32 4294901760, %v15676_v41  ;;  %v14587_v58 = vand.u32 4294901760, %v15719_v16 }
 0x224   :  { %v11634_v34 = vsel %vm1247_vm2, %v1251_v17, %v1252_v42  ;;  %v11637_v10 = vsel %vm1247_vm2, %v1252_v42, %v1256_v55  ;;  %v15694_v19 = vrot.slane %v15693_v0, 1  ;;  %7559 = vmatpush1.bf16.msra.mxu0 %v15696_v52  ;;  %v1964_v20 = vand.u32 4294901760, %v1963_v63  ;;  %v15701_v42 = vld [vmem:[#allocation233_spill] sm:$0xff]  ;;  %v15711_v63 = vld [vmem:[#allocation184_spill] sm:$0xff] }
 0x225   :  { %7947 = vmatpush1.bf16.msra.mxu1 %v15689_v56  ;;  %15691 = vst [vmem:[#allocation215_spill] sm:$0xff] %v11634_v34  ;;  %15692 = vst [vmem:[#allocation218_spill] sm:$0xff] %v11637_v10  ;;  %v15698_v56 = vld [vmem:[#allocation180_spill] sm:$0xff]  ;;  %v11650_v17 = vsel %vm1247_vm2, %v1256_v55, %v15699_v15  ;;  %7561 = vmatprep.subr.bf16.mxu0 %v15701_v42  ;;  %v7958_v10 = vpack.c.bf16 %v3440_v39, %v3428_v27  ;;  %v15702_v0 = vand.u32 4294901760, %v15675_v8  ;;  %v15718_v31 = vld [vmem:[#allocation185_spill] sm:$0xff] }
 0x226   :  { %v11642_v18 = vsel %vm1247_vm2, %v15694_v19, %v1254_v4  ;;  %7949 = vmatprep.subr.bf16.mxu1 %v7948_v61  ;;  %15700 = vst [vmem:[#allocation219_spill] sm:$0xff] %v11650_v17  ;;  %v15704_v61 = vld [vmem:[#allocation178_spill] sm:$0xff]  ;;  %v3446_v34 = vand.u32 4294901760, %v3445_v28  ;;  %v1969_v3 = vsub.f32 %v15676_v41, %v15705_v50  ;;  %v15706_v55 = vrot.slane %v11297_v59, 1  ;;  %v15710_v28 = vld [vmem:[#allocation183_spill] sm:$0xff] }
 0x227   :  { %15695 = vst [vmem:[#allocation217_spill] sm:$0xff] %v11642_v18  ;;  %v1957_v19 = vsub.f32 %v15675_v8, %v15702_v0  ;;  %v15703_v18 = vld [vmem:[#allocation177_spill] sm:$0xff]  ;;  %v15708_v27 = vand.u32 4294901760, %v15677_v9  ;;  %v15709_v42 = vand.u32 4294901760, %v15690_v44  ;;  %v15712_v50 = vand.u32 4294901760, %v15697_v13 }
 0x228   :  { %v11664_v15 = vsel %vm1247_vm2, %v1254_v4, %v15706_v55  ;;  %7563 = vmatpush1.bf16.msra.mxu0 %v11563_v26  ;;  %v15717_v26 = vand.u32 4294901760, %v15704_v61  ;;  %v7572_v38 = vpack.c.bf16 %v1964_v20, %v1952_v1  ;;  %v1970_v59 = vand.u32 4294901760, %v1969_v3 }
 0x229   :  { %15707 = vst [vmem:[#allocation220_spill] sm:$0xff] %v11664_v15  ;;  %7951 = vmatpush1.bf16.msra.mxu1 %v7950_v53  ;;  %v3451_v39 = vsub.f32 %v15677_v9, %v15708_v27  ;;  %v3463_v0 = vsub.f32 %v15690_v44, %v15709_v42  ;;  %v3469_v4 = vsub.f32 %v15697_v13, %v15712_v50  ;;  %v15713_v53 = vand.u32 4294901760, %v15698_v56  ;;  %v15714_v27 = vld [vmem:[#allocation181_spill] sm:$0xff]  ;;  %v15715_v15 = vld [vmem:[#allocation182_spill] sm:$0xff] }
 0x22a   :  { %7953 = vmatprep.subr.bf16.mxu1 %v7952_v60  ;;  %7565 = vmatprep.subr.bf16.mxu0 %v11574_v54  ;;  %v15716_v42 = vand.u32 4294901760, %v15703_v18  ;;  %v1987_v60 = vsub.f32 %v15704_v61, %v15717_v26  ;;  %v14586_v50 = vand.u32 4294901760, %v15718_v31  ;;  %v1958_v7 = vand.u32 4294901760, %v1957_v19 }
 0x22b   :  { %v3481_v55 = vsub.f32 %v15698_v56, %v15713_v53  ;;  %v7960_v53 = vpack.c.bf16 %v3458_v23, %v3446_v34  ;;  %v3452_v17 = vand.u32 4294901760, %v3451_v39  ;;  %v3464_v54 = vand.u32 4294901760, %v3463_v0 }
 0x22c   :  { %v1975_v52 = vsub.f32 %v15703_v18, %v15716_v42  ;;  %v15720_v11 = vand.u32 4294901760, %v15710_v28  ;;  %v15721_v33 = vand.u32 4294901760, %v15711_v63  ;;  %7567 = vmatpush1.bf16.msra.mxu0 %v11576_v2  ;;  %v3470_v1 = vand.u32 4294901760, %v3469_v4 }
 0x22d   :  { %7955 = vmatpush1.bf16.msra.mxu1 %v11580_v37  ;;  %v3482_v23 = vand.u32 4294901760, %v3481_v55  ;;  %v15722_v3 = vand.u32 4294901760, %v15714_v27  ;;  %v15723_v34 = vand.u32 4294901760, %v15715_v15  ;;  %7569 = vmatprep.subr.bf16.mxu0 %v11582_v47  ;;  %v1988_v19 = vand.u32 4294901760, %v1987_v60 }
 0x22e   :  { %v3475_v42 = vsub.f32 %v15710_v28, %v15720_v11  ;;  %v3487_v26 = vsub.f32 %v15711_v63, %v15721_v33  ;;  %7957 = vmatprep.subr.bf16.mxu1 %v11584_v36  ;;  %v1976_v11 = vand.u32 4294901760, %v1975_v52  ;;  %v1999_v2 = vsub.f32 %v15718_v31, %v14586_v50 }
 0x22f   :  { %v1981_v37 = vsub.f32 %v15714_v27, %v15722_v3  ;;  %v1993_v20 = vsub.f32 %v15715_v15, %v15723_v34  ;;  %v2011_v36 = vsub.f32 %v15719_v16, %v14587_v58  ;;  %v7962_v33 = vpack.c.bf16 %v3464_v54, %v3452_v17  ;;  %v15724_v17 = vld [vmem:[#allocation234_spill] sm:$0xff] }
 0x230   :  { %v3476_v39 = vand.u32 4294901760, %v3475_v42  ;;  %v3488_v0 = vand.u32 4294901760, %v3487_v26  ;;  %7571 = vmatpush1.bf16.msra.mxu0 %v11588_v45  ;;  %v7574_v4 = vpack.c.bf16 %v1970_v59, %v1958_v7  ;;  %v7964_v55 = vpack.c.bf16 %v3482_v23, %v3470_v1  ;;  %v15725_v59 = vld [vmem:[#allocation236_spill] sm:$0xff]  ;;  %v15726_v7 = vld [vmem:[#allocation235_spill] sm:$0xff]  ;;  %v15727_v45 = vld [vmem:[#allocation237_spill] sm:$0xff] }
 0x231   :  { %7959 = vmatpush1.bf16.msra.mxu1 %v7958_v10  ;;  %v1982_v47 = vand.u32 4294901760, %v1981_v37  ;;  %v1994_v52 = vand.u32 4294901760, %v1993_v20  ;;  %7573 = vmatprep.subr.bf16.mxu0 %v7572_v38  ;;  %v7576_v60 = vpack.c.bf16 %v1988_v19, %v1976_v11  ;;  %v2000_v3 = vand.u32 4294901760, %v1999_v2  ;;  %v15728_v38 = vld [vmem:[#allocation39_spill] sm:$0xff]  ;;  %v15732_v1 = vld [vmem:[#allocation41_spill] sm:$0xff]  ;;  %v15735_v37 = vld [vmem:[#allocation48_spill] sm:$0xff] }
 0x232   :  { %7961 = vmatprep.subr.bf16.mxu1 %v7960_v53  ;;  %v2012_v34 = vand.u32 4294901760, %v2011_v36  ;;  %v7966_v50 = vpack.c.bf16 %v3488_v0, %v3476_v39  ;;  %v15729_v53 = vld [vmem:[#allocation40_spill] sm:$0xff]  ;;  %v15730_v42 = vld [vmem:[#allocation151_spill] sm:$0xff]  ;;  %v15736_v20 = vld [vmem:[#allocation49_spill] sm:$0xff] }
 0x233   :  { %v7578_v58 = vpack.c.bf16 %v1994_v52, %v1982_v47  ;;  %v7976_v54 = vpack.c.bf16 %v15729_v53, %v15728_v38  ;;  %v15731_v26 = vld [vmem:[#allocation243_spill] sm:$0xff]  ;;  %v7980_v11 = vpack.c.bf16 %v15736_v20, %v15735_v37  ;;  %v15737_v19 = vld [vmem:[#allocation44_spill] sm:$0xff]  ;;  %v15738_v2 = vld [vmem:[#allocation45_spill] sm:$0xff] }
 0x234   :  { %7575 = vmatpush1.bf16.msra.mxu0 %v7574_v4  ;;  %v7580_v10 = vpack.c.bf16 %v2012_v34, %v2000_v3  ;;  %v15733_v23 = vld [vmem:[#allocation43_spill] sm:$0xff]  ;;  %v7592_v36 = vpack.c.bf16 %v15738_v2, %v15737_v19  ;;  %v15741_v0 = vld [vmem:[#allocation50_spill] sm:$0xff]  ;;  %v15742_v4 = vld [vmem:[#allocation52_spill] sm:$0xff] }
 0x235   :  { %7963 = vmatpush1.bf16.msra.mxu1 %v7962_v33  ;;  %7577 = vmatprep.subr.bf16.mxu0 %v7576_v60  ;;  %v15739_v33 = vld [vmem:[#allocation239_spill] sm:$0xff]  ;;  %v15743_v47 = vld [vmem:[#allocation54_spill] sm:$0xff]  ;;  %v15744_v52 = vld [vmem:[#allocation56_spill] sm:$0xff] }
 0x236   :  { %7965 = vmatprep.subr.bf16.mxu1 %v7964_v55  ;;  %v15740_v39 = vld [vmem:[#allocation247_spill] sm:$0xff]  ;;  %v7594_v55 = vpack.c.bf16 %v15742_v4, %v15741_v0  ;;  %v7982_v60 = vpack.c.bf16 %v15744_v52, %v15743_v47  ;;  %v15745_v3 = vld [vmem:[#allocation57_spill] sm:$0xff] }
 0x238   :  { %7579 = vmatpush1.bf16.msra.mxu0 %v7578_v58  ;;  %v15734_v58 = vld [vmem:[#allocation238_spill] sm:$0xff] }
 0x239   :  { %7967 = vmatpush1.bf16.msra.mxu1 %v7966_v50  ;;  %7581 = vmatprep.subr.bf16.mxu0 %v7580_v10  ;;  %v7978_v50 = vpack.c.bf16 %v15733_v23, %v15732_v1  ;;  %v15747_v10 = vld [vmem:[#allocation246_spill] sm:$0xff] }
 0x23a   :  { %7969 = vmatprep.subr.bf16.mxu1 %v15724_v17  ;;  %v15748_v17 = vld [vmem:[#allocation60_spill] sm:$0xff] }
 0x23c   :  { %7583 = vmatpush1.bf16.msra.mxu0 %v15726_v7 }
 0x23d   :  { %7971 = vmatpush1.bf16.msra.mxu1 %v15725_v59  ;;  %7585 = vmatprep.subr.bf16.mxu0 %v15730_v42  ;;  %v15749_v59 = vld [vmem:[#allocation63_spill] sm:$0xff]  ;;  %v15753_v42 = vld [vmem:[#allocation66_spill] sm:$0xff] }
 0x23e   :  { %7973 = vmatprep.subr.bf16.mxu1 %v15727_v45  ;;  %v7984_v7 = vpack.c.bf16 %v15749_v59, %v15748_v17  ;;  %v15750_v45 = vld [vmem:[#allocation248_spill] sm:$0xff] }
 0x240   :  { %7587 = vmatpush1.bf16.msra.mxu0 %v15734_v58  ;;  %v15755_v58 = vld [vmem:[#allocation69_spill] sm:$0xff] }
 0x241   :  { %7975 = vmatpush1.bf16.msra.mxu1 %v15731_v26  ;;  %7589 = vmatprep.subr.bf16.mxu0 %v11485_v5  ;;  %v15746_v5 = vld [vmem:[#allocation59_spill] sm:$0xff] }
 0x242   :  { %7977 = vmatprep.subr.bf16.mxu1 %v7976_v54  ;;  %v7596_v34 = vpack.c.bf16 %v15746_v5, %v15745_v3  ;;  %v15751_v54 = vld [vmem:[#allocation255_spill] sm:$0xff] }
 0x244   :  { %3541 = vmatmul.mubr.f32.vlgmr.msra.gmra.mrb[0].mxu1 %v15739_v33  ;;  %7591 = vmatpush1.bf16.msra.mxu0 %v11513_v29  ;;  %v15752_v29 = vld [vmem:[#allocation64_spill] sm:$0xff]  ;;  %v15759_v33 = vld [vmem:[#allocation77_spill] sm:$0xff] }
 0x245   :  { %3547 = vmatprep.mubr.f32.mxu1 %v15740_v39  ;;  %7979 = vmatpush1.bf16.msra.mxu1 %v7978_v50  ;;  %v7598_v26 = vpack.c.bf16 %v15753_v42, %v15752_v29  ;;  %v15754_v50 = vld [vmem:[#allocation68_spill] sm:$0xff]  ;;  %v15792_v29 = vld [vmem:[#allocation114_spill] sm:$0xff] }
 0x246   :  { %7981 = vmatprep.subr.bf16.mxu1 %v7980_v11  ;;  %7593 = vmatprep.subr.bf16.mxu0 %v7592_v36  ;;  %v7986_v11 = vpack.c.bf16 %v15755_v58, %v15754_v50  ;;  %v15756_v36 = vld [vmem:[#allocation72_spill] sm:$0xff]  ;;  %v15766_v50 = vld [vmem:[#allocation257_spill] sm:$0xff] }
 0x247   :  { %2071 = vmatmul.mubr.f32.vlgmr.msra.gmra.mrb[8].mxu0 %v15750_v45  ;;  %v15758_v45 = vld [vmem:[#allocation76_spill] sm:$0xff] }
 0x248   :  { %3549 = vmatmul.mubr.f32.gmra.mrb[2].mxu1 %v15747_v10  ;;  %2077 = vmatprep.mubr.f32.mxu0 %v11349_v14  ;;  %v15757_v10 = vld [vmem:[#allocation73_spill] sm:$0xff]  ;;  %v15783_v42 = vld [vmem:[#allocation100_spill] sm:$0xff] }
 0x249   :  { %3555 = vmatprep.mubr.f32.mxu1 %v15751_v54  ;;  %7595 = vmatpush1.bf16.msra.mxu0 %v7594_v55  ;;  %v7600_v39 = vpack.c.bf16 %v15757_v10, %v15756_v36  ;;  %v7988_v54 = vpack.c.bf16 %v15759_v33, %v15758_v45  ;;  %v15760_v55 = vld [vmem:[#allocation78_spill] sm:$0xff]  ;;  %v15762_v14 = vld [vmem:[#allocation81_spill] sm:$0xff]  ;;  %v15763_v10 = vld [vmem:[#allocation83_spill] sm:$0xff] }
 0x24a   :  { %7983 = vmatpush1.bf16.msra.mxu1 %v7982_v60  ;;  %7597 = vmatprep.subr.bf16.mxu0 %v7596_v34  ;;  %v15761_v60 = vld [vmem:[#allocation15_spill] sm:$0xff]  ;;  %v7990_v36 = vpack.c.bf16 %v15763_v10, %v15762_v14  ;;  %v15769_v45 = vld [vmem:[#allocation210_spill] sm:$0xff] }
 0x24b   :  { %7985 = vmatprep.subr.bf16.mxu1 %v7984_v7  ;;  %2079 = vmatmul.mubr.f32.gmra.mrb[10].mxu0 %v11365_v40  ;;  %v7602_v34 = vpack.c.bf16 %v15761_v60, %v15760_v55  ;;  %v15765_v7 = vld [vmem:[#allocation16_spill] sm:$0xff]  ;;  %v15767_v40 = vld [vmem:[#allocation17_spill] sm:$0xff]  ;;  %v15768_v33 = vld [vmem:[#allocation87_spill] sm:$0xff] }
 0x24c   :  { %3557 = vmatmul.mubr.f32.gmra.mrb[4].mxu1 %v11289_v21  ;;  %2085 = vmatprep.mubr.f32.mxu0 %v11390_v25  ;;  %v15764_v21 = vld [vmem:[#allocation29_spill] sm:$0xff]  ;;  %v15771_v25 = vld [vmem:[#allocation267_spill] sm:$0xff]  ;;  %v15780_v55 = vld [vmem:[#allocation214_spill] sm:$0xff] }
 0x24d   :  { %3563 = vmatprep.mubr.f32.mxu1 %v11335_v24  ;;  %7599 = vmatpush1.bf16.msra.mxu0 %v7598_v26  ;;  %v7604_v58 = vpack.c.bf16 %v15765_v7, %v15764_v21  ;;  %v7992_v24 = vpack.c.bf16 %v15768_v33, %v15767_v40  ;;  %v15770_v26 = vld [vmem:[#allocation244_spill] sm:$0xff]  ;;  %v15774_v10 = vld [vmem:[#allocation91_spill] sm:$0xff]  ;;  %v15778_v33 = vld [vmem:[#allocation97_spill] sm:$0xff] }
 0x24e   :  { %7987 = vmatpush1.bf16.msra.mxu1 %v7986_v11  ;;  %7601 = vmatprep.subr.bf16.mxu0 %v7600_v39  ;;  %v15772_v39 = vld [vmem:[#allocation88_spill] sm:$0xff]  ;;  %v15773_v11 = vld [vmem:[#allocation89_spill] sm:$0xff]  ;;  %v15779_v40 = vld [vmem:[#allocation98_spill] sm:$0xff] }
 0x24f   :  { %7989 = vmatprep.subr.bf16.mxu1 %v7988_v54  ;;  %2087 = vmatmul.mubr.f32.gmra.mrb[12].mxu0 %v15769_v45  ;;  %v7606_v60 = vpack.c.bf16 %v15773_v11, %v15772_v39  ;;  %v15775_v7 = vld [vmem:[#allocation92_spill] sm:$0xff]  ;;  %v15777_v54 = vld [vmem:[#allocation19_spill] sm:$0xff]  ;;  %v7996_v45 = vpack.c.bf16 %v15779_v40, %v15778_v33  ;;  %v15787_v39 = vld [vmem:[#allocation105_spill] sm:$0xff] }
 0x250   :  { %3565 = vmatmul.mubr.f32.gmra.mrb[6].mxu1 %v15766_v50  ;;  %2093 = vmatprep.mubr.f32.mxu0 %v15771_v25  ;;  %v7994_v21 = vpack.c.bf16 %v15775_v7, %v15774_v10  ;;  %v15776_v50 = vld [vmem:[#allocation18_spill] sm:$0xff]  ;;  %v15786_v10 = vld [vmem:[#allocation104_spill] sm:$0xff] }
 0x251   :  { %3765 = vmatprep.mubr.f32.mxu1 %v15770_v26  ;;  %7603 = vmatpush1.bf16.msra.mxu0 %v7602_v34  ;;  %v7608_v14 = vpack.c.bf16 %v15777_v54, %v15776_v50  ;;  %v15781_v25 = vld [vmem:[#allocation258_spill] sm:$0xff]  ;;  %v15782_v34 = vld [vmem:[#allocation33_spill] sm:$0xff]  ;;  %v7612_v54 = vpack.c.bf16 %v15787_v39, %v15786_v10  ;;  %v15799_v10 = vld [vmem:[#allocation123_spill] sm:$0xff] }
 0x252   :  { %7991 = vmatpush1.bf16.msra.mxu1 %v7990_v36  ;;  %7605 = vmatprep.subr.bf16.mxu0 %v7604_v58  ;;  %v7610_v11 = vpack.c.bf16 %v15783_v42, %v15782_v34  ;;  %v15784_v58 = vld [vmem:[#allocation102_spill] sm:$0xff]  ;;  %v15785_v36 = vld [vmem:[#allocation20_spill] sm:$0xff]  ;;  %v15789_v50 = vld [vmem:[#allocation109_spill] sm:$0xff] }
 0x253   :  { %7993 = vmatprep.subr.bf16.mxu1 %v7992_v24  ;;  %2095 = vmatmul.mubr.f32.gmra.mrb[14].mxu0 %v15780_v55  ;;  %v7998_v7 = vpack.c.bf16 %v15785_v36, %v15784_v58  ;;  %v15788_v24 = vld [vmem:[#allocation106_spill] sm:$0xff]  ;;  %v15793_v42 = vld [vmem:[#allocation23_spill] sm:$0xff]  ;;  %v15796_v36 = vld [vmem:[#allocation120_spill] sm:$0xff] }
 0x254   :  { %2295 = vmatprep.mubr.f32.mxu0 %v15781_v25  ;;  %v8000_v40 = vpack.c.bf16 %v15789_v50, %v15788_v24  ;;  %v15790_v55 = vld [vmem:[#allocation110_spill] sm:$0xff]  ;;  %v15797_v58 = vld [vmem:[#allocation24_spill] sm:$0xff] }
 0x255   :  { %7607 = vmatpush1.bf16.msra.mxu0 %v7606_v60  ;;  %v15791_v60 = vld [vmem:[#allocation22_spill] sm:$0xff]  ;;  %v8004_v39 = vpack.c.bf16 %v15797_v58, %v15796_v36 }
 0x256   :  { %7995 = vmatpush1.bf16.msra.mxu1 %v7994_v21  ;;  %7609 = vmatprep.subr.bf16.mxu0 %v7608_v14  ;;  %v7614_v33 = vpack.c.bf16 %v15791_v60, %v15790_v55  ;;  %v8002_v21 = vpack.c.bf16 %v15793_v42, %v15792_v29  ;;  %v15794_v14 = vld [vmem:[#allocation115_spill] sm:$0xff]  ;;  %v15795_v34 = vld [vmem:[#allocation118_spill] sm:$0xff] }
 0x257   :  { %7997 = vmatprep.subr.bf16.mxu1 %v7996_v45  ;;  %v7616_v59 = vpack.c.bf16 %v15795_v34, %v15794_v14  ;;  %v15798_v45 = vld [vmem:[#allocation122_spill] sm:$0xff]  ;;  %v15805_v29 = vld [vmem:[#allocation131_spill] sm:$0xff] }
 0x258   :  { %v7618_v50 = vpack.c.bf16 %v15799_v10, %v15798_v45  ;;  %v15801_v60 = vld [vmem:[#allocation126_spill] sm:$0xff]  ;;  %v15809_v10 = vld [vmem:[#allocation137_spill] sm:$0xff] }
 0x259   :  { %7611 = vmatpush1.bf16.msra.mxu0 %v7610_v11  ;;  %v15800_v11 = vld [vmem:[#allocation25_spill] sm:$0xff]  ;;  %v15803_v55 = vld [vmem:[#allocation26_spill] sm:$0xff] }
 0x25a   :  { %7999 = vmatpush1.bf16.msra.mxu1 %v7998_v7  ;;  %7613 = vmatprep.subr.bf16.mxu0 %v7612_v54  ;;  %v8006_v7 = vpack.c.bf16 %v15801_v60, %v15800_v11  ;;  %v15802_v54 = vld [vmem:[#allocation127_spill] sm:$0xff]  ;;  %v15804_v42 = vld [vmem:[#allocation130_spill] sm:$0xff]  ;;  %v15812_v60 = vld [vmem:[#allocation140_spill] sm:$0xff] }
 0x25b   :  { %8001 = vmatprep.subr.bf16.mxu1 %v8000_v40  ;;  %v7620_v24 = vpack.c.bf16 %v15803_v55, %v15802_v54  ;;  %v8008_v34 = vpack.c.bf16 %v15805_v29, %v15804_v42  ;;  %v15806_v40 = vld [vmem:[#allocation27_spill] sm:$0xff]  ;;  %v15807_v14 = vld [vmem:[#allocation134_spill] sm:$0xff]  ;;  %v15813_v11 = vld [vmem:[#allocation141_spill] sm:$0xff] }
 0x25c   :  { %v7622_v58 = vpack.c.bf16 %v15807_v14, %v15806_v40  ;;  %v15811_v45 = vld [vmem:[#allocation30_spill] sm:$0xff]  ;;  %v8012_v55 = vpack.c.bf16 %v15813_v11, %v15812_v60  ;;  %v15815_v54 = vld [vmem:[#allocation143_spill] sm:$0xff]  ;;  %v15817_v14 = vld [vmem:[#allocation145_spill] sm:$0xff] }
 0x25d   :  { %7615 = vmatpush1.bf16.msra.mxu0 %v7614_v33  ;;  %v15808_v33 = vld [vmem:[#allocation136_spill] sm:$0xff]  ;;  %v15819_v40 = vld [vmem:[#allocation147_spill] sm:$0xff] }
 0x25e   :  { %8003 = vmatpush1.bf16.msra.mxu1 %v8002_v21  ;;  %7617 = vmatprep.subr.bf16.mxu0 %v7616_v59  ;;  %v8010_v21 = vpack.c.bf16 %v15809_v10, %v15808_v33  ;;  %v15810_v59 = vld [vmem:[#allocation138_spill] sm:$0xff]  ;;  %v15820_v10 = vld [vmem:[#allocation149_spill] sm:$0xff] }
 0x25f   :  { %8005 = vmatprep.subr.bf16.mxu1 %v8004_v39  ;;  %v7624_v36 = vpack.c.bf16 %v15811_v45, %v15810_v59  ;;  %v15814_v39 = vld [vmem:[#allocation142_spill] sm:$0xff] }
 0x260   :  { %v7626_v29 = vpack.c.bf16 %v15815_v54, %v15814_v39  ;;  %v15821_v33 = vld [vmem:[#allocation150_spill] sm:$0xff]  ;;  %v15824_v54 = vld [vmem:[#allocation155_spill] sm:$0xff]  ;;  %v15826_v39 = vld [vmem:[#allocation157_spill] sm:$0xff] }
 0x261   :  { %7619 = vmatpush1.bf16.msra.mxu0 %v7618_v50  ;;  %v15816_v50 = vld [vmem:[#allocation31_spill] sm:$0xff]  ;;  %v8016_v45 = vpack.c.bf16 %v15821_v33, %v15820_v10 }
 0x262   :  { %8007 = vmatpush1.bf16.msra.mxu1 %v8006_v7  ;;  %7621 = vmatprep.subr.bf16.mxu0 %v7620_v24  ;;  %v8014_v7 = vpack.c.bf16 %v15817_v14, %v15816_v50  ;;  %v15818_v24 = vld [vmem:[#allocation146_spill] sm:$0xff]  ;;  %v15827_v14 = vld [vmem:[#allocation159_spill] sm:$0xff]  ;;  %v15828_v50 = vld [vmem:[#allocation160_spill] sm:$0xff] }
 0x263   :  { %8009 = vmatprep.subr.bf16.mxu1 %v8008_v34  ;;  %v7628_v42 = vpack.c.bf16 %v15819_v40, %v15818_v24  ;;  %v15822_v34 = vld [vmem:[#allocation152_spill] sm:$0xff]  ;;  %v8020_v40 = vpack.c.bf16 %v15828_v50, %v15827_v14  ;;  %v15830_v24 = vld [vmem:[#allocation162_spill] sm:$0xff] }
 0x264   :  { %v7630_v11 = vpack.c.bf16 %v15822_v34, %v15555_v32  ;;  %v15832_v34 = vld [vmem:[#allocation165_spill] sm:$0xff] }
 0x265   :  { %7623 = vmatpush1.bf16.msra.mxu0 %v7622_v58  ;;  %v15823_v58 = vld [vmem:[#allocation153_spill] sm:$0xff] }
 0x266   :  { %8011 = vmatpush1.bf16.msra.mxu1 %v8010_v21  ;;  %7625 = vmatprep.subr.bf16.mxu0 %v7624_v36  ;;  %v8018_v21 = vpack.c.bf16 %v15824_v54, %v15823_v58  ;;  %v15825_v36 = vld [vmem:[#allocation156_spill] sm:$0xff] }
 0x267   :  { %8013 = vmatprep.subr.bf16.mxu1 %v8012_v55  ;;  %v7632_v60 = vpack.c.bf16 %v15826_v39, %v15825_v36  ;;  %v15829_v55 = vld [vmem:[#allocation161_spill] sm:$0xff]  ;;  %v8024_v39 = vpack.c.bf16 %v15667_v51, %v15666_v46 }
 0x268   :  { %v7634_v33 = vpack.c.bf16 %v15830_v24, %v15829_v55 }
 0x269   :  { %7627 = vmatpush1.bf16.msra.mxu0 %v7626_v29  ;;  %v15831_v29 = vld [vmem:[#allocation163_spill] sm:$0xff] }
 0x26a   :  { %8015 = vmatpush1.bf16.msra.mxu1 %v8014_v7  ;;  %7629 = vmatprep.subr.bf16.mxu0 %v7628_v42  ;;  %v8022_v7 = vpack.c.bf16 %v15832_v34, %v15831_v29  ;;  %v7636_v42 = vpack.c.bf16 %v15661_v22, %v15652_v62 }
 0x26b   :  { %8017 = vmatprep.subr.bf16.mxu1 %v8016_v45  ;;  %v7638_v45 = vpack.c.bf16 %v15676_v41, %v15675_v8 }
 0x26d   :  { %7631 = vmatpush1.bf16.msra.mxu0 %v7630_v11  ;;  %v8026_v11 = vpack.c.bf16 %v15690_v44, %v15677_v9 }
 0x26e   :  { %8019 = vmatpush1.bf16.msra.mxu1 %v8018_v21  ;;  %7633 = vmatprep.subr.bf16.mxu0 %v7632_v60  ;;  %v7640_v60 = vpack.c.bf16 %v15704_v61, %v15703_v18  ;;  %v8028_v21 = vpack.c.bf16 %v15698_v56, %v15697_v13 }
 0x26f   :  { %8021 = vmatprep.subr.bf16.mxu1 %v8020_v40  ;;  %v7642_v40 = vpack.c.bf16 %v15715_v15, %v15714_v27  ;;  %v15885_v15 = vld [vmem:[#allocation90_spill] sm:$0xff]  ;;  %v15886_v27 = vld [vmem:[#allocation61_spill] sm:$0xff] }
 0x271   :  { %7635 = vmatpush1.bf16.msra.mxu0 %v7634_v33  ;;  %v8030_v33 = vpack.c.bf16 %v15711_v63, %v15710_v28  ;;  %v15880_v63 = vld [vmem:[#allocation55_spill] sm:$0xff]  ;;  %v15883_v28 = vand.u32 4294901760, %v15781_v25  ;;  %v15893_v25 = vld [vmem:[#allocation113_spill] sm:$0xff] }
 0x272   :  { %8023 = vmatpush1.bf16.msra.mxu1 %v8022_v7  ;;  %7637 = vmatprep.subr.bf16.mxu0 %v7636_v42  ;;  %v7644_v7 = vpack.c.bf16 %v15719_v16, %v15718_v31  ;;  %v15834_v42 = vpack.c.bf16 %v10642_v43, %v10637_v49  ;;  %v15847_v49 = vld [vmem:[#allocation202_spill] sm:$0xff]  ;;  %v15876_v16 = vld [vmem:[#allocation213_spill] sm:$0xff]  ;;  %v15878_v31 = vand.u32 4294901760, %v15770_v26 }
 0x273   :  { %8025 = vmatprep.subr.bf16.mxu1 %v8024_v39  ;;  %v15833_v39 = vpack.c.bf16 %v10631_v35, %v10626_v30  ;;  %v15844_v30 = vld [vmem:[#allocation199_spill] sm:$0xff]  ;;  %v15889_v26 = vld [vmem:[#allocation101_spill] sm:$0xff] }
 0x275   :  { %7639 = vmatpush1.bf16.msra.mxu0 %v7638_v45  ;;  %v15835_v45 = vpack.c.bf16 %v15679_v12, %v15678_v6  ;;  %v15873_v6 = vld [vmem:[#allocation266_spill] sm:$0xff] }
 0x276   :  { %8027 = vmatpush1.bf16.msra.mxu1 %v8026_v11  ;;  %7641 = vmatprep.subr.bf16.mxu0 %v7640_v60  ;;  %v15836_v11 = vpack.c.bf16 %v15681_v48, %v15680_v57  ;;  %v15837_v60 = vld [vmem:[#allocation196_spill] sm:$0xff]  ;;  %v15850_v48 = vld [vmem:[#allocation242_spill] sm:$0xff]  ;;  %v15852_v57 = vld [vmem:[#allocation205_spill] sm:$0xff] }
 0x277   :  { %8029 = vmatprep.subr.bf16.mxu1 %v8028_v21  ;;  %v15838_v21 = vld [vmem:[#allocation195_spill] sm:$0xff] }
 0x279   :  { %7643 = vmatpush1.bf16.msra.mxu0 %v7642_v40  ;;  %v15839_v40 = vpack.c.bf16 %v15837_v60, %v15838_v21  ;;  %v15871_v21 = vld [vmem:[#allocation67_spill] sm:$0xff] }
 0x27a   :  { %8031 = vmatpush1.bf16.msra.mxu1 %v8030_v33  ;;  %7645 = vmatprep.subr.bf16.mxu0 %v7644_v7  ;;  %v15840_v33 = vld [vmem:[#allocation198_spill] sm:$0xff]  ;;  %v15841_v7 = vld [vmem:[#allocation197_spill] sm:$0xff] }
 0x27b   :  { %8033 = vmatprep.subr.bf16.mxu1 %v15833_v39  ;;  %v15842_v35 = vpack.c.bf16 %v15840_v33, %v15841_v7  ;;  %v15843_v39 = vld [vmem:[#allocation200_spill] sm:$0xff]  ;;  %v15855_v33 = vld [vmem:[#allocation42_spill] sm:$0xff]  ;;  %v15870_v7 = vld [vmem:[#allocation265_spill] sm:$0xff] }
 0x27c   :  { %v15845_v43 = vpack.c.bf16 %v15843_v39, %v15844_v30  ;;  %v15857_v39 = vld [vmem:[#allocation47_spill] sm:$0xff]  ;;  %v15869_v30 = vld [vmem:[#allocation37_spill] sm:$0xff] }
 0x27d   :  { %7647 = vmatpush1.bf16.msra.mxu0 %v15834_v42  ;;  %v15846_v42 = vld [vmem:[#allocation203_spill] sm:$0xff] }
 0x27e   :  { %8035 = vmatpush1.bf16.msra.mxu1 %v15835_v45  ;;  %7649 = vmatprep.subr.bf16.mxu0 %v15836_v11  ;;  %v15848_v12 = vpack.c.bf16 %v15846_v42, %v15847_v49  ;;  %v15849_v45 = vld [vmem:[#allocation38_spill] sm:$0xff]  ;;  %v15862_v49 = vld [vmem:[#allocation261_spill] sm:$0xff] }
 0x27f   :  { %8037 = vmatprep.subr.bf16.mxu1 %v15839_v40  ;;  %v15851_v11 = vld [vmem:[#allocation206_spill] sm:$0xff]  ;;  %v15854_v40 = vld [vmem:[#allocation253_spill] sm:$0xff] }
 0x280   :  { %v15853_v60 = vpack.c.bf16 %v15851_v11, %v15852_v57  ;;  %v15859_v42 = vld [vmem:[#allocation254_spill] sm:$0xff]  ;;  %v15863_v11 = vld [vmem:[#allocation53_spill] sm:$0xff]  ;;  %v15865_v57 = vld [vmem:[#allocation263_spill] sm:$0xff] }
 0x281   :  { %7651 = vmatpush1.bf16.msra.mxu0 %v15842_v35  ;;  %v15856_v35 = vld [vmem:[#allocation34_spill] sm:$0xff] }
 0x282   :  { %8039 = vmatpush1.bf16.msra.mxu1 %v15845_v43  ;;  %7653 = vmatprep.subr.bf16.mxu0 %v15848_v12  ;;  %v15858_v43 = vld [vmem:[#allocation252_spill] sm:$0xff]  ;;  %v15860_v12 = vld [vmem:[#allocation209_spill] sm:$0xff] }
 0x283   :  { %8041 = vmatprep.subr.bf16.mxu1 %v15849_v45  ;;  %v15861_v45 = vld [vmem:[#allocation35_spill] sm:$0xff] }
 0x285   :  { %3768 = vmatmul.mubr.f32.vlgmr.msra.gmra.mrb[0].mxu1 %v15850_v48  ;;  %7655 = vmatpush1.bf16.msra.mxu0 %v15853_v60  ;;  %v15864_v60 = vld [vmem:[#allocation36_spill] sm:$0xff] }
 0x286   :  { %3775 = vmatprep.mubr.f32.mxu1 %v15854_v40  ;;  %8043 = vmatpush1.bf16.msra.mxu1 %v15855_v33  ;;  %v15866_v33 = vld [vmem:[#allocation62_spill] sm:$0xff] }
 0x287   :  { %7657 = vmatprep.subr.bf16.mxu0 %v15856_v35  ;;  %8045 = vmatprep.subr.bf16.mxu1 %v15857_v39  ;;  %v15867_v35 = vld [vmem:[#allocation262_spill] sm:$0xff]  ;;  %v15868_v39 = vld [vmem:[#allocation211_spill] sm:$0xff] }
 0x288   :  { %2298 = vmatmul.mubr.f32.vlgmr.msra.gmra.mrb[8].mxu0 %v15858_v43 }
 0x289   :  { %3778 = vmatmul.mubr.f32.gmra.mrb[2].mxu1 %v15859_v42  ;;  %2305 = vmatprep.mubr.f32.mxu0 %v15860_v12 }
 0x28a   :  { %7659 = vmatpush1.bf16.msra.mxu0 %v15861_v45  ;;  %3785 = vmatprep.mubr.f32.mxu1 %v15862_v49  ;;  %v15872_v45 = vld [vmem:[#allocation46_spill] sm:$0xff] }
 0x28b   :  { %8047 = vmatpush1.bf16.msra.mxu1 %v15863_v11  ;;  %7661 = vmatprep.subr.bf16.mxu0 %v15864_v60  ;;  %v15874_v11 = vld [vmem:[#allocation74_spill] sm:$0xff]  ;;  %v15875_v60 = vld [vmem:[#allocation212_spill] sm:$0xff] }
 0x28c   :  { %2308 = vmatmul.mubr.f32.gmra.mrb[10].mxu0 %v15865_v57  ;;  %8049 = vmatprep.subr.bf16.mxu1 %v15866_v33  ;;  %v15877_v33 = vld [vmem:[#allocation51_spill] sm:$0xff] }
 0x28d   :  { %3788 = vmatmul.mubr.f32.gmra.mrb[4].mxu1 %v15867_v35  ;;  %2315 = vmatprep.mubr.f32.mxu0 %v15868_v39 }
 0x28e   :  { %7663 = vmatpush1.bf16.msra.mxu0 %v15869_v30  ;;  %3795 = vmatprep.mubr.f32.mxu1 %v15870_v7  ;;  %v15879_v30 = vld [vmem:[#allocation80_spill] sm:$0xff] }
 0x28f   :  { %8051 = vmatpush1.bf16.msra.mxu1 %v15871_v21  ;;  %7665 = vmatprep.subr.bf16.mxu0 %v15872_v45  ;;  %v15881_v21 = vld [vmem:[#allocation216_spill] sm:$0xff]  ;;  %v15882_v45 = vld [vmem:[#allocation85_spill] sm:$0xff] }
 0x290   :  { %2318 = vmatmul.mubr.f32.gmra.mrb[12].mxu0 %v15873_v6  ;;  %8053 = vmatprep.subr.bf16.mxu1 %v15874_v11  ;;  %v15884_v11 = vld [vmem:[#allocation58_spill] sm:$0xff] }
 0x291   :  { %3798 = vmatmul.mubr.f32.gmra.mrb[6].mxu1 %v15875_v60  ;;  %2325 = vmatprep.mubr.f32.mxu0 %v15876_v16 }
 0x292   :  { %7667 = vmatpush1.bf16.msra.mxu0 %v15877_v33  ;;  %3935 = vmatprep.mubr.f32.mxu1 %v15878_v31  ;;  %v15887_v33 = vld [vmem:[#allocation96_spill] sm:$0xff]  ;;  %v15888_v31 = vld [vmem:[#allocation65_spill] sm:$0xff] }
 0x293   :  { %8055 = vmatpush1.bf16.msra.mxu1 %v15879_v30  ;;  %7669 = vmatprep.subr.bf16.mxu0 %v15880_v63  ;;  %v15890_v63 = vld [vmem:[#allocation70_spill] sm:$0xff]  ;;  %v15891_v30 = vld [vmem:[#allocation108_spill] sm:$0xff] }
 0x294   :  { %2328 = vmatmul.mubr.f32.gmra.mrb[14].mxu0 %v15881_v21  ;;  %8057 = vmatprep.subr.bf16.mxu1 %v15882_v45  ;;  %v15892_v45 = vld [vmem:[#allocation71_spill] sm:$0xff] }
 0x295   :  { %2465 = vmatprep.mubr.f32.mxu0 %v15883_v28  ;;  %v15894_v28 = vld [vmem:[#allocation75_spill] sm:$0xff] }
 0x296   :  { %7671 = vmatpush1.bf16.msra.mxu0 %v15884_v11  ;;  %v15895_v11 = vld [vmem:[#allocation119_spill] sm:$0xff] }
 0x297   :  { %8059 = vmatpush1.bf16.msra.mxu1 %v15885_v15  ;;  %7673 = vmatprep.subr.bf16.mxu0 %v15886_v27  ;;  %v15896_v15 = vld [vmem:[#allocation79_spill] sm:$0xff]  ;;  %v15897_v27 = vld [vmem:[#allocation125_spill] sm:$0xff] }
 0x298   :  { %8061 = vmatprep.subr.bf16.mxu1 %v15887_v33  ;;  %v15898_v33 = vld [vmem:[#allocation82_spill] sm:$0xff] }
 0x29a   :  { %7675 = vmatpush1.bf16.msra.mxu0 %v15888_v31  ;;  %v15899_v31 = vld [vmem:[#allocation129_spill] sm:$0xff] }
 0x29b   :  { %8063 = vmatpush1.bf16.msra.mxu1 %v15889_v26  ;;  %7677 = vmatprep.subr.bf16.mxu0 %v15890_v63  ;;  %v15900_v26 = vld [vmem:[#allocation84_spill] sm:$0xff] }
 0x29c   :  { %8065 = vmatprep.subr.bf16.mxu1 %v15891_v30  ;;  %v15901_v63 = vld [vmem:[#allocation28_spill] sm:$0xff]  ;;  %v15902_v30 = vld [vmem:[#allocation86_spill] sm:$0xff] }
 0x29e   :  { %7679 = vmatpush1.bf16.msra.mxu0 %v15892_v45  ;;  %v15903_v45 = vld [vmem:[#allocation139_spill] sm:$0xff] }
 0x29f   :  { %8067 = vmatpush1.bf16.msra.mxu1 %v15893_v25  ;;  %7681 = vmatprep.subr.bf16.mxu0 %v15894_v28  ;;  %v15904_v25 = vld [vmem:[#allocation93_spill] sm:$0xff]  ;;  %v15905_v28 = vld [vmem:[#allocation144_spill] sm:$0xff] }
 0x2a0   :  { %8069 = vmatprep.subr.bf16.mxu1 %v15895_v11  ;;  %v15906_v11 = vld [vmem:[#allocation94_spill] sm:$0xff] }
 0x2a2   :  { %7683 = vmatpush1.bf16.msra.mxu0 %v15896_v15  ;;  %v15907_v15 = vld [vmem:[#allocation148_spill] sm:$0xff] }
 0x2a3   :  { %8071 = vmatpush1.bf16.msra.mxu1 %v15897_v27  ;;  %7685 = vmatprep.subr.bf16.mxu0 %v15898_v33  ;;  %v15908_v27 = vld [vmem:[#allocation32_spill] sm:$0xff]  ;;  %v15909_v33 = vld [vmem:[#allocation154_spill] sm:$0xff] }
 0x2a4   :  { %8073 = vmatprep.subr.bf16.mxu1 %v15899_v31  ;;  %v15910_v31 = vld [vmem:[#allocation95_spill] sm:$0xff] }
 0x2a6   :  { %7687 = vmatpush1.bf16.msra.mxu0 %v15900_v26  ;;  %v15911_v26 = vld [vmem:[#allocation158_spill] sm:$0xff] }
 0x2a7   :  { %8075 = vmatpush1.bf16.msra.mxu1 %v15901_v63  ;;  %7689 = vmatprep.subr.bf16.mxu0 %v15902_v30  ;;  %v15912_v63 = vld [vmem:[#allocation99_spill] sm:$0xff]  ;;  %v15913_v30 = vld [vmem:[#allocation164_spill] sm:$0xff] }
 0x2a8   :  { %8077 = vmatprep.subr.bf16.mxu1 %v15903_v45  ;;  %v15914_v45 = vld [vmem:[#allocation103_spill] sm:$0xff] }
 0x2aa   :  { %7691 = vmatpush1.bf16.msra.mxu0 %v15904_v25  ;;  %v15915_v25 = vld [vmem:[#allocation21_spill] sm:$0xff] }
 0x2ab   :  { %8079 = vmatpush1.bf16.msra.mxu1 %v15905_v28  ;;  %7693 = vmatprep.subr.bf16.mxu0 %v15906_v11  ;;  %v15916_v28 = vld [vmem:[#allocation107_spill] sm:$0xff] }
 0x2ac   :  { %8081 = vmatprep.subr.bf16.mxu1 %v15907_v15  ;;  %v15917_v11 = vld [vmem:[#allocation111_spill] sm:$0xff]  ;;  %v15918_v15 = vld [vmem:[#allocation112_spill] sm:$0xff] }
 0x2ae   :  { %7695 = vmatpush1.bf16.msra.mxu0 %v15908_v27  ;;  %v15919_v27 = vld [vmem:[#allocation116_spill] sm:$0xff] }
 0x2af   :  { %8083 = vmatpush1.bf16.msra.mxu1 %v15909_v33  ;;  %7697 = vmatprep.subr.bf16.mxu0 %v15910_v31  ;;  %v15920_v33 = vld [vmem:[#allocation117_spill] sm:$0xff] }
 0x2b0   :  { %8085 = vmatprep.subr.bf16.mxu1 %v15911_v26  ;;  %v15921_v31 = vld [vmem:[#allocation121_spill] sm:$0xff]  ;;  %v15922_v26 = vld [vmem:[#allocation124_spill] sm:$0xff] }
 0x2b2   :  { %7699 = vmatpush1.bf16.msra.mxu0 %v15912_v63  ;;  %v15923_v63 = vld [vmem:[#allocation170_spill] sm:$0xff] }
 0x2b3   :  { %8087 = vmatpush1.bf16.msra.mxu1 %v15913_v30  ;;  %7701 = vmatprep.subr.bf16.mxu0 %v15914_v45  ;;  %v15924_v30 = vld [vmem:[#allocation171_spill] sm:$0xff]  ;;  %v15925_v45 = vld [vmem:[#allocation172_spill] sm:$0xff] }
 0x2b4   :  { %8089 = vmatprep.subr.bf16.mxu1 %v15915_v25  ;;  %v15926_v25 = vld [vmem:[#allocation173_spill] sm:$0xff] }
 0x2b6   :  { %7703 = vmatpush1.bf16.msra.mxu0 %v15916_v28  ;;  %v15927_v28 = vld [vmem:[#allocation174_spill] sm:$0xff] }
 0x2b7   :  { %8091 = vmatpush1.bf16.msra.mxu1 %v15917_v11  ;;  %7705 = vmatprep.subr.bf16.mxu0 %v15918_v15  ;;  %v15928_v15 = vand.u32 4294901760, %v15728_v38 }
 0x2b8   :  { %8093 = vmatprep.subr.bf16.mxu1 %v15919_v27  ;;  %v15929_v27 = vand.u32 4294901760, %v15729_v53  ;;  %v15937_v53 = vand.u32 4294901760, %v15735_v37  ;;  %v15944_v37 = vand.u32 4294901760, %v15743_v47  ;;  %v15953_v47 = vand.u32 4294901760, %v15860_v12  ;;  %v15965_v12 = vld [vmem:[#allocation73_spill] sm:$0xff] }
 0x2ba   :  { %7707 = vmatpush1.bf16.msra.mxu0 %v15920_v33  ;;  %v8104_v11 = vpack.c.bf16 %v15929_v27, %v15928_v15  ;;  %v15930_v33 = vld [vmem:[#allocation175_spill] sm:$0xff]  ;;  %v15938_v15 = vand.u32 4294901760, %v15736_v20  ;;  %v15945_v20 = vand.u32 4294901760, %v15744_v52  ;;  %v15954_v52 = vand.u32 4294901760, %v15862_v49 }
 0x2bb   :  { %8095 = vmatpush1.bf16.msra.mxu1 %v15921_v31  ;;  %7709 = vmatprep.subr.bf16.mxu0 %v15922_v26  ;;  %v15931_v31 = vld [vmem:[#allocation176_spill] sm:$0xff]  ;;  %v15932_v26 = vld [vmem:[#allocation201_spill] sm:$0xff]  ;;  %v15967_v49 = vand.u32 4294901760, %v15865_v57  ;;  %v15977_v57 = vld [vmem:[#allocation15_spill] sm:$0xff] }
 0x2bc   :  { %8097 = vmatprep.subr.bf16.mxu1 %v15923_v63  ;;  %v15933_v63 = vand.u32 4294901760, %v15732_v1  ;;  %v8108_v27 = vpack.c.bf16 %v15938_v15, %v15937_v53  ;;  %v15941_v1 = vand.u32 4294901760, %v15854_v40  ;;  %v15948_v40 = vand.u32 4294901760, %v15858_v43  ;;  %v15961_v15 = vld [vmem:[#allocation69_spill] sm:$0xff] }
 0x2be   :  { %7711 = vmatpush1.bf16.msra.mxu0 %v15924_v30  ;;  %v15934_v30 = vand.u32 4294901760, %v15733_v23 }
 0x2bf   :  { %8099 = vmatpush1.bf16.msra.mxu1 %v15925_v45  ;;  %7713 = vmatprep.subr.bf16.mxu0 %v15926_v25  ;;  %v15935_v25 = vand.u32 4294901760, %v15737_v19  ;;  %v8110_v19 = vpack.c.bf16 %v15945_v20, %v15944_v37  ;;  %v15968_v37 = vld [vmem:[#allocation76_spill] sm:$0xff] }
 0x2c0   :  { %8101 = vmatprep.subr.bf16.mxu1 %v15927_v28  ;;  %v8106_v45 = vpack.c.bf16 %v15934_v30, %v15933_v63  ;;  %v15936_v28 = vand.u32 4294901760, %v15738_v2  ;;  %v15942_v30 = vand.u32 4294901760, %v15741_v0  ;;  %v15943_v63 = vand.u32 4294901760, %v15742_v4 }
 0x2c1   :  { %v15947_v2 = vand.u32 4294901760, %v15746_v5  ;;  %v15949_v0 = vand.u32 4294901760, %v15748_v17  ;;  %v15959_v17 = vld [vmem:[#allocation68_spill] sm:$0xff]  ;;  %v15969_v20 = vand.u32 4294901760, %v15968_v37  ;;  %v15997_v37 = vld [vmem:[#allocation89_spill] sm:$0xff] }
 0x2c2   :  { %7715 = vmatpush1.bf16.msra.mxu0 %v15930_v33  ;;  %v7720_v38 = vpack.c.bf16 %v15936_v28, %v15935_v25  ;;  %v7722_v23 = vpack.c.bf16 %v15943_v63, %v15942_v30  ;;  %v15952_v25 = vand.u32 4294901760, %v15859_v42  ;;  %v15957_v28 = vld [vmem:[#allocation66_spill] sm:$0xff]  ;;  %v15960_v53 = vand.u32 4294901760, %v15959_v17 }
 0x2c3   :  { %8103 = vmatpush1.bf16.msra.mxu1 %v15931_v31  ;;  %7717 = vmatprep.subr.bf16.mxu0 %v15932_v26  ;;  %v15939_v31 = vand.u32 4294901760, %v15850_v48  ;;  %v15940_v26 = vld [vmem:[#allocation204_spill] sm:$0xff]  ;;  %v15946_v48 = vand.u32 4294901760, %v15745_v3  ;;  %v15958_v43 = vand.u32 4294901760, %v15957_v28  ;;  %v15966_v63 = vand.u32 4294901760, %v15965_v12  ;;  %v15983_v28 = vld [vmem:[#allocation29_spill] sm:$0xff] }
 0x2c4   :  { %8105 = vmatprep.subr.bf16.mxu1 %v8104_v11  ;;  %v15955_v3 = vld [vmem:[#allocation64_spill] sm:$0xff]  ;;  %v15993_v12 = vand.u32 4294901760, %v15876_v16 }
 0x2c5   :  { %v7724_v11 = vpack.c.bf16 %v15947_v2, %v15946_v48  ;;  %v15956_v5 = vand.u32 4294901760, %v15955_v3  ;;  %v15970_v48 = vld [vmem:[#allocation77_spill] sm:$0xff]  ;;  %v15981_v3 = vld [vmem:[#allocation83_spill] sm:$0xff] }
 0x2c6   :  { %3939 = vmatmul.mubr.f32.vlgmr.msra.gmra.mrb[0].mxu1 %v15939_v31  ;;  %7719 = vmatpush1.bf16.msra.mxu0 %v15940_v26  ;;  %v15971_v2 = vand.u32 4294901760, %v15970_v48  ;;  %v15999_v48 = vld [vmem:[#allocation91_spill] sm:$0xff] }
 0x2c7   :  { %3947 = vmatprep.mubr.f32.mxu1 %v15941_v1  ;;  %8107 = vmatpush1.bf16.msra.mxu1 %v8106_v45  ;;  %v15950_v45 = vld [vmem:[#allocation63_spill] sm:$0xff]  ;;  %v15963_v1 = vld [vmem:[#allocation72_spill] sm:$0xff] }
 0x2c8   :  { %7721 = vmatprep.subr.bf16.mxu0 %v7720_v38  ;;  %8109 = vmatprep.subr.bf16.mxu1 %v8108_v27  ;;  %v15951_v4 = vand.u32 4294901760, %v15950_v45  ;;  %v7726_v38 = vpack.c.bf16 %v15958_v43, %v15956_v5  ;;  %v15962_v27 = vand.u32 4294901760, %v15961_v15  ;;  %v15964_v30 = vand.u32 4294901760, %v15963_v1  ;;  %v15975_v45 = vld [vmem:[#allocation78_spill] sm:$0xff] }
 0x2c9   :  { %2469 = vmatmul.mubr.f32.vlgmr.msra.gmra.mrb[8].mxu0 %v15948_v40  ;;  %v15973_v40 = vand.u32 4294901760, %v15868_v39  ;;  %v15982_v5 = vand.u32 4294901760, %v15981_v3  ;;  %v15984_v43 = vand.u32 4294901760, %v15983_v28  ;;  %v15985_v39 = vld [vmem:[#allocation16_spill] sm:$0xff] }
 0x2ca   :  { %v8112_v31 = vpack.c.bf16 %v15951_v4, %v15949_v0  ;;  %3951 = vmatmul.mubr.f32.gmra.mrb[2].mxu1 %v15952_v25  ;;  %2477 = vmatprep.mubr.f32.mxu0 %v15953_v47  ;;  %v8114_v42 = vpack.c.bf16 %v15962_v27, %v15960_v53  ;;  %v15974_v0 = vand.u32 4294901760, %v15870_v7  ;;  %v15976_v4 = vand.u32 4294901760, %v15975_v45  ;;  %v15979_v47 = vld [vmem:[#allocation81_spill] sm:$0xff]  ;;  %v15990_v27 = vld [vmem:[#allocation87_spill] sm:$0xff] }
 0x2cb   :  { %7723 = vmatpush1.bf16.msra.mxu0 %v7722_v23  ;;  %3959 = vmatprep.mubr.f32.mxu1 %v15954_v52  ;;  %v7728_v23 = vpack.c.bf16 %v15966_v63, %v15964_v30  ;;  %v15978_v25 = vand.u32 4294901760, %v15977_v57  ;;  %v15980_v52 = vand.u32 4294901760, %v15979_v47  ;;  %v15986_v17 = vand.u32 4294901760, %v15985_v39  ;;  %v15988_v53 = vld [vmem:[#allocation17_spill] sm:$0xff]  ;;  %v15994_v63 = vld [vmem:[#allocation240_spill] sm:$0xff]  ;;  %v16005_v45 = vld [vmem:[#allocation19_spill] sm:$0xff] }
 0x2cc   :  { %8111 = vmatpush1.bf16.msra.mxu1 %v8110_v19  ;;  %7725 = vmatprep.subr.bf16.mxu0 %v7724_v11  ;;  %v8116_v19 = vpack.c.bf16 %v15971_v2, %v15969_v20  ;;  %v15972_v11 = vand.u32 4294901760, %v15867_v35  ;;  %v15987_v7 = vand.u32 4294901760, %v15873_v6  ;;  %v15989_v15 = vand.u32 4294901760, %v15988_v53  ;;  %v16010_v47 = vld [vmem:[#allocation98_spill] sm:$0xff] }
 0x2cd   :  { %2481 = vmatmul.mubr.f32.gmra.mrb[10].mxu0 %v15967_v49  ;;  %8113 = vmatprep.subr.bf16.mxu1 %v8112_v31  ;;  %v7730_v31 = vpack.c.bf16 %v15978_v25, %v15976_v4  ;;  %v8118_v35 = vpack.c.bf16 %v15982_v5, %v15980_v52  ;;  %v15991_v1 = vand.u32 4294901760, %v15990_v27  ;;  %v15992_v30 = vand.u32 4294901760, %v15875_v60  ;;  %v16003_v60 = vld [vmem:[#allocation18_spill] sm:$0xff]  ;;  %v16008_v25 = vld [vmem:[#allocation97_spill] sm:$0xff]  ;;  %v16012_v5 = vld [vmem:[#allocation251_spill] sm:$0xff] }
 0x2ce   :  { %3963 = vmatmul.mubr.f32.gmra.mrb[4].mxu1 %v15972_v11  ;;  %2489 = vmatprep.mubr.f32.mxu0 %v15973_v40  ;;  %v15998_v6 = vand.u32 4294901760, %v15997_v37  ;;  %v16000_v2 = vand.u32 4294901760, %v15999_v48  ;;  %v16006_v16 = vand.u32 4294901760, %v16005_v45  ;;  %v16007_v57 = vand.u32 4294901760, %v15881_v21  ;;  %v16019_v21 = vld [vmem:[#allocation20_spill] sm:$0xff]  ;;  %v16027_v37 = vld [vmem:[#allocation109_spill] sm:$0xff] }
 0x2cf   :  { %7727 = vmatpush1.bf16.msra.mxu0 %v7726_v38  ;;  %3971 = vmatprep.mubr.f32.mxu1 %v15974_v0  ;;  %v7732_v38 = vpack.c.bf16 %v15986_v17, %v15984_v43  ;;  %v16004_v0 = vand.u32 4294901760, %v16003_v60  ;;  %v16011_v52 = vand.u32 4294901760, %v16010_v47  ;;  %v16015_v43 = vld [vmem:[#allocation100_spill] sm:$0xff]  ;;  %v16020_v53 = vand.u32 4294901760, %v16019_v21  ;;  %v16029_v48 = vld [vmem:[#allocation110_spill] sm:$0xff]  ;;  %v16035_v45 = vld [vmem:[#allocation23_spill] sm:$0xff] }
 0x2d0   :  { %8115 = vmatpush1.bf16.msra.mxu1 %v8114_v42  ;;  %7729 = vmatprep.subr.bf16.mxu0 %v7728_v23  ;;  %v8120_v42 = vpack.c.bf16 %v15991_v1, %v15989_v15  ;;  %v15995_v23 = vld [vmem:[#allocation88_spill] sm:$0xff]  ;;  %v16016_v39 = vand.u32 4294901760, %v16015_v43  ;;  %v16033_v60 = vld [vmem:[#allocation114_spill] sm:$0xff] }
 0x2d1   :  { %2493 = vmatmul.mubr.f32.gmra.mrb[12].mxu0 %v15987_v7  ;;  %8117 = vmatprep.subr.bf16.mxu1 %v8116_v19  ;;  %v15996_v49 = vand.u32 4294901760, %v15995_v23  ;;  %v16001_v19 = vld [vmem:[#allocation92_spill] sm:$0xff]  ;;  %v7736_v4 = vpack.c.bf16 %v16006_v16, %v16004_v0  ;;  %v16025_v23 = vld [vmem:[#allocation106_spill] sm:$0xff]  ;;  %v16034_v0 = vand.u32 4294901760, %v16033_v60  ;;  %v16036_v16 = vand.u32 4294901760, %v16035_v45 }
 0x2d2   :  { %3975 = vmatmul.mubr.f32.gmra.mrb[6].mxu1 %v15992_v30  ;;  %2501 = vmatprep.mubr.f32.mxu0 %v15993_v12  ;;  %v16002_v11 = vand.u32 4294901760, %v16001_v19  ;;  %v16021_v27 = vld [vmem:[#allocation104_spill] sm:$0xff]  ;;  %v16031_v19 = vld [vmem:[#allocation22_spill] sm:$0xff] }
 0x2d3   :  { %7731 = vmatpush1.bf16.msra.mxu0 %v7730_v31  ;;  %4238 = vmatprep.mubr.f32.mxu1 %v15994_v63  ;;  %v7734_v20 = vpack.c.bf16 %v15998_v6, %v15996_v49  ;;  %v16009_v31 = vand.u32 4294901760, %v16008_v25  ;;  %v16022_v1 = vand.u32 4294901760, %v16021_v27  ;;  %v16026_v49 = vand.u32 4294901760, %v16025_v23 }
 0x2d4   :  { %8119 = vmatpush1.bf16.msra.mxu1 %v8118_v35  ;;  %7733 = vmatprep.subr.bf16.mxu0 %v7732_v38  ;;  %v8122_v40 = vpack.c.bf16 %v16002_v11, %v16000_v2  ;;  %v16013_v35 = vld [vmem:[#allocation33_spill] sm:$0xff]  ;;  %v16017_v38 = vld [vmem:[#allocation102_spill] sm:$0xff]  ;;  %v16028_v6 = vand.u32 4294901760, %v16027_v37  ;;  %v16030_v2 = vand.u32 4294901760, %v16029_v48  ;;  %v16032_v11 = vand.u32 4294901760, %v16031_v19 }
 0x2d5   :  { %2505 = vmatmul.mubr.f32.gmra.mrb[14].mxu0 %v16007_v57  ;;  %8121 = vmatprep.subr.bf16.mxu1 %v8120_v42  ;;  %v8124_v3 = vpack.c.bf16 %v16011_v52, %v16009_v31  ;;  %v16014_v28 = vand.u32 4294901760, %v16013_v35  ;;  %v16018_v7 = vand.u32 4294901760, %v16017_v38  ;;  %v16023_v42 = vld [vmem:[#allocation105_spill] sm:$0xff]  ;;  %v16037_v57 = vld [vmem:[#allocation115_spill] sm:$0xff]  ;;  %v16039_v31 = vld [vmem:[#allocation118_spill] sm:$0xff] }
 0x2d6   :  { %2768 = vmatprep.mubr.f32.mxu0 %v16012_v5  ;;  %v16024_v30 = vand.u32 4294901760, %v16023_v42  ;;  %v16038_v25 = vand.u32 4294901760, %v16037_v57  ;;  %v16040_v47 = vand.u32 4294901760, %v16039_v31 }
 0x2d7   :  { %7735 = vmatpush1.bf16.msra.mxu0 %v7734_v20  ;;  %v7738_v17 = vpack.c.bf16 %v16016_v39, %v16014_v28  ;;  %v8126_v15 = vpack.c.bf16 %v16020_v53, %v16018_v7  ;;  %v8128_v20 = vpack.c.bf16 %v16028_v6, %v16026_v49  ;;  %v16043_v28 = vld [vmem:[#allocation24_spill] sm:$0xff]  ;;  %v16047_v7 = vld [vmem:[#allocation123_spill] sm:$0xff]  ;;  %v16055_v49 = vld [vmem:[#allocation26_spill] sm:$0xff] }
 0x2d8   :  { %8123 = vmatpush1.bf16.msra.mxu1 %v8122_v40  ;;  %7737 = vmatprep.subr.bf16.mxu0 %v7736_v4  ;;  %v7740_v12 = vpack.c.bf16 %v16024_v30, %v16022_v1  ;;  %v7742_v40 = vpack.c.bf16 %v16032_v11, %v16030_v2  ;;  %v8130_v4 = vpack.c.bf16 %v16036_v16, %v16034_v0  ;;  %v16044_v43 = vand.u32 4294901760, %v16043_v28  ;;  %v16051_v1 = vld [vmem:[#allocation126_spill] sm:$0xff]  ;;  %v16059_v2 = vld [vmem:[#allocation131_spill] sm:$0xff] }
 0x2d9   :  { %8125 = vmatprep.subr.bf16.mxu1 %v8124_v3  ;;  %v7744_v52 = vpack.c.bf16 %v16040_v47, %v16038_v25  ;;  %v16041_v3 = vld [vmem:[#allocation120_spill] sm:$0xff]  ;;  %v16048_v21 = vand.u32 4294901760, %v16047_v7  ;;  %v16052_v42 = vand.u32 4294901760, %v16051_v1  ;;  %v16056_v37 = vand.u32 4294901760, %v16055_v49  ;;  %v16063_v0 = vld [vmem:[#allocation134_spill] sm:$0xff]  ;;  %v16067_v25 = vld [vmem:[#allocation137_spill] sm:$0xff] }
 0x2da   :  { %v16042_v35 = vand.u32 4294901760, %v16041_v3  ;;  %v16060_v19 = vand.u32 4294901760, %v16059_v2  ;;  %v16064_v45 = vand.u32 4294901760, %v16063_v0  ;;  %v16068_v31 = vand.u32 4294901760, %v16067_v25  ;;  %v16070_v3 = vld [vmem:[#allocation30_spill] sm:$0xff]  ;;  %v16092_v0 = vld [vmem:[#allocation152_spill] sm:$0xff] }
 0x2db   :  { %7739 = vmatpush1.bf16.msra.mxu0 %v7738_v17  ;;  %v16045_v17 = vld [vmem:[#allocation122_spill] sm:$0xff]  ;;  %v16088_v2 = vand.u32 4294901760, %v15820_v10 }
 0x2dc   :  { %8127 = vmatpush1.bf16.msra.mxu1 %v8126_v15  ;;  %7741 = vmatprep.subr.bf16.mxu0 %v7740_v12  ;;  %v8132_v39 = vpack.c.bf16 %v16044_v43, %v16042_v35  ;;  %v16046_v38 = vand.u32 4294901760, %v16045_v17  ;;  %v16049_v15 = vld [vmem:[#allocation25_spill] sm:$0xff]  ;;  %v16053_v12 = vld [vmem:[#allocation127_spill] sm:$0xff]  ;;  %v16071_v35 = vand.u32 4294901760, %v16070_v3  ;;  %v16072_v43 = vld [vmem:[#allocation140_spill] sm:$0xff]  ;;  %v16099_v3 = vand.u32 4294901760, %v15827_v14 }
 0x2dd   :  { %8129 = vmatprep.subr.bf16.mxu1 %v8128_v20  ;;  %v16050_v27 = vand.u32 4294901760, %v16049_v15  ;;  %v16054_v23 = vand.u32 4294901760, %v16053_v12  ;;  %v16057_v20 = vld [vmem:[#allocation130_spill] sm:$0xff]  ;;  %v16074_v17 = vld [vmem:[#allocation141_spill] sm:$0xff]  ;;  %v16078_v15 = vld [vmem:[#allocation143_spill] sm:$0xff]  ;;  %v16106_v14 = vand.u32 4294901760, %v15661_v22 }
 0x2de   :  { %v7746_v53 = vpack.c.bf16 %v16048_v21, %v16046_v38  ;;  %v16058_v48 = vand.u32 4294901760, %v16057_v20  ;;  %v16075_v38 = vand.u32 4294901760, %v16074_v17  ;;  %v16076_v21 = vld [vmem:[#allocation142_spill] sm:$0xff]  ;;  %v16105_v17 = vand.u32 4294901760, %v15652_v62 }
 0x2df   :  { %7743 = vmatpush1.bf16.msra.mxu0 %v7742_v40  ;;  %v8134_v30 = vpack.c.bf16 %v16052_v42, %v16050_v27  ;;  %v7748_v6 = vpack.c.bf16 %v16056_v37, %v16054_v23  ;;  %v16061_v40 = vld [vmem:[#allocation27_spill] sm:$0xff]  ;;  %v16079_v27 = vand.u32 4294901760, %v16078_v15  ;;  %v16084_v49 = vld [vmem:[#allocation146_spill] sm:$0xff]  ;;  %v16112_v62 = vand.u32 4294901760, %v15690_v44 }
 0x2e0   :  { %8131 = vmatpush1.bf16.msra.mxu1 %v8130_v4  ;;  %7745 = vmatprep.subr.bf16.mxu0 %v7744_v52  ;;  %v8136_v11 = vpack.c.bf16 %v16060_v19, %v16058_v48  ;;  %v16062_v60 = vand.u32 4294901760, %v16061_v40  ;;  %v16065_v4 = vld [vmem:[#allocation136_spill] sm:$0xff]  ;;  %v16069_v52 = vand.u32 4294901760, %v15810_v59  ;;  %v16080_v42 = vld [vmem:[#allocation31_spill] sm:$0xff]  ;;  %v16082_v59 = vld [vmem:[#allocation145_spill] sm:$0xff]  ;;  %v16085_v37 = vand.u32 4294901760, %v16084_v49 }
 0x2e1   :  { %8133 = vmatprep.subr.bf16.mxu1 %v8132_v39  ;;  %v16066_v57 = vand.u32 4294901760, %v16065_v4  ;;  %v16073_v39 = vand.u32 4294901760, %v16072_v43  ;;  %v16083_v12 = vand.u32 4294901760, %v16082_v59  ;;  %v16089_v19 = vld [vmem:[#allocation150_spill] sm:$0xff]  ;;  %v16094_v4 = vand.u32 4294901760, %v15823_v58  ;;  %v16121_v44 = vld [vmem:[#allocation183_spill] sm:$0xff] }
 0x2e2   :  { %v7750_v16 = vpack.c.bf16 %v16064_v45, %v16062_v60  ;;  %v7752_v28 = vpack.c.bf16 %v16071_v35, %v16069_v52  ;;  %v16091_v60 = vand.u32 4294901760, %v15555_v32  ;;  %v16093_v45 = vand.u32 4294901760, %v16092_v0 }
 0x2e3   :  { %7747 = vmatpush1.bf16.msra.mxu0 %v7746_v53  ;;  %v8138_v47 = vpack.c.bf16 %v16068_v31, %v16066_v57  ;;  %v8140_v7 = vpack.c.bf16 %v16075_v38, %v16073_v39  ;;  %v16077_v53 = vand.u32 4294901760, %v16076_v21  ;;  %v16095_v57 = vand.u32 4294901760, %v15824_v54 }
 0x2e4   :  { %8135 = vmatpush1.bf16.msra.mxu1 %v8134_v30  ;;  %7749 = vmatprep.subr.bf16.mxu0 %v7748_v6  ;;  %v16081_v30 = vand.u32 4294901760, %v16080_v42  ;;  %v16086_v6 = vld [vmem:[#allocation147_spill] sm:$0xff]  ;;  %v16096_v31 = vand.u32 4294901760, %v15825_v36  ;;  %v16100_v32 = vand.u32 4294901760, %v15828_v50  ;;  %v16102_v43 = vand.u32 4294901760, %v15830_v24  ;;  %v16119_v42 = vld [vmem:[#allocation182_spill] sm:$0xff] }
 0x2e5   :  { %8137 = vmatprep.subr.bf16.mxu1 %v8136_v11  ;;  %v7754_v1 = vpack.c.bf16 %v16079_v27, %v16077_v53  ;;  %v16087_v20 = vand.u32 4294901760, %v16086_v6  ;;  %v16090_v11 = vand.u32 4294901760, %v16089_v19  ;;  %v8146_v25 = vpack.c.bf16 %v16095_v57, %v16094_v4  ;;  %v16139_v57 = vld [vmem:[#allocation192_spill] sm:$0xff] }
 0x2e6   :  { %v8142_v23 = vpack.c.bf16 %v16083_v12, %v16081_v30  ;;  %v8148_v35 = vpack.c.bf16 %v16100_v32, %v16099_v3  ;;  %v16103_v54 = vand.u32 4294901760, %v15831_v29  ;;  %v16104_v36 = vand.u32 4294901760, %v15832_v34 }
 0x2e7   :  { %7751 = vmatpush1.bf16.msra.mxu0 %v7750_v16  ;;  %v7756_v48 = vpack.c.bf16 %v16087_v20, %v16085_v37  ;;  %v8144_v40 = vpack.c.bf16 %v16090_v11, %v16088_v2  ;;  %v7758_v16 = vpack.c.bf16 %v16093_v45, %v16091_v60  ;;  %v7764_v38 = vpack.c.bf16 %v16106_v14, %v16105_v17  ;;  %v16127_v37 = vld [vmem:[#allocation186_spill] sm:$0xff]  ;;  %v16133_v11 = vld [vmem:[#allocation189_spill] sm:$0xff] }
 0x2e8   :  { %8139 = vmatpush1.bf16.msra.mxu1 %v8138_v47  ;;  %7753 = vmatprep.subr.bf16.mxu0 %v7752_v28  ;;  %v16097_v47 = vld [vmem:[#allocation157_spill] sm:$0xff]  ;;  %v16101_v28 = vand.u32 4294901760, %v15829_v55  ;;  %v8150_v39 = vpack.c.bf16 %v16104_v36, %v16103_v54  ;;  %v16107_v50 = vand.u32 4294901760, %v15666_v46  ;;  %v16108_v55 = vand.u32 4294901760, %v15667_v51  ;;  %v16135_v60 = vld [vmem:[#allocation190_spill] sm:$0xff] }
 0x2e9   :  { %8141 = vmatprep.subr.bf16.mxu1 %v8140_v7  ;;  %v16098_v10 = vand.u32 4294901760, %v16097_v47  ;;  %v16109_v24 = vand.u32 4294901760, %v15675_v8  ;;  %v16110_v21 = vand.u32 4294901760, %v15676_v41  ;;  %v16111_v34 = vand.u32 4294901760, %v15677_v9  ;;  %v16117_v41 = vld [vmem:[#allocation181_spill] sm:$0xff]  ;;  %v16151_v17 = vld [vmem:[#allocation198_spill] sm:$0xff] }
 0x2ea   :  { %v7762_v58 = vpack.c.bf16 %v16102_v43, %v16101_v28  ;;  %v8152_v7 = vpack.c.bf16 %v16108_v55, %v16107_v50  ;;  %v16113_v53 = vand.u32 4294901760, %v15703_v18  ;;  %v16114_v46 = vand.u32 4294901760, %v15704_v61  ;;  %v16123_v18 = vld [vmem:[#allocation184_spill] sm:$0xff]  ;;  %v16141_v47 = vld [vmem:[#allocation193_spill] sm:$0xff]  ;;  %v16153_v50 = vld [vmem:[#allocation199_spill] sm:$0xff] }
 0x2eb   :  { %7755 = vmatpush1.bf16.msra.mxu0 %v7754_v1  ;;  %v7760_v52 = vpack.c.bf16 %v16098_v10, %v16096_v31  ;;  %v7766_v29 = vpack.c.bf16 %v16110_v21, %v16109_v24  ;;  %v8154_v22 = vpack.c.bf16 %v16112_v62, %v16111_v34  ;;  %v16115_v51 = vand.u32 4294901760, %v15697_v13  ;;  %v16147_v43 = vld [vmem:[#allocation196_spill] sm:$0xff]  ;;  %v16149_v36 = vld [vmem:[#allocation197_spill] sm:$0xff]  ;;  %v16159_v62 = vld [vmem:[#allocation203_spill] sm:$0xff] }
 0x2ec   :  { %8143 = vmatpush1.bf16.msra.mxu1 %v8142_v23  ;;  %7757 = vmatprep.subr.bf16.mxu0 %v7756_v48  ;;  %v7768_v15 = vpack.c.bf16 %v16114_v46, %v16113_v53  ;;  %v16116_v8 = vand.u32 4294901760, %v15698_v56  ;;  %v16118_v1 = vand.u32 4294901760, %v16117_v41  ;;  %v16120_v30 = vand.u32 4294901760, %v16119_v42  ;;  %v16125_v23 = vld [vmem:[#allocation185_spill] sm:$0xff]  ;;  %v16129_v56 = vld [vmem:[#allocation187_spill] sm:$0xff]  ;;  %v16131_v48 = vld [vmem:[#allocation188_spill] sm:$0xff] }
 0x2ed   :  { %8145 = vmatprep.subr.bf16.mxu1 %v8144_v40  ;;  %v16122_v59 = vand.u32 4294901760, %v16121_v44  ;;  %v16124_v12 = vand.u32 4294901760, %v16123_v18  ;;  %v16126_v49 = vand.u32 4294901760, %v16125_v23  ;;  %v16128_v13 = vand.u32 4294901760, %v16127_v37  ;;  %v16161_v46 = vld [vmem:[#allocation205_spill] sm:$0xff]  ;;  %v16165_v41 = vld [vmem:[#allocation38_spill] sm:$0xff] }
 0x2ee   :  { %v8156_v27 = vpack.c.bf16 %v16116_v8, %v16115_v51  ;;  %v7770_v9 = vpack.c.bf16 %v16120_v30, %v16118_v1  ;;  %v16130_v20 = vand.u32 4294901760, %v16129_v56  ;;  %v16132_v2 = vand.u32 4294901760, %v16131_v48  ;;  %v16163_v51 = vld [vmem:[#allocation206_spill] sm:$0xff]  ;;  %v16166_v1 = vld [vmem:[#allocation239_spill] sm:$0xff]  ;;  %v16177_v37 = vld [vmem:[#allocation36_spill] sm:$0xff] }
 0x2ef   :  { %7759 = vmatpush1.bf16.msra.mxu0 %v7758_v16  ;;  %v8158_v61 = vpack.c.bf16 %v16124_v12, %v16122_v59  ;;  %v7772_v6 = vpack.c.bf16 %v16128_v13, %v16126_v49  ;;  %v16134_v40 = vand.u32 4294901760, %v16133_v11  ;;  %v16136_v0 = vand.u32 4294901760, %v16135_v60  ;;  %v16137_v16 = vld [vmem:[#allocation191_spill] sm:$0xff]  ;;  %v16168_v30 = vld [vmem:[#allocation42_spill] sm:$0xff]  ;;  %v16171_v59 = vld [vmem:[#allocation248_spill] sm:$0xff] }
 0x2f0   :  { %8147 = vmatpush1.bf16.msra.mxu1 %v8146_v25  ;;  %7761 = vmatprep.subr.bf16.mxu0 %v7760_v52  ;;  %v8160_v19 = vpack.c.bf16 %v16132_v2, %v16130_v20  ;;  %v16138_v4 = vand.u32 4294901760, %v16137_v16  ;;  %v16140_v25 = vand.u32 4294901760, %v16139_v57  ;;  %v16142_v10 = vand.u32 4294901760, %v16141_v47  ;;  %v16143_v52 = vld [vmem:[#allocation194_spill] sm:$0xff]  ;;  %v16167_v42 = vld [vmem:[#allocation247_spill] sm:$0xff]  ;;  %v16173_v12 = vld [vmem:[#allocation260_spill] sm:$0xff] }
 0x2f1   :  { %8149 = vmatprep.subr.bf16.mxu1 %v8148_v35  ;;  %v7774_v45 = vpack.c.bf16 %v16136_v0, %v16134_v40  ;;  %v16144_v3 = vand.u32 4294901760, %v16143_v52  ;;  %v16145_v35 = vld [vmem:[#allocation195_spill] sm:$0xff]  ;;  %v16152_v14 = vand.u32 4294901760, %v16151_v17  ;;  %v16154_v55 = vand.u32 4294901760, %v16153_v50  ;;  %v16172_v18 = vld [vmem:[#allocation246_spill] sm:$0xff]  ;;  %v16176_v49 = vld [vmem:[#allocation53_spill] sm:$0xff] }
 0x2f2   :  { %v8162_v31 = vpack.c.bf16 %v16140_v25, %v16138_v4  ;;  %v16146_v28 = vand.u32 4294901760, %v16145_v35  ;;  %v16164_v8 = vand.u32 4294901760, %v16163_v51  ;;  %v16170_v44 = vld [vmem:[#allocation47_spill] sm:$0xff]  ;;  %v16178_v13 = vld [vmem:[#allocation208_spill] sm:$0xff]  ;;  %v16180_v56 = vld [vmem:[#allocation249_spill] sm:$0xff] }
 0x2f3   :  { %7763 = vmatpush1.bf16.msra.mxu0 %v7762_v58  ;;  %v7776_v32 = vpack.c.bf16 %v16144_v3, %v16142_v10  ;;  %v16148_v58 = vand.u32 4294901760, %v16147_v43  ;;  %v16175_v23 = vld [vmem:[#allocation255_spill] sm:$0xff]  ;;  %v16181_v20 = vld [vmem:[#allocation264_spill] sm:$0xff]  ;;  %v16182_v48 = vld [vmem:[#allocation37_spill] sm:$0xff] }
 0x2f4   :  { %8151 = vmatpush1.bf16.msra.mxu1 %v8150_v39  ;;  %7765 = vmatprep.subr.bf16.mxu0 %v7764_v38  ;;  %v16150_v39 = vand.u32 4294901760, %v16149_v36  ;;  %v16183_v2 = vld [vmem:[#allocation259_spill] sm:$0xff]  ;;  %v16185_v11 = vld [vmem:[#allocation46_spill] sm:$0xff]  ;;  %v16188_v0 = vld [vmem:[#allocation257_spill] sm:$0xff] }
 0x2f5   :  { %8153 = vmatprep.subr.bf16.mxu1 %v8152_v7  ;;  %v8164_v54 = vpack.c.bf16 %v16148_v58, %v16146_v28  ;;  %v16155_v7 = vld [vmem:[#allocation200_spill] sm:$0xff]  ;;  %v16186_v40 = vld [vmem:[#allocation210_spill] sm:$0xff]  ;;  %v16190_v16 = vld [vmem:[#allocation51_spill] sm:$0xff] }
 0x2f6   :  { %v7778_v38 = vpack.c.bf16 %v16152_v14, %v16150_v39  ;;  %v16156_v24 = vand.u32 4294901760, %v16155_v7  ;;  %v16187_v60 = vld [vmem:[#allocation74_spill] sm:$0xff]  ;;  %v16191_v4 = vld [vmem:[#allocation80_spill] sm:$0xff]  ;;  %v16192_v57 = vld [vmem:[#allocation55_spill] sm:$0xff] }
 0x2f7   :  { %7767 = vmatpush1.bf16.msra.mxu0 %v7766_v29  ;;  %v16157_v29 = vld [vmem:[#allocation202_spill] sm:$0xff]  ;;  %v16197_v52 = vld [vmem:[#allocation61_spill] sm:$0xff]  ;;  %v16198_v3 = vld [vmem:[#allocation96_spill] sm:$0xff] }
 0x2f8   :  { %8155 = vmatpush1.bf16.msra.mxu1 %v8154_v22  ;;  %7769 = vmatprep.subr.bf16.mxu0 %v7768_v15  ;;  %v8166_v21 = vpack.c.bf16 %v16156_v24, %v16154_v55  ;;  %v16158_v34 = vand.u32 4294901760, %v16157_v29  ;;  %v16160_v22 = vand.u32 4294901760, %v16159_v62  ;;  %v16162_v15 = vand.u32 4294901760, %v16161_v46  ;;  %v16193_v25 = vld [vmem:[#allocation214_spill] sm:$0xff]  ;;  %v16202_v28 = vld [vmem:[#allocation108_spill] sm:$0xff]  ;;  %v16203_v43 = vld [vmem:[#allocation71_spill] sm:$0xff] }
 0x2f9   :  { %8157 = vmatprep.subr.bf16.mxu1 %v8156_v27  ;;  %v16195_v47 = vld [vmem:[#allocation58_spill] sm:$0xff]  ;;  %v16204_v58 = vld [vmem:[#allocation113_spill] sm:$0xff]  ;;  %v16207_v36 = vld [vmem:[#allocation79_spill] sm:$0xff] }
 0x2fa   :  { %v7780_v53 = vpack.c.bf16 %v16160_v22, %v16158_v34  ;;  %v7782_v27 = vpack.c.bf16 %v16164_v8, %v16162_v15  ;;  %v16196_v10 = vld [vmem:[#allocation90_spill] sm:$0xff]  ;;  %v16208_v39 = vld [vmem:[#allocation125_spill] sm:$0xff]  ;;  %v16212_v50 = vld [vmem:[#allocation28_spill] sm:$0xff] }
 0x2fb   :  { %7771 = vmatpush1.bf16.msra.mxu0 %v7770_v9  ;;  %v16169_v9 = vld [vmem:[#allocation34_spill] sm:$0xff]  ;;  %v16210_v14 = vld [vmem:[#allocation129_spill] sm:$0xff]  ;;  %v16214_v7 = vld [vmem:[#allocation139_spill] sm:$0xff] }
 0x2fc   :  { %8159 = vmatpush1.bf16.msra.mxu1 %v8158_v61  ;;  %7773 = vmatprep.subr.bf16.mxu0 %v7772_v6  ;;  %v16174_v61 = vld [vmem:[#allocation35_spill] sm:$0xff]  ;;  %v16179_v6 = vld [vmem:[#allocation62_spill] sm:$0xff]  ;;  %v16215_v24 = vld [vmem:[#allocation93_spill] sm:$0xff] }
 0x2fd   :  { %8161 = vmatprep.subr.bf16.mxu1 %v8160_v19  ;;  %v16184_v19 = vld [vmem:[#allocation67_spill] sm:$0xff]  ;;  %v16201_v35 = vld [vmem:[#allocation70_spill] sm:$0xff]  ;;  %v16218_v34 = vld [vmem:[#allocation148_spill] sm:$0xff] }
 0x2fe   :  { %v16209_v17 = vld [vmem:[#allocation82_spill] sm:$0xff]  ;;  %v16219_v62 = vld [vmem:[#allocation32_spill] sm:$0xff]  ;;  %v16223_v15 = vld [vmem:[#allocation99_spill] sm:$0xff] }
 0x2ff   :  { %7775 = vmatpush1.bf16.msra.mxu0 %v7774_v45  ;;  %v16189_v45 = vld [vmem:[#allocation267_spill] sm:$0xff]  ;;  %v16213_v55 = vld [vmem:[#allocation86_spill] sm:$0xff]  ;;  %v16224_v51 = vld [vmem:[#allocation164_spill] sm:$0xff] }
 0x300   :  { %8163 = vmatpush1.bf16.msra.mxu1 %v8162_v31  ;;  %7777 = vmatprep.subr.bf16.mxu0 %v7776_v32  ;;  %v16194_v31 = vld [vmem:[#allocation85_spill] sm:$0xff]  ;;  %v16217_v29 = vld [vmem:[#allocation94_spill] sm:$0xff]  ;;  %v16225_v8 = vld [vmem:[#allocation103_spill] sm:$0xff] }
 0x301   :  { %8165 = vmatprep.subr.bf16.mxu1 %v8164_v54  ;;  %v16199_v32 = vld [vmem:[#allocation65_spill] sm:$0xff]  ;;  %v16206_v54 = vld [vmem:[#allocation119_spill] sm:$0xff]  ;;  %v16220_v22 = vld [vmem:[#allocation154_spill] sm:$0xff] }
 0x302   :  { %v16222_v46 = vld [vmem:[#allocation158_spill] sm:$0xff] }
 0x303   :  { %7779 = vmatpush1.bf16.msra.mxu0 %v7778_v38  ;;  %v16211_v38 = vld [vmem:[#allocation84_spill] sm:$0xff] }
 0x304   :  { %8167 = vmatpush1.bf16.msra.mxu1 %v8166_v21  ;;  %7781 = vmatprep.subr.bf16.mxu0 %v7780_v53  ;;  %v16216_v21 = vld [vmem:[#allocation144_spill] sm:$0xff]  ;;  %v16221_v53 = vld [vmem:[#allocation95_spill] sm:$0xff] }
 0x305   :  { %8169 = vmatprep.subr.bf16.mxu1 %v16165_v41  ;;  %v16227_v41 = vld [vmem:[#allocation207_spill] sm:$0xff] }
 0x307   :  { %4240 = vmatmul.mubr.f32.vlgmr.msra.gmra.mrb[0].mxu1 %v16166_v1  ;;  %7783 = vmatpush1.bf16.msra.mxu0 %v7782_v27  ;;  %v16226_v27 = vld [vmem:[#allocation21_spill] sm:$0xff] }
 0x308   :  { %4246 = vmatprep.mubr.f32.mxu1 %v16167_v42  ;;  %8171 = vmatpush1.bf16.msra.mxu1 %v16168_v30  ;;  %v1139_v30 = vadd.s32 8, %v16227_v41 }
 0x309   :  { %7785 = vmatprep.subr.bf16.mxu0 %v16169_v9  ;;  %8173 = vmatprep.subr.bf16.mxu1 %v16170_v44  ;;  %v16228_v9 = vld [vmem:[#allocation107_spill] sm:$0xff]  ;;  %v16229_v44 = vld [vmem:[#allocation245_spill] sm:$0xff] }
 0x30a   :  { %2770 = vmatmul.mubr.f32.vlgmr.msra.gmra.mrb[8].mxu0 %v16171_v59 }
 0x30b   :  { %4248 = vmatmul.mubr.f32.gmra.mrb[2].mxu1 %v16172_v18  ;;  %2776 = vmatprep.mubr.f32.mxu0 %v16173_v12 }
 0x30c   :  { %7787 = vmatpush1.bf16.msra.mxu0 %v16174_v61  ;;  %4254 = vmatprep.mubr.f32.mxu1 %v16175_v23  ;;  %v12312_v61 = vand.u32 4294901760, %v16229_v44 }
 0x30d   :  { %8175 = vmatpush1.bf16.msra.mxu1 %v16176_v49  ;;  %7789 = vmatprep.subr.bf16.mxu0 %v16177_v37  ;;  %v16231_v49 = vld [vmem:[#allocation111_spill] sm:$0xff]  ;;  %v16232_v37 = vld [vmem:[#allocation112_spill] sm:$0xff] }
 0x30e   :  { %2778 = vmatmul.mubr.f32.gmra.mrb[10].mxu0 %v16178_v13  ;;  %8177 = vmatprep.subr.bf16.mxu1 %v16179_v6  ;;  %16230 = vst [vmem:[#allocation221_spill] sm:$0xff] %v12312_v61  ;;  %v16233_v6 = vld [vmem:[#allocation116_spill] sm:$0xff] }
 0x30f   :  { %4256 = vmatmul.mubr.f32.gmra.mrb[4].mxu1 %v16180_v56  ;;  %2784 = vmatprep.mubr.f32.mxu0 %v16181_v20 }
 0x310   :  { %7791 = vmatpush1.bf16.msra.mxu0 %v16182_v48  ;;  %4262 = vmatprep.mubr.f32.mxu1 %v16183_v2  ;;  %v1153_v48 = vand.u32 15, %v1139_v30  ;;  %v16253_v30 = vld [vmem:[#allocation201_spill] sm:$0xff] }
 0x311   :  { %8179 = vmatpush1.bf16.msra.mxu1 %v16184_v19  ;;  %7793 = vmatprep.subr.bf16.mxu0 %v16185_v11  ;;  %v1417_v19 = vld [vmem:[#allocation7 + $0x408] sm:$0xff]  ;;  %v1419_v11 = vld [vmem:[#allocation7 + $0x418] sm:$0xff] }
 0x312   :  { %2786 = vmatmul.mubr.f32.gmra.mrb[12].mxu0 %v16186_v40  ;;  %8181 = vmatprep.subr.bf16.mxu1 %v16187_v60  ;;  %v16234_v60 = vld [vmem:[#allocation117_spill] sm:$0xff]  ;;  %vm12325_vm4 = vcmp.eq.s32.totalorder %v1153_v48, 15 }
 0x313   :  { %4264 = vmatmul.mubr.f32.gmra.mrb[6].mxu1 %v16188_v0  ;;  %2792 = vmatprep.mubr.f32.mxu0 %v16189_v45 }
 0x314   :  { %7795 = vmatpush1.bf16.msra.mxu0 %v16190_v16  ;;  %4399 = vmatprep.mubr.f32.mxu1 %v15994_v63  ;;  %v16200_v63 = vld [vmem:[#allocation101_spill] sm:$0xff]  ;;  %v12320_v16 = vsub.f32 %v16229_v44, %v12312_v61 }
 0x315   :  { %8183 = vmatpush1.bf16.msra.mxu1 %v16191_v4  ;;  %7797 = vmatprep.subr.bf16.mxu0 %v16192_v57  ;;  %v16236_v4 = vld [vmem:[#allocation121_spill] sm:$0xff]  ;;  %v16237_v57 = vld [vmem:[#allocation124_spill] sm:$0xff] }
 0x316   :  { %2794 = vmatmul.mubr.f32.gmra.mrb[14].mxu0 %v16193_v25  ;;  %8185 = vmatprep.subr.bf16.mxu1 %v16194_v31  ;;  %16235 = vst [vmem:[#allocation222_spill] sm:$0xff] %v12320_v16  ;;  %v16238_v31 = vld [vmem:[#allocation170_spill] sm:$0xff] }
 0x317   :  { %2929 = vmatprep.mubr.f32.mxu0 %v16012_v5  ;;  %v16205_v5 = vld [vmem:[#allocation75_spill] sm:$0xff] }
 0x318   :  { %7799 = vmatpush1.bf16.msra.mxu0 %v16195_v47  ;;  %v4431_v47 = vand.u32 4294901760, %v1417_v19 }
 0x319   :  { %8187 = vmatpush1.bf16.msra.mxu1 %v16196_v10  ;;  %7801 = vmatprep.subr.bf16.mxu0 %v16197_v52  ;;  %v4435_v10 = vand.u32 4294901760, %v1419_v11  ;;  %v1416_v52 = vld [vmem:[#allocation7 + $0x400] sm:$0xff] }
 0x31a   :  { %8189 = vmatprep.subr.bf16.mxu1 %v16198_v3  ;;  %v1418_v3 = vld [vmem:[#allocation7 + $0x410] sm:$0xff] }
 0x31c   :  { %7803 = vmatpush1.bf16.msra.mxu0 %v16199_v32  ;;  %v1431_v32 = vld [vmem:[#allocation7 + $0x478] sm:$0xff] }
 0x31d   :  { %8191 = vmatpush1.bf16.msra.mxu1 %v16200_v63  ;;  %7805 = vmatprep.subr.bf16.mxu0 %v16201_v35  ;;  %v1421_v63 = vld [vmem:[#allocation7 + $0x428] sm:$0xff]  ;;  %v1423_v35 = vld [vmem:[#allocation7 + $0x438] sm:$0xff] }
 0x31e   :  { %8193 = vmatprep.subr.bf16.mxu1 %v16202_v28  ;;  %v16241_v28 = vld [vmem:[#allocation171_spill] sm:$0xff] }
 0x320   :  { %7807 = vmatpush1.bf16.msra.mxu0 %v16203_v43  ;;  %v16242_v43 = vld [vmem:[#allocation215_spill] sm:$0xff] }
 0x321   :  { %8195 = vmatpush1.bf16.msra.mxu1 %v16204_v58  ;;  %7809 = vmatprep.subr.bf16.mxu0 %v16205_v5  ;;  %v12331_v58 = vand.u32 4294901760, %v16242_v43  ;;  %v16244_v5 = vld [vmem:[#allocation172_spill] sm:$0xff] }
 0x322   :  { %8197 = vmatprep.subr.bf16.mxu1 %v16206_v54  ;;  %v16245_v54 = vld [vmem:[#allocation173_spill] sm:$0xff] }
 0x323   :  { %16243 = vst [vmem:[#allocation128_spill] sm:$0xff] %v12331_v58 }
 0x324   :  { %7811 = vmatpush1.bf16.msra.mxu0 %v16207_v36  ;;  %v4433_v36 = vand.u32 4294901760, %v1416_v52 }
 0x325   :  { %8199 = vmatpush1.bf16.msra.mxu1 %v16208_v39  ;;  %7813 = vmatprep.subr.bf16.mxu0 %v16209_v17  ;;  %v4437_v39 = vand.u32 4294901760, %v1418_v3  ;;  %v1420_v17 = vld [vmem:[#allocation7 + $0x420] sm:$0xff] }
 0x326   :  { %8201 = vmatprep.subr.bf16.mxu1 %v16210_v14  ;;  %v1422_v14 = vld [vmem:[#allocation7 + $0x430] sm:$0xff] }
 0x327   :  { %v12358_v44 = vpack.c.bf16 %v4437_v39, %v4433_v36 }
 0x328   :  { %7815 = vmatpush1.bf16.msra.mxu0 %v16211_v38  ;;  %v14612_v38 = vand.u32 4294901760, %v12320_v16 }
 0x329   :  { %8203 = vmatpush1.bf16.msra.mxu1 %v16212_v50  ;;  %7817 = vmatprep.subr.bf16.mxu0 %v16213_v55  ;;  %v16246_v50 = vld [vmem:[#allocation218_spill] sm:$0xff]  ;;  %16255 = vst [vmem:[#allocation226_spill] sm:$0xff] %v12358_v44 }
 0x32a   :  { %8205 = vmatprep.subr.bf16.mxu1 %v16214_v7  ;;  %v1283_v55 = vsel %vm12325_vm4, 0.0, %v16246_v50  ;;  %v16247_v7 = vld [vmem:[#allocation174_spill] sm:$0xff] }
 0x32c   :  { %7819 = vmatpush1.bf16.msra.mxu0 %v16215_v24  ;;  %v12340_v24 = vpack.c.bf16 %v4435_v10, %v4431_v47 }
 0x32d   :  { %8207 = vmatpush1.bf16.msra.mxu1 %v16216_v21  ;;  %7821 = vmatprep.subr.bf16.mxu0 %v16217_v29  ;;  %v4439_v21 = vand.u32 4294901760, %v1421_v63  ;;  %v4443_v29 = vand.u32 4294901760, %v1423_v35 }
 0x32e   :  { %8209 = vmatprep.subr.bf16.mxu1 %v16218_v34  ;;  %16248 = vst [vmem:[#allocation223_spill] sm:$0xff] %v12340_v24  ;;  %v1425_v34 = vld [vmem:[#allocation7 + $0x448] sm:$0xff] }
 0x32f   :  { %v4447_v48 = vand.u32 4294901760, %v1425_v34 }
 0x330   :  { %7823 = vmatpush1.bf16.msra.mxu0 %v16219_v62  ;;  %v12342_v62 = vld [vmem:[#allocation7 + $0x458] sm:$0xff] }
 0x331   :  { %8211 = vmatpush1.bf16.msra.mxu1 %v16220_v22  ;;  %7825 = vmatprep.subr.bf16.mxu0 %v16221_v53  ;;  %v16249_v22 = vld [vmem:[#allocation217_spill] sm:$0xff] }
 0x332   :  { %8213 = vmatprep.subr.bf16.mxu1 %v16222_v46  ;;  %v1282_v53 = vsel %vm12325_vm4, 0.0, %v16249_v22  ;;  %v4441_v46 = vand.u32 4294901760, %v1420_v17 }
 0x334   :  { %7827 = vmatpush1.bf16.msra.mxu0 %v16223_v15  ;;  %v4445_v15 = vand.u32 4294901760, %v1422_v14 }
 0x335   :  { %8215 = vmatpush1.bf16.msra.mxu1 %v16224_v51  ;;  %7829 = vmatprep.subr.bf16.mxu0 %v16225_v8  ;;  %v12350_v51 = vsub.f32 %v16242_v43, %v12331_v58  ;;  %v12352_v8 = vand.u32 4294901760, %v1283_v55  ;;  %v16259_v43 = vld [vmem:[#allocation219_spill] sm:$0xff]  ;;  %v1458_v58 = vld [vmem:[#allocation7 + $0x550] sm:$0xff] }
 0x336   :  { %8217 = vmatprep.subr.bf16.mxu1 %v16226_v27  ;;  %v16252_v27 = vld [vmem:[#allocation176_spill] sm:$0xff] }
 0x337   :  { %16250 = vst [vmem:[#allocation225_spill] sm:$0xff] %v12350_v51  ;;  %16251 = vst [vmem:[#allocation224_spill] sm:$0xff] %v12352_v8 }
 0x338   :  { %7831 = vmatpush1.bf16.msra.mxu0 %v16228_v9  ;;  %v12356_v9 = vsub.f32 %v1417_v19, %v4431_v47  ;;  %v4451_v19 = vand.u32 4294901760, %v12342_v62  ;;  %v1429_v47 = vld [vmem:[#allocation7 + $0x468] sm:$0xff] }
 0x339   :  { %8219 = vmatpush1.bf16.msra.mxu1 %v16231_v49  ;;  %7833 = vmatprep.subr.bf16.mxu0 %v16232_v37  ;;  %v12366_v49 = vadd.s32 24, %v16227_v41  ;;  %v12369_v37 = vsub.f32 %v1419_v11, %v4435_v10  ;;  %v12385_v11 = vpack.c.bf16 %v4445_v15, %v4441_v46  ;;  %v1428_v10 = vld [vmem:[#allocation7 + $0x460] sm:$0xff]  ;;  %v4455_v22 = vand.u32 4294901760, %v1429_v47 }
 0x33a   :  { %8221 = vmatprep.subr.bf16.mxu1 %v16233_v6  ;;  %16254 = vst [vmem:[#allocation227_spill] sm:$0xff] %v12356_v9  ;;  %v12371_v6 = vpack.c.bf16 %v4443_v29, %v4439_v21 }
 0x33b   :  { %16256 = vst [vmem:[#allocation132_spill] sm:$0xff] %v12369_v37  ;;  %16261 = vst [vmem:[#allocation228_spill] sm:$0xff] %v12385_v11 }
 0x33c   :  { %7835 = vmatpush1.bf16.msra.mxu0 %v16234_v60  ;;  %16257 = vst [vmem:[#allocation133_spill] sm:$0xff] %v12371_v6  ;;  %v1424_v60 = vld [vmem:[#allocation7 + $0x440] sm:$0xff] }
 0x33d   :  { %8223 = vmatpush1.bf16.msra.mxu1 %v16236_v4  ;;  %7837 = vmatprep.subr.bf16.mxu0 %v16237_v57  ;;  %v1426_v4 = vld [vmem:[#allocation7 + $0x450] sm:$0xff]  ;;  %v12374_v57 = vsub.f32 %v1416_v52, %v4433_v36  ;;  %v14614_v52 = vand.u32 4294901760, %v12350_v51  ;;  %v1435_v36 = vld [vmem:[#allocation7 + $0x498] sm:$0xff] }
 0x33e   :  { %8225 = vmatprep.subr.bf16.mxu1 %v16238_v31  ;;  %v12376_v31 = vsub.f32 %v1418_v3, %v4437_v39  ;;  %v12389_v3 = vsub.f32 %v1283_v55, %v12352_v8  ;;  %v12395_v39 = vsub.f32 %v1421_v63, %v4439_v21  ;;  %v12402_v55 = vpack.c.bf16 %v4451_v19, %v4447_v48 }
 0x33f   :  { %v4457_v63 = vand.u32 4294901760, %v1428_v10 }
 0x340   :  { %7839 = vmatpush1.bf16.msra.mxu0 %v16241_v28  ;;  %v12378_v28 = vand.u32 4294901760, %v1282_v53  ;;  %16262 = vst [vmem:[#allocation230_spill] sm:$0xff] %v12389_v3  ;;  %16263 = vst [vmem:[#allocation166_spill] sm:$0xff] %v12395_v39 }
 0x341   :  { %8227 = vmatpush1.bf16.msra.mxu1 %v16244_v5  ;;  %7841 = vmatprep.subr.bf16.mxu0 %v16245_v54  ;;  %v12381_v5 = vand.u32 4294901760, %v16259_v43  ;;  %v1430_v54 = vld [vmem:[#allocation7 + $0x470] sm:$0xff]  ;;  %16264 = vst [vmem:[#allocation167_spill] sm:$0xff] %v12402_v55 }
 0x342   :  { %8229 = vmatprep.subr.bf16.mxu1 %v16247_v7  ;;  %16258 = vst [vmem:[#allocation135_spill] sm:$0xff] %v12378_v28  ;;  %v12400_v7 = vsub.f32 %v1423_v35, %v4443_v29  ;;  %v4461_v21 = vand.u32 4294901760, %v1430_v54  ;;  %v12412_v35 = vsub.f32 %v1282_v53, %v12378_v28  ;;  %v4562_v53 = vsub.f32 %v12350_v51, %v14614_v52 }
 0x343   :  { %16260 = vst [vmem:[#allocation229_spill] sm:$0xff] %v12381_v5  ;;  %v12416_v29 = vsub.f32 %v16259_v43, %v12381_v5  ;;  %v1432_v43 = vld [vmem:[#allocation7 + $0x480] sm:$0xff]  ;;  %v16304_v28 = vand.u32 4294901760, %v12389_v3 }
 0x344   :  { %7843 = vmatpush1.bf16.msra.mxu0 %v15930_v33  ;;  %v12363_v33 = vsub.f32 %v12320_v16, %v14612_v38  ;;  %v1433_v38 = vld [vmem:[#allocation7 + $0x488] sm:$0xff]  ;;  %16265 = vst [vmem:[#allocation168_spill] sm:$0xff] %v12412_v35  ;;  %v12441_v50 = vpack.c.bf16 %v4461_v21, %v4457_v63  ;;  %v1450_v16 = vld [vmem:[#allocation7 + $0x510] sm:$0xff] }
 0x345   :  { %8231 = vmatpush1.bf16.msra.mxu1 %v16252_v27  ;;  %7845 = vmatprep.subr.bf16.mxu0 %v16253_v30  ;;  %v4459_v27 = vand.u32 4294901760, %v1431_v32  ;;  %v12407_v30 = vsub.f32 %v1422_v14, %v4445_v15  ;;  %16266 = vst [vmem:[#allocation232_spill] sm:$0xff] %v12416_v29  ;;  %v12423_v14 = vsub.f32 %v1425_v34, %v4447_v48 }
 0x346   :  { %8233 = vmatprep.subr.bf16.mxu1 %v12340_v24  ;;  %16271 = vst [vmem:[#allocation180_spill] sm:$0xff] %v12441_v50 }
 0x347   :  { %16267 = vst [vmem:[#allocation169_spill] sm:$0xff] %v12423_v14  ;;  %v12434_v15 = vpack.c.bf16 %v4459_v27, %v4455_v22  ;;  %v12450_v41 = vsub.f32 %v1431_v32, %v4459_v27  ;;  %v1436_v27 = vld [vmem:[#allocation7 + $0x4a0] sm:$0xff] }
 0x348   :  { %4401 = vmatmul.mubr.f32.vlgmr.msra.gmra.mrb[0].mxu1 %v16166_v1  ;;  %7847 = vmatpush1.bf16.msra.mxu0 %v15940_v26  ;;  %v4449_v1 = vand.u32 4294901760, %v1424_v60  ;;  %v4453_v26 = vand.u32 4294901760, %v1426_v4 }
 0x349   :  { %4407 = vmatprep.mubr.f32.mxu1 %v16167_v42  ;;  %8235 = vmatpush1.bf16.msra.mxu1 %v12358_v44  ;;  %v12405_v42 = vsub.f32 %v1420_v17, %v4441_v46  ;;  %v12432_v46 = vsub.f32 %v12342_v62, %v4451_v19  ;;  %16269 = vst [vmem:[#allocation231_spill] sm:$0xff] %v12434_v15  ;;  %v1434_v17 = vld [vmem:[#allocation7 + $0x490] sm:$0xff]  ;;  %v1437_v62 = vld [vmem:[#allocation7 + $0x4a8] sm:$0xff]  ;;  %v1439_v19 = vld [vmem:[#allocation7 + $0x4b8] sm:$0xff] }
 0x34a   :  { %8237 = vmatprep.subr.bf16.mxu1 %v12371_v6  ;;  %v12437_v34 = vsub.f32 %v1424_v60, %v4449_v1  ;;  %v12439_v48 = vsub.f32 %v1426_v4, %v4453_v26  ;;  %v12460_v4 = vsub.f32 %v1428_v10, %v4457_v63  ;;  %v1443_v60 = vld [vmem:[#allocation7 + $0x4d8] sm:$0xff]  ;;  %v1446_v44 = vld [vmem:[#allocation7 + $0x4f0] sm:$0xff] }
 0x34b   :  { %2931 = vmatmul.mubr.f32.vlgmr.msra.gmra.mrb[8].mxu0 %v16171_v59  ;;  %v1167_v59 = vand.u32 15, %v12366_v49  ;;  %v4463_v49 = vand.u32 4294901760, %v1433_v38 }
 0x34c   :  { %4409 = vmatmul.mubr.f32.gmra.mrb[2].mxu1 %v16172_v18  ;;  %2937 = vmatprep.mubr.f32.mxu0 %v16173_v12  ;;  %v12425_v18 = vpack.c.bf16 %v4453_v26, %v4449_v1  ;;  %16270 = vst [vmem:[#allocation179_spill] sm:$0xff] %v12437_v34  ;;  %v12448_v12 = vsub.f32 %v1429_v47, %v4455_v22  ;;  %16274 = vst [vmem:[#allocation233_spill] sm:$0xff] %v12460_v4  ;;  %v4469_v1 = vand.u32 4294901760, %v1434_v17 }
 0x34d   :  { %4415 = vmatprep.mubr.f32.mxu1 %v16175_v23  ;;  %8239 = vmatpush1.bf16.msra.mxu1 %v12385_v11  ;;  %v4467_v23 = vand.u32 4294901760, %v1435_v36  ;;  %vm12452_vm5 = vcmp.eq.s32.totalorder %v1167_v59, 15  ;;  %v12465_v47 = vsub.f32 %v1430_v54, %v4461_v21  ;;  %v4471_v26 = vand.u32 4294901760, %v1437_v62  ;;  %v1438_v59 = vld [vmem:[#allocation7 + $0x4b0] sm:$0xff]  ;;  %v16280_v21 = vld [vmem:[#allocation256_spill] sm:$0xff] }
 0x34e   :  { %16268 = vst [vmem:[#allocation241_spill] sm:$0xff] %v12425_v18  ;;  %8241 = vmatprep.subr.bf16.mxu1 %v12402_v55  ;;  %v4475_v22 = vand.u32 4294901760, %v1439_v19  ;;  %v12470_v10 = vsub.f32 %v1433_v38, %v4463_v49  ;;  %v12478_v54 = vsub.f32 %v1434_v17, %v4469_v1  ;;  %v1447_v38 = vld [vmem:[#allocation7 + $0x4f8] sm:$0xff] }
 0x34f   :  { %2939 = vmatmul.mubr.f32.gmra.mrb[10].mxu0 %v16178_v13  ;;  %v12467_v32 = vpack.c.bf16 %v4467_v23, %v4463_v49  ;;  %v12472_v63 = vsub.f32 %v1435_v36, %v4467_v23  ;;  %v4483_v49 = vand.u32 4294901760, %v1443_v60  ;;  %v1440_v23 = vld [vmem:[#allocation7 + $0x4c0] sm:$0xff]  ;;  %v4491_v6 = vand.u32 4294901760, %v1447_v38 }
 0x350   :  { %4417 = vmatmul.mubr.f32.gmra.mrb[4].mxu1 %v16180_v56  ;;  %2945 = vmatprep.mubr.f32.mxu0 %v16181_v20  ;;  %v4465_v56 = vand.u32 4294901760, %v1432_v43  ;;  %16276 = vst [vmem:[#allocation178_spill] sm:$0xff] %v12470_v10  ;;  %v1441_v20 = vld [vmem:[#allocation7 + $0x4c8] sm:$0xff]  ;;  %16279 = vst [vmem:[#allocation235_spill] sm:$0xff] %v12478_v54  ;;  %v12493_v17 = vpack.c.bf16 %v4475_v22, %v4471_v26 }
 0x351   :  { %4423 = vmatprep.mubr.f32.mxu1 %v16183_v2  ;;  %8243 = vmatpush1.bf16.msra.mxu1 %v12425_v18  ;;  %16275 = vst [vmem:[#allocation177_spill] sm:$0xff] %v12467_v32  ;;  %v4563_v2 = vand.u32 4294901760, %v4562_v53  ;;  %16277 = vst [vmem:[#allocation234_spill] sm:$0xff] %v12472_v63  ;;  %v4477_v53 = vand.u32 4294901760, %v1438_v59 }
 0x352   :  { %8245 = vmatprep.subr.bf16.mxu1 %v12434_v15  ;;  %v12474_v52 = vsub.f32 %v1432_v43, %v4465_v56  ;;  %v16281_v15 = vrot.slane %v16280_v21, 1  ;;  %v12488_v36 = vpack.c.bf16 %v4469_v1, %v4465_v56  ;;  %16283 = vst [vmem:[#allocation39_spill] sm:$0xff] %v12493_v17  ;;  %v1442_v43 = vld [vmem:[#allocation7 + $0x4d0] sm:$0xff]  ;;  %v12498_v56 = vsub.f32 %v1437_v62, %v4471_v26  ;;  %v1444_v21 = vld [vmem:[#allocation7 + $0x4e0] sm:$0xff] }
 0x353   :  { %2947 = vmatmul.mubr.f32.gmra.mrb[12].mxu0 %v16186_v40  ;;  %v12500_v1 = vsub.f32 %v1439_v19, %v4475_v22  ;;  %v12511_v55 = vsub.f32 %v1438_v59, %v4477_v53  ;;  %v4481_v22 = vand.u32 4294901760, %v1440_v23  ;;  %v4485_v11 = vand.u32 4294901760, %v1442_v43 }
 0x354   :  { %16278 = vst [vmem:[#allocation236_spill] sm:$0xff] %v12474_v52  ;;  %4425 = vmatmul.mubr.f32.gmra.mrb[6].mxu1 %v16188_v0  ;;  %2953 = vmatprep.mubr.f32.mxu0 %v16189_v45  ;;  %v1271_v18 = vsel %vm1247_vm2, %v16281_v15, 0.0  ;;  %16282 = vst [vmem:[#allocation237_spill] sm:$0xff] %v12488_v36  ;;  %v4473_v0 = vand.u32 4294901760, %v1436_v27  ;;  %v4479_v15 = vand.u32 4294901760, %v1441_v20  ;;  %v16286_v45 = vld [vmem:[#allocation220_spill] sm:$0xff] }
 0x355   :  { %8247 = vmatpush1.bf16.msra.mxu1 %v12441_v50  ;;  %4564 = vmatprep.mubr.f32.mxu1 %v4563_v2  ;;  %16284 = vst [vmem:[#allocation40_spill] sm:$0xff] %v12498_v56  ;;  %16285 = vst [vmem:[#allocation151_spill] sm:$0xff] %v12500_v1  ;;  %v1445_v2 = vld [vmem:[#allocation7 + $0x4e8] sm:$0xff]  ;;  %v12503_v40 = vand.u32 4294901760, %v16286_v45  ;;  %v12535_v24 = vsub.f32 %v1442_v43, %v4485_v11 }
 0x356   :  { %8249 = vmatprep.subr.bf16.mxu1 %v12467_v32  ;;  %v12507_v32 = vsel %vm12452_vm5, 0.0, %v1271_v18  ;;  %v12509_v50 = vsub.f32 %v1436_v27, %v4473_v0  ;;  %16289 = vst [vmem:[#allocation43_spill] sm:$0xff] %v12511_v55  ;;  %v12518_v26 = vpack.c.bf16 %v4477_v53, %v4473_v0  ;;  %v12523_v27 = vpack.c.bf16 %v4483_v49, %v4479_v15  ;;  %v1449_v53 = vld [vmem:[#allocation7 + $0x508] sm:$0xff] }
 0x357   :  { %2955 = vmatmul.mubr.f32.gmra.mrb[14].mxu0 %v16193_v25  ;;  %16287 = vst [vmem:[#allocation243_spill] sm:$0xff] %v12503_v40  ;;  %v16290_v25 = vld [vmem:[#allocation250_spill] sm:$0xff]  ;;  %v4487_v59 = vand.u32 4294901760, %v1445_v2  ;;  %v12529_v0 = vsub.f32 %v1443_v60, %v4483_v49  ;;  %16297 = vst [vmem:[#allocation50_spill] sm:$0xff] %v12535_v24  ;;  %v12539_v51 = vsub.f32 %v16286_v45, %v12503_v40  ;;  %v4495_v43 = vand.u32 4294901760, %v1449_v53  ;;  %v1448_v45 = vld [vmem:[#allocation7 + $0x500] sm:$0xff] }
 0x358   :  { %16288 = vst [vmem:[#allocation41_spill] sm:$0xff] %v12509_v50  ;;  %v16291_v62 = vrot.slane %v16290_v25, 1  ;;  %16292 = vst [vmem:[#allocation238_spill] sm:$0xff] %v12518_v26  ;;  %v12542_v25 = vand.u32 4294901760, %v12507_v32  ;;  %v12545_v60 = vpack.c.bf16 %v4485_v11, %v4481_v22  ;;  %v12556_v11 = vsub.f32 %v1447_v38, %v4491_v6  ;;  %v1477_v50 = vld [vmem:[#allocation7 + $0x5e8] sm:$0xff] }
 0x359   :  { %8251 = vmatpush1.bf16.msra.mxu1 %v12488_v36  ;;  %16293 = vst [vmem:[#allocation48_spill] sm:$0xff] %v12523_v27  ;;  %16295 = vst [vmem:[#allocation44_spill] sm:$0xff] %v12529_v0  ;;  %v1451_v36 = vld [vmem:[#allocation7 + $0x518] sm:$0xff]  ;;  %v12554_v5 = vsub.f32 %v1445_v2, %v4487_v59  ;;  %v12561_v49 = vsub.f32 %v12389_v3, %v16304_v28  ;;  %v16307_v40 = vand.u32 4294901760, %v12412_v35  ;;  %v4497_v13 = vand.u32 4294901760, %v1448_v45  ;;  %v1454_v3 = vld [vmem:[#allocation7 + $0x530] sm:$0xff] }
 0x35a   :  { %v1270_v19 = vsel %vm1247_vm2, %v16291_v62, 0.0  ;;  %8253 = vmatprep.subr.bf16.mxu1 %v12493_v17  ;;  %v12527_v62 = vsub.f32 %v1441_v20, %v4479_v15  ;;  %v12533_v17 = vsub.f32 %v1440_v23, %v4481_v22  ;;  %16298 = vst [vmem:[#allocation52_spill] sm:$0xff] %v12539_v51  ;;  %16299 = vst [vmem:[#allocation54_spill] sm:$0xff] %v12542_v25  ;;  %v4489_v20 = vand.u32 4294901760, %v1444_v21  ;;  %v1453_v22 = vld [vmem:[#allocation7 + $0x528] sm:$0xff] }
 0x35b   :  { %16300 = vst [vmem:[#allocation56_spill] sm:$0xff] %v12545_v60  ;;  %v4493_v15 = vand.u32 4294901760, %v1446_v44  ;;  %v12550_v23 = vpack.c.bf16 %v4491_v6, %v4487_v59  ;;  %v4499_v18 = vand.u32 4294901760, %v1451_v36  ;;  %16302 = vst [vmem:[#allocation59_spill] sm:$0xff] %v12554_v5  ;;  %v12572_v2 = vsub.f32 %v12412_v35, %v16307_v40  ;;  %v1452_v35 = vld [vmem:[#allocation7 + $0x520] sm:$0xff] }
 0x35c   :  { %16294 = vst [vmem:[#allocation49_spill] sm:$0xff] %v12527_v62  ;;  %16296 = vst [vmem:[#allocation45_spill] sm:$0xff] %v12533_v17  ;;  %v12565_v8 = vsub.f32 %v1444_v21, %v4489_v20  ;;  %v16309_v6 = vand.u32 4294901760, %v12416_v29  ;;  %v4503_v40 = vand.u32 4294901760, %v1453_v22  ;;  %v16325_v17 = vand.u32 4294901760, %v12539_v51  ;;  %v1471_v62 = vld [vmem:[#allocation7 + $0x5b8] sm:$0xff] }
 0x35d   :  { %8255 = vmatpush1.bf16.msra.mxu1 %v12518_v26  ;;  %16301 = vst [vmem:[#allocation57_spill] sm:$0xff] %v12550_v23  ;;  %16303 = vst [vmem:[#allocation60_spill] sm:$0xff] %v12556_v11  ;;  %v1455_v26 = vld [vmem:[#allocation7 + $0x538] sm:$0xff]  ;;  %v12567_v61 = vsub.f32 %v1446_v44, %v4493_v15  ;;  %v12580_v28 = vpack.c.bf16 %v4493_v15, %v4489_v20  ;;  %v12585_v21 = vpack.c.bf16 %v4499_v18, %v4495_v43  ;;  %v1457_v15 = vld [vmem:[#allocation7 + $0x548] sm:$0xff] }
 0x35e   :  { %8257 = vmatprep.subr.bf16.mxu1 %v12523_v27  ;;  %v1286_v27 = vsel %vm12452_vm5, 0.0, %v1270_v19  ;;  %16305 = vst [vmem:[#allocation244_spill] sm:$0xff] %v12565_v8  ;;  %16308 = vst [vmem:[#allocation138_spill] sm:$0xff] %v12572_v2  ;;  %v12577_v38 = vsub.f32 %v12416_v29, %v16309_v6  ;;  %v4501_v19 = vand.u32 4294901760, %v1450_v16  ;;  %v4507_v59 = vand.u32 4294901760, %v1455_v26  ;;  %v1456_v6 = vld [vmem:[#allocation7 + $0x540] sm:$0xff] }
 0x35f   :  { %16306 = vst [vmem:[#allocation258_spill] sm:$0xff] %v12567_v61  ;;  %16311 = vst [vmem:[#allocation153_spill] sm:$0xff] %v12580_v28  ;;  %v12589_v29 = vsub.f32 %v1449_v53, %v4495_v43  ;;  %v12591_v20 = vsub.f32 %v1451_v36, %v4499_v18  ;;  %v12596_v44 = vsub.f32 %v12507_v32, %v12542_v25  ;;  %v12603_v24 = vand.u32 4294901760, %v1286_v27  ;;  %v1462_v8 = vld [vmem:[#allocation7 + $0x570] sm:$0xff]  ;;  %v1467_v43 = vld [vmem:[#allocation7 + $0x598] sm:$0xff] }
 0x360   :  { %16310 = vst [vmem:[#allocation149_spill] sm:$0xff] %v12577_v38  ;;  %16312 = vst [vmem:[#allocation155_spill] sm:$0xff] %v12585_v21  ;;  %v12600_v11 = vsub.f32 %v1450_v16, %v4501_v19  ;;  %v12606_v36 = vpack.c.bf16 %v4501_v19, %v4497_v13  ;;  %v4505_v18 = vand.u32 4294901760, %v1452_v35  ;;  %v4509_v53 = vand.u32 4294901760, %v1454_v3  ;;  %v1461_v19 = vld [vmem:[#allocation7 + $0x568] sm:$0xff]  ;;  %v1479_v2 = vld [vmem:[#allocation7 + $0x5f8] sm:$0xff] }
 0x361   :  { %8259 = vmatpush1.bf16.msra.mxu1 %v12545_v60  ;;  %16313 = vst [vmem:[#allocation156_spill] sm:$0xff] %v12589_v29  ;;  %16314 = vst [vmem:[#allocation159_spill] sm:$0xff] %v12591_v20  ;;  %v1459_v60 = vld [vmem:[#allocation7 + $0x558] sm:$0xff]  ;;  %v12611_v32 = vpack.c.bf16 %v4507_v59, %v4503_v40  ;;  %v12615_v25 = vsub.f32 %v1453_v22, %v4503_v40  ;;  %v1460_v29 = vld [vmem:[#allocation7 + $0x560] sm:$0xff]  ;;  %v12628_v5 = vsub.f32 %v12539_v51, %v16325_v17 }
 0x362   :  { %8261 = vmatprep.subr.bf16.mxu1 %v12550_v23  ;;  %16315 = vst [vmem:[#allocation160_spill] sm:$0xff] %v12596_v44  ;;  %v12598_v23 = vsub.f32 %v1448_v45, %v4497_v13  ;;  %16317 = vst [vmem:[#allocation162_spill] sm:$0xff] %v12600_v11  ;;  %v4511_v45 = vand.u32 4294901760, %v1457_v15  ;;  %v4515_v16 = vand.u32 4294901760, %v1459_v60  ;;  %v12617_v13 = vsub.f32 %v1455_v26, %v4507_v59  ;;  %v1464_v11 = vld [vmem:[#allocation7 + $0x580] sm:$0xff] }
 0x363   :  { %16318 = vst [vmem:[#allocation163_spill] sm:$0xff] %v12603_v24  ;;  %16319 = vst [vmem:[#allocation165_spill] sm:$0xff] %v12606_v36  ;;  %v12623_v20 = vsub.f32 %v1454_v3, %v4509_v53  ;;  %v12631_v26 = vsub.f32 %v1286_v27, %v12603_v24  ;;  %v12634_v22 = vpack.c.bf16 %v4509_v53, %v4505_v18  ;;  %v4513_v40 = vand.u32 4294901760, %v1456_v6  ;;  %v1466_v27 = vld [vmem:[#allocation7 + $0x590] sm:$0xff] }
 0x364   :  { %16316 = vst [vmem:[#allocation161_spill] sm:$0xff] %v12598_v23  ;;  %16320 = vst [vmem:[#allocation242_spill] sm:$0xff] %v12611_v32  ;;  %v4517_v59 = vand.u32 4294901760, %v1458_v58  ;;  %v12639_v61 = vpack.c.bf16 %v4515_v16, %v4511_v45  ;;  %v4519_v17 = vand.u32 4294901760, %v1461_v19  ;;  %v12645_v53 = vsub.f32 %v1459_v60, %v4515_v16  ;;  %v1470_v16 = vld [vmem:[#allocation7 + $0x5b0] sm:$0xff]  ;;  %v1473_v60 = vld [vmem:[#allocation7 + $0x5c8] sm:$0xff] }
 0x365   :  { %8263 = vmatpush1.bf16.msra.mxu1 %v12580_v28  ;;  %16321 = vst [vmem:[#allocation253_spill] sm:$0xff] %v12615_v25  ;;  %16322 = vst [vmem:[#allocation252_spill] sm:$0xff] %v12617_v13  ;;  %v1463_v28 = vld [vmem:[#allocation7 + $0x578] sm:$0xff]  ;;  %v4521_v24 = vand.u32 4294901760, %v1460_v29  ;;  %v4525_v23 = vand.u32 4294901760, %v1462_v8  ;;  %v12647_v0 = vsub.f32 %v1456_v6, %v4513_v40  ;;  %v4531_v13 = vand.u32 4294901760, %v1467_v43 }
 0x366   :  { %8265 = vmatprep.subr.bf16.mxu1 %v12585_v21  ;;  %v12621_v21 = vsub.f32 %v1452_v35, %v4505_v18  ;;  %16324 = vst [vmem:[#allocation209_spill] sm:$0xff] %v12623_v20  ;;  %16326 = vst [vmem:[#allocation261_spill] sm:$0xff] %v12631_v26  ;;  %v1465_v35 = vld [vmem:[#allocation7 + $0x588] sm:$0xff]  ;;  %v4523_v51 = vand.u32 4294901760, %v1463_v28  ;;  %v12643_v18 = vsub.f32 %v1457_v15, %v4511_v45  ;;  %v4529_v55 = vand.u32 4294901760, %v1464_v11  ;;  %v1468_v45 = vld [vmem:[#allocation7 + $0x5a0] sm:$0xff] }
 0x367   :  { %16327 = vst [vmem:[#allocation263_spill] sm:$0xff] %v12634_v22  ;;  %16328 = vst [vmem:[#allocation262_spill] sm:$0xff] %v12639_v61  ;;  %v12649_v3 = vsub.f32 %v1458_v58, %v4517_v59  ;;  %v1469_v25 = vld [vmem:[#allocation7 + $0x5a8] sm:$0xff]  ;;  %v12652_v38 = vpack.c.bf16 %v4517_v59, %v4513_v40  ;;  %v12659_v6 = vsub.f32 %v1461_v19, %v4519_v17 }
 0x368   :  { %16323 = vst [vmem:[#allocation254_spill] sm:$0xff] %v12621_v21  ;;  %16329 = vst [vmem:[#allocation211_spill] sm:$0xff] %v12643_v18  ;;  %v12657_v15 = vpack.c.bf16 %v4523_v51, %v4519_v17  ;;  %v12661_v58 = vsub.f32 %v1463_v28, %v4523_v51  ;;  %v12665_v40 = vpack.c.bf16 %v4525_v23, %v4521_v24  ;;  %v4535_v20 = vand.u32 4294901760, %v1469_v25 }
 0x369   :  { %8267 = vmatpush1.bf16.msra.mxu1 %v12606_v36  ;;  %16330 = vst [vmem:[#allocation265_spill] sm:$0xff] %v12645_v53  ;;  %16331 = vst [vmem:[#allocation266_spill] sm:$0xff] %v12647_v0  ;;  %v4533_v36 = vand.u32 4294901760, %v1466_v27  ;;  %v12667_v59 = vsub.f32 %v1460_v29, %v4521_v24  ;;  %v4539_v21 = vand.u32 4294901760, %v1471_v62  ;;  %v1475_v53 = vld [vmem:[#allocation7 + $0x5d8] sm:$0xff]  ;;  %v12675_v51 = vsub.f32 %v1467_v43, %v4531_v13  ;;  %v1472_v24 = vld [vmem:[#allocation7 + $0x5c0] sm:$0xff] }
 0x36a   :  { %8269 = vmatprep.subr.bf16.mxu1 %v12611_v32  ;;  %16332 = vst [vmem:[#allocation212_spill] sm:$0xff] %v12649_v3  ;;  %v4527_v32 = vand.u32 4294901760, %v1465_v35  ;;  %16333 = vst [vmem:[#allocation213_spill] sm:$0xff] %v12652_v38  ;;  %v4537_v17 = vand.u32 4294901760, %v1468_v45  ;;  %v1474_v29 = vld [vmem:[#allocation7 + $0x5d0] sm:$0xff]  ;;  %v4545_v3 = vand.u32 4294901760, %v1472_v24 }
 0x36b   :  { %16334 = vst [vmem:[#allocation216_spill] sm:$0xff] %v12657_v15  ;;  %16335 = vst [vmem:[#allocation175_spill] sm:$0xff] %v12661_v58  ;;  %v12678_v28 = vpack.c.bf16 %v4533_v36, %v4529_v55  ;;  %v12693_v0 = vsub.f32 %v1471_v62, %v4539_v21  ;;  %v4549_v58 = vand.u32 4294901760, %v1474_v29  ;;  %v16353_v43 = vand.u32 4294901760, %v12369_v37 }
 0x36c   :  { %16336 = vst [vmem:[#allocation204_spill] sm:$0xff] %v12665_v40  ;;  %v12671_v18 = vpack.c.bf16 %v4531_v13, %v4527_v32  ;;  %v12673_v19 = vsub.f32 %v1465_v35, %v4527_v32  ;;  %16338 = vst [vmem:[#allocation64_spill] sm:$0xff] %v12675_v51  ;;  %v4547_v32 = vand.u32 4294901760, %v1475_v53  ;;  %v12687_v13 = vsub.f32 %v1466_v27, %v4533_v36 }
 0x36d   :  { %8271 = vmatpush1.bf16.msra.mxu1 %v12634_v22  ;;  %16339 = vst [vmem:[#allocation66_spill] sm:$0xff] %v12678_v28  ;;  %v4541_v22 = vand.u32 4294901760, %v1470_v16  ;;  %v12689_v35 = vpack.c.bf16 %v4539_v21, %v4535_v20  ;;  %16343 = vst [vmem:[#allocation73_spill] sm:$0xff] %v12693_v0  ;;  %v12700_v36 = vsub.f32 %v1468_v45, %v4537_v17  ;;  %v4551_v21 = vand.u32 4294901760, %v1477_v50  ;;  %v1476_v45 = vld [vmem:[#allocation7 + $0x5e0] sm:$0xff] }
 0x36e   :  { %8273 = vmatprep.subr.bf16.mxu1 %v12639_v61  ;;  %v12669_v61 = vsub.f32 %v1462_v8, %v4525_v23  ;;  %16337 = vst [vmem:[#allocation63_spill] sm:$0xff] %v12671_v18  ;;  %v12683_v8 = vsub.f32 %v1464_v11, %v4529_v55  ;;  %v4543_v23 = vand.u32 4294901760, %v1473_v60  ;;  %v12713_v55 = vsub.f32 %v1475_v53, %v4547_v32 }
 0x36f   :  { %16341 = vst [vmem:[#allocation69_spill] sm:$0xff] %v12689_v35  ;;  %16345 = vst [vmem:[#allocation77_spill] sm:$0xff] %v12700_v36  ;;  %v12702_v27 = vsub.f32 %v1470_v16, %v4541_v22  ;;  %v12728_v53 = vsub.f32 %v1474_v29, %v4549_v58  ;;  %v16358_v29 = vand.u32 4294901760, %v12374_v57 }
 0x370   :  { %16340 = vst [vmem:[#allocation68_spill] sm:$0xff] %v12683_v8  ;;  %v12707_v62 = vpack.c.bf16 %v4547_v32, %v4543_v23  ;;  %v12711_v11 = vsub.f32 %v1473_v60, %v4543_v23  ;;  %16349 = vst [vmem:[#allocation83_spill] sm:$0xff] %v12713_v55  ;;  %v4639_v60 = vsub.f32 %v12369_v37, %v16353_v43  ;;  %v16359_v23 = vand.u32 4294901760, %v12376_v31 }
 0x371   :  { %8275 = vmatpush1.bf16.msra.mxu1 %v12652_v38  ;;  %v12691_v38 = vsub.f32 %v1469_v25, %v4535_v20  ;;  %16346 = vst [vmem:[#allocation78_spill] sm:$0xff] %v12702_v27  ;;  %v4555_v20 = vand.u32 4294901760, %v1479_v2  ;;  %v12717_v25 = vpack.c.bf16 %v4549_v58, %v4545_v3  ;;  %16354 = vst [vmem:[#allocation17_spill] sm:$0xff] %v12728_v53  ;;  %v14757_v43 = vand.u32 4294901760, %v12432_v46 }
 0x372   :  { %8277 = vmatprep.subr.bf16.mxu1 %v12657_v15  ;;  %v12698_v15 = vpack.c.bf16 %v4541_v22, %v4537_v17  ;;  %16347 = vst [vmem:[#allocation15_spill] sm:$0xff] %v12707_v62  ;;  %16348 = vst [vmem:[#allocation81_spill] sm:$0xff] %v12711_v11  ;;  %v1478_v17 = vld [vmem:[#allocation7 + $0x5f0] sm:$0xff]  ;;  %v12739_v22 = vsub.f32 %v1477_v50, %v4551_v21  ;;  %v4633_v32 = vsub.f32 %v12374_v57, %v16358_v29 }
 0x373   :  { %16342 = vst [vmem:[#allocation72_spill] sm:$0xff] %v12691_v38  ;;  %16350 = vst [vmem:[#allocation29_spill] sm:$0xff] %v12717_v25  ;;  %v4557_v16 = vand.u32 4294901760, %v1478_v17  ;;  %v12741_v58 = vsub.f32 %v1479_v2, %v4555_v20  ;;  %v16360_v50 = vand.u32 4294901760, %v12395_v39  ;;  %v14767_v29 = vand.u32 4294901760, %v12439_v48 }
 0x374   :  { %16344 = vst [vmem:[#allocation76_spill] sm:$0xff] %v12698_v15  ;;  %16356 = vst [vmem:[#allocation240_spill] sm:$0xff] %v12739_v22 }
 0x375   :  { %8279 = vmatpush1.bf16.msra.mxu1 %v12665_v40  ;;  %v16352_v40 = vand.u32 4294901760, %v12356_v9  ;;  %16357 = vst [vmem:[#allocation88_spill] sm:$0xff] %v12741_v58  ;;  %v4651_v2 = vsub.f32 %v12395_v39, %v16360_v50  ;;  %v12769_v37 = vsub.f32 %v1478_v17, %v4557_v16 }
 0x376   :  { %8281 = vmatprep.subr.bf16.mxu1 %v12671_v18  ;;  %v12719_v18 = vsub.f32 %v1472_v24, %v4545_v3  ;;  %v12735_v24 = vpack.c.bf16 %v4555_v20, %v4551_v21  ;;  %v4645_v3 = vsub.f32 %v12376_v31, %v16359_v23  ;;  %v16361_v21 = vand.u32 4294901760, %v12400_v7 }
 0x377   :  { %v4627_v51 = vsub.f32 %v12356_v9, %v16352_v40  ;;  %v4553_v40 = vand.u32 4294901760, %v1476_v45  ;;  %16364 = vst [vmem:[#allocation92_spill] sm:$0xff] %v12769_v37  ;;  %v4634_v9 = vand.u32 4294901760, %v4633_v32  ;;  %v4652_v50 = vand.u32 4294901760, %v4651_v2 }
 0x378   :  { %16351 = vst [vmem:[#allocation16_spill] sm:$0xff] %v12719_v18  ;;  %16355 = vst [vmem:[#allocation87_spill] sm:$0xff] %v12735_v24  ;;  %v4663_v20 = vsub.f32 %v12400_v7, %v16361_v21  ;;  %v14762_v21 = vand.u32 4294901760, %v12437_v34 }
 0x379   :  { %8283 = vmatpush1.bf16.msra.mxu1 %v12678_v28  ;;  %v4640_v28 = vand.u32 4294901760, %v4639_v60  ;;  %v12762_v60 = vpack.c.bf16 %v4557_v16, %v4553_v40  ;;  %v12764_v23 = vsub.f32 %v1476_v45, %v4553_v40  ;;  %v16366_v45 = vand.u32 4294901760, %v12407_v30 }
 0x37a   :  { %8285 = vmatprep.subr.bf16.mxu1 %v12689_v35  ;;  %v4628_v35 = vand.u32 4294901760, %v4627_v51  ;;  %v4646_v51 = vand.u32 4294901760, %v4645_v3  ;;  %v4664_v17 = vand.u32 4294901760, %v4663_v20  ;;  %v16367_v16 = vand.u32 4294901760, %v12423_v14 }
 0x37b   :  { %16362 = vst [vmem:[#allocation89_spill] sm:$0xff] %v12762_v60  ;;  %16363 = vst [vmem:[#allocation91_spill] sm:$0xff] %v12764_v23  ;;  %v4669_v40 = vsub.f32 %v12407_v30, %v16366_v45  ;;  %v4681_v45 = vsub.f32 %v12437_v34, %v14762_v21  ;;  %v14768_v3 = vand.u32 4294901760, %v12460_v4  ;;  %v14769_v20 = vand.u32 4294901760, %v12465_v47 }
 0x37c   :  { %v4675_v32 = vsub.f32 %v12423_v14, %v16367_v16  ;;  %v4693_v16 = vsub.f32 %v12439_v48, %v14767_v29  ;;  %v8300_v2 = vpack.c.bf16 %v4664_v17, %v4652_v50  ;;  %v14770_v21 = vand.u32 4294901760, %v12472_v63 }
 0x37d   :  { %8287 = vmatpush1.bf16.msra.mxu1 %v12698_v15  ;;  %v8296_v15 = vpack.c.bf16 %v4640_v28, %v4628_v35  ;;  %v4687_v35 = vsub.f32 %v12432_v46, %v14757_v43  ;;  %v8298_v43 = vpack.c.bf16 %v4646_v51, %v4634_v9  ;;  %v16368_v29 = vand.u32 4294901760, %v12448_v12 }
 0x37e   :  { %8289 = vmatprep.subr.bf16.mxu1 %v12707_v62  ;;  %v16365_v62 = vand.u32 4294901760, %v12405_v42  ;;  %v4676_v34 = vand.u32 4294901760, %v4675_v32  ;;  %v4694_v28 = vand.u32 4294901760, %v4693_v16  ;;  %v14771_v50 = vand.u32 4294901760, %v12474_v52 }
 0x37f   :  { %v4688_v14 = vand.u32 4294901760, %v4687_v35  ;;  %v4699_v9 = vsub.f32 %v12448_v12, %v16368_v29  ;;  %v14774_v17 = vand.u32 4294901760, %v12478_v54  ;;  %v4705_v32 = vsub.f32 %v12460_v4, %v14768_v3 }
 0x380   :  { %v4657_v39 = vsub.f32 %v12405_v42, %v16365_v62  ;;  %v4670_v62 = vand.u32 4294901760, %v4669_v40  ;;  %v4682_v40 = vand.u32 4294901760, %v4681_v45  ;;  %v14781_v29 = vand.u32 4294901760, %v12498_v56 }
 0x381   :  { %8291 = vmatpush1.bf16.msra.mxu1 %v12717_v25  ;;  %v16370_v25 = vand.u32 4294901760, %v12363_v33  ;;  %v4601_v45 = vand.u32 4294901760, %v12628_v5  ;;  %v4717_v33 = vsub.f32 %v12465_v47, %v14769_v20  ;;  %v8304_v16 = vpack.c.bf16 %v4688_v14, %v4676_v34  ;;  %v16375_v14 = vld [vmem:[#allocation138_spill] sm:$0xff] }
 0x382   :  { %8293 = vmatprep.subr.bf16.mxu1 %v12735_v24  ;;  %v4658_v24 = vand.u32 4294901760, %v4657_v39  ;;  %v16369_v39 = vand.u32 4294901760, %v12450_v41  ;;  %v8306_v3 = vpack.c.bf16 %v4694_v28, %v4682_v40  ;;  %v16374_v35 = vand.u32 4294901760, %v12631_v26  ;;  %v16378_v40 = vld [vmem:[#allocation41_spill] sm:$0xff] }
 0x383   :  { %v16376_v34 = vand.u32 4294901760, %v16375_v14  ;;  %v16377_v28 = vand.u32 4294901760, %v12500_v1 }
 0x384   :  { %v4711_v51 = vsub.f32 %v12450_v41, %v16369_v39  ;;  %v16371_v39 = vand.u32 4294901760, %v12561_v49  ;;  %v16373_v49 = vand.u32 4294901760, %v12596_v44  ;;  %v4616_v20 = vsub.f32 %v12631_v26, %v16374_v35  ;;  %v16384_v35 = vld [vmem:[#allocation45_spill] sm:$0xff] }
 0x385   :  { %8295 = vmatpush1.bf16.msra.mxu1 %v12762_v60  ;;  %v4718_v26 = vand.u32 4294901760, %v4717_v33 }
 0x386   :  { %8297 = vmatprep.subr.bf16.mxu1 %v8296_v15  ;;  %v8302_v15 = vpack.c.bf16 %v4670_v62, %v4658_v24  ;;  %v4735_v62 = vsub.f32 %v12472_v63, %v14770_v21  ;;  %v4712_v5 = vand.u32 4294901760, %v4711_v51  ;;  %v4759_v51 = vsub.f32 %v12500_v1, %v16377_v28  ;;  %v16385_v21 = vld [vmem:[#allocation50_spill] sm:$0xff] }
 0x387   :  { %v14796_v63 = vand.u32 4294901760, %v16384_v35  ;;  %v14798_v4 = vand.u32 4294901760, %v16385_v21 }
 0x388   :  { %4570 = vmatmul.mubr.f32.vlgmr.msra.gmra.mrb[0].mxu1 %v16370_v25  ;;  %v16372_v25 = vand.u32 4294901760, %v12470_v10 }
 0x389   :  { %4580 = vmatprep.mubr.f32.mxu1 %v16371_v39  ;;  %8299 = vmatpush1.bf16.msra.mxu1 %v8298_v43  ;;  %v4610_v43 = vsub.f32 %v12596_v44, %v16373_v49  ;;  %v4700_v39 = vand.u32 4294901760, %v4699_v9  ;;  %v4747_v9 = vsub.f32 %v12498_v56, %v14781_v29  ;;  %v16379_v49 = vld [vmem:[#allocation43_spill] sm:$0xff]  ;;  %v16382_v29 = vld [vmem:[#allocation49_spill] sm:$0xff] }
 0x38a   :  { %v4723_v24 = vsub.f32 %v12470_v10, %v16372_v25  ;;  %8301 = vmatprep.subr.bf16.mxu1 %v8300_v2  ;;  %v4729_v25 = vsub.f32 %v12474_v52, %v14771_v50  ;;  %v4741_v2 = vsub.f32 %v12478_v54, %v14774_v17  ;;  %v16380_v50 = vld [vmem:[#allocation149_spill] sm:$0xff]  ;;  %v4706_v17 = vand.u32 4294901760, %v4705_v32  ;;  %v16383_v54 = vld [vmem:[#allocation44_spill] sm:$0xff] }
 0x38b   :  { %v16381_v60 = vand.u32 4294901760, %v16380_v50  ;;  %v4611_v44 = vand.u32 4294901760, %v4610_v43  ;;  %v8308_v52 = vpack.c.bf16 %v4712_v5, %v4700_v39  ;;  %v14795_v56 = vand.u32 4294901760, %v16382_v29  ;;  %v16388_v5 = vld [vmem:[#allocation59_spill] sm:$0xff] }
 0x38c   :  { %4586 = vmatmul.mubr.f32.gmra.mrb[2].mxu1 %v16376_v34  ;;  %v4724_v14 = vand.u32 4294901760, %v4723_v24  ;;  %v4736_v34 = vand.u32 4294901760, %v4735_v62  ;;  %v14794_v10 = vand.u32 4294901760, %v16383_v54  ;;  %v4730_v28 = vand.u32 4294901760, %v4729_v25 }
 0x38d   :  { %4596 = vmatprep.mubr.f32.mxu1 %v16381_v60  ;;  %8303 = vmatpush1.bf16.msra.mxu1 %v8302_v15  ;;  %v4742_v1 = vand.u32 4294901760, %v4741_v2  ;;  %v4748_v60 = vand.u32 4294901760, %v4747_v9  ;;  %v4760_v50 = vand.u32 4294901760, %v4759_v51  ;;  %v16386_v15 = vand.u32 4294901760, %v16378_v40  ;;  %v16389_v2 = vld [vmem:[#allocation60_spill] sm:$0xff]  ;;  %v16394_v9 = vld [vmem:[#allocation159_spill] sm:$0xff] }
 0x38e   :  { %8305 = vmatprep.subr.bf16.mxu1 %v8304_v16  ;;  %v16387_v33 = vand.u32 4294901760, %v16379_v49  ;;  %v4617_v62 = vand.u32 4294901760, %v4616_v20  ;;  %v8310_v16 = vpack.c.bf16 %v4718_v26, %v4706_v17  ;;  %v8312_v43 = vpack.c.bf16 %v4736_v34, %v4724_v14  ;;  %v16390_v51 = vld [vmem:[#allocation128_spill] sm:$0xff]  ;;  %v16399_v34 = vld [vmem:[#allocation253_spill] sm:$0xff] }
 0x38f   :  { %v4753_v32 = vsub.f32 %v16378_v40, %v16386_v15  ;;  %v4783_v39 = vsub.f32 %v16383_v54, %v14794_v10  ;;  %v8314_v26 = vpack.c.bf16 %v4742_v1, %v4730_v28  ;;  %v16391_v14 = vld [vmem:[#allocation244_spill] sm:$0xff]  ;;  %v16392_v15 = vld [vmem:[#allocation258_spill] sm:$0xff]  ;;  %v16396_v28 = vand.u32 4294901760, %v16389_v2 }
 0x390   :  { %4602 = vmatmul.mubr.f32.gmra.mrb[4].mxu1 %v4601_v45  ;;  %v4765_v24 = vsub.f32 %v16379_v49, %v16387_v33  ;;  %v4771_v45 = vsub.f32 %v16382_v29, %v14795_v56  ;;  %v16393_v10 = vld [vmem:[#allocation156_spill] sm:$0xff]  ;;  %v16404_v33 = vand.u32 4294901760, %v16394_v9 }
 0x391   :  { %4612 = vmatprep.mubr.f32.mxu1 %v4611_v44  ;;  %8307 = vmatpush1.bf16.msra.mxu1 %v8306_v3  ;;  %v4777_v44 = vsub.f32 %v16384_v35, %v14796_v63  ;;  %v8316_v3 = vpack.c.bf16 %v4760_v50, %v4748_v60  ;;  %v4754_v20 = vand.u32 4294901760, %v4753_v32  ;;  %v4784_v35 = vand.u32 4294901760, %v4783_v39 }
 0x392   :  { %8309 = vmatprep.subr.bf16.mxu1 %v8308_v52  ;;  %v4789_v52 = vsub.f32 %v16385_v21, %v14798_v4  ;;  %v4766_v17 = vand.u32 4294901760, %v4765_v24  ;;  %v4772_v25 = vand.u32 4294901760, %v4771_v45  ;;  %v4807_v60 = vsub.f32 %v16389_v2, %v16396_v28  ;;  %v16397_v24 = vld [vmem:[#allocation161_spill] sm:$0xff]  ;;  %v16398_v4 = vld [vmem:[#allocation162_spill] sm:$0xff] }
 0x393   :  { %v4778_v50 = vand.u32 4294901760, %v4777_v44  ;;  %v16401_v39 = vand.u32 4294901760, %v16391_v14  ;;  %v16403_v44 = vand.u32 4294901760, %v16393_v10  ;;  %v16412_v2 = vld [vmem:[#allocation266_spill] sm:$0xff] }
 0x394   :  { %4618 = vmatmul.mubr.f32.gmra.mrb[6].mxu1 %v4617_v62  ;;  %v16395_v62 = vand.u32 4294901760, %v16388_v5  ;;  %v4790_v32 = vand.u32 4294901760, %v4789_v52  ;;  %v8318_v56 = vpack.c.bf16 %v4766_v17, %v4754_v20  ;;  %v4831_v20 = vsub.f32 %v16394_v9, %v16404_v33  ;;  %v16409_v33 = vld [vmem:[#allocation209_spill] sm:$0xff] }
 0x395   :  { %8311 = vmatpush1.bf16.msra.mxu1 %v8310_v16  ;;  %5009 = vmatprep.mubr.f32.mxu1 %v16390_v51  ;;  %v14802_v16 = vand.u32 4294901760, %v16397_v24  ;;  %v16402_v51 = vand.u32 4294901760, %v16392_v15  ;;  %v4819_v52 = vsub.f32 %v16393_v10, %v16403_v44  ;;  %v8320_v17 = vpack.c.bf16 %v4784_v35, %v4772_v25  ;;  %v16408_v35 = vld [vmem:[#allocation254_spill] sm:$0xff]  ;;  %v16411_v9 = vld [vmem:[#allocation265_spill] sm:$0xff] }
 0x396   :  { %8313 = vmatprep.subr.bf16.mxu1 %v8312_v43  ;;  %v4795_v1 = vsub.f32 %v16388_v5, %v16395_v62  ;;  %v16400_v43 = vld [vmem:[#allocation252_spill] sm:$0xff]  ;;  %v4801_v62 = vsub.f32 %v16391_v14, %v16401_v39  ;;  %v8322_v63 = vpack.c.bf16 %v4790_v32, %v4778_v50  ;;  %v16405_v14 = vand.u32 4294901760, %v16398_v4 }
 0x397   :  { %v4813_v28 = vsub.f32 %v16392_v15, %v16402_v51  ;;  %v4825_v39 = vsub.f32 %v16397_v24, %v14802_v16  ;;  %v16406_v15 = vand.u32 4294901760, %v16399_v34  ;;  %v16407_v10 = vand.u32 4294901760, %v16400_v43 }
 0x398   :  { %v4796_v45 = vand.u32 4294901760, %v4795_v1  ;;  %v4837_v51 = vsub.f32 %v16398_v4, %v16405_v14  ;;  %v14814_v1 = vand.u32 4294901760, %v16409_v33  ;;  %v4820_v32 = vand.u32 4294901760, %v4819_v52  ;;  %v16410_v14 = vld [vmem:[#allocation211_spill] sm:$0xff] }
 0x399   :  { %8315 = vmatpush1.bf16.msra.mxu1 %v8314_v26  ;;  %v4808_v26 = vand.u32 4294901760, %v4807_v60  ;;  %v4843_v44 = vsub.f32 %v16399_v34, %v16406_v15  ;;  %v4802_v60 = vand.u32 4294901760, %v4801_v62  ;;  %v4814_v50 = vand.u32 4294901760, %v4813_v28 }
 0x39a   :  { %8317 = vmatprep.subr.bf16.mxu1 %v8316_v3  ;;  %v4855_v3 = vsub.f32 %v16400_v43, %v16407_v10  ;;  %v4832_v16 = vand.u32 4294901760, %v4831_v20  ;;  %v14813_v4 = vand.u32 4294901760, %v16410_v14  ;;  %v14812_v5 = vand.u32 4294901760, %v16411_v9  ;;  %v16413_v10 = vld [vmem:[#allocation212_spill] sm:$0xff] }
 0x39b   :  { %v8324_v24 = vpack.c.bf16 %v4808_v26, %v4796_v45  ;;  %v4826_v15 = vand.u32 4294901760, %v4825_v39  ;;  %v4838_v34 = vand.u32 4294901760, %v4837_v51  ;;  %v14815_v21 = vand.u32 4294901760, %v16412_v2  ;;  %v16415_v39 = vld [vmem:[#allocation175_spill] sm:$0xff] }
 0x39c   :  { %v14816_v43 = vand.u32 4294901760, %v16413_v10  ;;  %v4844_v25 = vand.u32 4294901760, %v4843_v44  ;;  %v4856_v29 = vand.u32 4294901760, %v4855_v3  ;;  %v4861_v45 = vsub.f32 %v16409_v33, %v14814_v1 }
 0x39d   :  { %8319 = vmatpush1.bf16.msra.mxu1 %v8318_v56  ;;  %v16414_v56 = vand.u32 4294901760, %v16408_v35  ;;  %v8326_v28 = vpack.c.bf16 %v4814_v50, %v4802_v60  ;;  %v8328_v52 = vpack.c.bf16 %v4832_v16, %v4820_v32  ;;  %v4867_v20 = vsub.f32 %v16410_v14, %v14813_v4 }
 0x39e   :  { %8321 = vmatprep.subr.bf16.mxu1 %v8320_v17  ;;  %v4879_v17 = vsub.f32 %v16411_v9, %v14812_v5  ;;  %v14825_v26 = vand.u32 4294901760, %v12659_v6  ;;  %v14817_v51 = vand.u32 4294901760, %v16415_v39  ;;  %v4873_v44 = vsub.f32 %v16412_v2, %v14815_v21  ;;  %v16416_v5 = vld [vmem:[#allocation64_spill] sm:$0xff] }
 0x39f   :  { %v4849_v62 = vsub.f32 %v16408_v35, %v16414_v56  ;;  %v8332_v16 = vpack.c.bf16 %v4856_v29, %v4844_v25  ;;  %v4862_v60 = vand.u32 4294901760, %v4861_v45  ;;  %v14818_v50 = vand.u32 4294901760, %v12667_v59 }
 0x3a0   :  { %v14819_v32 = vand.u32 4294901760, %v12669_v61  ;;  %v14820_v56 = vand.u32 4294901760, %v12673_v19  ;;  %v14823_v4 = vand.u32 4294901760, %v16416_v5  ;;  %v4868_v1 = vand.u32 4294901760, %v4867_v20 }
 0x3a1   :  { %8323 = vmatpush1.bf16.msra.mxu1 %v8322_v63  ;;  %v4885_v63 = vsub.f32 %v16413_v10, %v14816_v43  ;;  %v4850_v3 = vand.u32 4294901760, %v4849_v62  ;;  %v4880_v21 = vand.u32 4294901760, %v4879_v17  ;;  %v4891_v43 = vsub.f32 %v12659_v6, %v14825_v26 }
 0x3a2   :  { %8325 = vmatprep.subr.bf16.mxu1 %v8324_v24  ;;  %v8330_v24 = vpack.c.bf16 %v4838_v34, %v4826_v15  ;;  %v4903_v29 = vsub.f32 %v16415_v39, %v14817_v51  ;;  %v4874_v34 = vand.u32 4294901760, %v4873_v44  ;;  %v14821_v15 = vand.u32 4294901760, %v12683_v8 }
 0x3a3   :  { %v4886_v25 = vand.u32 4294901760, %v4885_v63  ;;  %v14822_v62 = vand.u32 4294901760, %v12687_v13  ;;  %v8334_v45 = vpack.c.bf16 %v4862_v60, %v4850_v3  ;;  %v4897_v20 = vsub.f32 %v12667_v59, %v14818_v50 }
 0x3a4   :  { %v4909_v17 = vsub.f32 %v12669_v61, %v14819_v32  ;;  %v4915_v44 = vsub.f32 %v12673_v19, %v14820_v56  ;;  %v4927_v63 = vsub.f32 %v16416_v5, %v14823_v4  ;;  %v8336_v3 = vpack.c.bf16 %v4880_v21, %v4868_v1 }
 0x3a5   :  { %8327 = vmatpush1.bf16.msra.mxu1 %v8326_v28  ;;  %v14824_v28 = vand.u32 4294901760, %v12691_v38  ;;  %v4892_v60 = vand.u32 4294901760, %v4891_v43  ;;  %v8338_v51 = vpack.c.bf16 %v4886_v25, %v4874_v34  ;;  %v4921_v50 = vsub.f32 %v12683_v8, %v14821_v15 }
 0x3a6   :  { %8329 = vmatprep.subr.bf16.mxu1 %v8328_v52  ;;  %v14830_v52 = vand.u32 4294901760, %v12693_v0  ;;  %v4933_v32 = vsub.f32 %v12687_v13, %v14822_v62  ;;  %v14840_v21 = vand.u32 4294901760, %v12700_v36  ;;  %v14839_v43 = vand.u32 4294901760, %v12702_v27 }
 0x3a7   :  { %v4939_v56 = vsub.f32 %v12691_v38, %v14824_v28  ;;  %v4898_v1 = vand.u32 4294901760, %v4897_v20  ;;  %v4916_v34 = vand.u32 4294901760, %v4915_v44  ;;  %v4928_v25 = vand.u32 4294901760, %v4927_v63 }
 0x3a8   :  { %v14838_v62 = vand.u32 4294901760, %v12711_v11  ;;  %v14831_v4 = vand.u32 4294901760, %v12713_v55  ;;  %v4922_v28 = vand.u32 4294901760, %v4921_v50  ;;  %v4934_v26 = vand.u32 4294901760, %v4933_v32 }
 0x3a9   :  { %8331 = vmatpush1.bf16.msra.mxu1 %v8330_v24  ;;  %v4904_v24 = vand.u32 4294901760, %v4903_v29  ;;  %v4910_v29 = vand.u32 4294901760, %v4909_v17  ;;  %v4940_v38 = vand.u32 4294901760, %v4939_v56  ;;  %v8344_v17 = vpack.c.bf16 %v4928_v25, %v4916_v34 }
 0x3aa   :  { %8333 = vmatprep.subr.bf16.mxu1 %v8332_v16  ;;  %v4951_v16 = vsub.f32 %v12693_v0, %v14830_v52  ;;  %v4945_v52 = vsub.f32 %v12700_v36, %v14840_v21  ;;  %v14837_v44 = vand.u32 4294901760, %v12719_v18  ;;  %v14833_v63 = vand.u32 4294901760, %v12728_v53  ;;  %v16451_v21 = vld [vmem:[#allocation50_spill] sm:$0xff] }
 0x3ab   :  { %v8340_v15 = vpack.c.bf16 %v4904_v24, %v4892_v60  ;;  %v8342_v20 = vpack.c.bf16 %v4910_v29, %v4898_v1  ;;  %v4963_v50 = vsub.f32 %v12711_v11, %v14838_v62  ;;  %v4975_v32 = vsub.f32 %v12713_v55, %v14831_v4 }
 0x3ac   :  { %v4952_v8 = vand.u32 4294901760, %v4951_v16  ;;  %v14832_v56 = vand.u32 4294901760, %v12739_v22  ;;  %v4946_v24 = vand.u32 4294901760, %v4945_v52  ;;  %v4981_v1 = vsub.f32 %v12728_v53, %v14833_v63 }
 0x3ad   :  { %8335 = vmatpush1.bf16.msra.mxu1 %v8334_v45  ;;  %v4957_v45 = vsub.f32 %v12702_v27, %v14839_v43  ;;  %v14835_v29 = vand.u32 4294901760, %v12764_v23  ;;  %v14836_v34 = vand.u32 4294901760, %v12769_v37  ;;  %v4964_v25 = vand.u32 4294901760, %v4963_v50 }
 0x3ae   :  { %8337 = vmatprep.subr.bf16.mxu1 %v8336_v3  ;;  %v14834_v3 = vand.u32 4294901760, %v12741_v58  ;;  %v8348_v60 = vpack.c.bf16 %v4952_v8, %v4940_v38  ;;  %v4976_v4 = vand.u32 4294901760, %v4975_v32  ;;  %v4987_v38 = vsub.f32 %v12739_v22, %v14832_v56 }
 0x3af   :  { %v4958_v16 = vand.u32 4294901760, %v4957_v45  ;;  %v4982_v52 = vand.u32 4294901760, %v4981_v1  ;;  %v4993_v45 = vsub.f32 %v12764_v23, %v14835_v29  ;;  %v16420_v29 = vld [vmem:[#allocation221_spill] sm:$0xff] }
 0x3b0   :  { %v4999_v8 = vsub.f32 %v12741_v58, %v14834_v3  ;;  %v4988_v50 = vand.u32 4294901760, %v4987_v38 }
 0x3b1   :  { %8339 = vmatpush1.bf16.msra.mxu1 %v8338_v51  ;;  %v8346_v51 = vpack.c.bf16 %v4934_v26, %v4922_v28  ;;  %v8350_v26 = vpack.c.bf16 %v4958_v16, %v4946_v24  ;;  %v4994_v63 = vand.u32 4294901760, %v4993_v45  ;;  %v16417_v16 = vld [vmem:[#allocation132_spill] sm:$0xff]  ;;  %v16432_v45 = vld [vmem:[#allocation179_spill] sm:$0xff] }
 0x3b2   :  { %8341 = vmatprep.subr.bf16.mxu1 %v8340_v15  ;;  %v4969_v15 = vsub.f32 %v12719_v18, %v14837_v44  ;;  %v5000_v32 = vand.u32 4294901760, %v4999_v8  ;;  %v16428_v8 = vld [vmem:[#allocation169_spill] sm:$0xff]  ;;  %v16446_v44 = vld [vmem:[#allocation40_spill] sm:$0xff] }
 0x3b4   :  { %v4970_v28 = vand.u32 4294901760, %v4969_v15  ;;  %v16418_v15 = vld [vmem:[#allocation227_spill] sm:$0xff] }
 0x3b5   :  { %8343 = vmatpush1.bf16.msra.mxu1 %v8342_v20  ;;  %v5005_v20 = vsub.f32 %v12769_v37, %v14836_v34  ;;  %v16419_v1 = vpack.c.bf16 %v16417_v16, %v16418_v15 }
 0x3b6   :  { %8345 = vmatprep.subr.bf16.mxu1 %v8344_v17  ;;  %v8352_v17 = vpack.c.bf16 %v4976_v4, %v4964_v25  ;;  %v8354_v56 = vpack.c.bf16 %v4982_v52, %v4970_v28  ;;  %v16422_v4 = vpack.c.bf16 %v12376_v31, %v12374_v57  ;;  %v16423_v25 = vld [vmem:[#allocation166_spill] sm:$0xff]  ;;  %v16430_v28 = vld [vmem:[#allocation243_spill] sm:$0xff] }
 0x3b7   :  { %v5006_v3 = vand.u32 4294901760, %v5005_v20  ;;  %v16424_v38 = vpack.c.bf16 %v12400_v7, %v16423_v25  ;;  %v16431_v52 = vld [vmem:[#allocation54_spill] sm:$0xff]  ;;  %v16433_v20 = vpack.c.bf16 %v12439_v48, %v16432_v45 }
 0x3b9   :  { %8347 = vmatpush1.bf16.msra.mxu1 %v8346_v51  ;;  %v8356_v51 = vpack.c.bf16 %v5000_v32, %v4988_v50  ;;  %v8358_v24 = vpack.c.bf16 %v5006_v3, %v4994_v63  ;;  %v16426_v63 = vld [vmem:[#allocation229_spill] sm:$0xff]  ;;  %v16427_v3 = vpack.c.bf16 %v12407_v30, %v12405_v42  ;;  %v16435_v50 = vld [vmem:[#allocation163_spill] sm:$0xff] }
 0x3ba   :  { %8349 = vmatprep.subr.bf16.mxu1 %v8348_v60  ;;  %v16421_v60 = vld [vmem:[#allocation224_spill] sm:$0xff]  ;;  %v16436_v32 = vld [vmem:[#allocation233_spill] sm:$0xff] }
 0x3bd   :  { %8351 = vmatpush1.bf16.msra.mxu1 %v8350_v26  ;;  %v16429_v26 = vpack.c.bf16 %v12432_v46, %v16428_v8 }
 0x3be   :  { %8353 = vmatprep.subr.bf16.mxu1 %v8352_v17  ;;  %v16434_v17 = vpack.c.bf16 %v12450_v41, %v12448_v12 }
 0x3c1   :  { %8355 = vmatpush1.bf16.msra.mxu1 %v8354_v56  ;;  %v16425_v56 = vld [vmem:[#allocation135_spill] sm:$0xff] }
 0x3c2   :  { %8357 = vmatprep.subr.bf16.mxu1 %v8356_v51  ;;  %v16437_v51 = vpack.c.bf16 %v12465_v47, %v16436_v32 }
 0x3c5   :  { %8359 = vmatpush1.bf16.msra.mxu1 %v8358_v24  ;;  %v16438_v24 = vld [vmem:[#allocation225_spill] sm:$0xff] }
 0x3c6   :  { %8361 = vmatprep.subr.bf16.mxu1 %v16419_v1  ;;  %v16439_v1 = vld [vmem:[#allocation234_spill] sm:$0xff] }
 0x3c8   :  { %5011 = vmatmul.mubr.f32.vlgmr.msra.gmra.mrb[0].mxu1 %v16420_v29  ;;  %v16461_v29 = vld [vmem:[#allocation156_spill] sm:$0xff] }
 0x3c9   :  { %5017 = vmatprep.mubr.f32.mxu1 %v16421_v60  ;;  %8363 = vmatpush1.bf16.msra.mxu1 %v16422_v4  ;;  %v16440_v4 = vld [vmem:[#allocation178_spill] sm:$0xff] }
 0x3ca   :  { %8365 = vmatprep.subr.bf16.mxu1 %v16424_v38  ;;  %v16441_v38 = vpack.c.bf16 %v16439_v1, %v16440_v4 }
 0x3cc   :  { %5019 = vmatmul.mubr.f32.gmra.mrb[2].mxu1 %v16425_v56  ;;  %v16458_v56 = vld [vmem:[#allocation244_spill] sm:$0xff] }
 0x3cd   :  { %5025 = vmatprep.mubr.f32.mxu1 %v16426_v63  ;;  %8367 = vmatpush1.bf16.msra.mxu1 %v16427_v3  ;;  %v16442_v3 = vld [vmem:[#allocation235_spill] sm:$0xff] }
 0x3ce   :  { %8369 = vmatprep.subr.bf16.mxu1 %v16429_v26  ;;  %v16443_v26 = vld [vmem:[#allocation236_spill] sm:$0xff] }
 0x3cf   :  { %v16444_v34 = vpack.c.bf16 %v16442_v3, %v16443_v26 }
 0x3d0   :  { %5027 = vmatmul.mubr.f32.gmra.mrb[4].mxu1 %v16430_v28  ;;  %v16455_v28 = vld [vmem:[#allocation59_spill] sm:$0xff] }
 0x3d1   :  { %5033 = vmatprep.mubr.f32.mxu1 %v16431_v52  ;;  %8371 = vmatpush1.bf16.msra.mxu1 %v16433_v20  ;;  %v16445_v20 = vld [vmem:[#allocation151_spill] sm:$0xff] }
 0x3d2   :  { %8373 = vmatprep.subr.bf16.mxu1 %v16434_v17  ;;  %v16447_v62 = vpack.c.bf16 %v16445_v20, %v16446_v44  ;;  %v16448_v17 = vpack.c.bf16 %v16379_v49, %v16378_v40  ;;  %v16464_v40 = vld [vmem:[#allocation161_spill] sm:$0xff] }
 0x3d4   :  { %5035 = vmatmul.mubr.f32.gmra.mrb[6].mxu1 %v16435_v50  ;;  %v16452_v50 = vld [vmem:[#allocation45_spill] sm:$0xff] }
 0x3d5   :  { %8375 = vmatpush1.bf16.msra.mxu1 %v16437_v51  ;;  %5235 = vmatprep.mubr.f32.mxu1 %v16438_v24  ;;  %v16449_v51 = vld [vmem:[#allocation49_spill] sm:$0xff]  ;;  %v16453_v52 = vpack.c.bf16 %v16451_v21, %v16452_v50 }
 0x3d6   :  { %8377 = vmatprep.subr.bf16.mxu1 %v16441_v38  ;;  %v16450_v43 = vpack.c.bf16 %v16383_v54, %v16449_v51  ;;  %v16454_v38 = vld [vmem:[#allocation60_spill] sm:$0xff]  ;;  %v16467_v51 = vld [vmem:[#allocation253_spill] sm:$0xff] }
 0x3d7   :  { %v16456_v63 = vpack.c.bf16 %v16454_v38, %v16455_v28 }
 0x3d9   :  { %8379 = vmatpush1.bf16.msra.mxu1 %v16444_v34  ;;  %v16457_v34 = vld [vmem:[#allocation258_spill] sm:$0xff] }
 0x3da   :  { %8381 = vmatprep.subr.bf16.mxu1 %v16447_v62  ;;  %v16459_v60 = vpack.c.bf16 %v16457_v34, %v16458_v56  ;;  %v16460_v62 = vld [vmem:[#allocation159_spill] sm:$0xff] }
 0x3db   :  { %v16462_v49 = vpack.c.bf16 %v16460_v62, %v16461_v29 }
 0x3dd   :  { %8383 = vmatpush1.bf16.msra.mxu1 %v16448_v17  ;;  %v16463_v17 = vld [vmem:[#allocation162_spill] sm:$0xff] }
 0x3de   :  { %8385 = vmatprep.subr.bf16.mxu1 %v16450_v43  ;;  %v16465_v54 = vpack.c.bf16 %v16463_v17, %v16464_v40  ;;  %v16466_v43 = vld [vmem:[#allocation252_spill] sm:$0xff] }
 0x3df   :  { %v16468_v21 = vpack.c.bf16 %v16466_v43, %v16467_v51 }
 0x3e1   :  { %8387 = vmatpush1.bf16.msra.mxu1 %v16453_v52  ;;  %v16469_v52 = vpack.c.bf16 %v16409_v33, %v16408_v35 }
 0x3e2   :  { %8389 = vmatprep.subr.bf16.mxu1 %v16456_v63  ;;  %v16470_v63 = vpack.c.bf16 %v16411_v9, %v16410_v14 }
 0x3e5   :  { %8391 = vmatpush1.bf16.msra.mxu1 %v16459_v60  ;;  %v16471_v60 = vpack.c.bf16 %v16413_v10, %v16412_v2 }
 0x3e6   :  { %8393 = vmatprep.subr.bf16.mxu1 %v16462_v49  ;;  %v16472_v49 = vpack.c.bf16 %v16415_v39, %v12659_v6 }
 0x3e9   :  { %8395 = vmatpush1.bf16.msra.mxu1 %v16465_v54  ;;  %v16473_v54 = vpack.c.bf16 %v12669_v61, %v12667_v59 }
 0x3ea   :  { %8397 = vmatprep.subr.bf16.mxu1 %v16468_v21  ;;  %v16474_v21 = vpack.c.bf16 %v16416_v5, %v12673_v19 }
 0x3ed   :  { %8399 = vmatpush1.bf16.msra.mxu1 %v16469_v52  ;;  %v16475_v52 = vld [vmem:[#allocation68_spill] sm:$0xff] }
 0x3ee   :  { %8401 = vmatprep.subr.bf16.mxu1 %v16470_v63  ;;  %v16476_v9 = vpack.c.bf16 %v12687_v13, %v16475_v52  ;;  %v16477_v63 = vld [vmem:[#allocation72_spill] sm:$0xff] }
 0x3ef   :  { %v16478_v10 = vpack.c.bf16 %v12693_v0, %v16477_v63  ;;  %v16507_v0 = vld [vmem:[#allocation56_spill] sm:$0xff] }
 0x3f1   :  { %8403 = vmatpush1.bf16.msra.mxu1 %v16471_v60  ;;  %v16479_v60 = vpack.c.bf16 %v12702_v27, %v12700_v36  ;;  %v16485_v27 = vld [vmem:[#allocation222_spill] sm:$0xff] }
 0x3f2   :  { %8405 = vmatprep.subr.bf16.mxu1 %v16472_v49  ;;  %v16480_v49 = vpack.c.bf16 %v12713_v55, %v12711_v11  ;;  %v16487_v55 = vld [vmem:[#allocation226_spill] sm:$0xff] }
 0x3f3   :  { %v16503_v11 = vld [vmem:[#allocation238_spill] sm:$0xff] }
 0x3f5   :  { %8407 = vmatpush1.bf16.msra.mxu1 %v16473_v54  ;;  %v16481_v54 = vpack.c.bf16 %v12728_v53, %v12719_v18  ;;  %v16489_v53 = vld [vmem:[#allocation168_spill] sm:$0xff]  ;;  %v16500_v18 = vld [vmem:[#allocation177_spill] sm:$0xff] }
 0x3f6   :  { %8409 = vmatprep.subr.bf16.mxu1 %v16474_v21  ;;  %v16482_v21 = vpack.c.bf16 %v12741_v58, %v12739_v22  ;;  %v16491_v58 = vld [vmem:[#allocation228_spill] sm:$0xff]  ;;  %v16497_v22 = vld [vmem:[#allocation261_spill] sm:$0xff] }
 0x3f9   :  { %8411 = vmatpush1.bf16.msra.mxu1 %v16476_v9  ;;  %v16483_v9 = vpack.c.bf16 %v12769_v37, %v12764_v23  ;;  %v16493_v37 = vld [vmem:[#allocation52_spill] sm:$0xff]  ;;  %v16496_v23 = vld [vmem:[#allocation231_spill] sm:$0xff] }
 0x3fa   :  { %8413 = vmatprep.subr.bf16.mxu1 %v16478_v10  ;;  %v16484_v10 = vld [vmem:[#allocation223_spill] sm:$0xff] }
 0x3fd   :  { %8415 = vmatpush1.bf16.msra.mxu1 %v16479_v60  ;;  %v16486_v60 = vld [vmem:[#allocation230_spill] sm:$0xff] }
 0x3fe   :  { %8417 = vmatprep.subr.bf16.mxu1 %v16480_v49  ;;  %v16488_v49 = vld [vmem:[#allocation133_spill] sm:$0xff] }
 0x401   :  { %8419 = vmatpush1.bf16.msra.mxu1 %v16481_v54  ;;  %v16490_v54 = vld [vmem:[#allocation232_spill] sm:$0xff] }
 0x402   :  { %8421 = vmatprep.subr.bf16.mxu1 %v16482_v21  ;;  %v16492_v21 = vld [vmem:[#allocation167_spill] sm:$0xff] }
 0x405   :  { %8423 = vmatpush1.bf16.msra.mxu1 %v16483_v9  ;;  %v16494_v9 = vld [vmem:[#allocation160_spill] sm:$0xff] }
 0x406   :  { %8425 = vmatprep.subr.bf16.mxu1 %v16484_v10  ;;  %v16495_v10 = vld [vmem:[#allocation241_spill] sm:$0xff] }
 0x408   :  { %5238 = vmatmul.mubr.f32.vlgmr.msra.gmra.mrb[0].mxu1 %v16485_v27 }
 0x409   :  { %5245 = vmatprep.mubr.f32.mxu1 %v16486_v60  ;;  %8427 = vmatpush1.bf16.msra.mxu1 %v16487_v55  ;;  %v16498_v55 = vld [vmem:[#allocation180_spill] sm:$0xff] }
 0x40a   :  { %8429 = vmatprep.subr.bf16.mxu1 %v16488_v49  ;;  %v16499_v49 = vand.u32 4294901760, %v16438_v24  ;;  %v16509_v24 = vld [vmem:[#allocation57_spill] sm:$0xff] }
 0x40c   :  { %5248 = vmatmul.mubr.f32.gmra.mrb[2].mxu1 %v16489_v53 }
 0x40d   :  { %5255 = vmatprep.mubr.f32.mxu1 %v16490_v54  ;;  %8431 = vmatpush1.bf16.msra.mxu1 %v16491_v58  ;;  %v16501_v58 = vld [vmem:[#allocation237_spill] sm:$0xff] }
 0x40e   :  { %8433 = vmatprep.subr.bf16.mxu1 %v16492_v21  ;;  %v16502_v21 = vld [vmem:[#allocation39_spill] sm:$0xff] }
 0x410   :  { %5258 = vmatmul.mubr.f32.gmra.mrb[4].mxu1 %v16493_v37 }
 0x411   :  { %5265 = vmatprep.mubr.f32.mxu1 %v16494_v9  ;;  %8435 = vmatpush1.bf16.msra.mxu1 %v16495_v10  ;;  %v16505_v10 = vld [vmem:[#allocation48_spill] sm:$0xff] }
 0x412   :  { %8437 = vmatprep.subr.bf16.mxu1 %v16496_v23 }
 0x414   :  { %5268 = vmatmul.mubr.f32.gmra.mrb[6].mxu1 %v16497_v22 }
 0x415   :  { %8439 = vmatpush1.bf16.msra.mxu1 %v16498_v55  ;;  %5405 = vmatprep.mubr.f32.mxu1 %v16499_v49 }
 0x416   :  { %8441 = vmatprep.subr.bf16.mxu1 %v16500_v18  ;;  %v16511_v18 = vld [vmem:[#allocation153_spill] sm:$0xff] }
 0x419   :  { %8443 = vmatpush1.bf16.msra.mxu1 %v16501_v58 }
 0x41a   :  { %8445 = vmatprep.subr.bf16.mxu1 %v16502_v21  ;;  %v16513_v21 = vld [vmem:[#allocation155_spill] sm:$0xff] }
 0x41d   :  { %8447 = vmatpush1.bf16.msra.mxu1 %v16503_v11 }
 0x41e   :  { %v13149_v36 = vpop.f32.mrb[8].mxu0  ;;  %8449 = vmatprep.subr.bf16.mxu1 %v16505_v10 }
 0x41f   :  { %16504 = vst [vmem:[#allocation18_spill] sm:$0xff] %v13149_v36  ;;  %v13152_v23 = vpop.f32.mrb[9].mxu0  ;;  %v16515_v36 = vld [vmem:[#allocation165_spill] sm:$0xff] }
 0x420   :  { %16506 = vst [vmem:[#allocation19_spill] sm:$0xff] %v13152_v23  ;;  %v16517_v23 = vld [vmem:[#allocation242_spill] sm:$0xff] }
 0x421   :  { %8451 = vmatpush1.bf16.msra.mxu1 %v16507_v0 }
 0x422   :  { %v13155_v55 = vpop.f32.mrb[10].mxu0  ;;  %8453 = vmatprep.subr.bf16.mxu1 %v16509_v24  ;;  %v16520_v24 = vld [vmem:[#allocation262_spill] sm:$0xff] }
 0x423   :  { %16508 = vst [vmem:[#allocation97_spill] sm:$0xff] %v13155_v55  ;;  %v13158_v49 = vpop.f32.mrb[11].mxu0  ;;  %v16519_v55 = vld [vmem:[#allocation263_spill] sm:$0xff] }
 0x424   :  { %16510 = vst [vmem:[#allocation98_spill] sm:$0xff] %v13158_v49  ;;  %v16521_v49 = vld [vmem:[#allocation213_spill] sm:$0xff] }
 0x425   :  { %8455 = vmatpush1.bf16.msra.mxu1 %v16511_v18  ;;  %v16522_v18 = vld [vmem:[#allocation216_spill] sm:$0xff] }
 0x426   :  { %v13161_v58 = vpop.f32.mrb[12].mxu0  ;;  %8457 = vmatprep.subr.bf16.mxu1 %v16513_v21  ;;  %v16524_v21 = vld [vmem:[#allocation63_spill] sm:$0xff] }
 0x427   :  { %16512 = vst [vmem:[#allocation251_spill] sm:$0xff] %v13161_v58  ;;  %v13164_v11 = vpop.f32.mrb[13].mxu0  ;;  %v16523_v58 = vld [vmem:[#allocation204_spill] sm:$0xff] }
 0x428   :  { %16514 = vst [vmem:[#allocation33_spill] sm:$0xff] %v13164_v11  ;;  %v16525_v11 = vld [vmem:[#allocation66_spill] sm:$0xff] }
 0x429   :  { %8459 = vmatpush1.bf16.msra.mxu1 %v16515_v36  ;;  %v16526_v36 = vld [vmem:[#allocation69_spill] sm:$0xff] }
 0x42a   :  { %v13167_v10 = vpop.f32.mrb[14].mxu0  ;;  %8461 = vmatprep.subr.bf16.mxu1 %v16517_v23  ;;  %v16528_v23 = vld [vmem:[#allocation15_spill] sm:$0xff] }
 0x42b   :  { %16516 = vst [vmem:[#allocation100_spill] sm:$0xff] %v13167_v10  ;;  %v13170_v0 = vpop.f32.mrb[15].mxu0  ;;  %v16527_v10 = vld [vmem:[#allocation76_spill] sm:$0xff] }
 0x42c   :  { %16518 = vst [vmem:[#allocation102_spill] sm:$0xff] %v13170_v0  ;;  %v16529_v0 = vld [vmem:[#allocation29_spill] sm:$0xff] }
 0x42d   :  { %8463 = vmatpush1.bf16.msra.mxu1 %v16519_v55  ;;  %v16530_v55 = vld [vmem:[#allocation87_spill] sm:$0xff] }
 0x42e   :  { %8465 = vmatprep.subr.bf16.mxu1 %v16520_v24 }
 0x431   :  { %8467 = vmatpush1.bf16.msra.mxu1 %v16521_v49  ;;  %v16531_v49 = vand.u32 4294901760, %v16418_v15  ;;  %v16539_v15 = vand.u32 4294901760, %v16486_v60 }
 0x432   :  { %8469 = vmatprep.subr.bf16.mxu1 %v16522_v18  ;;  %v16532_v18 = vand.u32 4294901760, %v16417_v16 }
 0x434   :  { %v8488_v24 = vpack.c.bf16 %v16532_v18, %v16531_v49  ;;  %v16540_v18 = vand.u32 4294901760, %v12405_v42  ;;  %v16547_v42 = vand.u32 4294901760, %v12439_v48  ;;  %v16554_v48 = vand.u32 4294901760, %v16440_v4  ;;  %v5926_v49 = vld [vmem:[#allocation8 + $0x88] sm:$0xff] }
 0x435   :  { %8471 = vmatpush1.bf16.msra.mxu1 %v16523_v58  ;;  %v16533_v58 = vld [vmem:[#allocation89_spill] sm:$0xff]  ;;  %v16561_v4 = vld [vmem:[#allocation128_spill] sm:$0xff] }
 0x436   :  { %8473 = vmatprep.subr.bf16.mxu1 %v16524_v21  ;;  %v16534_v21 = vand.u32 4294901760, %v12374_v57  ;;  %v16541_v57 = vand.u32 4294901760, %v12407_v30  ;;  %v16548_v30 = vand.u32 4294901760, %v12448_v12  ;;  %v16555_v12 = vand.u32 4294901760, %v16439_v1  ;;  %v16562_v1 = vld [vmem:[#allocation41_spill] sm:$0xff] }
 0x438   :  { %v8494_v16 = vpack.c.bf16 %v16541_v57, %v16540_v18  ;;  %v8504_v60 = vpack.c.bf16 %v16555_v12, %v16554_v48  ;;  %v16563_v18 = vand.u32 4294901760, %v16562_v1  ;;  %v5930_v12 = vld [vmem:[#allocation8 + $0xa8] sm:$0xff]  ;;  %v5931_v1 = vld [vmem:[#allocation8 + $0xb0] sm:$0xff] }
 0x439   :  { %8475 = vmatpush1.bf16.msra.mxu1 %v16525_v11  ;;  %v16535_v11 = vand.u32 4294901760, %v12376_v31  ;;  %v16542_v31 = vand.u32 4294901760, %v16428_v8  ;;  %v16552_v8 = vand.u32 4294901760, %v16436_v32  ;;  %v16560_v32 = vand.u32 4294901760, %v16445_v20  ;;  %v16566_v20 = vld [vmem:[#allocation49_spill] sm:$0xff] }
 0x43a   :  { %8477 = vmatprep.subr.bf16.mxu1 %v16526_v36 }
 0x43b   :  { %v8490_v36 = vpack.c.bf16 %v16535_v11, %v16534_v21  ;;  %v16543_v11 = vand.u32 4294901760, %v12432_v46  ;;  %v16550_v46 = vand.u32 4294901760, %v16493_v37  ;;  %v16557_v37 = vand.u32 4294901760, %v16443_v26 }
 0x43d   :  { %8479 = vmatpush1.bf16.msra.mxu1 %v16527_v10  ;;  %v16536_v10 = vand.u32 4294901760, %v16423_v25  ;;  %v8496_v25 = vpack.c.bf16 %v16543_v11, %v16542_v31  ;;  %v5997_v31 = vand.u32 4294901760, %v5926_v49 }
 0x43e   :  { %8481 = vmatprep.subr.bf16.mxu1 %v16528_v23  ;;  %v16537_v23 = vand.u32 4294901760, %v12400_v7  ;;  %v16544_v7 = vand.u32 4294901760, %v16489_v53  ;;  %v16551_v53 = vand.u32 4294901760, %v16494_v9  ;;  %v16559_v9 = vand.u32 4294901760, %v16446_v44  ;;  %v5928_v44 = vld [vmem:[#allocation8 + $0x98] sm:$0xff] }
 0x441   :  { %8483 = vmatpush1.bf16.msra.mxu1 %v16529_v0  ;;  %v8492_v0 = vpack.c.bf16 %v16537_v23, %v16536_v10 }
 0x442   :  { %8485 = vmatprep.subr.bf16.mxu1 %v16530_v55  ;;  %v16538_v55 = vand.u32 4294901760, %v16485_v27 }
 0x445   :  { %8487 = vmatpush1.bf16.msra.mxu1 %v16533_v58 }
 0x446   :  { %8489 = vmatprep.subr.bf16.mxu1 %v8488_v24  ;;  %v5925_v24 = vld [vmem:[#allocation8 + $0x80] sm:$0xff] }
 0x447   :  { %v5994_v26 = vand.u32 4294901760, %v5925_v24 }
 0x448   :  { %5409 = vmatmul.mubr.f32.vlgmr.msra.gmra.mrb[0].mxu1 %v16538_v55  ;;  %v16545_v55 = vand.u32 4294901760, %v16490_v54  ;;  %v16558_v54 = vand.u32 4294901760, %v16442_v3  ;;  %v5910_v3 = vld [vmem:[#allocation8 + $0x8] sm:$0xff] }
 0x449   :  { %5417 = vmatprep.mubr.f32.mxu1 %v16539_v15  ;;  %8491 = vmatpush1.bf16.msra.mxu1 %v8490_v36  ;;  %v16546_v36 = vand.u32 4294901760, %v16432_v45  ;;  %v16553_v45 = vand.u32 4294901760, %v12465_v47  ;;  %v8508_v47 = vpack.c.bf16 %v16560_v32, %v16559_v9  ;;  %v5909_v15 = vld [vmem:[#allocation8] sm:$0xff] }
 0x44a   :  { %8493 = vmatprep.subr.bf16.mxu1 %v8492_v0  ;;  %v16549_v0 = vand.u32 4294901760, %v12450_v41  ;;  %v16556_v41 = vand.u32 4294901760, %v16497_v22  ;;  %v8506_v21 = vpack.c.bf16 %v16558_v54, %v16557_v37  ;;  %v16564_v22 = vld [vmem:[#allocation43_spill] sm:$0xff]  ;;  %v5946_v11 = vand.u32 4294901760, %v5909_v15 }
 0x44b   :  { %v8498_v27 = vpack.c.bf16 %v16547_v42, %v16546_v36  ;;  %v8502_v10 = vpack.c.bf16 %v16553_v45, %v16552_v8  ;;  %v16565_v57 = vand.u32 4294901760, %v16564_v22  ;;  %v13252_v8 = vpack.c.bf16 %v5997_v31, %v5994_v26 }
 0x44c   :  { %5421 = vmatmul.mubr.f32.gmra.mrb[2].mxu1 %v16544_v7  ;;  %v8500_v23 = vpack.c.bf16 %v16549_v0, %v16548_v30  ;;  %v16567_v7 = vand.u32 4294901760, %v16566_v20  ;;  %v6003_v0 = vand.u32 4294901760, %v5928_v44  ;;  %v13254_v45 = vsub.f32 %v5925_v24, %v5994_v26 }
 0x44d   :  { %5429 = vmatprep.mubr.f32.mxu1 %v16545_v55  ;;  %8495 = vmatpush1.bf16.msra.mxu1 %v8494_v16  ;;  %v8510_v16 = vpack.c.bf16 %v16565_v57, %v16563_v18  ;;  %v16568_v55 = vld [vmem:[#allocation44_spill] sm:$0xff]  ;;  %16570 = vst [vmem:[#allocation20_spill] sm:$0xff] %v13252_v8  ;;  %v13258_v48 = vsub.f32 %v5909_v15, %v5946_v11  ;;  %v6009_v22 = vand.u32 4294901760, %v5930_v12 }
 0x44e   :  { %8497 = vmatprep.subr.bf16.mxu1 %v8496_v25  ;;  %v5927_v25 = vld [vmem:[#allocation8 + $0x90] sm:$0xff]  ;;  %v16569_v36 = vand.u32 4294901760, %v16568_v55  ;;  %8617 = vmatprep.subr.bf16.mxu0 %v13252_v8  ;;  %v13269_v24 = vsub.f32 %v5928_v44, %v6003_v0  ;;  %v16575_v55 = vld [vmem:[#allocation50_spill] sm:$0xff] }
 0x44f   :  { %v6000_v30 = vand.u32 4294901760, %v5927_v25 }
 0x450   :  { %5433 = vmatmul.mubr.f32.gmra.mrb[4].mxu1 %v16550_v46  ;;  %v8512_v42 = vpack.c.bf16 %v16569_v36, %v16567_v7  ;;  %v5912_v46 = vld [vmem:[#allocation8 + $0x18] sm:$0xff]  ;;  %v16576_v36 = vand.u32 4294901760, %v16575_v55 }
 0x451   :  { %5441 = vmatprep.mubr.f32.mxu1 %v16551_v53  ;;  %8499 = vmatpush1.bf16.msra.mxu1 %v8498_v27  ;;  %v5949_v27 = vand.u32 4294901760, %v5910_v3  ;;  %v5929_v53 = vld [vmem:[#allocation8 + $0xa0] sm:$0xff]  ;;  %v13264_v9 = vpack.c.bf16 %v6003_v0, %v6000_v30  ;;  %v13266_v32 = vsub.f32 %v5927_v25, %v6000_v30  ;;  %v5955_v15 = vand.u32 4294901760, %v5912_v46  ;;  %v5916_v7 = vld [vmem:[#allocation8 + $0x38] sm:$0xff] }
 0x452   :  { %8501 = vmatprep.subr.bf16.mxu1 %v8500_v23  ;;  %v5911_v23 = vld [vmem:[#allocation8 + $0x10] sm:$0xff]  ;;  %v6006_v18 = vand.u32 4294901760, %v5929_v53  ;;  %v13287_v0 = vsub.f32 %v5930_v12, %v6009_v22  ;;  %v5967_v12 = vand.u32 4294901760, %v5916_v7 }
 0x453   :  { %v13260_v37 = vpack.c.bf16 %v5949_v27, %v5946_v11  ;;  %v13262_v54 = vsub.f32 %v5910_v3, %v5949_v27  ;;  %16572 = vst [vmem:[#allocation105_spill] sm:$0xff] %v13264_v9  ;;  %v6012_v3 = vand.u32 4294901760, %v5931_v1  ;;  %v5915_v11 = vld [vmem:[#allocation8 + $0x30] sm:$0xff]  ;;  %v13277_v44 = vsub.f32 %v5912_v46, %v5955_v15 }
 0x454   :  { %5445 = vmatmul.mubr.f32.gmra.mrb[6].mxu1 %v16556_v41  ;;  %v5914_v41 = vld [vmem:[#allocation8 + $0x28] sm:$0xff]  ;;  %v13279_v20 = vsub.f32 %v5929_v53, %v6006_v18  ;;  %v13285_v30 = vpack.c.bf16 %v6009_v22, %v6006_v18  ;;  %v5964_v53 = vand.u32 4294901760, %v5915_v11  ;;  %v16584_v22 = vand.u32 4294901760, %v16461_v29 }
 0x455   :  { %8503 = vmatpush1.bf16.msra.mxu1 %v8502_v10  ;;  %5708 = vmatprep.mubr.f32.mxu1 %v16561_v4  ;;  %v13256_v10 = vsub.f32 %v5926_v49, %v5997_v31  ;;  %16571 = vst [vmem:[#allocation104_spill] sm:$0xff] %v13260_v37  ;;  %v5952_v49 = vand.u32 4294901760, %v5911_v23  ;;  %v5961_v26 = vand.u32 4294901760, %v5914_v41  ;;  %v5932_v31 = vld [vmem:[#allocation8 + $0xb8] sm:$0xff]  ;;  %v13293_v46 = vsub.f32 %v5931_v1, %v6012_v3 }
 0x456   :  { %8505 = vmatprep.subr.bf16.mxu1 %v8504_v60  ;;  %v5913_v60 = vld [vmem:[#allocation8 + $0x20] sm:$0xff]  ;;  %8619 = vmatpush3.bf16.msra.mxu0 %v13260_v37  ;;  %16577 = vst [vmem:[#allocation109_spill] sm:$0xff] %v13285_v30  ;;  %v13309_v1 = vsub.f32 %v5916_v7, %v5967_v12  ;;  %v16590_v29 = vand.u32 4294901760, %v16466_v43 }
 0x457   :  { %v5958_v57 = vand.u32 4294901760, %v5913_v60  ;;  %8621 = vmatprep.subr.bf16.mxu0 %v13264_v9  ;;  %v13273_v25 = vpack.c.bf16 %v5955_v15, %v5952_v49  ;;  %v13291_v9 = vsub.f32 %v5914_v41, %v5961_v26  ;;  %v13307_v41 = vsub.f32 %v5915_v11, %v5964_v53 }
 0x459   :  { %8507 = vmatpush1.bf16.msra.mxu1 %v8506_v21  ;;  %16573 = vst [vmem:[#allocation106_spill] sm:$0xff] %v13273_v25  ;;  %v13275_v21 = vsub.f32 %v5911_v23, %v5952_v49  ;;  %v13289_v37 = vsub.f32 %v5913_v60, %v5958_v57  ;;  %v6015_v23 = vand.u32 4294901760, %v5932_v31  ;;  %v16578_v49 = vand.u32 4294901760, %v16455_v28 }
 0x45a   :  { %8509 = vmatprep.subr.bf16.mxu1 %v8508_v47  ;;  %v16574_v47 = vand.u32 4294901760, %v16452_v50  ;;  %v16579_v50 = vand.u32 4294901760, %v16454_v38  ;;  %8623 = vmatpush3.bf16.msra.mxu0 %v13273_v25  ;;  %v13300_v18 = vpack.c.bf16 %v5961_v26, %v5958_v57  ;;  %v16582_v28 = vand.u32 4294901760, %v16458_v56  ;;  %v16690_v25 = vld [vmem:[#allocation97_spill] sm:$0xff] }
 0x45b   :  { %8625 = vmatprep.subr.bf16.mxu0 %v13285_v30  ;;  %v13305_v60 = vsub.f32 %v5932_v31, %v6015_v23  ;;  %v16583_v38 = vand.u32 4294901760, %v16457_v34  ;;  %v16585_v57 = vand.u32 4294901760, %v16460_v62  ;;  %v13320_v31 = vpack.c.bf16 %v5967_v12, %v5964_v53 }
 0x45c   :  { %v8514_v27 = vpack.c.bf16 %v16576_v36, %v16574_v47  ;;  %v8516_v15 = vpack.c.bf16 %v16579_v50, %v16578_v49  ;;  %16580 = vst [vmem:[#allocation110_spill] sm:$0xff] %v13300_v18  ;;  %v16588_v56 = vand.u32 4294901760, %v16463_v17  ;;  %v16589_v34 = vand.u32 4294901760, %v16467_v51  ;;  %v16594_v36 = vld [vmem:[#allocation265_spill] sm:$0xff] }
 0x45d   :  { %8511 = vmatpush1.bf16.msra.mxu1 %v8510_v16  ;;  %v13303_v16 = vpack.c.bf16 %v6015_v23, %v6012_v3  ;;  %v8520_v26 = vpack.c.bf16 %v16585_v57, %v16584_v22  ;;  %16586 = vst [vmem:[#allocation114_spill] sm:$0xff] %v13320_v31  ;;  %v16587_v3 = vand.u32 4294901760, %v16464_v40  ;;  %v16591_v62 = vand.u32 4294901760, %v16408_v35  ;;  %v16597_v23 = vld [vmem:[#allocation212_spill] sm:$0xff]  ;;  %v16608_v22 = vld [vmem:[#allocation73_spill] sm:$0xff] }
 0x45e   :  { %8513 = vmatprep.subr.bf16.mxu1 %v8512_v42  ;;  %v8518_v42 = vpack.c.bf16 %v16583_v38, %v16582_v28  ;;  %8627 = vmatpush3.bf16.msra.mxu0 %v13300_v18  ;;  %v8524_v7 = vpack.c.bf16 %v16590_v29, %v16589_v34  ;;  %v16592_v47 = vand.u32 4294901760, %v16409_v33  ;;  %v16593_v40 = vand.u32 4294901760, %v16410_v14  ;;  %v16616_v34 = vld [vmem:[#allocation83_spill] sm:$0xff] }
 0x45f   :  { %16581 = vst [vmem:[#allocation22_spill] sm:$0xff] %v13303_v16  ;;  %8629 = vmatprep.subr.bf16.mxu0 %v13303_v16  ;;  %v8522_v11 = vpack.c.bf16 %v16588_v56, %v16587_v3  ;;  %v16595_v17 = vand.u32 4294901760, %v16594_v36  ;;  %v16596_v51 = vand.u32 4294901760, %v16412_v2  ;;  %v16598_v43 = vand.u32 4294901760, %v16597_v23  ;;  %v16612_v3 = vld [vmem:[#allocation78_spill] sm:$0xff]  ;;  %v16624_v36 = vld [vmem:[#allocation88_spill] sm:$0xff] }
 0x460   :  { %v8526_v55 = vpack.c.bf16 %v16592_v47, %v16591_v62  ;;  %v16599_v49 = vand.u32 4294901760, %v12659_v6  ;;  %v16600_v35 = vand.u32 4294901760, %v16415_v39  ;;  %v16601_v33 = vand.u32 4294901760, %v12667_v59  ;;  %v16620_v62 = vld [vmem:[#allocation17_spill] sm:$0xff] }
 0x461   :  { %8515 = vmatpush1.bf16.msra.mxu1 %v8514_v27  ;;  %v8528_v27 = vpack.c.bf16 %v16595_v17, %v16593_v40  ;;  %v8530_v53 = vpack.c.bf16 %v16598_v43, %v16596_v51  ;;  %v16602_v14 = vand.u32 4294901760, %v12669_v61  ;;  %v16603_v12 = vand.u32 4294901760, %v12673_v19  ;;  %v16610_v61 = vld [vmem:[#allocation77_spill] sm:$0xff]  ;;  %v16626_v51 = vld [vmem:[#allocation91_spill] sm:$0xff]  ;;  %v16628_v43 = vld [vmem:[#allocation92_spill] sm:$0xff] }
 0x462   :  { %8517 = vmatprep.subr.bf16.mxu1 %v8516_v15  ;;  %8631 = vmatpush3.bf16.msra.mxu0 %v13320_v31  ;;  %v8532_v50 = vpack.c.bf16 %v16600_v35, %v16599_v49  ;;  %v16604_v2 = vand.u32 4294901760, %v16416_v5  ;;  %v16605_v38 = vand.u32 4294901760, %v16475_v52  ;;  %v16606_v6 = vand.u32 4294901760, %v12687_v13  ;;  %v16614_v5 = vld [vmem:[#allocation81_spill] sm:$0xff]  ;;  %v16618_v13 = vld [vmem:[#allocation16_spill] sm:$0xff]  ;;  %v16630_v35 = vld [vmem:[#allocation223_spill] sm:$0xff] }
 0x463   :  { %v8534_v15 = vpack.c.bf16 %v16602_v14, %v16601_v33  ;;  %v16607_v39 = vand.u32 4294901760, %v16477_v63  ;;  %v16609_v59 = vand.u32 4294901760, %v16608_v22  ;;  %v16613_v19 = vand.u32 4294901760, %v16612_v3  ;;  %v16632_v33 = vld [vmem:[#allocation224_spill] sm:$0xff]  ;;  %v16633_v14 = vld [vmem:[#allocation226_spill] sm:$0xff]  ;;  %v16642_v22 = vld [vmem:[#allocation231_spill] sm:$0xff] }
 0x464   :  { %v8536_v28 = vpack.c.bf16 %v16604_v2, %v16603_v12  ;;  %v16617_v52 = vand.u32 4294901760, %v16616_v34  ;;  %v16621_v63 = vand.u32 4294901760, %v16620_v62  ;;  %v16625_v17 = vand.u32 4294901760, %v16624_v36  ;;  %v16635_v12 = vld [vmem:[#allocation135_spill] sm:$0xff]  ;;  %v16636_v2 = vld [vmem:[#allocation229_spill] sm:$0xff] }
 0x465   :  { %8519 = vmatpush1.bf16.msra.mxu1 %v8518_v42  ;;  %v8538_v42 = vpack.c.bf16 %v16606_v6, %v16605_v38  ;;  %v8540_v57 = vpack.c.bf16 %v16609_v59, %v16607_v39  ;;  %v16627_v23 = vand.u32 4294901760, %v16626_v51  ;;  %v16638_v38 = vld [vmem:[#allocation167_spill] sm:$0xff]  ;;  %v16641_v39 = vld [vmem:[#allocation241_spill] sm:$0xff] }
 0x466   :  { %8521 = vmatprep.subr.bf16.mxu1 %v8520_v26  ;;  %v16611_v26 = vand.u32 4294901760, %v16610_v61  ;;  %v16639_v6 = vld [vmem:[#allocation243_spill] sm:$0xff]  ;;  %v16645_v61 = vld [vmem:[#allocation177_spill] sm:$0xff] }
 0x467   :  { %v16643_v59 = vld [vmem:[#allocation163_spill] sm:$0xff]  ;;  %v16652_v34 = vld [vmem:[#allocation153_spill] sm:$0xff] }
 0x468   :  { %v8542_v56 = vpack.c.bf16 %v16613_v19, %v16611_v26  ;;  %v16646_v26 = vld [vmem:[#allocation237_spill] sm:$0xff]  ;;  %v16647_v3 = vld [vmem:[#allocation39_spill] sm:$0xff]  ;;  %v16648_v19 = vld [vmem:[#allocation238_spill] sm:$0xff] }
 0x469   :  { %8523 = vmatpush1.bf16.msra.mxu1 %v8522_v11  ;;  %v16615_v11 = vand.u32 4294901760, %v16614_v5  ;;  %v16650_v5 = vld [vmem:[#allocation56_spill] sm:$0xff]  ;;  %v16658_v62 = vld [vmem:[#allocation213_spill] sm:$0xff] }
 0x46a   :  { %8525 = vmatprep.subr.bf16.mxu1 %v8524_v7  ;;  %v16619_v7 = vand.u32 4294901760, %v16618_v13  ;;  %v16656_v13 = vld [vmem:[#allocation263_spill] sm:$0xff]  ;;  %v16663_v36 = vld [vmem:[#allocation69_spill] sm:$0xff] }
 0x46b   :  { %v8544_v29 = vpack.c.bf16 %v16617_v52, %v16615_v11  ;;  %v16651_v11 = vld [vmem:[#allocation57_spill] sm:$0xff]  ;;  %v16653_v52 = vld [vmem:[#allocation155_spill] sm:$0xff] }
 0x46c   :  { %v8546_v47 = vpack.c.bf16 %v16621_v63, %v16619_v7  ;;  %v16657_v7 = vld [vmem:[#allocation262_spill] sm:$0xff]  ;;  %v16659_v63 = vld [vmem:[#allocation216_spill] sm:$0xff]  ;;  %v16666_v51 = vld [vmem:[#allocation29_spill] sm:$0xff] }
 0x46d   :  { %8527 = vmatpush1.bf16.msra.mxu1 %v8526_v55  ;;  %v16622_v55 = vld [vmem:[#allocation240_spill] sm:$0xff] }
 0x46e   :  { %8529 = vmatprep.subr.bf16.mxu1 %v8528_v27  ;;  %v16623_v40 = vand.u32 4294901760, %v16622_v55  ;;  %v16661_v55 = vld [vmem:[#allocation63_spill] sm:$0xff] }
 0x470   :  { %v8548_v27 = vpack.c.bf16 %v16625_v17, %v16623_v40  ;;  %v16662_v40 = vld [vmem:[#allocation66_spill] sm:$0xff]  ;;  %v16664_v17 = vld [vmem:[#allocation76_spill] sm:$0xff] }
 0x471   :  { %8531 = vmatpush1.bf16.msra.mxu1 %v8530_v53  ;;  %v16629_v53 = vand.u32 4294901760, %v16628_v43  ;;  %v5933_v43 = vld [vmem:[#allocation8 + $0xc0] sm:$0xff] }
 0x472   :  { %8533 = vmatprep.subr.bf16.mxu1 %v8532_v50  ;;  %v16631_v50 = vld [vmem:[#allocation221_spill] sm:$0xff] }
 0x473   :  { %v8550_v49 = vpack.c.bf16 %v16629_v53, %v16627_v23  ;;  %v16667_v23 = vld [vmem:[#allocation87_spill] sm:$0xff]  ;;  %v5934_v53 = vld [vmem:[#allocation8 + $0xc8] sm:$0xff] }
 0x475   :  { %8535 = vmatpush1.bf16.msra.mxu1 %v8534_v15  ;;  %v16634_v15 = vld [vmem:[#allocation133_spill] sm:$0xff] }
 0x476   :  { %8537 = vmatprep.subr.bf16.mxu1 %v8536_v28  ;;  %v16637_v28 = vld [vmem:[#allocation228_spill] sm:$0xff] }
 0x479   :  { %8539 = vmatpush1.bf16.msra.mxu1 %v8538_v42  ;;  %v16640_v42 = vld [vmem:[#allocation54_spill] sm:$0xff] }
 0x47a   :  { %8541 = vmatprep.subr.bf16.mxu1 %v8540_v57  ;;  %v16644_v57 = vld [vmem:[#allocation180_spill] sm:$0xff] }
 0x47d   :  { %8543 = vmatpush1.bf16.msra.mxu1 %v8542_v56  ;;  %v16649_v56 = vld [vmem:[#allocation48_spill] sm:$0xff] }
 0x47e   :  { %8545 = vmatprep.subr.bf16.mxu1 %v8544_v29  ;;  %v16654_v29 = vld [vmem:[#allocation165_spill] sm:$0xff] }
 0x481   :  { %8547 = vmatpush1.bf16.msra.mxu1 %v8546_v47  ;;  %v16660_v47 = vld [vmem:[#allocation204_spill] sm:$0xff] }
 0x482   :  { %8549 = vmatprep.subr.bf16.mxu1 %v8548_v27  ;;  %v16665_v27 = vld [vmem:[#allocation15_spill] sm:$0xff] }
 0x485   :  { %8551 = vmatpush1.bf16.msra.mxu1 %v8550_v49  ;;  %v5917_v49 = vld [vmem:[#allocation8 + $0x40] sm:$0xff] }
 0x486   :  { %8553 = vmatprep.subr.bf16.mxu1 %v16630_v35  ;;  %v6018_v35 = vand.u32 4294901760, %v5933_v43 }
 0x488   :  { %5710 = vmatmul.mubr.f32.vlgmr.msra.gmra.mrb[0].mxu1 %v16631_v50 }
 0x489   :  { %5716 = vmatprep.mubr.f32.mxu1 %v16632_v33  ;;  %8555 = vmatpush1.bf16.msra.mxu1 %v16633_v14  ;;  %v6021_v14 = vand.u32 4294901760, %v5934_v53 }
 0x48a   :  { %8557 = vmatprep.subr.bf16.mxu1 %v16634_v15  ;;  %v5970_v15 = vand.u32 4294901760, %v5917_v49 }
 0x48c   :  { %5718 = vmatmul.mubr.f32.gmra.mrb[2].mxu1 %v16635_v12 }
 0x48d   :  { %5724 = vmatprep.mubr.f32.mxu1 %v16636_v2  ;;  %8559 = vmatpush1.bf16.msra.mxu1 %v16637_v28  ;;  %v5936_v28 = vld [vmem:[#allocation8 + $0xd8] sm:$0xff] }
 0x48e   :  { %8561 = vmatprep.subr.bf16.mxu1 %v16638_v38 }
 0x490   :  { %5726 = vmatmul.mubr.f32.gmra.mrb[4].mxu1 %v16639_v6 }
 0x491   :  { %5732 = vmatprep.mubr.f32.mxu1 %v16640_v42  ;;  %8563 = vmatpush1.bf16.msra.mxu1 %v16641_v39  ;;  %v5919_v39 = vld [vmem:[#allocation8 + $0x50] sm:$0xff] }
 0x492   :  { %8565 = vmatprep.subr.bf16.mxu1 %v16642_v22  ;;  %v5937_v22 = vld [vmem:[#allocation8 + $0xe0] sm:$0xff] }
 0x494   :  { %5734 = vmatmul.mubr.f32.gmra.mrb[6].mxu1 %v16643_v59 }
 0x495   :  { %8567 = vmatpush1.bf16.msra.mxu1 %v16644_v57  ;;  %5869 = vmatprep.mubr.f32.mxu1 %v16561_v4  ;;  %v16655_v4 = vld [vmem:[#allocation242_spill] sm:$0xff]  ;;  %v13437_v57 = vsub.f32 %v5917_v49, %v5970_v15 }
 0x496   :  { %8569 = vmatprep.subr.bf16.mxu1 %v16645_v61  ;;  %v5938_v61 = vld [vmem:[#allocation8 + $0xe8] sm:$0xff] }
 0x499   :  { %8571 = vmatpush1.bf16.msra.mxu1 %v16646_v26  ;;  %v5921_v26 = vld [vmem:[#allocation8 + $0x60] sm:$0xff] }
 0x49a   :  { %8573 = vmatprep.subr.bf16.mxu1 %v16647_v3  ;;  %v5922_v3 = vld [vmem:[#allocation8 + $0x68] sm:$0xff] }
 0x49d   :  { %8575 = vmatpush1.bf16.msra.mxu1 %v16648_v19 }
 0x49e   :  { %8577 = vmatprep.subr.bf16.mxu1 %v16649_v56 }
 0x4a1   :  { %8579 = vmatpush1.bf16.msra.mxu1 %v16650_v5 }
 0x4a2   :  { %8581 = vmatprep.subr.bf16.mxu1 %v16651_v11 }
 0x4a5   :  { %8583 = vmatpush1.bf16.msra.mxu1 %v16652_v34 }
 0x4a6   :  { %8585 = vmatprep.subr.bf16.mxu1 %v16653_v52  ;;  %v5976_v52 = vand.u32 4294901760, %v5919_v39 }
 0x4a9   :  { %8587 = vmatpush1.bf16.msra.mxu1 %v16654_v29 }
 0x4aa   :  { %8589 = vmatprep.subr.bf16.mxu1 %v16655_v4  ;;  %v6030_v4 = vand.u32 4294901760, %v5937_v22 }
 0x4ad   :  { %8591 = vmatpush1.bf16.msra.mxu1 %v16656_v13  ;;  %v6033_v13 = vand.u32 4294901760, %v5938_v61 }
 0x4ae   :  { %8593 = vmatprep.subr.bf16.mxu1 %v16657_v7  ;;  %v5982_v7 = vand.u32 4294901760, %v5921_v26 }
 0x4b0   :  { %v13466_v49 = vsub.f32 %v5921_v26, %v5982_v7 }
 0x4b1   :  { %8595 = vmatpush1.bf16.msra.mxu1 %v16658_v62  ;;  %v5985_v62 = vand.u32 4294901760, %v5922_v3 }
 0x4b2   :  { %8597 = vmatprep.subr.bf16.mxu1 %v16659_v63  ;;  %v5939_v63 = vld [vmem:[#allocation8 + $0xf0] sm:$0xff]  ;;  %16677 = vst [vmem:[#allocation127_spill] sm:$0xff] %v13466_v49 }
 0x4b5   :  { %8599 = vmatpush1.bf16.msra.mxu1 %v16660_v47  ;;  %v5940_v47 = vld [vmem:[#allocation8 + $0xf8] sm:$0xff] }
 0x4b6   :  { %8601 = vmatprep.subr.bf16.mxu1 %v16661_v55 }
 0x4b9   :  { %8603 = vmatpush1.bf16.msra.mxu1 %v16662_v40  ;;  %v13454_v40 = vsub.f32 %v5919_v39, %v5976_v52 }
 0x4ba   :  { %8605 = vmatprep.subr.bf16.mxu1 %v16663_v36 }
 0x4bb   :  { %16672 = vst [vmem:[#allocation24_spill] sm:$0xff] %v13454_v40 }
 0x4bd   :  { %8607 = vmatpush1.bf16.msra.mxu1 %v16664_v17  ;;  %v13458_v17 = vsub.f32 %v5937_v22, %v6030_v4 }
 0x4be   :  { %8609 = vmatprep.subr.bf16.mxu1 %v16665_v27  ;;  %v5923_v27 = vld [vmem:[#allocation8 + $0x70] sm:$0xff] }
 0x4bf   :  { %16673 = vst [vmem:[#allocation122_spill] sm:$0xff] %v13458_v17 }
 0x4c1   :  { %8611 = vmatpush1.bf16.msra.mxu1 %v16666_v51  ;;  %v5924_v51 = vld [vmem:[#allocation8 + $0x78] sm:$0xff] }
 0x4c2   :  { %8613 = vmatprep.subr.bf16.mxu1 %v16667_v23  ;;  %v13460_v23 = vpack.c.bf16 %v6033_v13, %v6030_v4  ;;  %v14861_v4 = vand.u32 4294901760, %v13262_v54 }
 0x4c4   :  { %16674 = vst [vmem:[#allocation123_spill] sm:$0xff] %v13460_v23 }
 0x4c5   :  { %8615 = vmatpush1.bf16.msra.mxu1 %v16533_v58  ;;  %v5918_v58 = vld [vmem:[#allocation8 + $0x48] sm:$0xff] }
 0x4c8   :  { %5871 = vmatmul.mubr.f32.vlgmr.msra.gmra.mrb[0].mxu1 %v16631_v50  ;;  %v5935_v50 = vld [vmem:[#allocation8 + $0xd0] sm:$0xff] }
 0x4c9   :  { %5877 = vmatprep.mubr.f32.mxu1 %v16632_v33  ;;  %v5973_v33 = vand.u32 4294901760, %v5918_v58  ;;  %v6024_v38 = vand.u32 4294901760, %v5935_v50 }
 0x4cb   :  { %v13439_v19 = vpack.c.bf16 %v5973_v33, %v5970_v15  ;;  %v13441_v56 = vsub.f32 %v5918_v58, %v5973_v33  ;;  %v13445_v11 = vsub.f32 %v5935_v50, %v6024_v38  ;;  %v6039_v58 = vand.u32 4294901760, %v5940_v47 }
 0x4cc   :  { %5879 = vmatmul.mubr.f32.gmra.mrb[2].mxu1 %v16635_v12  ;;  %v6027_v12 = vand.u32 4294901760, %v5936_v28  ;;  %v5988_v15 = vand.u32 4294901760, %v5923_v27  ;;  %v5991_v50 = vand.u32 4294901760, %v5924_v51  ;;  %v14863_v33 = vand.u32 4294901760, %v13256_v10 }
 0x4cd   :  { %5885 = vmatprep.mubr.f32.mxu1 %v16636_v2  ;;  %v5920_v2 = vld [vmem:[#allocation8 + $0x58] sm:$0xff]  ;;  %16669 = vst [vmem:[#allocation115_spill] sm:$0xff] %v13439_v19 }
 0x4ce   :  { %v13443_v5 = vpack.c.bf16 %v6027_v12, %v6024_v38  ;;  %v13448_v34 = vsub.f32 %v5936_v28, %v6027_v12  ;;  %v5979_v29 = vand.u32 4294901760, %v5920_v2  ;;  %v14865_v28 = vand.u32 4294901760, %v13254_v45 }
 0x4cf   :  { %v14862_v38 = vand.u32 4294901760, %v13258_v48  ;;  %v13481_v22 = vsub.f32 %v5923_v27, %v5988_v15  ;;  %v13485_v26 = vsub.f32 %v5924_v51, %v5991_v50  ;;  %v14868_v27 = vand.u32 4294901760, %v13277_v44 }
 0x4d0   :  { %5887 = vmatmul.mubr.f32.gmra.mrb[4].mxu1 %v16639_v6  ;;  %v13431_v6 = vpack.c.bf16 %v6021_v14, %v6018_v35  ;;  %16670 = vst [vmem:[#allocation118_spill] sm:$0xff] %v13443_v5  ;;  %v13452_v55 = vpack.c.bf16 %v5979_v29, %v5976_v52  ;;  %v13456_v36 = vsub.f32 %v5920_v2, %v5979_v29 }
 0x4d1   :  { %5893 = vmatprep.mubr.f32.mxu1 %v16640_v42  ;;  %v13433_v42 = vsub.f32 %v5933_v43, %v6018_v35  ;;  %v13462_v43 = vsub.f32 %v5938_v61, %v6033_v13  ;;  %v13468_v35 = vsub.f32 %v5922_v3, %v5985_v62  ;;  %v13479_v2 = vsub.f32 %v5940_v47, %v6039_v58 }
 0x4d2   :  { %16668 = vst [vmem:[#allocation23_spill] sm:$0xff] %v13431_v6  ;;  %8633 = vmatprep.subr.bf16.mxu0 %v13431_v6  ;;  %16671 = vst [vmem:[#allocation120_spill] sm:$0xff] %v13452_v55  ;;  %v13483_v61 = vpack.c.bf16 %v5991_v50, %v5988_v15  ;;  %v6218_v3 = vsub.f32 %v13254_v45, %v14865_v28  ;;  %v6225_v52 = vsub.f32 %v13256_v10, %v14863_v33 }
 0x4d3   :  { %8635 = vmatpush3.bf16.msra.mxu0 %v13439_v19  ;;  %16675 = vst [vmem:[#allocation25_spill] sm:$0xff] %v13462_v43  ;;  %16678 = vst [vmem:[#allocation26_spill] sm:$0xff] %v13468_v35  ;;  %v6106_v29 = vsub.f32 %v13258_v48, %v14862_v38  ;;  %v14864_v13 = vand.u32 4294901760, %v13266_v32  ;;  %v14867_v47 = vand.u32 4294901760, %v13275_v21  ;;  %v14912_v6 = vand.u32 4294901760, %v13485_v26 }
 0x4d4   :  { %5895 = vmatmul.mubr.f32.gmra.mrb[6].mxu1 %v16643_v59  ;;  %v13435_v59 = vsub.f32 %v5934_v53, %v6021_v14  ;;  %8637 = vmatprep.subr.bf16.mxu0 %v13443_v5  ;;  %v13464_v53 = vpack.c.bf16 %v5985_v62, %v5982_v7  ;;  %v6036_v14 = vand.u32 4294901760, %v5939_v63  ;;  %16681 = vst [vmem:[#allocation27_spill] sm:$0xff] %v13479_v2  ;;  %16682 = vst [vmem:[#allocation134_spill] sm:$0xff] %v13481_v22 }
 0x4d5   :  { %16683 = vst [vmem:[#allocation136_spill] sm:$0xff] %v13483_v61  ;;  %16684 = vst [vmem:[#allocation137_spill] sm:$0xff] %v13485_v26  ;;  %v14866_v7 = vand.u32 4294901760, %v13269_v24  ;;  %v6219_v62 = vand.u32 4294901760, %v6218_v3  ;;  %v6107_v51 = vand.u32 4294901760, %v6106_v29  ;;  %v6120_v3 = vsub.f32 %v13275_v21, %v14867_v47 }
 0x4d6   :  { %16676 = vst [vmem:[#allocation126_spill] sm:$0xff] %v13464_v53  ;;  %v13475_v12 = vpack.c.bf16 %v6039_v58, %v6036_v14  ;;  %v13477_v39 = vsub.f32 %v5939_v63, %v6036_v14  ;;  %v6226_v63 = vand.u32 4294901760, %v6225_v52  ;;  %v6113_v14 = vsub.f32 %v13262_v54, %v14861_v4 }
 0x4d7   :  { %8639 = vmatpush3.bf16.msra.mxu0 %v13452_v55  ;;  %v6232_v58 = vsub.f32 %v13266_v32, %v14864_v13  ;;  %v6239_v15 = vsub.f32 %v13269_v24, %v14866_v7  ;;  %v6127_v52 = vsub.f32 %v13277_v44, %v14868_v27  ;;  %v14869_v29 = vand.u32 4294901760, %v13279_v20 }
 0x4d8   :  { %8641 = vmatprep.subr.bf16.mxu0 %v13460_v23  ;;  %16679 = vst [vmem:[#allocation130_spill] sm:$0xff] %v13475_v12  ;;  %16680 = vst [vmem:[#allocation131_spill] sm:$0xff] %v13477_v39  ;;  %v8648_v50 = vpack.c.bf16 %v6226_v63, %v6219_v62  ;;  %v6114_v4 = vand.u32 4294901760, %v6113_v14  ;;  %v14872_v13 = vand.u32 4294901760, %v13287_v0  ;;  %v6121_v28 = vand.u32 4294901760, %v6120_v3 }
 0x4d9   :  { %v6233_v38 = vand.u32 4294901760, %v6232_v58  ;;  %v6240_v33 = vand.u32 4294901760, %v6239_v15  ;;  %v6128_v7 = vand.u32 4294901760, %v6127_v52  ;;  %v6246_v62 = vsub.f32 %v13279_v20, %v14869_v29 }
 0x4da   :  { %v14870_v63 = vand.u32 4294901760, %v13289_v37  ;;  %v13525_v47 = vpack.c.bf16 %v6114_v4, %v6107_v51  ;;  %v6253_v14 = vsub.f32 %v13287_v0, %v14872_v13  ;;  %v14871_v58 = vand.u32 4294901760, %v13291_v9 }
 0x4db   :  { %8643 = vmatpush3.bf16.msra.mxu0 %v13464_v53  ;;  %v13527_v27 = vpack.c.bf16 %v6240_v33, %v6233_v38  ;;  %v13533_v15 = vpack.c.bf16 %v6128_v7, %v6121_v28  ;;  %v6247_v3 = vand.u32 4294901760, %v6246_v62  ;;  %v14873_v29 = vand.u32 4294901760, %v13293_v46 }
 0x4dc   :  { %8645 = vmatprep.subr.bf16.mxu0 %v13475_v12  ;;  %v6134_v52 = vsub.f32 %v13289_v37, %v14870_v63  ;;  %v6141_v33 = vsub.f32 %v13291_v9, %v14871_v58  ;;  %v14878_v38 = vand.u32 4294901760, %v13305_v60  ;;  %v14884_v4 = vand.u32 4294901760, %v13307_v41 }
 0x4dd   :  { %v6260_v28 = vsub.f32 %v13293_v46, %v14873_v29  ;;  %v14883_v7 = vand.u32 4294901760, %v13309_v1  ;;  %v14885_v62 = vand.u32 4294901760, %v13433_v42  ;;  %v14900_v5 = vand.u32 4294901760, %v13462_v43 }
 0x4de   :  { %v6135_v51 = vand.u32 4294901760, %v6134_v52  ;;  %v6267_v58 = vsub.f32 %v13305_v60, %v14878_v38  ;;  %v6148_v13 = vsub.f32 %v13307_v41, %v14884_v4  ;;  %v14887_v38 = vand.u32 4294901760, %v13437_v57 }
 0x4df   :  { %8647 = vmatpush3.bf16.msra.mxu0 %v13483_v61  ;;  %v6261_v52 = vand.u32 4294901760, %v6260_v28  ;;  %v6155_v29 = vsub.f32 %v13309_v1, %v14883_v7  ;;  %v6274_v61 = vsub.f32 %v13433_v42, %v14885_v62  ;;  %v14888_v7 = vand.u32 4294901760, %v13441_v56 }
 0x4e0   :  { %8649 = vmatprep.subr.bf16.mxu0 %v8648_v50  ;;  %v6254_v50 = vand.u32 4294901760, %v6253_v14  ;;  %v6142_v14 = vand.u32 4294901760, %v6141_v33  ;;  %v6268_v33 = vand.u32 4294901760, %v6267_v58  ;;  %v6149_v12 = vand.u32 4294901760, %v6148_v13 }
 0x4e1   :  { %v6156_v53 = vand.u32 4294901760, %v6155_v29  ;;  %v6275_v23 = vand.u32 4294901760, %v6274_v61  ;;  %v6162_v62 = vsub.f32 %v13437_v57, %v14887_v38  ;;  %v14894_v13 = vand.u32 4294901760, %v13448_v34 }
 0x4e2   :  { %v13549_v63 = vpack.c.bf16 %v6254_v50, %v6247_v3  ;;  %v14886_v3 = vand.u32 4294901760, %v13435_v59  ;;  %v13564_v50 = vpack.c.bf16 %v6142_v14, %v6135_v51  ;;  %v13571_v4 = vpack.c.bf16 %v6268_v33, %v6261_v52 }
 0x4e3   :  { %v14891_v51 = vand.u32 4294901760, %v13445_v11  ;;  %v13578_v58 = vpack.c.bf16 %v6156_v53, %v6149_v12  ;;  %v6169_v61 = vsub.f32 %v13441_v56, %v14888_v7  ;;  %v14897_v14 = vand.u32 4294901760, %v13454_v40 }
 0x4e4   :  { %v6281_v28 = vsub.f32 %v13435_v59, %v14886_v3  ;;  %v6163_v3 = vand.u32 4294901760, %v6162_v62  ;;  %v6295_v33 = vsub.f32 %v13448_v34, %v14894_v13  ;;  %v14898_v38 = vand.u32 4294901760, %v13456_v36 }
 0x4e5   :  { %v6288_v52 = vsub.f32 %v13445_v11, %v14891_v51  ;;  %v6170_v12 = vand.u32 4294901760, %v6169_v61  ;;  %v14899_v7 = vand.u32 4294901760, %v13458_v17 }
 0x4e6   :  { %v6282_v29 = vand.u32 4294901760, %v6281_v28  ;;  %v6176_v28 = vsub.f32 %v13454_v40, %v14897_v14  ;;  %v6296_v55 = vand.u32 4294901760, %v6295_v33  ;;  %v6183_v51 = vsub.f32 %v13456_v36, %v14898_v38 }
 0x4e7   :  { %v6289_v62 = vand.u32 4294901760, %v6288_v52  ;;  %v13601_v13 = vpack.c.bf16 %v6170_v12, %v6163_v3  ;;  %v6309_v52 = vsub.f32 %v13462_v43, %v14900_v5  ;;  %v14904_v33 = vand.u32 4294901760, %v13468_v35 }
 0x4e8   :  { %v13591_v53 = vpack.c.bf16 %v6282_v29, %v6275_v23  ;;  %v6177_v19 = vand.u32 4294901760, %v6176_v28  ;;  %v6302_v23 = vsub.f32 %v13458_v17, %v14899_v7  ;;  %v14901_v29 = vand.u32 4294901760, %v13466_v49  ;;  %v16696_v17 = vld [vmem:[#allocation102_spill] sm:$0xff] }
 0x4e9   :  { %v13607_v61 = vpack.c.bf16 %v6296_v55, %v6289_v62  ;;  %v6184_v14 = vand.u32 4294901760, %v6183_v51  ;;  %v14907_v12 = vand.u32 4294901760, %v13477_v39  ;;  %v14908_v28 = vand.u32 4294901760, %v13479_v2 }
 0x4ea   :  { %v6303_v38 = vand.u32 4294901760, %v6302_v23  ;;  %v6190_v3 = vsub.f32 %v13466_v49, %v14901_v29  ;;  %v6310_v55 = vand.u32 4294901760, %v6309_v52  ;;  %v6197_v51 = vsub.f32 %v13468_v35, %v14904_v33 }
 0x4eb   :  { %v13618_v7 = vpack.c.bf16 %v6184_v14, %v6177_v19  ;;  %v14911_v62 = vand.u32 4294901760, %v13481_v22  ;;  %v6316_v23 = vsub.f32 %v13477_v39, %v14907_v12  ;;  %v6323_v29 = vsub.f32 %v13479_v2, %v14908_v28 }
 0x4ec   :  { %v6191_v5 = vand.u32 4294901760, %v6190_v3  ;;  %v13631_v19 = vpack.c.bf16 %v6310_v55, %v6303_v38  ;;  %v6198_v14 = vand.u32 4294901760, %v6197_v51  ;;  %v6211_v12 = vsub.f32 %v13485_v26, %v14912_v6 }
 0x4ed   :  { %v6204_v52 = vsub.f32 %v13481_v22, %v14911_v62  ;;  %v6317_v33 = vand.u32 4294901760, %v6316_v23  ;;  %v6324_v31 = vand.u32 4294901760, %v6323_v29  ;;  %v16689_v62 = vld [vmem:[#allocation19_spill] sm:$0xff]  ;;  %v16691_v22 = vld [vmem:[#allocation98_spill] sm:$0xff] }
 0x4ee   :  { %v13643_v16 = vpack.c.bf16 %v6198_v14, %v6191_v5  ;;  %v6212_v51 = vand.u32 4294901760, %v6211_v12  ;;  %v7006_v12 = vld [vmem:[%s13993_s4 + $0x1] ss:$4 sm:$0x3] }
 0x4ef   :  { %v6205_v38 = vand.u32 4294901760, %v6204_v52  ;;  %v13645_v55 = vpack.c.bf16 %v6324_v31, %v6317_v33  ;;  %v16685_v14 = vld [vmem:[#allocation207_spill] sm:$0xff] }
 0x4f0   :  { %v16686_v5 = vsub.s32 0, %v16685_v14  ;;  %v16687_v52 = vsub.s32 1, %v16685_v14 }
 0x4f1   :  { %v13651_v29 = vpack.c.bf16 %v6212_v51, %v6205_v38  ;;  %v16688_v38 = vld [vmem:[#allocation18_spill] sm:$0xff] }
 0x4f2   :  { %v1484_v28 = vrot.slane %v7006_v12, %v16686_v5  ;;  %v1488_v6 = vrot.slane %v7006_v12, %v16687_v52 }
 0x4f4   :  { %v8816_v23 = vadd.f32 %v16688_v38, %v1484_v28  ;;  %v8818_v51 = vadd.f32 %v16689_v62, %v1488_v6  ;;  %v8820_v33 = vadd.f32 %v16690_v25, %v1484_v28  ;;  %v8822_v26 = vadd.f32 %v16691_v22, %v1488_v6  ;;  %v16692_v38 = vld [vmem:[#allocation251_spill] sm:$0xff] }
 0x4f5   :  { %v8824_v62 = vadd.f32 %v16692_v38, %v1484_v28  ;;  %v16695_v38 = vld [vmem:[#allocation100_spill] sm:$0xff]  ;;  %v8830_v43 = vadd.f32 %v16696_v17, %v1488_v6 }
 0x59b   :  { %v5872_v3 = vpop.f32.mrb[0].mxu1 }
 0x59c   :  { %v8817_v18 = vadd.f32 %v8816_v23, %v5872_v3  ;;  %v5874_v31 = vpop.f32.mrb[1].mxu1 }
 0x59d   :  { %v8819_v30 = vadd.f32 %v8818_v51, %v5874_v31  ;;  %v16694_v31 = vld [vmem:[#allocation33_spill] sm:$0xff] }
 0x59e   :  { %v5901_v8 = vmax.f32 %v8817_v18, 0.0  ;;  %v8826_v25 = vadd.f32 %v16694_v31, %v1488_v6 }
 0x59f   :  { %v5902_v39 = vmax.f32 %v8819_v30, 0.0  ;;  %v5880_v2 = vpop.f32.mrb[2].mxu1 }
 0x5a0   :  { %v13688_v49 = vand.u32 4294901760, %v5901_v8  ;;  %v8821_v5 = vadd.f32 %v8820_v33, %v5880_v2  ;;  %v5882_v14 = vpop.f32.mrb[3].mxu1 }
 0x5a1   :  { %v13690_v12 = vand.u32 4294901760, %v5902_v39  ;;  %v8823_v52 = vadd.f32 %v8822_v26, %v5882_v14 }
 0x5a2   :  { %v13694_v3 = vsub.f32 %v5901_v8, %v13688_v49  ;;  %v5903_v23 = vmax.f32 %v8821_v5, 0.0  ;;  %v8828_v5 = vadd.f32 %v16695_v38, %v1484_v28 }
 0x5a3   :  { %v13698_v18 = vsub.f32 %v5902_v39, %v13690_v12  ;;  %v5904_v30 = vmax.f32 %v8823_v52, 0.0  ;;  %v5888_v22 = vpop.f32.mrb[4].mxu1 }
 0x5a4   :  { %16693 = vst [vmem:[#allocation30_spill] sm:$0xff] %v13694_v3  ;;  %v14939_v51 = vand.u32 4294901760, %v13694_v3  ;;  %v13701_v2 = vand.u32 4294901760, %v5903_v23  ;;  %v8825_v33 = vadd.f32 %v8824_v62, %v5888_v22  ;;  %v5890_v35 = vpop.f32.mrb[5].mxu1 }
 0x5a5   :  { %v13703_v26 = vand.u32 4294901760, %v5904_v30  ;;  %v8827_v14 = vadd.f32 %v8826_v25, %v5890_v35  ;;  %v14942_v8 = vand.u32 4294901760, %v13698_v18 }
 0x5a6   :  { %v6050_v39 = vsub.f32 %v13694_v3, %v14939_v51  ;;  %v13711_v52 = vsub.f32 %v5903_v23, %v13701_v2  ;;  %v5905_v31 = vmax.f32 %v8825_v33, 0.0 }
 0x5a7   :  { %v13715_v62 = vsub.f32 %v5904_v30, %v13703_v26  ;;  %v5906_v22 = vmax.f32 %v8827_v14, 0.0  ;;  %v5896_v40 = vpop.f32.mrb[6].mxu1  ;;  %v6044_v35 = vsub.f32 %v13698_v18, %v14942_v8 }
 0x5a8   :  { %v13720_v28 = vand.u32 4294901760, %v5905_v31  ;;  %v8829_v25 = vadd.f32 %v8828_v5, %v5896_v40  ;;  %v5898_v38 = vpop.f32.mrb[7].mxu1  ;;  %v14947_v51 = vand.u32 4294901760, %v13711_v52  ;;  %v6051_v17 = vand.u32 4294901760, %v6050_v39 }
 0x5a9   :  { %v13723_v23 = vand.u32 4294901760, %v5906_v22  ;;  %v8831_v33 = vadd.f32 %v8830_v43, %v5898_v38  ;;  %v6045_v3 = vand.u32 4294901760, %v6044_v35  ;;  %v14948_v6 = vand.u32 4294901760, %v13715_v62 }
 0x5aa   :  { %v13727_v30 = vsub.f32 %v5905_v31, %v13720_v28  ;;  %v5907_v14 = vmax.f32 %v8829_v25, 0.0  ;;  %v6065_v8 = vsub.f32 %v13711_v52, %v14947_v51  ;;  %v16738_v51 = vld [vmem:[#allocation126_spill] sm:$0xff] }
 0x5ab   :  { %v13733_v40 = vsub.f32 %v5906_v22, %v13723_v23  ;;  %v5908_v5 = vmax.f32 %v8831_v33, 0.0  ;;  %6046 = vmatprep.mubr.f32.mxu0 %v6045_v3  ;;  %v6059_v43 = vsub.f32 %v13715_v62, %v14948_v6  ;;  %v16739_v6 = vld [vmem:[#allocation130_spill] sm:$0xff] }
 0x5ac   :  { %v13738_v35 = vand.u32 4294901760, %v5907_v14  ;;  %6052 = vmatmul.mubr.f32.vlgmr.msra.gmra.mrb[16].mxu0 %v6051_v17  ;;  %v14945_v39 = vand.u32 4294901760, %v13727_v30  ;;  %v6066_v3 = vand.u32 4294901760, %v6065_v8 }
 0x5ad   :  { %v13741_v31 = vand.u32 4294901760, %v5908_v5  ;;  %8651 = vmatpush3.bf16.msra.mxu0 %v13525_v47  ;;  %v6060_v25 = vand.u32 4294901760, %v6059_v43  ;;  %v14946_v38 = vand.u32 4294901760, %v13733_v40 }
 0x5ae   :  { %16697 = vst [vmem:[#allocation140_spill] sm:$0xff] %v13738_v35  ;;  %v13746_v22 = vsub.f32 %v5907_v14, %v13738_v35  ;;  %8653 = vmatprep.subr.bf16.mxu0 %v13527_v27  ;;  %v6080_v33 = vsub.f32 %v13727_v30, %v14945_v39  ;;  %v16736_v39 = vld [vmem:[#allocation120_spill] sm:$0xff] }
 0x5af   :  { %v13753_v17 = vsub.f32 %v5908_v5, %v13741_v31  ;;  %6061 = vmatprep.mubr.f32.mxu0 %v6060_v25  ;;  %v6074_v47 = vsub.f32 %v13733_v40, %v14946_v38  ;;  %v16737_v38 = vld [vmem:[#allocation123_spill] sm:$0xff] }
 0x5b0   :  { %6067 = vmatmul.mubr.f32.gmra.mrb[18].mxu0 %v6066_v3  ;;  %v14943_v43 = vand.u32 4294901760, %v13746_v22  ;;  %v6081_v8 = vand.u32 4294901760, %v6080_v33 }
 0x5b1   :  { %8655 = vmatpush3.bf16.msra.mxu0 %v13533_v15  ;;  %v6075_v14 = vand.u32 4294901760, %v6074_v47  ;;  %v14944_v27 = vand.u32 4294901760, %v13753_v17  ;;  %v16711_v47 = vld [vmem:[#allocation25_spill] sm:$0xff] }
 0x5b2   :  { %8657 = vmatprep.subr.bf16.mxu0 %v13549_v63  ;;  %v6095_v5 = vsub.f32 %v13746_v22, %v14943_v43  ;;  %v16698_v63 = vpack.c.bf16 %v13256_v10, %v13254_v45  ;;  %v16734_v43 = vld [vmem:[#allocation115_spill] sm:$0xff] }
 0x5b3   :  { %6076 = vmatprep.mubr.f32.mxu0 %v6075_v14  ;;  %v6089_v25 = vsub.f32 %v13753_v17, %v14944_v27  ;;  %v16712_v14 = vld [vmem:[#allocation122_spill] sm:$0xff] }
 0x5b4   :  { %6082 = vmatmul.mubr.f32.gmra.mrb[20].mxu0 %v6081_v8  ;;  %v6096_v15 = vand.u32 4294901760, %v6095_v5  ;;  %v16713_v8 = vpack.c.bf16 %v16711_v47, %v16712_v14  ;;  %v16714_v5 = vld [vmem:[#allocation26_spill] sm:$0xff] }
 0x5b5   :  { %8659 = vmatpush3.bf16.msra.mxu0 %v13564_v50  ;;  %v6090_v3 = vand.u32 4294901760, %v6089_v25  ;;  %v16702_v50 = vpack.c.bf16 %v13287_v0, %v13279_v20  ;;  %v16715_v25 = vld [vmem:[#allocation127_spill] sm:$0xff]  ;;  %v16735_v27 = vld [vmem:[#allocation118_spill] sm:$0xff] }
 0x5b6   :  { %8661 = vmatprep.subr.bf16.mxu0 %v13571_v4  ;;  %v16699_v4 = vpack.c.bf16 %v13262_v54, %v13258_v48 }
 0x5b7   :  { %6091 = vmatprep.mubr.f32.mxu0 %v6090_v3  ;;  %v16716_v3 = vpack.c.bf16 %v16714_v5, %v16715_v25 }
 0x5b8   :  { %6097 = vmatmul.mubr.f32.gmra.mrb[22].mxu0 %v6096_v15  ;;  %v16717_v15 = vld [vmem:[#allocation27_spill] sm:$0xff] }
 0x5b9   :  { %8663 = vmatpush3.bf16.msra.mxu0 %v13578_v58  ;;  %6327 = vmatprep.mubr.f32.mxu0 %v13690_v12  ;;  %v16704_v58 = vpack.c.bf16 %v13305_v60, %v13293_v46 }
 0x5ba   :  { %8665 = vmatprep.subr.bf16.mxu0 %v13591_v53  ;;  %v16705_v53 = vpack.c.bf16 %v13309_v1, %v13307_v41 }
 0x5bd   :  { %8667 = vmatpush3.bf16.msra.mxu0 %v13601_v13  ;;  %v16703_v13 = vpack.c.bf16 %v13291_v9, %v13289_v37 }
 0x5be   :  { %8669 = vmatprep.subr.bf16.mxu0 %v13607_v61  ;;  %v16706_v61 = vpack.c.bf16 %v13435_v59, %v13433_v42 }
 0x5c1   :  { %8671 = vmatpush3.bf16.msra.mxu0 %v13618_v7  ;;  %v16700_v7 = vpack.c.bf16 %v13269_v24, %v13266_v32 }
 0x5c2   :  { %8673 = vmatprep.subr.bf16.mxu0 %v13631_v19  ;;  %v16707_v19 = vpack.c.bf16 %v13441_v56, %v13437_v57 }
 0x5c5   :  { %8675 = vmatpush3.bf16.msra.mxu0 %v13643_v16  ;;  %v16701_v16 = vpack.c.bf16 %v13277_v44, %v13275_v21 }
 0x5c6   :  { %8677 = vmatprep.subr.bf16.mxu0 %v13645_v55  ;;  %v16708_v55 = vpack.c.bf16 %v13448_v34, %v13445_v11 }
 0x5c9   :  { %8679 = vmatpush3.bf16.msra.mxu0 %v13651_v29  ;;  %v16709_v29 = vld [vmem:[#allocation24_spill] sm:$0xff] }
 0x5ca   :  { %8681 = vmatprep.subr.bf16.mxu0 %v16698_v63  ;;  %v16710_v33 = vpack.c.bf16 %v13456_v36, %v16709_v29  ;;  %v16718_v63 = vld [vmem:[#allocation131_spill] sm:$0xff] }
 0x5cc   :  { %6329 = vmatmul.mubr.f32.vlgmr.msra.gmra.mrb[24].mxu0 %v13688_v49 }
 0x5cd   :  { %6334 = vmatprep.mubr.f32.mxu0 %v13703_v26  ;;  %8683 = vmatpush3.bf16.msra.mxu0 %v16699_v4  ;;  %v16719_v4 = vpack.c.bf16 %v16717_v15, %v16718_v63 }
 0x5ce   :  { %8685 = vmatprep.subr.bf16.mxu0 %v16700_v7  ;;  %v16720_v7 = vld [vmem:[#allocation137_spill] sm:$0xff] }
 0x5d0   :  { %6336 = vmatmul.mubr.f32.gmra.mrb[26].mxu0 %v13701_v2 }
 0x5d1   :  { %6341 = vmatprep.mubr.f32.mxu0 %v13723_v23  ;;  %8687 = vmatpush3.bf16.msra.mxu0 %v16701_v16  ;;  %v16721_v16 = vld [vmem:[#allocation134_spill] sm:$0xff] }
 0x5d2   :  { %8689 = vmatprep.subr.bf16.mxu0 %v16702_v50  ;;  %v16722_v50 = vpack.c.bf16 %v16720_v7, %v16721_v16 }
 0x5d4   :  { %6343 = vmatmul.mubr.f32.gmra.mrb[28].mxu0 %v13720_v28 }
 0x5d5   :  { %6348 = vmatprep.mubr.f32.mxu0 %v13741_v31  ;;  %8691 = vmatpush3.bf16.msra.mxu0 %v16703_v13  ;;  %v16723_v13 = vld [vmem:[#allocation20_spill] sm:$0xff] }
 0x5d6   :  { %8693 = vmatprep.subr.bf16.mxu0 %v16704_v58  ;;  %v16724_v58 = vld [vmem:[#allocation30_spill] sm:$0xff] }
 0x5d8   :  { %6350 = vmatmul.mubr.f32.gmra.mrb[30].mxu0 %v13738_v35  ;;  %v16740_v35 = vand.u32 4294901760, %v13254_v45  ;;  %v16748_v45 = vand.u32 4294901760, %v13715_v62 }
 0x5d9   :  { %8695 = vmatpush3.bf16.msra.mxu0 %v16705_v53  ;;  %6485 = vmatprep.mubr.f32.mxu0 %v13698_v18  ;;  %v16725_v53 = vld [vmem:[#allocation104_spill] sm:$0xff] }
 0x5da   :  { %8697 = vmatprep.subr.bf16.mxu0 %v16706_v61  ;;  %v16726_v61 = vld [vmem:[#allocation105_spill] sm:$0xff] }
 0x5dd   :  { %8699 = vmatpush3.bf16.msra.mxu0 %v16707_v19  ;;  %v16727_v19 = vld [vmem:[#allocation106_spill] sm:$0xff] }
 0x5de   :  { %8701 = vmatprep.subr.bf16.mxu0 %v16708_v55  ;;  %v16728_v55 = vld [vmem:[#allocation109_spill] sm:$0xff] }
 0x5e1   :  { %8703 = vmatpush3.bf16.msra.mxu0 %v16710_v33  ;;  %v16729_v33 = vld [vmem:[#allocation110_spill] sm:$0xff] }
 0x5e2   :  { %8705 = vmatprep.subr.bf16.mxu0 %v16713_v8  ;;  %v16730_v8 = vld [vmem:[#allocation22_spill] sm:$0xff] }
 0x5e5   :  { %8707 = vmatpush3.bf16.msra.mxu0 %v16716_v3  ;;  %v16731_v3 = vld [vmem:[#allocation114_spill] sm:$0xff] }
 0x5e6   :  { %8709 = vmatprep.subr.bf16.mxu0 %v16719_v4  ;;  %v16732_v4 = vand.u32 4294901760, %v13698_v18 }
 0x5e9   :  { %8711 = vmatpush3.bf16.msra.mxu0 %v16722_v50  ;;  %v16733_v50 = vld [vmem:[#allocation23_spill] sm:$0xff] }
 0x5ea   :  { %8713 = vmatprep.subr.bf16.mxu0 %v16723_v13 }
 0x5ec   :  { %6488 = vmatmul.mubr.f32.vlgmr.msra.gmra.mrb[32].mxu0 %v16724_v58 }
 0x5ed   :  { %6494 = vmatprep.mubr.f32.mxu0 %v13715_v62  ;;  %8715 = vmatpush3.bf16.msra.mxu0 %v16725_v53  ;;  %v16755_v62 = vand.u32 4294901760, %v13289_v37  ;;  %v16762_v37 = vand.u32 4294901760, %v13309_v1  ;;  %v16768_v1 = vand.u32 4294901760, %v13445_v11  ;;  %v16775_v11 = vand.u32 4294901760, %v16714_v5  ;;  %v16781_v5 = vld [vmem:[#allocation114_spill] sm:$0xff] }
 0x5ee   :  { %8717 = vmatprep.subr.bf16.mxu0 %v16726_v61 }
 0x5f0   :  { %6497 = vmatmul.mubr.f32.gmra.mrb[34].mxu0 %v13711_v52 }
 0x5f1   :  { %6503 = vmatprep.mubr.f32.mxu0 %v13733_v40  ;;  %8719 = vmatpush3.bf16.msra.mxu0 %v16727_v19 }
 0x5f2   :  { %8721 = vmatprep.subr.bf16.mxu0 %v16728_v55 }
 0x5f4   :  { %6506 = vmatmul.mubr.f32.gmra.mrb[36].mxu0 %v13727_v30 }
 0x5f5   :  { %6512 = vmatprep.mubr.f32.mxu0 %v13753_v17  ;;  %8723 = vmatpush3.bf16.msra.mxu0 %v16729_v33 }
 0x5f6   :  { %8725 = vmatprep.subr.bf16.mxu0 %v16730_v8 }
 0x5f8   :  { %6515 = vmatmul.mubr.f32.gmra.mrb[38].mxu0 %v13746_v22 }
 0x5f9   :  { %8727 = vmatpush3.bf16.msra.mxu0 %v16731_v3  ;;  %6619 = vmatprep.mubr.f32.mxu0 %v16732_v4  ;;  %v16741_v3 = vand.u32 4294901760, %v13256_v10  ;;  %v16742_v4 = vld [vmem:[#allocation136_spill] sm:$0xff]  ;;  %v16749_v10 = vand.u32 4294901760, %v13275_v21  ;;  %v16756_v21 = vand.u32 4294901760, %v13291_v9  ;;  %v16763_v9 = vand.u32 4294901760, %v13433_v42 }
 0x5fa   :  { %8729 = vmatprep.subr.bf16.mxu0 %v16733_v50  ;;  %v16743_v50 = vand.u32 4294901760, %v13258_v48  ;;  %v16750_v48 = vand.u32 4294901760, %v13277_v44  ;;  %v16757_v44 = vand.u32 4294901760, %v13293_v46  ;;  %v16764_v46 = vand.u32 4294901760, %v13435_v59 }
 0x5fb   :  { %v8744_v18 = vpack.c.bf16 %v16741_v3, %v16740_v35  ;;  %v16770_v59 = vand.u32 4294901760, %v16709_v29  ;;  %v16777_v29 = vand.u32 4294901760, %v16717_v15  ;;  %v16783_v15 = vld [vmem:[#allocation115_spill] sm:$0xff] }
 0x5fc   :  { %v8750_v35 = vpack.c.bf16 %v16750_v48, %v16749_v10 }
 0x5fd   :  { %8731 = vmatpush3.bf16.msra.mxu0 %v16734_v43  ;;  %v16744_v43 = vand.u32 4294901760, %v13262_v54  ;;  %v16751_v54 = vand.u32 4294901760, %v13279_v20  ;;  %v16758_v20 = vand.u32 4294901760, %v13305_v60  ;;  %v16765_v60 = vand.u32 4294901760, %v13746_v22 }
 0x5fe   :  { %8733 = vmatprep.subr.bf16.mxu0 %v16735_v27  ;;  %v16771_v22 = vand.u32 4294901760, %v13456_v36  ;;  %v16778_v36 = vand.u32 4294901760, %v16721_v16  ;;  %v16786_v16 = vld [vmem:[#allocation123_spill] sm:$0xff] }
 0x5ff   :  { %v8746_v27 = vpack.c.bf16 %v16744_v43, %v16743_v50  ;;  %v16772_v50 = vand.u32 4294901760, %v16712_v14  ;;  %v16779_v14 = vand.u32 4294901760, %v16720_v7  ;;  %v16785_v7 = vld [vmem:[#allocation120_spill] sm:$0xff] }
 0x600   :  { %v8766_v3 = vpack.c.bf16 %v16771_v22, %v16770_v59 }
 0x601   :  { %8735 = vmatpush3.bf16.msra.mxu0 %v16736_v39  ;;  %v16745_v39 = vand.u32 4294901760, %v13266_v32  ;;  %v16752_v32 = vand.u32 4294901760, %v13287_v0  ;;  %v16759_v0 = vand.u32 4294901760, %v13727_v30  ;;  %v16766_v30 = vand.u32 4294901760, %v13437_v57 }
 0x602   :  { %8737 = vmatprep.subr.bf16.mxu0 %v16737_v38  ;;  %v16746_v38 = vand.u32 4294901760, %v13269_v24  ;;  %v16753_v24 = vand.u32 4294901760, %v13711_v52  ;;  %v16760_v52 = vand.u32 4294901760, %v13753_v17  ;;  %v16767_v17 = vand.u32 4294901760, %v13441_v56 }
 0x603   :  { %v8752_v43 = vpack.c.bf16 %v16752_v32, %v16751_v54  ;;  %v16773_v57 = vand.u32 4294901760, %v16711_v47  ;;  %v16774_v56 = vand.u32 4294901760, %v16715_v25  ;;  %v8774_v48 = vpack.c.bf16 %v16779_v14, %v16778_v36  ;;  %v16780_v47 = vld [vmem:[#allocation140_spill] sm:$0xff]  ;;  %v16782_v25 = vld [vmem:[#allocation23_spill] sm:$0xff] }
 0x605   :  { %8739 = vmatpush3.bf16.msra.mxu0 %v16738_v51  ;;  %v8748_v51 = vpack.c.bf16 %v16746_v38, %v16745_v39  ;;  %v8754_v39 = vpack.c.bf16 %v16756_v21, %v16755_v62 }
 0x606   :  { %8741 = vmatprep.subr.bf16.mxu0 %v16739_v6  ;;  %v16747_v6 = vand.u32 4294901760, %v16724_v58  ;;  %v16769_v58 = vand.u32 4294901760, %v13448_v34  ;;  %v16776_v34 = vand.u32 4294901760, %v16718_v63  ;;  %v16784_v63 = vld [vmem:[#allocation118_spill] sm:$0xff] }
 0x608   :  { %v8764_v42 = vpack.c.bf16 %v16769_v58, %v16768_v1  ;;  %v8772_v10 = vpack.c.bf16 %v16777_v29, %v16776_v34 }
 0x609   :  { %8743 = vmatpush3.bf16.msra.mxu0 %v16742_v4 }
 0x60a   :  { %8745 = vmatprep.subr.bf16.mxu0 %v8744_v18  ;;  %v8768_v18 = vpack.c.bf16 %v16773_v57, %v16772_v50 }
 0x60c   :  { %6623 = vmatmul.mubr.f32.vlgmr.msra.gmra.mrb[40].mxu0 %v16747_v6  ;;  %v16754_v6 = vand.u32 4294901760, %v13733_v40  ;;  %v16761_v40 = vand.u32 4294901760, %v13307_v41  ;;  %v8762_v41 = vpack.c.bf16 %v16767_v17, %v16766_v30 }
 0x60d   :  { %6630 = vmatprep.mubr.f32.mxu0 %v16748_v45  ;;  %8747 = vmatpush3.bf16.msra.mxu0 %v8746_v27  ;;  %v8760_v27 = vpack.c.bf16 %v16764_v46, %v16763_v9  ;;  %v8770_v45 = vpack.c.bf16 %v16775_v11, %v16774_v56 }
 0x60e   :  { %8749 = vmatprep.subr.bf16.mxu0 %v8748_v51  ;;  %v8756_v51 = vpack.c.bf16 %v16758_v20, %v16757_v44  ;;  %v8758_v38 = vpack.c.bf16 %v16762_v37, %v16761_v40 }
 0x610   :  { %6634 = vmatmul.mubr.f32.gmra.mrb[42].mxu0 %v16753_v24 }
 0x611   :  { %6641 = vmatprep.mubr.f32.mxu0 %v16754_v6  ;;  %8751 = vmatpush3.bf16.msra.mxu0 %v8750_v35 }
 0x612   :  { %8753 = vmatprep.subr.bf16.mxu0 %v8752_v43 }
 0x614   :  { %6645 = vmatmul.mubr.f32.gmra.mrb[44].mxu0 %v16759_v0 }
 0x615   :  { %6652 = vmatprep.mubr.f32.mxu0 %v16760_v52  ;;  %8755 = vmatpush3.bf16.msra.mxu0 %v8754_v39 }
 0x616   :  { %8757 = vmatprep.subr.bf16.mxu0 %v8756_v51 }
 0x618   :  { %6656 = vmatmul.mubr.f32.gmra.mrb[46].mxu0 %v16765_v60 }
 0x619   :  { %8759 = vmatpush3.bf16.msra.mxu0 %v8758_v38  ;;  %6822 = vmatprep.mubr.f32.mxu0 %v13690_v12 }
 0x61a   :  { %8761 = vmatprep.subr.bf16.mxu0 %v8760_v27 }
 0x61d   :  { %8763 = vmatpush3.bf16.msra.mxu0 %v8762_v41 }
 0x61e   :  { %8765 = vmatprep.subr.bf16.mxu0 %v8764_v42 }
 0x621   :  { %8767 = vmatpush3.bf16.msra.mxu0 %v8766_v3 }
 0x622   :  { %8769 = vmatprep.subr.bf16.mxu0 %v8768_v18 }
 0x625   :  { %8771 = vmatpush3.bf16.msra.mxu0 %v8770_v45 }
 0x626   :  { %8773 = vmatprep.subr.bf16.mxu0 %v8772_v10 }
 0x629   :  { %8775 = vmatpush3.bf16.msra.mxu0 %v8774_v48 }
 0x62a   :  { %8777 = vmatprep.subr.bf16.mxu0 %v16723_v13  ;;  %v16787_v13 = vld [vmem:[#allocation126_spill] sm:$0xff] }
 0x62c   :  { %6824 = vmatmul.mubr.f32.vlgmr.msra.gmra.mrb[48].mxu0 %v13688_v49 }
 0x62d   :  { %6829 = vmatprep.mubr.f32.mxu0 %v13703_v26  ;;  %8779 = vmatpush3.bf16.msra.mxu0 %v16725_v53  ;;  %v16788_v53 = vld [vmem:[#allocation130_spill] sm:$0xff] }
 0x62e   :  { %8781 = vmatprep.subr.bf16.mxu0 %v16726_v61 }
 0x630   :  { %6831 = vmatmul.mubr.f32.gmra.mrb[50].mxu0 %v13701_v2 }
 0x631   :  { %6836 = vmatprep.mubr.f32.mxu0 %v13723_v23  ;;  %8783 = vmatpush3.bf16.msra.mxu0 %v16727_v19 }
 0x632   :  { %8785 = vmatprep.subr.bf16.mxu0 %v16728_v55 }
 0x634   :  { %6838 = vmatmul.mubr.f32.gmra.mrb[52].mxu0 %v13720_v28 }
 0x635   :  { %6843 = vmatprep.mubr.f32.mxu0 %v13741_v31  ;;  %8787 = vmatpush3.bf16.msra.mxu0 %v16729_v33 }
 0x636   :  { %8789 = vmatprep.subr.bf16.mxu0 %v16730_v8 }
 0x638   :  { %6845 = vmatmul.mubr.f32.gmra.mrb[54].mxu0 %v16780_v47 }
 0x639   :  { %8791 = vmatpush3.bf16.msra.mxu0 %v16781_v5  ;;  %6947 = vmatprep.mubr.f32.mxu0 %v13690_v12 }
 0x63a   :  { %8793 = vmatprep.subr.bf16.mxu0 %v16782_v25 }
 0x63d   :  { %8795 = vmatpush3.bf16.msra.mxu0 %v16783_v15 }
 0x63e   :  { %8797 = vmatprep.subr.bf16.mxu0 %v16784_v63 }
 0x641   :  { %8799 = vmatpush3.bf16.msra.mxu0 %v16785_v7 }
 0x642   :  { %8801 = vmatprep.subr.bf16.mxu0 %v16786_v16 }
 0x645   :  { %8803 = vmatpush3.bf16.msra.mxu0 %v16787_v13 }
 0x646   :  { %8805 = vmatprep.subr.bf16.mxu0 %v16788_v53 }
 0x649   :  { %8807 = vmatpush3.bf16.msra.mxu0 %v16742_v4 }
 0x64c   :  { %6949 = vmatmul.mubr.f32.vlgmr.msra.gmra.mrb[56].mxu0 %v13688_v49 }
 0x64d   :  { %6954 = vmatprep.mubr.f32.mxu0 %v13703_v26 }
 0x650   :  { %6956 = vmatmul.mubr.f32.gmra.mrb[58].mxu0 %v13701_v2 }
 0x651   :  { %6961 = vmatprep.mubr.f32.mxu0 %v13723_v23 }
 0x654   :  { %6963 = vmatmul.mubr.f32.gmra.mrb[60].mxu0 %v13720_v28  ;;  %v7007_v28 = vld [vmem:[%s13993_s4 + $0x2] ss:$0 sm:$0xff]  ;;  %s9141_s4 = smov [#allocation10]  }
 0x655   :  { %6968 = vmatprep.mubr.f32.mxu0 %v13741_v31  ;;  %s6992_s23 = sshll.u32 %s9141_s4, 4  ;;  %s6993_s23 = int_to_ptr.vmem [resolvable:$true] %s6992_s23 }
 0x656   :  { %s9102_s24 = scalar_lea.vmem %s6993_s23, 512  ;;  %p9107_p5 = scmp.lt.s32.totalorder %s6993_s23, %s6993_s23 }
 0x657   :  { %p9103_p4 = scmp.ne.s32.totalorder %s6993_s23, %s9102_s24  ;;  %p9108_p6 = scmp.lt.s32.totalorder %s9102_s24, %s9102_s24 }
 0x658   :  { %6970 = vmatmul.mubr.f32.gmra.mrb[62].mxu0 %v16780_v47 }
 0x659   :  { %p9109_p7 = por %p9108_p6, %p9107_p5 }
 0x65b   :  { %p9110_p8 = pnand %p9109_p7, %p9103_p4 }
 0x67f   :  { %v7040_v12 = vpop.f32.mrb[16].mxu0 }
 0x680   :  { %v7041_v61 = vpop.f32.mrb[17].mxu0 }
 0x681   :  { %v7042_v19 = vadd.f32 %v7041_v61, %v7040_v12 }
 0x683   :  { %v7043_v55 = vpop.f32.mrb[18].mxu0  ;;  %v6054_v32 = vadd.f32 %v7042_v19, %v7007_v28 }
 0x684   :  { %v7044_v33 = vpop.f32.mrb[19].mxu0 }
 0x685   :  { %v7045_v8 = vadd.f32 %v7044_v33, %v7043_v55 }
 0x687   :  { %v7046_v4 = vpop.f32.mrb[20].mxu0  ;;  %v6069_v21 = vadd.f32 %v7045_v8, %v7007_v28 }
 0x688   :  { %v7047_v49 = vpop.f32.mrb[21].mxu0 }
 0x689   :  { %v7048_v35 = vadd.f32 %v7047_v49, %v7046_v4 }
 0x68b   :  { %v7049_v26 = vpop.f32.mrb[22].mxu0  ;;  %v6084_v0 = vadd.f32 %v7048_v35, %v7007_v28 }
 0x68c   :  { %v7050_v54 = vpop.f32.mrb[23].mxu0 }
 0x68d   :  { %v7051_v2 = vadd.f32 %v7050_v54, %v7049_v26 }
 0x68f   :  { %v6099_v9 = vadd.f32 %v7051_v2, %v7007_v28 }
 0x69f   :  { %v7084_v23 = vpop.f32.mrb[24].mxu0 }
 0x6a0   :  { %v7085_v31 = vpop.f32.mrb[25].mxu0 }
 0x6a1   :  { %v7086_v43 = vadd.f32 %v7085_v31, %v7084_v23 }
 0x6a3   :  { %v6331_v24 = vadd.f32 %v7086_v43, %v6054_v32  ;;  %v7087_v6 = vpop.f32.mrb[26].mxu0 }
 0x6a4   :  { %v7088_v62 = vpop.f32.mrb[27].mxu0 }
 0x6a5   :  { %v7089_v39 = vadd.f32 %v7088_v62, %v7087_v6 }
 0x6a7   :  { %v6338_v44 = vadd.f32 %v7089_v39, %v6069_v21  ;;  %v7090_v20 = vpop.f32.mrb[28].mxu0 }
 0x6a8   :  { %v7091_v51 = vpop.f32.mrb[29].mxu0 }
 0x6a9   :  { %v7092_v52 = vadd.f32 %v7091_v51, %v7090_v20  ;;  %v9010_v20 = vld [vmem:[#allocation2] sm:$0xff] }
 0x6ab   :  { %v6345_v40 = vadd.f32 %v7092_v52, %v6084_v0  ;;  %v7093_v37 = vpop.f32.mrb[30].mxu0 }
 0x6ac   :  { %v7094_v38 = vpop.f32.mrb[31].mxu0 }
 0x6ad   :  { %v7095_v46 = vadd.f32 %v7094_v38, %v7093_v37 }
 0x6af   :  { %v6352_v27 = vadd.f32 %v7095_v46, %v6099_v9  ;;  %v9011_v9 = vld [vmem:[#allocation2 + $0x8] sm:$0xff] }
 0x6bf   :  { %v7128_v60 = vpop.f32.mrb[32].mxu0 }
 0x6c0   :  { %v7129_v30 = vpop.f32.mrb[33].mxu0 }
 0x6c1   :  { %v7130_v17 = vadd.f32 %v7129_v30, %v7128_v60 }
 0x6c3   :  { %v6490_v41 = vadd.f32 %v7130_v17, %v6331_v24  ;;  %v7131_v1 = vpop.f32.mrb[34].mxu0 }
 0x6c4   :  { %v7132_v58 = vpop.f32.mrb[35].mxu0 }
 0x6c5   :  { %v7133_v42 = vadd.f32 %v7132_v58, %v7131_v1  ;;  %v9012_v1 = vld [vmem:[#allocation2 + $0x10] sm:$0xff] }
 0x6c7   :  { %v6499_v59 = vadd.f32 %v7133_v42, %v6338_v44  ;;  %v7134_v22 = vpop.f32.mrb[36].mxu0 }
 0x6c8   :  { %v7135_v3 = vpop.f32.mrb[37].mxu0 }
 0x6c9   :  { %v7136_v50 = vadd.f32 %v7135_v3, %v7134_v22  ;;  %v9013_v3 = vld [vmem:[#allocation2 + $0x18] sm:$0xff] }
 0x6cb   :  { %v6508_v57 = vadd.f32 %v7136_v50, %v6345_v40  ;;  %v7137_v18 = vpop.f32.mrb[38].mxu0 }
 0x6cc   :  { %v7138_v56 = vpop.f32.mrb[39].mxu0 }
 0x6cd   :  { %v7139_v11 = vadd.f32 %v7138_v56, %v7137_v18 }
 0x6cf   :  { %v6517_v45 = vadd.f32 %v7139_v11, %v6352_v27 }
 0x6df   :  { %v7172_v34 = vpop.f32.mrb[40].mxu0 }
 0x6e0   :  { %v7173_v29 = vpop.f32.mrb[41].mxu0 }
 0x6e1   :  { %v7174_v10 = vadd.f32 %v7173_v29, %v7172_v34 }
 0x6e3   :  { %v6625_v36 = vadd.f32 %v7174_v10, %v6490_v41  ;;  %v7175_v14 = vpop.f32.mrb[42].mxu0 }
 0x6e4   :  { %v7176_v48 = vpop.f32.mrb[43].mxu0 }
 0x6e5   :  { %v7177_v47 = vadd.f32 %v7176_v48, %v7175_v14 }
 0x6e7   :  { %v6636_v5 = vadd.f32 %v7177_v47, %v6499_v59  ;;  %v7178_v25 = vpop.f32.mrb[44].mxu0 }
 0x6e8   :  { %v7179_v15 = vpop.f32.mrb[45].mxu0 }
 0x6e9   :  { %v7180_v63 = vadd.f32 %v7179_v15, %v7178_v25 }
 0x6eb   :  { %v6647_v7 = vadd.f32 %v7180_v63, %v6508_v57  ;;  %v7181_v16 = vpop.f32.mrb[46].mxu0 }
 0x6ec   :  { %v7182_v13 = vpop.f32.mrb[47].mxu0 }
 0x6ed   :  { %v7183_v53 = vadd.f32 %v7182_v13, %v7181_v16 }
 0x6ef   :  { %v6658_v12 = vadd.f32 %v7183_v53, %v6517_v45 }
 0x6ff   :  { %v7216_v61 = vpop.f32.mrb[48].mxu0 }
 0x700   :  { %v7217_v19 = vpop.f32.mrb[49].mxu0 }
 0x701   :  { %v7218_v55 = vadd.f32 %v7217_v19, %v7216_v61 }
 0x703   :  { %v6826_v33 = vadd.f32 %v7218_v55, %v6625_v36  ;;  %v7219_v8 = vpop.f32.mrb[50].mxu0 }
 0x704   :  { %v7220_v4 = vpop.f32.mrb[51].mxu0 }
 0x705   :  { %v7221_v49 = vadd.f32 %v7220_v4, %v7219_v8 }
 0x707   :  { %v6833_v35 = vadd.f32 %v7221_v49, %v6636_v5  ;;  %v7222_v26 = vpop.f32.mrb[52].mxu0 }
 0x708   :  { %v7223_v54 = vpop.f32.mrb[53].mxu0 }
 0x709   :  { %v7224_v2 = vadd.f32 %v7223_v54, %v7222_v26 }
 0x70b   :  { %v6840_v28 = vadd.f32 %v7224_v2, %v6647_v7  ;;  %v7225_v23 = vpop.f32.mrb[54].mxu0 }
 0x70c   :  { %v7226_v31 = vpop.f32.mrb[55].mxu0 }
 0x70d   :  { %v7227_v32 = vadd.f32 %v7226_v31, %v7225_v23 }
 0x70f   :  { %v6847_v43 = vadd.f32 %v7227_v32, %v6658_v12 }
 0x71f   :  { %v7260_v24 = vpop.f32.mrb[56].mxu0 }
 0x720   :  { %v7261_v6 = vpop.f32.mrb[57].mxu0 }
 0x721   :  { %v7262_v62 = vadd.f32 %v7261_v6, %v7260_v24 }
 0x723   :  { %v6951_v21 = vadd.f32 %v7262_v62, %v6826_v33  ;;  %v7263_v39 = vpop.f32.mrb[58].mxu0 }
 0x724   :  { %v7264_v44 = vpop.f32.mrb[59].mxu0 }
 0x725   :  { %v6975_v51 = vadd.f32 %v9010_v20, %v6951_v21  ;;  %v7265_v0 = vadd.f32 %v7264_v44, %v7263_v39 }
 0x727   :  { %v6979_v52 = vmax.f32 %v6975_v51, 0.0  ;;  %v6958_v40 = vadd.f32 %v7265_v0, %v6833_v35  ;;  %v7266_v37 = vpop.f32.mrb[60].mxu0 }
 0x728   :  { %v7267_v38 = vpop.f32.mrb[61].mxu0 }
 0x729   :  { %6983 = vst [vmem:[#allocation10] sm:$0xff] %v6979_v52  ;;  %v6976_v46 = vadd.f32 %v9011_v9, %v6958_v40  ;;  %v7268_v27 = vadd.f32 %v7267_v38, %v7266_v37 }
 0x72b   :  { %v6980_v60 = vmax.f32 %v6976_v46, 0.0  ;;  %v6965_v30 = vadd.f32 %v7268_v27, %v6840_v28  ;;  %v7269_v17 = vpop.f32.mrb[62].mxu0 }
 0x72c   :  { %v7270_v41 = vpop.f32.mrb[63].mxu0 }
 0x72d   :  { %6984 = vst [vmem:[#allocation10 + $0x8] sm:$0xff] %v6980_v60  ;;  %v6977_v58 = vadd.f32 %v9012_v1, %v6965_v30  ;;  %v7271_v42 = vadd.f32 %v7270_v41, %v7269_v17 }
 0x72f   :  { %v6981_v59 = vmax.f32 %v6977_v58, 0.0  ;;  %v6972_v22 = vadd.f32 %v7271_v42, %v6847_v43 }
 0x731   :  { %6985 = vst [vmem:[#allocation10 + $0x10] sm:$0xff] %v6981_v59  ;;  %v6978_v50 = vadd.f32 %v9013_v3, %v6972_v22 }
 0x733   :  { %v6982_v57 = vmax.f32 %v6978_v50, 0.0 }
 0x735   :  { %6986 = vst [vmem:[#allocation10 + $0x18] sm:$0xff] %v6982_v57 }
 0x736   :  { %9113 = shalt.err (!%p9110_p8)
}
 0x737   :  { %s9114_s27 = scalar_lea.hbm %s13994_s5, 512 }
 0x738   :  { %p9115_p9 = scmp.ne.s32.totalorder %s13994_s5, %s9114_s27  ;;  %p9118_p10 = scmp.lt.u32.totalorder %s9114_s27, %s13994_s5 }
 0x73a   :  { %p9120_p11 = pnand %p9118_p10, %p9115_p9 }
 0x73c   :  { %9123 = shalt.err (!%p9120_p11)
}
 0x73d   :  { %6998 = dma.vmem_to_hbm [thread:$0]  %s6993_s23, 512, %s13994_s5, [#allocation4], %s9136_s1, %s9136_s1, %s9137_s17  }
 0x73e   :  { %9130 = dma.done.wait [#allocation4], 512  }
 0x73f   :  { %9131 = vsyncadd [#allocation4], 4294966784 }
 0x740   :  { %7002 = vsyncpa [#allocation3], 1 }
 0x741   :  { %7003 = vsyncpa [#allocation6], 1 }
 0x742   :  { %7004 = vsyncpa [#allocation9], 1 }
 0x743   :  { %7005 = vsyncpa [#allocation4], 1 }

</bundles_post_ra>
